<compile_context>
chip_gen: v6e
topology: v6e:2x2x1
jax: 0.10.0
libtpu: 0.0.40
codegen_flags: <defaults>
</compile_context>

<pallas_src>
import functools

import jax
import jax.numpy as jnp
from jax.experimental import pallas as pl
from jax.experimental.pallas import tpu as pltpu


def _round_up(x, m):
    return ((x + m - 1) // m) * m


# ---------------------------------------------------------------------------
# Pallas kernel: one deep matmul per M-tile, bias + LeakyReLU fused epilogue
# ---------------------------------------------------------------------------
def _fused_matmul_kernel(x_ref, w_ref, b_ref, o_ref, *, negative_slope):
    # bf16 operands, f32 accumulation on the MXU
    y = jnp.dot(x_ref[...], w_ref[...], preferred_element_type=jnp.float32)
    y = y + b_ref[...]
    # leaky_relu(y) == max(y, slope*y) for slope in [0, 1]
    o_ref[...] = jnp.maximum(y, negative_slope * y).astype(o_ref.dtype)


def fused_matmul_bias_act(x, w, b, *, negative_slope, tm_max=512):
    """x: (M, K) f32, w: (K, Co) f32, b: (Co,) f32
       returns leaky_relu(x @ w + b, negative_slope) as (M, Co) f32."""
    M, K = x.shape
    Co = w.shape[-1]

    # Lane-dense output / weight: pad Co up to a multiple of 128.
    Co_p = _round_up(max(Co, 128), 128)
    # M tiling: tile must be a multiple of 8 (sublane), pad M to a tile multiple.
    tm = min(tm_max, _round_up(M, 8))
    M_p = _round_up(M, tm)

    xb = jnp.pad(x.astype(jnp.bfloat16), ((0, M_p - M), (0, 0)))
    wb = jnp.pad(w.astype(jnp.bfloat16), ((0, 0), (0, Co_p - Co)))
    bb = jnp.pad(b.astype(jnp.float32).reshape(1, Co), ((0, 0), (0, Co_p - Co)))

    kernel = functools.partial(_fused_matmul_kernel, negative_slope=negative_slope)
    out = pl.pallas_call(
        kernel,
        out_shape=jax.ShapeDtypeStruct((M_p, Co_p), jnp.float32),
        grid_spec=pltpu.PrefetchScalarGridSpec(
            num_scalar_prefetch=0,
            grid=(M_p // tm,),
            in_specs=[
                pl.BlockSpec((tm, K), lambda i: (i, 0)),      # im2col M-tile
                pl.BlockSpec((K, Co_p), lambda i: (0, 0)),    # full weight (resident)
                pl.BlockSpec((1, Co_p), lambda i: (0, 0)),    # bias (resident)
            ],
            out_specs=pl.BlockSpec((tm, Co_p), lambda i: (i, 0)),
        ),
        compiler_params=pltpu.CompilerParams(
            dimension_semantics=("parallel",),      # M tiles are independent (2 TCs on v7x)
            vmem_limit_bytes=32 * 1024 * 1024,      # explicit budget; blocks are far smaller
        ),
        cost_estimate=pl.CostEstimate(
            flops=2 * M_p * K * Co_p,
            transcendentals=0,
            bytes_accessed=M_p * K * 2 + K * Co_p * 2 + Co_p * 4 + M_p * Co_p * 4,
        ),
    )(xb, wb, bb)
    return out[:M, :Co]


# ---------------------------------------------------------------------------
# Conv layer: fused im2col (single XLA gather) + Pallas matmul/bias/LeakyReLU
# ---------------------------------------------------------------------------
def conv5x5_s2_lrelu(x_nchw, w_oihw, b):
    N, Ci, H, W = x_nchw.shape
    Co = w_oihw.shape[0]
    Ho = (H + 4 - 5) // 2 + 1
    Wo = (W + 4 - 5) // 2 + 1
    # (N, Ci*25, Ho, Wo); feature index = ci*25 + (kh*5 + kw)  -> matches OIHW reshape
    patches = jax.lax.conv_general_dilated_patches(
        x_nchw, filter_shape=(5, 5), window_strides=(2, 2),
        padding=((2, 2), (2, 2)),
        dimension_numbers=("NCHW", "OIHW", "NCHW"))
    x2d = patches.transpose(0, 2, 3, 1).reshape(N * Ho * Wo, Ci * 25)
    w2d = w_oihw.reshape(Co, Ci * 25).T                         # (25*Ci, Co)
    y2d = fused_matmul_bias_act(x2d, w2d, b, negative_slope=0.2)
    return y2d.reshape(N, Ho, Wo, Co).transpose(0, 3, 1, 2)     # back to NCHW


def linear_pallas(x2d, w, b):
    # PyTorch Linear: y = x @ w.T + b, w: (out, in)
    return fused_matmul_bias_act(x2d, w.T, b, negative_slope=1.0)


# ---------------------------------------------------------------------------
# Full forward passes (Pallas vs pure-JAX reference)
# ---------------------------------------------------------------------------
def pallas_forward(x_nchw, params):
    x = x_nchw
    for w_oihw, b in params["convs"]:
        x = conv5x5_s2_lrelu(x, w_oihw, b)
    x = x.reshape(x.shape[0], -1)                               # PyTorch (C,H,W) flatten
    return linear_pallas(x, params["lin_w"], params["lin_b"])


def reference_forward(x_nchw, params):
    x = x_nchw
    for w_oihw, b in params["convs"]:
        x = jax.lax.conv_general_dilated(
            x, w_oihw, window_strides=(2, 2), padding=((2, 2), (2, 2)),
            dimension_numbers=("NCHW", "OIHW", "NCHW"),
            precision=jax.lax.Precision.HIGHEST)
        x = x + b[None, :, None, None]
        x = jnp.where(x >= 0.0, x, 0.2 * x)
    x = x.reshape(x.shape[0], -1)
    return x @ params["lin_w"].T + params["lin_b"]


# ---------------------------------------------------------------------------
# Deterministic parameter init (PyTorch-default-like uniform(-1/sqrt(fan_in), ...))
# ---------------------------------------------------------------------------
def init_params(key, input_dim, cnum, flat_features):
    chans = [(input_dim, cnum), (cnum, 2 * cnum), (2 * cnum, 4 * cnum), (4 * cnum, 4 * cnum)]
    convs = []
    for (ci, co) in chans:
        key, kw, kb = jax.random.split(key, 3)
        bound = 1.0 / jnp.sqrt(ci * 25.0)
        w = jax.random.uniform(kw, (co, ci, 5, 5), jnp.float32, -bound, bound)  # OIHW
        b = jax.random.uniform(kb, (co,), jnp.float32, -bound, bound)
        convs.append((w, b))
    key, kw, kb = jax.random.split(key, 3)
    bound = 1.0 / jnp.sqrt(float(flat_features))
    lin_w = jax.random.uniform(kw, (1, flat_features), jnp.float32, -bound, bound)
    lin_b = jax.random.uniform(kb, (1,), jnp.float32, -bound, bound)
    return {"convs": convs, "lin_w": lin_w, "lin_b": lin_b}


if __name__ == "__main__":
    key = jax.random.PRNGKey(0)
    key, kx = jax.random.split(key)

    batch, input_dim, cnum, spatial = 2, 3, 16, 32
    h_out = spatial // 16                               # after 4 stride-2 convs
    flat_features = 4 * cnum * h_out * h_out            # analogue of cnum*4*16*16

    x = jax.random.normal(kx, (batch, input_dim, spatial, spatial), jnp.float32)
    params = init_params(key, input_dim, cnum, flat_features)

    out = jax.jit(pallas_forward)(x, params)
    out = jax.block_until_ready(out)
    ref = jax.block_until_ready(jax.jit(reference_forward)(x, params))

    assert out.shape == (batch, 1), out.shape
    # bf16 operands with f32 accumulation across 5 stacked layers -> bf16-level tolerance
    assert jnp.allclose(out, ref, atol=2e-2, rtol=2e-2), (out, ref)
    print("KERNEL_OK")
</pallas_src>

<mosaic_0001>
module attributes {stable_mosaic.version = 11 : i64} {
  func.func @_fused_matmul_kernel(%arg0: i32, %arg1: memref<512x75xbf16, #tpu.memory_space<vmem>>, %arg2: memref<75x128xbf16, #tpu.memory_space<vmem>>, %arg3: memref<1x128xf32, #tpu.memory_space<vmem>>, %arg4: memref<512x128xf32, #tpu.memory_space<vmem>>) attributes {dimension_semantics = [#tpu.dimension_semantics<parallel>], iteration_bounds = array<i64: 1>, scalar_prefetch = 0 : i64, scratch_operands = 0 : i64, tpu.core_type = #tpu.core_type<tc>, window_params = [{transform_indices = @transform_0, window_bounds = array<i64: 512, 75>}, {pipeline_mode = #tpu.pipeline_mode<synchronous>, transform_indices = @transform_1, window_bounds = array<i64: 75, 128>}, {pipeline_mode = #tpu.pipeline_mode<synchronous>, transform_indices = @transform_2, window_bounds = array<i64: 1, 128>}, {transform_indices = @transform_3, window_bounds = array<i64: 512, 128>}]} {
    %c0 = arith.constant 0 : index
    %c0_0 = arith.constant 0 : index
    %0 = vector.load %arg1[%c0, %c0_0] : memref<512x75xbf16, #tpu.memory_space<vmem>>, vector<512x75xbf16>
    %c0_1 = arith.constant 0 : index
    %c0_2 = arith.constant 0 : index
    %1 = vector.load %arg2[%c0_1, %c0_2] : memref<75x128xbf16, #tpu.memory_space<vmem>>, vector<75x128xbf16>
    %cst = arith.constant dense<0.000000e+00> : vector<512x128xf32>
    %2 = tpu.matmul %0, %1, %cst {dimension_numbers = #tpu.dot_dimension_numbers<[1], [0], [0], [1], [0, 0, 1, 1], [], []>} : vector<512x75xbf16>, vector<75x128xbf16>, vector<512x128xf32> -> vector<512x128xf32>
    %c0_3 = arith.constant 0 : index
    %c0_4 = arith.constant 0 : index
    %3 = vector.load %arg3[%c0_3, %c0_4] : memref<1x128xf32, #tpu.memory_space<vmem>>, vector<1x128xf32>
    %4 = vector.broadcast %3 : vector<1x128xf32> to vector<512x128xf32>
    %5 = arith.addf %2, %4 : vector<512x128xf32>
    %cst_5 = arith.constant 2.000000e-01 : f32
    %6 = vector.broadcast %cst_5 : f32 to vector<512x128xf32>
    %7 = arith.mulf %6, %5 : vector<512x128xf32>
    %8 = arith.maximumf %5, %7 : vector<512x128xf32>
    %c0_6 = arith.constant 0 : index
    %c0_7 = arith.constant 0 : index
    %9 = vector.load %arg4[%c0_6, %c0_7] : memref<512x128xf32, #tpu.memory_space<vmem>>, vector<512x128xf32>
    tpu.vector_store %arg4[%c0_6, %c0_7], %8 {strides = array<i32>} : memref<512x128xf32, #tpu.memory_space<vmem>>, vector<512x128xf32>,
    return
  }
  func.func @transform_0(%arg0: i32) -> (i32, i32) {
    %c0_i32 = arith.constant 0 : i32
    %c0_i32_0 = arith.constant 0 : i32
    return %arg0, %c0_i32 : i32, i32
  }
  func.func @transform_1(%arg0: i32) -> (i32, i32) {
    %c0_i32 = arith.constant 0 : i32
    %c0_i32_0 = arith.constant 0 : i32
    %c0_i32_1 = arith.constant 0 : i32
    return %c0_i32, %c0_i32_0 : i32, i32
  }
  func.func @transform_2(%arg0: i32) -> (i32, i32) {
    %c0_i32 = arith.constant 0 : i32
    %c0_i32_0 = arith.constant 0 : i32
    %c0_i32_1 = arith.constant 0 : i32
    return %c0_i32, %c0_i32_0 : i32, i32
  }
  func.func @transform_3(%arg0: i32) -> (i32, i32) {
    %c0_i32 = arith.constant 0 : i32
    %c0_i32_0 = arith.constant 0 : i32
    return %arg0, %c0_i32 : i32, i32
  }
}

module attributes {stable_mosaic.version = 11 : i64} {
  func.func @_fused_matmul_kernel(%arg0: i32, %arg1: memref<128x400xbf16, #tpu.memory_space<vmem>>, %arg2: memref<400x128xbf16, #tpu.memory_space<vmem>>, %arg3: memref<1x128xf32, #tpu.memory_space<vmem>>, %arg4: memref<128x128xf32, #tpu.memory_space<vmem>>) attributes {dimension_semantics = [#tpu.dimension_semantics<parallel>], iteration_bounds = array<i64: 1>, scalar_prefetch = 0 : i64, scratch_operands = 0 : i64, tpu.core_type = #tpu.core_type<tc>, window_params = [{transform_indices = @transform_0, window_bounds = array<i64: 128, 400>}, {pipeline_mode = #tpu.pipeline_mode<synchronous>, transform_indices = @transform_1, window_bounds = array<i64: 400, 128>}, {pipeline_mode = #tpu.pipeline_mode<synchronous>, transform_indices = @transform_2, window_bounds = array<i64: 1, 128>}, {transform_indices = @transform_3, window_bounds = array<i64: 128, 128>}]} {
    %c0 = arith.constant 0 : index
    %c0_0 = arith.constant 0 : index
    %0 = vector.load %arg1[%c0, %c0_0] : memref<128x400xbf16, #tpu.memory_space<vmem>>, vector<128x400xbf16>
    %c0_1 = arith.constant 0 : index
    %c0_2 = arith.constant 0 : index
    %1 = vector.load %arg2[%c0_1, %c0_2] : memref<400x128xbf16, #tpu.memory_space<vmem>>, vector<400x128xbf16>
    %cst = arith.constant dense<0.000000e+00> : vector<128x128xf32>
    %2 = tpu.matmul %0, %1, %cst {dimension_numbers = #tpu.dot_dimension_numbers<[1], [0], [0], [1], [0, 0, 1, 1], [], []>} : vector<128x400xbf16>, vector<400x128xbf16>, vector<128x128xf32> -> vector<128x128xf32>
    %c0_3 = arith.constant 0 : index
    %c0_4 = arith.constant 0 : index
    %3 = vector.load %arg3[%c0_3, %c0_4] : memref<1x128xf32, #tpu.memory_space<vmem>>, vector<1x128xf32>
    %4 = vector.broadcast %3 : vector<1x128xf32> to vector<128x128xf32>
    %5 = arith.addf %2, %4 : vector<128x128xf32>
    %cst_5 = arith.constant 2.000000e-01 : f32
    %6 = vector.broadcast %cst_5 : f32 to vector<128x128xf32>
    %7 = arith.mulf %6, %5 : vector<128x128xf32>
    %8 = arith.maximumf %5, %7 : vector<128x128xf32>
    %c0_6 = arith.constant 0 : index
    %c0_7 = arith.constant 0 : index
    %9 = vector.load %arg4[%c0_6, %c0_7] : memref<128x128xf32, #tpu.memory_space<vmem>>, vector<128x128xf32>
    tpu.vector_store %arg4[%c0_6, %c0_7], %8 {strides = array<i32>} : memref<128x128xf32, #tpu.memory_space<vmem>>, vector<128x128xf32>,
    return
  }
  func.func @transform_0(%arg0: i32) -> (i32, i32) {
    %c0_i32 = arith.constant 0 : i32
    %c0_i32_0 = arith.constant 0 : i32
    return %arg0, %c0_i32 : i32, i32
  }
  func.func @transform_1(%arg0: i32) -> (i32, i32) {
    %c0_i32 = arith.constant 0 : i32
    %c0_i32_0 = arith.constant 0 : i32
    %c0_i32_1 = arith.constant 0 : i32
    return %c0_i32, %c0_i32_0 : i32, i32
  }
  func.func @transform_2(%arg0: i32) -> (i32, i32) {
    %c0_i32 = arith.constant 0 : i32
    %c0_i32_0 = arith.constant 0 : i32
    %c0_i32_1 = arith.constant 0 : i32
    return %c0_i32, %c0_i32_0 : i32, i32
  }
  func.func @transform_3(%arg0: i32) -> (i32, i32) {
    %c0_i32 = arith.constant 0 : i32
    %c0_i32_0 = arith.constant 0 : i32
    return %arg0, %c0_i32 : i32, i32
  }
}

module attributes {stable_mosaic.version = 11 : i64} {
  func.func @_fused_matmul_kernel(%arg0: i32, %arg1: memref<32x800xbf16, #tpu.memory_space<vmem>>, %arg2: memref<800x128xbf16, #tpu.memory_space<vmem>>, %arg3: memref<1x128xf32, #tpu.memory_space<vmem>>, %arg4: memref<32x128xf32, #tpu.memory_space<vmem>>) attributes {dimension_semantics = [#tpu.dimension_semantics<parallel>], iteration_bounds = array<i64: 1>, scalar_prefetch = 0 : i64, scratch_operands = 0 : i64, tpu.core_type = #tpu.core_type<tc>, window_params = [{transform_indices = @transform_0, window_bounds = array<i64: 32, 800>}, {pipeline_mode = #tpu.pipeline_mode<synchronous>, transform_indices = @transform_1, window_bounds = array<i64: 800, 128>}, {pipeline_mode = #tpu.pipeline_mode<synchronous>, transform_indices = @transform_2, window_bounds = array<i64: 1, 128>}, {transform_indices = @transform_3, window_bounds = array<i64: 32, 128>}]} {
    %c0 = arith.constant 0 : index
    %c0_0 = arith.constant 0 : index
    %0 = vector.load %arg1[%c0, %c0_0] : memref<32x800xbf16, #tpu.memory_space<vmem>>, vector<32x800xbf16>
    %c0_1 = arith.constant 0 : index
    %c0_2 = arith.constant 0 : index
    %1 = vector.load %arg2[%c0_1, %c0_2] : memref<800x128xbf16, #tpu.memory_space<vmem>>, vector<800x128xbf16>
    %cst = arith.constant dense<0.000000e+00> : vector<32x128xf32>
    %2 = tpu.matmul %0, %1, %cst {dimension_numbers = #tpu.dot_dimension_numbers<[1], [0], [0], [1], [0, 0, 1, 1], [], []>} : vector<32x800xbf16>, vector<800x128xbf16>, vector<32x128xf32> -> vector<32x128xf32>
    %c0_3 = arith.constant 0 : index
    %c0_4 = arith.constant 0 : index
    %3 = vector.load %arg3[%c0_3, %c0_4] : memref<1x128xf32, #tpu.memory_space<vmem>>, vector<1x128xf32>
    %4 = vector.broadcast %3 : vector<1x128xf32> to vector<32x128xf32>
    %5 = arith.addf %2, %4 : vector<32x128xf32>
    %cst_5 = arith.constant 2.000000e-01 : f32
    %6 = vector.broadcast %cst_5 : f32 to vector<32x128xf32>
    %7 = arith.mulf %6, %5 : vector<32x128xf32>
    %8 = arith.maximumf %5, %7 : vector<32x128xf32>
    %c0_6 = arith.constant 0 : index
    %c0_7 = arith.constant 0 : index
    %9 = vector.load %arg4[%c0_6, %c0_7] : memref<32x128xf32, #tpu.memory_space<vmem>>, vector<32x128xf32>
    tpu.vector_store %arg4[%c0_6, %c0_7], %8 {strides = array<i32>} : memref<32x128xf32, #tpu.memory_space<vmem>>, vector<32x128xf32>,
    return
  }
  func.func @transform_0(%arg0: i32) -> (i32, i32) {
    %c0_i32 = arith.constant 0 : i32
    %c0_i32_0 = arith.constant 0 : i32
    return %arg0, %c0_i32 : i32, i32
  }
  func.func @transform_1(%arg0: i32) -> (i32, i32) {
    %c0_i32 = arith.constant 0 : i32
    %c0_i32_0 = arith.constant 0 : i32
    %c0_i32_1 = arith.constant 0 : i32
    return %c0_i32, %c0_i32_0 : i32, i32
  }
  func.func @transform_2(%arg0: i32) -> (i32, i32) {
    %c0_i32 = arith.constant 0 : i32
    %c0_i32_0 = arith.constant 0 : i32
    %c0_i32_1 = arith.constant 0 : i32
    return %c0_i32, %c0_i32_0 : i32, i32
  }
  func.func @transform_3(%arg0: i32) -> (i32, i32) {
    %c0_i32 = arith.constant 0 : i32
    %c0_i32_0 = arith.constant 0 : i32
    return %arg0, %c0_i32 : i32, i32
  }
}

module attributes {stable_mosaic.version = 11 : i64} {
  func.func @_fused_matmul_kernel(%arg0: i32, %arg1: memref<8x1600xbf16, #tpu.memory_space<vmem>>, %arg2: memref<1600x128xbf16, #tpu.memory_space<vmem>>, %arg3: memref<1x128xf32, #tpu.memory_space<vmem>>, %arg4: memref<8x128xf32, #tpu.memory_space<vmem>>) attributes {dimension_semantics = [#tpu.dimension_semantics<parallel>], iteration_bounds = array<i64: 1>, scalar_prefetch = 0 : i64, scratch_operands = 0 : i64, tpu.core_type = #tpu.core_type<tc>, window_params = [{transform_indices = @transform_0, window_bounds = array<i64: 8, 1600>}, {pipeline_mode = #tpu.pipeline_mode<synchronous>, transform_indices = @transform_1, window_bounds = array<i64: 1600, 128>}, {pipeline_mode = #tpu.pipeline_mode<synchronous>, transform_indices = @transform_2, window_bounds = array<i64: 1, 128>}, {transform_indices = @transform_3, window_bounds = array<i64: 8, 128>}]} {
    %c0 = arith.constant 0 : index
    %c0_0 = arith.constant 0 : index
    %0 = vector.load %arg1[%c0, %c0_0] : memref<8x1600xbf16, #tpu.memory_space<vmem>>, vector<8x1600xbf16>
    %c0_1 = arith.constant 0 : index
    %c0_2 = arith.constant 0 : index
    %1 = vector.load %arg2[%c0_1, %c0_2] : memref<1600x128xbf16, #tpu.memory_space<vmem>>, vector<1600x128xbf16>
    %cst = arith.constant dense<0.000000e+00> : vector<8x128xf32>
    %2 = tpu.matmul %0, %1, %cst {dimension_numbers = #tpu.dot_dimension_numbers<[1], [0], [0], [1], [0, 0, 1, 1], [], []>} : vector<8x1600xbf16>, vector<1600x128xbf16>, vector<8x128xf32> -> vector<8x128xf32>
    %c0_3 = arith.constant 0 : index
    %c0_4 = arith.constant 0 : index
    %3 = vector.load %arg3[%c0_3, %c0_4] : memref<1x128xf32, #tpu.memory_space<vmem>>, vector<1x128xf32>
    %4 = vector.broadcast %3 : vector<1x128xf32> to vector<8x128xf32>
    %5 = arith.addf %2, %4 : vector<8x128xf32>
    %cst_5 = arith.constant 2.000000e-01 : f32
    %6 = vector.broadcast %cst_5 : f32 to vector<8x128xf32>
    %7 = arith.mulf %6, %5 : vector<8x128xf32>
    %8 = arith.maximumf %5, %7 : vector<8x128xf32>
    %c0_6 = arith.constant 0 : index
    %c0_7 = arith.constant 0 : index
    %9 = vector.load %arg4[%c0_6, %c0_7] : memref<8x128xf32, #tpu.memory_space<vmem>>, vector<8x128xf32>
    tpu.vector_store %arg4[%c0_6, %c0_7], %8 {strides = array<i32>} : memref<8x128xf32, #tpu.memory_space<vmem>>, vector<8x128xf32>,
    return
  }
  func.func @transform_0(%arg0: i32) -> (i32, i32) {
    %c0_i32 = arith.constant 0 : i32
    %c0_i32_0 = arith.constant 0 : i32
    return %arg0, %c0_i32 : i32, i32
  }
  func.func @transform_1(%arg0: i32) -> (i32, i32) {
    %c0_i32 = arith.constant 0 : i32
    %c0_i32_0 = arith.constant 0 : i32
    %c0_i32_1 = arith.constant 0 : i32
    return %c0_i32, %c0_i32_0 : i32, i32
  }
  func.func @transform_2(%arg0: i32) -> (i32, i32) {
    %c0_i32 = arith.constant 0 : i32
    %c0_i32_0 = arith.constant 0 : i32
    %c0_i32_1 = arith.constant 0 : i32
    return %c0_i32, %c0_i32_0 : i32, i32
  }
  func.func @transform_3(%arg0: i32) -> (i32, i32) {
    %c0_i32 = arith.constant 0 : i32
    %c0_i32_0 = arith.constant 0 : i32
    return %arg0, %c0_i32 : i32, i32
  }
}

module attributes {stable_mosaic.version = 11 : i64} {
  func.func @_fused_matmul_kernel(%arg0: i32, %arg1: memref<8x256xbf16, #tpu.memory_space<vmem>>, %arg2: memref<256x128xbf16, #tpu.memory_space<vmem>>, %arg3: memref<1x128xf32, #tpu.memory_space<vmem>>, %arg4: memref<8x128xf32, #tpu.memory_space<vmem>>) attributes {dimension_semantics = [#tpu.dimension_semantics<parallel>], iteration_bounds = array<i64: 1>, scalar_prefetch = 0 : i64, scratch_operands = 0 : i64, tpu.core_type = #tpu.core_type<tc>, window_params = [{transform_indices = @transform_0, window_bounds = array<i64: 8, 256>}, {pipeline_mode = #tpu.pipeline_mode<synchronous>, transform_indices = @transform_1, window_bounds = array<i64: 256, 128>}, {pipeline_mode = #tpu.pipeline_mode<synchronous>, transform_indices = @transform_2, window_bounds = array<i64: 1, 128>}, {transform_indices = @transform_3, window_bounds = array<i64: 8, 128>}]} {
    %c0 = arith.constant 0 : index
    %c0_0 = arith.constant 0 : index
    %0 = vector.load %arg1[%c0, %c0_0] : memref<8x256xbf16, #tpu.memory_space<vmem>>, vector<8x256xbf16>
    %c0_1 = arith.constant 0 : index
    %c0_2 = arith.constant 0 : index
    %1 = vector.load %arg2[%c0_1, %c0_2] : memref<256x128xbf16, #tpu.memory_space<vmem>>, vector<256x128xbf16>
    %cst = arith.constant dense<0.000000e+00> : vector<8x128xf32>
    %2 = tpu.matmul %0, %1, %cst {dimension_numbers = #tpu.dot_dimension_numbers<[1], [0], [0], [1], [0, 0, 1, 1], [], []>} : vector<8x256xbf16>, vector<256x128xbf16>, vector<8x128xf32> -> vector<8x128xf32>
    %c0_3 = arith.constant 0 : index
    %c0_4 = arith.constant 0 : index
    %3 = vector.load %arg3[%c0_3, %c0_4] : memref<1x128xf32, #tpu.memory_space<vmem>>, vector<1x128xf32>
    %4 = vector.broadcast %3 : vector<1x128xf32> to vector<8x128xf32>
    %5 = arith.addf %2, %4 : vector<8x128xf32>
    %cst_5 = arith.constant 1.000000e+00 : f32
    %6 = vector.broadcast %cst_5 : f32 to vector<8x128xf32>
    %7 = arith.mulf %6, %5 : vector<8x128xf32>
    %8 = arith.maximumf %5, %7 : vector<8x128xf32>
    %c0_6 = arith.constant 0 : index
    %c0_7 = arith.constant 0 : index
    %9 = vector.load %arg4[%c0_6, %c0_7] : memref<8x128xf32, #tpu.memory_space<vmem>>, vector<8x128xf32>
    tpu.vector_store %arg4[%c0_6, %c0_7], %8 {strides = array<i32>} : memref<8x128xf32, #tpu.memory_space<vmem>>, vector<8x128xf32>,
    return
  }
  func.func @transform_0(%arg0: i32) -> (i32, i32) {
    %c0_i32 = arith.constant 0 : i32
    %c0_i32_0 = arith.constant 0 : i32
    return %arg0, %c0_i32 : i32, i32
  }
  func.func @transform_1(%arg0: i32) -> (i32, i32) {
    %c0_i32 = arith.constant 0 : i32
    %c0_i32_0 = arith.constant 0 : i32
    %c0_i32_1 = arith.constant 0 : i32
    return %c0_i32, %c0_i32_0 : i32, i32
  }
  func.func @transform_2(%arg0: i32) -> (i32, i32) {
    %c0_i32 = arith.constant 0 : i32
    %c0_i32_0 = arith.constant 0 : i32
    %c0_i32_1 = arith.constant 0 : i32
    return %c0_i32, %c0_i32_0 : i32, i32
  }
  func.func @transform_3(%arg0: i32) -> (i32, i32) {
    %c0_i32 = arith.constant 0 : i32
    %c0_i32_0 = arith.constant 0 : i32
    return %arg0, %c0_i32 : i32, i32
  }
}

</mosaic_0001>

<bundles_post_ra>
// kernel: pallas_forward.5
= control target key start
LH: loop header
LB: loop body
LE: loop exit
PB: predicated region body
PF: predicated region fallthrough
CT: control target
= control target key end

     0   :  { %vm382_vm0 = vcmask 1044480   ;;  %vm383_vm1 = vcmask 1045504   ;;  %v1103_v1 = vmov 65535   ;;  %vm285_vm2 = vcmask 613376   ;;  %s1528_s1 = inlined_call_operand.vmem [shape: bf16[75,128], index: 1, kind: input, shape index: {}]   ;;  %s1529_s0 = inlined_call_operand.vmem [shape: bf16[512,75], index: 0, kind: input, shape index: {}]   ;;  %s1530_s2 = inlined_call_operand.vmem [shape: f32[1,128], index: 2, kind: input, shape index: {}]   ;;  %s1531_s3 = inlined_call_operand.vmem [shape: f32[512,128], index: 3, kind: output, shape index: {}]  }
   0x1   :  { %v1066_v0 = vld [vmem:[%s1528_s1 + $0x20] sm:$0x3f]   ;;  %v384_v2 = vsel %vm382_vm0, 4294967295, %v1103_v1  ;;  %v1067_v5 = vld [vmem:[%s1528_s1 + $0x18] sm:$0xff]   ;;  %v1068_v8 = vld [vmem:[%s1528_s1 + $0x10] sm:$0xff]  }
   0x2   :  { %v385_v3 = vsel %vm383_vm1, %v384_v2, 0  ;;  %v1071_v6 = vld [vmem:[%s1529_s0] sm:$0xff]   ;;  %v1069_v9 = vld [vmem:[%s1528_s1 + $0x8] sm:$0xff]   ;;  %v1075_v13 = vld [vmem:[%s1529_s0 + $0x10] sm:$0xff]  }
   0x3   :  { %v387_v4 = vand.u32 %v1066_v0, %v385_v3  ;;  %v1072_v7 = vld [vmem:[%s1529_s0 + $0x80] sm:$0xff]   ;;  %991 = vmatprep.mubr.msk.bf16.mxu0 %vm285_vm2, %v1071_v6  ;;  %v1073_v11 = vld [vmem:[%s1529_s0 + $0x8] sm:$0xff]   ;;  %v1076_v14 = vld [vmem:[%s1529_s0 + $0x90] sm:$0xff]  }
   0x4   :  { %1023 = vmatprep.mubr.msk.bf16.mxu1 %vm285_vm2, %v1072_v7  ;;  %v1070_v10 = vld [vmem:[%s1528_s1] sm:$0xff]   ;;  %v1074_v12 = vld [vmem:[%s1529_s0 + $0x88] sm:$0xff]   ;;  %v1077_v15 = vld [vmem:[%s1529_s0 + $0x18] sm:$0xff]  }
   0x5   :  { %981 = vmatprep.subr.bf16.mxu0 %v387_v4  ;;  %1055 = vmatprep.subr.bf16.mxu1 %v387_v4  ;;  %v1078_v16 = vld [vmem:[%s1529_s0 + $0x98] sm:$0xff]   ;;  %v1079_v17 = vld [vmem:[%s1529_s0 + $0x20] sm:$0xff]   ;;  %v1081_v19 = vld [vmem:[%s1529_s0 + $0x28] sm:$0xff]  }
   0x6   :  { %982 = vmatpush3.bf16.msra.mxu0 %v387_v4  ;;  %1060 = vmatpush3.bf16.msra.mxu1 %v387_v4  ;;  %v1080_v18 = vld [vmem:[%s1529_s0 + $0xa0] sm:$0xff]   ;;  %v1082_v20 = vld [vmem:[%s1529_s0 + $0xa8] sm:$0xff]   ;;  %v1083_v21 = vld [vmem:[%s1529_s0 + $0x30] sm:$0xff]  }
   0x7   :  { %983 = vmatprep.subr.bf16.mxu0 %v1067_v5  ;;  %1056 = vmatprep.subr.bf16.mxu1 %v1067_v5  ;;  %v1084_v22 = vld [vmem:[%s1529_s0 + $0xb0] sm:$0xff]   ;;  %v1085_v23 = vld [vmem:[%s1529_s0 + $0x38] sm:$0xff]   ;;  %v1087_v25 = vld [vmem:[%s1529_s0 + $0x40] sm:$0xff]  }
   0x8   :  { %v1086_v24 = vld [vmem:[%s1529_s0 + $0xb8] sm:$0xff]   ;;  %v1088_v26 = vld [vmem:[%s1529_s0 + $0xc0] sm:$0xff]   ;;  %v1089_v27 = vld [vmem:[%s1529_s0 + $0x48] sm:$0xff]  }
   0x9   :  { %v1090_v28 = vld [vmem:[%s1529_s0 + $0xc8] sm:$0xff]   ;;  %v1091_v29 = vld [vmem:[%s1529_s0 + $0x50] sm:$0xff]   ;;  %v1093_v31 = vld [vmem:[%s1529_s0 + $0x58] sm:$0xff]  }
   0xa   :  { %984 = vmatpush3.bf16.msra.mxu0 %v1067_v5  ;;  %1061 = vmatpush3.bf16.msra.mxu1 %v1067_v5  ;;  %v1092_v30 = vld [vmem:[%s1529_s0 + $0xd0] sm:$0xff]   ;;  %v1094_v32 = vld [vmem:[%s1529_s0 + $0xd8] sm:$0xff]   ;;  %v1095_v33 = vld [vmem:[%s1529_s0 + $0x60] sm:$0xff]  }
   0xb   :  { %985 = vmatprep.subr.bf16.mxu0 %v1068_v8  ;;  %1057 = vmatprep.subr.bf16.mxu1 %v1068_v8  ;;  %v1096_v34 = vld [vmem:[%s1529_s0 + $0xe0] sm:$0xff]   ;;  %v1097_v35 = vld [vmem:[%s1529_s0 + $0x68] sm:$0xff]   ;;  %v1099_v37 = vld [vmem:[%s1529_s0 + $0x70] sm:$0xff]  }
   0xc   :  { %v1098_v36 = vld [vmem:[%s1529_s0 + $0xe8] sm:$0xff]   ;;  %v1100_v38 = vld [vmem:[%s1529_s0 + $0xf0] sm:$0xff]   ;;  %v1101_v39 = vld [vmem:[%s1529_s0 + $0x78] sm:$0xff]  }
   0xd   :  { %v1102_v40 = vld [vmem:[%s1529_s0 + $0xf8] sm:$0xff]   ;;  %v1270_v41 = vld [vmem:[%s1530_s2] ss:$0 sm:$0xff] }
   0xe   :  { %986 = vmatpush3.bf16.msra.mxu0 %v1068_v8  ;;  %1062 = vmatpush3.bf16.msra.mxu1 %v1068_v8 }
   0xf   :  { %987 = vmatprep.subr.bf16.mxu0 %v1069_v9  ;;  %1058 = vmatprep.subr.bf16.mxu1 %v1069_v9 }
  0x12   :  { %988 = vmatpush3.bf16.msra.mxu0 %v1069_v9  ;;  %1063 = vmatpush3.bf16.msra.mxu1 %v1069_v9 }
  0x13   :  { %989 = vmatprep.subr.bf16.mxu0 %v1070_v10  ;;  %1059 = vmatprep.subr.bf16.mxu1 %v1070_v10 }
  0x16   :  { %990 = vmatpush3.bf16.msra.mxu0 %v1070_v10  ;;  %1064 = vmatpush3.bf16.msra.mxu1 %v1070_v10 }
  0x19   :  { %992 = vmatmul.mubr.msk.bf16.vlgmr.msra.gmra.mxu0 %vm285_vm2, %v1073_v11  ;;  %1024 = vmatmul.mubr.msk.bf16.vlgmr.msra.gmra.mxu1 %vm285_vm2, %v1074_v12 }
  0x1a   :  { %995 = vmatprep.mubr.msk.bf16.mxu0 %vm285_vm2, %v1075_v13  ;;  %1027 = vmatprep.mubr.msk.bf16.mxu1 %vm285_vm2, %v1076_v14 }
  0x21   :  { %996 = vmatmul.mubr.msk.bf16.gmra.mxu0 %vm285_vm2, %v1077_v15  ;;  %1028 = vmatmul.mubr.msk.bf16.gmra.mxu1 %vm285_vm2, %v1078_v16 }
  0x22   :  { %999 = vmatprep.mubr.msk.bf16.mxu0 %vm285_vm2, %v1079_v17  ;;  %1031 = vmatprep.mubr.msk.bf16.mxu1 %vm285_vm2, %v1080_v18 }
  0x29   :  { %1000 = vmatmul.mubr.msk.bf16.gmra.mxu0 %vm285_vm2, %v1081_v19  ;;  %1032 = vmatmul.mubr.msk.bf16.gmra.mxu1 %vm285_vm2, %v1082_v20 }
  0x2a   :  { %1003 = vmatprep.mubr.msk.bf16.mxu0 %vm285_vm2, %v1083_v21  ;;  %1035 = vmatprep.mubr.msk.bf16.mxu1 %vm285_vm2, %v1084_v22 }
  0x31   :  { %1004 = vmatmul.mubr.msk.bf16.gmra.mxu0 %vm285_vm2, %v1085_v23  ;;  %1036 = vmatmul.mubr.msk.bf16.gmra.mxu1 %vm285_vm2, %v1086_v24 }
  0x32   :  { %1007 = vmatprep.mubr.msk.bf16.mxu0 %vm285_vm2, %v1087_v25  ;;  %1039 = vmatprep.mubr.msk.bf16.mxu1 %vm285_vm2, %v1088_v26 }
  0x39   :  { %1008 = vmatmul.mubr.msk.bf16.gmra.mxu0 %vm285_vm2, %v1089_v27  ;;  %1040 = vmatmul.mubr.msk.bf16.gmra.mxu1 %vm285_vm2, %v1090_v28 }
  0x3a   :  { %1011 = vmatprep.mubr.msk.bf16.mxu0 %vm285_vm2, %v1091_v29  ;;  %1043 = vmatprep.mubr.msk.bf16.mxu1 %vm285_vm2, %v1092_v30 }
  0x41   :  { %1012 = vmatmul.mubr.msk.bf16.gmra.mxu0 %vm285_vm2, %v1093_v31  ;;  %1044 = vmatmul.mubr.msk.bf16.gmra.mxu1 %vm285_vm2, %v1094_v32 }
  0x42   :  { %1015 = vmatprep.mubr.msk.bf16.mxu0 %vm285_vm2, %v1095_v33  ;;  %1047 = vmatprep.mubr.msk.bf16.mxu1 %vm285_vm2, %v1096_v34 }
  0x49   :  { %1016 = vmatmul.mubr.msk.bf16.gmra.mxu0 %vm285_vm2, %v1097_v35  ;;  %1048 = vmatmul.mubr.msk.bf16.gmra.mxu1 %vm285_vm2, %v1098_v36 }
  0x4a   :  { %1019 = vmatprep.mubr.msk.bf16.mxu0 %vm285_vm2, %v1099_v37  ;;  %1051 = vmatprep.mubr.msk.bf16.mxu1 %vm285_vm2, %v1100_v38 }
  0x51   :  { %1020 = vmatmul.mubr.msk.bf16.gmra.mxu0 %vm285_vm2, %v1101_v39  ;;  %1052 = vmatmul.mubr.msk.bf16.gmra.mxu1 %vm285_vm2, %v1102_v40 }
  0xd9   :  { %v993_v42 = vpop.f32.mrf.mxu0  ;;  %v1025_v43 = vpop.f32.mrf.mxu1 }
  0xda   :  { %v432_v44 = vadd.f32 %v993_v42, %v1270_v41  ;;  %v560_v45 = vadd.f32 %v1025_v43, %v1270_v41 }
  0xdb   :  { %v423_v46 = vpop.f32.mrf.mxu0  ;;  %v551_v47 = vpop.f32.mrf.mxu1 }
  0xdc   :  { %v680_v48 = vmul.f32 0.2, %v432_v44  ;;  %v712_v49 = vmul.f32 0.2, %v560_v45  ;;  %v424_v50 = vadd.f32 %v1270_v41, %v423_v46  ;;  %v552_v51 = vadd.f32 %v1270_v41, %v551_v47 }
  0xdd   :  { %v994_v52 = vpop.f32.mrf.mxu0  ;;  %v1026_v53 = vpop.f32.mrf.mxu1 }
  0xde   :  { %v744_v54 = vmax.f32 %v432_v44, %v680_v48  ;;  %v776_v55 = vmax.f32 %v560_v45, %v712_v49  ;;  %v678_v56 = vmul.f32 0.2, %v424_v50  ;;  %v710_v57 = vmul.f32 0.2, %v552_v51 }
  0xdf   :  { %v435_v58 = vadd.f32 %v994_v52, %v1270_v41  ;;  %v563_v59 = vadd.f32 %v1026_v53, %v1270_v41  ;;  %v426_v60 = vpop.f32.mrf.mxu0  ;;  %v554_v61 = vpop.f32.mrf.mxu1 }
  0xe0   :  { %808 = vst [vmem:[%s1531_s3 + $0x10] sm:$0xff] %v744_v54  ;;  %840 = vst [vmem:[%s1531_s3 + $0x110] sm:$0xff] %v776_v55  ;;  %v742_v62 = vmax.f32 %v424_v50, %v678_v56  ;;  %v774_v63 = vmax.f32 %v552_v51, %v710_v57  ;;  %v427_v0 = vadd.f32 %v1270_v41, %v426_v60 }
  0xe1   :  { %v555_v1 = vadd.f32 %v1270_v41, %v554_v61  ;;  %v681_v2 = vmul.f32 0.2, %v435_v58  ;;  %v713_v3 = vmul.f32 0.2, %v563_v59  ;;  %v997_v4 = vpop.f32.mrf.mxu0  ;;  %v1029_v5 = vpop.f32.mrf.mxu1 }
  0xe2   :  { %806 = vst [vmem:[%s1531_s3] sm:$0xff] %v742_v62  ;;  %838 = vst [vmem:[%s1531_s3 + $0x100] sm:$0xff] %v774_v63  ;;  %v679_v6 = vmul.f32 0.2, %v427_v0  ;;  %v448_v8 = vadd.f32 %v997_v4, %v1270_v41  ;;  %v576_v9 = vadd.f32 %v1029_v5, %v1270_v41 }
  0xe3   :  { %v711_v7 = vmul.f32 0.2, %v555_v1  ;;  %v745_v10 = vmax.f32 %v435_v58, %v681_v2  ;;  %v777_v11 = vmax.f32 %v563_v59, %v713_v3  ;;  %v439_v12 = vpop.f32.mrf.mxu0  ;;  %v567_v13 = vpop.f32.mrf.mxu1 }
  0xe4   :  { %v743_v14 = vmax.f32 %v427_v0, %v679_v6  ;;  %v684_v16 = vmul.f32 0.2, %v448_v8  ;;  %v716_v17 = vmul.f32 0.2, %v576_v9  ;;  %v440_v18 = vadd.f32 %v1270_v41, %v439_v12 }
  0xe5   :  { %v775_v15 = vmax.f32 %v555_v1, %v711_v7  ;;  %809 = vst [vmem:[%s1531_s3 + $0x18] sm:$0xff] %v745_v10  ;;  %841 = vst [vmem:[%s1531_s3 + $0x118] sm:$0xff] %v777_v11  ;;  %v568_v19 = vadd.f32 %v1270_v41, %v567_v13  ;;  %v998_v20 = vpop.f32.mrf.mxu0  ;;  %v1030_v21 = vpop.f32.mrf.mxu1 }
  0xe6   :  { %807 = vst [vmem:[%s1531_s3 + $0x8] sm:$0xff] %v743_v14  ;;  %v748_v22 = vmax.f32 %v448_v8, %v684_v16  ;;  %v780_v23 = vmax.f32 %v576_v9, %v716_v17  ;;  %v451_v24 = vadd.f32 %v998_v20, %v1270_v41  ;;  %v579_v25 = vadd.f32 %v1030_v21, %v1270_v41 }
  0xe7   :  { %839 = vst [vmem:[%s1531_s3 + $0x108] sm:$0xff] %v775_v15  ;;  %v682_v26 = vmul.f32 0.2, %v440_v18  ;;  %v714_v27 = vmul.f32 0.2, %v568_v19  ;;  %v442_v28 = vpop.f32.mrf.mxu0  ;;  %v570_v29 = vpop.f32.mrf.mxu1 }
  0xe8   :  { %812 = vst [vmem:[%s1531_s3 + $0x30] sm:$0xff] %v748_v22  ;;  %844 = vst [vmem:[%s1531_s3 + $0x130] sm:$0xff] %v780_v23  ;;  %v685_v30 = vmul.f32 0.2, %v451_v24  ;;  %v717_v31 = vmul.f32 0.2, %v579_v25  ;;  %v443_v32 = vadd.f32 %v1270_v41, %v442_v28  ;;  %v571_v33 = vadd.f32 %v1270_v41, %v570_v29 }
  0xe9   :  { %v746_v34 = vmax.f32 %v440_v18, %v682_v26  ;;  %v778_v35 = vmax.f32 %v568_v19, %v714_v27  ;;  %v1001_v36 = vpop.f32.mrf.mxu0  ;;  %v1033_v37 = vpop.f32.mrf.mxu1 }
  0xea   :  { %v749_v38 = vmax.f32 %v451_v24, %v685_v30  ;;  %v781_v39 = vmax.f32 %v579_v25, %v717_v31  ;;  %v683_v40 = vmul.f32 0.2, %v443_v32  ;;  %v715_v42 = vmul.f32 0.2, %v571_v33 }
  0xeb   :  { %810 = vst [vmem:[%s1531_s3 + $0x20] sm:$0xff] %v746_v34  ;;  %842 = vst [vmem:[%s1531_s3 + $0x120] sm:$0xff] %v778_v35  ;;  %v464_v43 = vadd.f32 %v1001_v36, %v1270_v41  ;;  %v592_v44 = vadd.f32 %v1033_v37, %v1270_v41  ;;  %v455_v45 = vpop.f32.mrf.mxu0  ;;  %v583_v46 = vpop.f32.mrf.mxu1 }
  0xec   :  { %813 = vst [vmem:[%s1531_s3 + $0x38] sm:$0xff] %v749_v38  ;;  %845 = vst [vmem:[%s1531_s3 + $0x138] sm:$0xff] %v781_v39  ;;  %v747_v47 = vmax.f32 %v443_v32, %v683_v40  ;;  %v779_v48 = vmax.f32 %v571_v33, %v715_v42  ;;  %v456_v49 = vadd.f32 %v1270_v41, %v455_v45 }
  0xed   :  { %v584_v50 = vadd.f32 %v1270_v41, %v583_v46  ;;  %v688_v51 = vmul.f32 0.2, %v464_v43  ;;  %v720_v52 = vmul.f32 0.2, %v592_v44  ;;  %v1002_v53 = vpop.f32.mrf.mxu0  ;;  %v1034_v54 = vpop.f32.mrf.mxu1 }
  0xee   :  { %811 = vst [vmem:[%s1531_s3 + $0x28] sm:$0xff] %v747_v47  ;;  %843 = vst [vmem:[%s1531_s3 + $0x128] sm:$0xff] %v779_v48  ;;  %v686_v55 = vmul.f32 0.2, %v456_v49  ;;  %v467_v57 = vadd.f32 %v1002_v53, %v1270_v41  ;;  %v595_v58 = vadd.f32 %v1034_v54, %v1270_v41 }
  0xef   :  { %v718_v56 = vmul.f32 0.2, %v584_v50  ;;  %v752_v59 = vmax.f32 %v464_v43, %v688_v51  ;;  %v784_v60 = vmax.f32 %v592_v44, %v720_v52  ;;  %v458_v61 = vpop.f32.mrf.mxu0  ;;  %v586_v62 = vpop.f32.mrf.mxu1 }
  0xf0   :  { %v750_v63 = vmax.f32 %v456_v49, %v686_v55  ;;  %v689_v1 = vmul.f32 0.2, %v467_v57  ;;  %v721_v2 = vmul.f32 0.2, %v595_v58  ;;  %v459_v3 = vadd.f32 %v1270_v41, %v458_v61 }
  0xf1   :  { %v782_v0 = vmax.f32 %v584_v50, %v718_v56  ;;  %816 = vst [vmem:[%s1531_s3 + $0x50] sm:$0xff] %v752_v59  ;;  %848 = vst [vmem:[%s1531_s3 + $0x150] sm:$0xff] %v784_v60  ;;  %v587_v4 = vadd.f32 %v1270_v41, %v586_v62  ;;  %v1005_v5 = vpop.f32.mrf.mxu0  ;;  %v1037_v6 = vpop.f32.mrf.mxu1 }
  0xf2   :  { %814 = vst [vmem:[%s1531_s3 + $0x40] sm:$0xff] %v750_v63  ;;  %v753_v7 = vmax.f32 %v467_v57, %v689_v1  ;;  %v785_v8 = vmax.f32 %v595_v58, %v721_v2  ;;  %v480_v9 = vadd.f32 %v1005_v5, %v1270_v41  ;;  %v608_v10 = vadd.f32 %v1037_v6, %v1270_v41 }
  0xf3   :  { %846 = vst [vmem:[%s1531_s3 + $0x140] sm:$0xff] %v782_v0  ;;  %v687_v11 = vmul.f32 0.2, %v459_v3  ;;  %v719_v12 = vmul.f32 0.2, %v587_v4  ;;  %v471_v13 = vpop.f32.mrf.mxu0  ;;  %v599_v14 = vpop.f32.mrf.mxu1 }
  0xf4   :  { %817 = vst [vmem:[%s1531_s3 + $0x58] sm:$0xff] %v753_v7  ;;  %849 = vst [vmem:[%s1531_s3 + $0x158] sm:$0xff] %v785_v8  ;;  %v692_v15 = vmul.f32 0.2, %v480_v9  ;;  %v724_v16 = vmul.f32 0.2, %v608_v10  ;;  %v472_v17 = vadd.f32 %v1270_v41, %v471_v13  ;;  %v600_v18 = vadd.f32 %v1270_v41, %v599_v14 }
  0xf5   :  { %v751_v19 = vmax.f32 %v459_v3, %v687_v11  ;;  %v783_v20 = vmax.f32 %v587_v4, %v719_v12  ;;  %v1006_v21 = vpop.f32.mrf.mxu0  ;;  %v1038_v22 = vpop.f32.mrf.mxu1 }
  0xf6   :  { %v756_v23 = vmax.f32 %v480_v9, %v692_v15  ;;  %v788_v24 = vmax.f32 %v608_v10, %v724_v16  ;;  %v690_v25 = vmul.f32 0.2, %v472_v17  ;;  %v722_v26 = vmul.f32 0.2, %v600_v18 }
  0xf7   :  { %815 = vst [vmem:[%s1531_s3 + $0x48] sm:$0xff] %v751_v19  ;;  %847 = vst [vmem:[%s1531_s3 + $0x148] sm:$0xff] %v783_v20  ;;  %v483_v27 = vadd.f32 %v1006_v21, %v1270_v41  ;;  %v611_v28 = vadd.f32 %v1038_v22, %v1270_v41  ;;  %v474_v29 = vpop.f32.mrf.mxu0  ;;  %v602_v30 = vpop.f32.mrf.mxu1 }
  0xf8   :  { %820 = vst [vmem:[%s1531_s3 + $0x70] sm:$0xff] %v756_v23  ;;  %852 = vst [vmem:[%s1531_s3 + $0x170] sm:$0xff] %v788_v24  ;;  %v754_v31 = vmax.f32 %v472_v17, %v690_v25  ;;  %v786_v32 = vmax.f32 %v600_v18, %v722_v26  ;;  %v475_v33 = vadd.f32 %v1270_v41, %v474_v29 }
  0xf9   :  { %v603_v34 = vadd.f32 %v1270_v41, %v602_v30  ;;  %v693_v35 = vmul.f32 0.2, %v483_v27  ;;  %v725_v36 = vmul.f32 0.2, %v611_v28  ;;  %v1009_v37 = vpop.f32.mrf.mxu0  ;;  %v1041_v38 = vpop.f32.mrf.mxu1 }
  0xfa   :  { %818 = vst [vmem:[%s1531_s3 + $0x60] sm:$0xff] %v754_v31  ;;  %850 = vst [vmem:[%s1531_s3 + $0x160] sm:$0xff] %v786_v32  ;;  %v691_v39 = vmul.f32 0.2, %v475_v33  ;;  %v496_v42 = vadd.f32 %v1009_v37, %v1270_v41  ;;  %v624_v43 = vadd.f32 %v1041_v38, %v1270_v41 }
  0xfb   :  { %v723_v40 = vmul.f32 0.2, %v603_v34  ;;  %v757_v44 = vmax.f32 %v483_v27, %v693_v35  ;;  %v789_v45 = vmax.f32 %v611_v28, %v725_v36  ;;  %v487_v46 = vpop.f32.mrf.mxu0  ;;  %v615_v47 = vpop.f32.mrf.mxu1 }
  0xfc   :  { %v755_v48 = vmax.f32 %v475_v33, %v691_v39  ;;  %v696_v50 = vmul.f32 0.2, %v496_v42  ;;  %v728_v51 = vmul.f32 0.2, %v624_v43  ;;  %v488_v52 = vadd.f32 %v1270_v41, %v487_v46 }
  0xfd   :  { %v787_v49 = vmax.f32 %v603_v34, %v723_v40  ;;  %821 = vst [vmem:[%s1531_s3 + $0x78] sm:$0xff] %v757_v44  ;;  %853 = vst [vmem:[%s1531_s3 + $0x178] sm:$0xff] %v789_v45  ;;  %v616_v53 = vadd.f32 %v1270_v41, %v615_v47  ;;  %v1010_v54 = vpop.f32.mrf.mxu0  ;;  %v1042_v55 = vpop.f32.mrf.mxu1 }
  0xfe   :  { %819 = vst [vmem:[%s1531_s3 + $0x68] sm:$0xff] %v755_v48  ;;  %v760_v56 = vmax.f32 %v496_v42, %v696_v50  ;;  %v792_v57 = vmax.f32 %v624_v43, %v728_v51  ;;  %v499_v58 = vadd.f32 %v1010_v54, %v1270_v41  ;;  %v627_v59 = vadd.f32 %v1042_v55, %v1270_v41 }
  0xff   :  { %851 = vst [vmem:[%s1531_s3 + $0x168] sm:$0xff] %v787_v49  ;;  %v694_v60 = vmul.f32 0.2, %v488_v52  ;;  %v726_v61 = vmul.f32 0.2, %v616_v53  ;;  %v490_v62 = vpop.f32.mrf.mxu0  ;;  %v618_v63 = vpop.f32.mrf.mxu1 }
 0x100   :  { %824 = vst [vmem:[%s1531_s3 + $0x90] sm:$0xff] %v760_v56  ;;  %856 = vst [vmem:[%s1531_s3 + $0x190] sm:$0xff] %v792_v57  ;;  %v697_v0 = vmul.f32 0.2, %v499_v58  ;;  %v729_v1 = vmul.f32 0.2, %v627_v59  ;;  %v491_v2 = vadd.f32 %v1270_v41, %v490_v62  ;;  %v619_v3 = vadd.f32 %v1270_v41, %v618_v63 }
 0x101   :  { %v758_v4 = vmax.f32 %v488_v52, %v694_v60  ;;  %v790_v5 = vmax.f32 %v616_v53, %v726_v61  ;;  %v1013_v6 = vpop.f32.mrf.mxu0  ;;  %v1045_v7 = vpop.f32.mrf.mxu1 }
 0x102   :  { %v761_v8 = vmax.f32 %v499_v58, %v697_v0  ;;  %v793_v9 = vmax.f32 %v627_v59, %v729_v1  ;;  %v695_v10 = vmul.f32 0.2, %v491_v2  ;;  %v727_v11 = vmul.f32 0.2, %v619_v3 }
 0x103   :  { %822 = vst [vmem:[%s1531_s3 + $0x80] sm:$0xff] %v758_v4  ;;  %854 = vst [vmem:[%s1531_s3 + $0x180] sm:$0xff] %v790_v5  ;;  %v512_v12 = vadd.f32 %v1013_v6, %v1270_v41  ;;  %v640_v13 = vadd.f32 %v1045_v7, %v1270_v41  ;;  %v503_v14 = vpop.f32.mrf.mxu0  ;;  %v631_v15 = vpop.f32.mrf.mxu1 }
 0x104   :  { %825 = vst [vmem:[%s1531_s3 + $0x98] sm:$0xff] %v761_v8  ;;  %857 = vst [vmem:[%s1531_s3 + $0x198] sm:$0xff] %v793_v9  ;;  %v759_v16 = vmax.f32 %v491_v2, %v695_v10  ;;  %v791_v17 = vmax.f32 %v619_v3, %v727_v11  ;;  %v504_v18 = vadd.f32 %v1270_v41, %v503_v14 }
 0x105   :  { %v632_v19 = vadd.f32 %v1270_v41, %v631_v15  ;;  %v700_v20 = vmul.f32 0.2, %v512_v12  ;;  %v732_v21 = vmul.f32 0.2, %v640_v13  ;;  %v1014_v22 = vpop.f32.mrf.mxu0  ;;  %v1046_v23 = vpop.f32.mrf.mxu1 }
 0x106   :  { %823 = vst [vmem:[%s1531_s3 + $0x88] sm:$0xff] %v759_v16  ;;  %855 = vst [vmem:[%s1531_s3 + $0x188] sm:$0xff] %v791_v17  ;;  %v698_v24 = vmul.f32 0.2, %v504_v18  ;;  %v515_v26 = vadd.f32 %v1014_v22, %v1270_v41  ;;  %v643_v27 = vadd.f32 %v1046_v23, %v1270_v41 }
 0x107   :  { %v730_v25 = vmul.f32 0.2, %v632_v19  ;;  %v764_v28 = vmax.f32 %v512_v12, %v700_v20  ;;  %v796_v29 = vmax.f32 %v640_v13, %v732_v21  ;;  %v506_v30 = vpop.f32.mrf.mxu0  ;;  %v634_v31 = vpop.f32.mrf.mxu1 }
 0x108   :  { %v762_v32 = vmax.f32 %v504_v18, %v698_v24  ;;  %v701_v34 = vmul.f32 0.2, %v515_v26  ;;  %v733_v35 = vmul.f32 0.2, %v643_v27  ;;  %v507_v36 = vadd.f32 %v1270_v41, %v506_v30 }
 0x109   :  { %v794_v33 = vmax.f32 %v632_v19, %v730_v25  ;;  %828 = vst [vmem:[%s1531_s3 + $0xb0] sm:$0xff] %v764_v28  ;;  %860 = vst [vmem:[%s1531_s3 + $0x1b0] sm:$0xff] %v796_v29  ;;  %v635_v37 = vadd.f32 %v1270_v41, %v634_v31  ;;  %v1017_v38 = vpop.f32.mrf.mxu0  ;;  %v1049_v39 = vpop.f32.mrf.mxu1 }
 0x10a   :  { %826 = vst [vmem:[%s1531_s3 + $0xa0] sm:$0xff] %v762_v32  ;;  %v765_v40 = vmax.f32 %v515_v26, %v701_v34  ;;  %v797_v42 = vmax.f32 %v643_v27, %v733_v35  ;;  %v528_v43 = vadd.f32 %v1017_v38, %v1270_v41  ;;  %v656_v44 = vadd.f32 %v1049_v39, %v1270_v41 }
 0x10b   :  { %858 = vst [vmem:[%s1531_s3 + $0x1a0] sm:$0xff] %v794_v33  ;;  %v699_v45 = vmul.f32 0.2, %v507_v36  ;;  %v731_v46 = vmul.f32 0.2, %v635_v37  ;;  %v519_v47 = vpop.f32.mrf.mxu0  ;;  %v647_v48 = vpop.f32.mrf.mxu1 }
 0x10c   :  { %829 = vst [vmem:[%s1531_s3 + $0xb8] sm:$0xff] %v765_v40  ;;  %861 = vst [vmem:[%s1531_s3 + $0x1b8] sm:$0xff] %v797_v42  ;;  %v704_v49 = vmul.f32 0.2, %v528_v43  ;;  %v736_v50 = vmul.f32 0.2, %v656_v44  ;;  %v520_v51 = vadd.f32 %v1270_v41, %v519_v47  ;;  %v648_v52 = vadd.f32 %v1270_v41, %v647_v48 }
 0x10d   :  { %v763_v53 = vmax.f32 %v507_v36, %v699_v45  ;;  %v795_v54 = vmax.f32 %v635_v37, %v731_v46  ;;  %v1018_v55 = vpop.f32.mrf.mxu0  ;;  %v1050_v56 = vpop.f32.mrf.mxu1 }
 0x10e   :  { %v768_v57 = vmax.f32 %v528_v43, %v704_v49  ;;  %v800_v58 = vmax.f32 %v656_v44, %v736_v50  ;;  %v702_v59 = vmul.f32 0.2, %v520_v51  ;;  %v734_v60 = vmul.f32 0.2, %v648_v52 }
 0x10f   :  { %827 = vst [vmem:[%s1531_s3 + $0xa8] sm:$0xff] %v763_v53  ;;  %859 = vst [vmem:[%s1531_s3 + $0x1a8] sm:$0xff] %v795_v54  ;;  %v531_v61 = vadd.f32 %v1018_v55, %v1270_v41  ;;  %v659_v62 = vadd.f32 %v1050_v56, %v1270_v41  ;;  %v522_v63 = vpop.f32.mrf.mxu0  ;;  %v650_v0 = vpop.f32.mrf.mxu1 }
 0x110   :  { %832 = vst [vmem:[%s1531_s3 + $0xd0] sm:$0xff] %v768_v57  ;;  %864 = vst [vmem:[%s1531_s3 + $0x1d0] sm:$0xff] %v800_v58  ;;  %v766_v1 = vmax.f32 %v520_v51, %v702_v59  ;;  %v798_v2 = vmax.f32 %v648_v52, %v734_v60  ;;  %v523_v3 = vadd.f32 %v1270_v41, %v522_v63 }
 0x111   :  { %v651_v4 = vadd.f32 %v1270_v41, %v650_v0  ;;  %v705_v5 = vmul.f32 0.2, %v531_v61  ;;  %v737_v6 = vmul.f32 0.2, %v659_v62  ;;  %v1021_v7 = vpop.f32.mrf.mxu0  ;;  %v1053_v8 = vpop.f32.mrf.mxu1 }
 0x112   :  { %830 = vst [vmem:[%s1531_s3 + $0xc0] sm:$0xff] %v766_v1  ;;  %862 = vst [vmem:[%s1531_s3 + $0x1c0] sm:$0xff] %v798_v2  ;;  %v703_v9 = vmul.f32 0.2, %v523_v3  ;;  %v544_v11 = vadd.f32 %v1021_v7, %v1270_v41  ;;  %v672_v12 = vadd.f32 %v1053_v8, %v1270_v41 }
 0x113   :  { %v735_v10 = vmul.f32 0.2, %v651_v4  ;;  %v769_v13 = vmax.f32 %v531_v61, %v705_v5  ;;  %v801_v14 = vmax.f32 %v659_v62, %v737_v6  ;;  %v535_v15 = vpop.f32.mrf.mxu0  ;;  %v663_v16 = vpop.f32.mrf.mxu1 }
 0x114   :  { %v767_v17 = vmax.f32 %v523_v3, %v703_v9  ;;  %v708_v19 = vmul.f32 0.2, %v544_v11  ;;  %v740_v20 = vmul.f32 0.2, %v672_v12  ;;  %v536_v21 = vadd.f32 %v1270_v41, %v535_v15 }
 0x115   :  { %v799_v18 = vmax.f32 %v651_v4, %v735_v10  ;;  %833 = vst [vmem:[%s1531_s3 + $0xd8] sm:$0xff] %v769_v13  ;;  %865 = vst [vmem:[%s1531_s3 + $0x1d8] sm:$0xff] %v801_v14  ;;  %v664_v22 = vadd.f32 %v1270_v41, %v663_v16  ;;  %v1022_v23 = vpop.f32.mrf.mxu0  ;;  %v1054_v24 = vpop.f32.mrf.mxu1 }
 0x116   :  { %831 = vst [vmem:[%s1531_s3 + $0xc8] sm:$0xff] %v767_v17  ;;  %v772_v25 = vmax.f32 %v544_v11, %v708_v19  ;;  %v804_v26 = vmax.f32 %v672_v12, %v740_v20  ;;  %v547_v27 = vadd.f32 %v1022_v23, %v1270_v41  ;;  %v675_v28 = vadd.f32 %v1054_v24, %v1270_v41 }
 0x117   :  { %863 = vst [vmem:[%s1531_s3 + $0x1c8] sm:$0xff] %v799_v18  ;;  %v706_v29 = vmul.f32 0.2, %v536_v21  ;;  %v738_v30 = vmul.f32 0.2, %v664_v22  ;;  %v538_v31 = vpop.f32.mrf.mxu0  ;;  %v666_v32 = vpop.f32.mrf.mxu1 }
 0x118   :  { %836 = vst [vmem:[%s1531_s3 + $0xf0] sm:$0xff] %v772_v25  ;;  %868 = vst [vmem:[%s1531_s3 + $0x1f0] sm:$0xff] %v804_v26  ;;  %v709_v33 = vmul.f32 0.2, %v547_v27  ;;  %v741_v34 = vmul.f32 0.2, %v675_v28  ;;  %v539_v35 = vadd.f32 %v1270_v41, %v538_v31  ;;  %v667_v36 = vadd.f32 %v1270_v41, %v666_v32 }
 0x119   :  { %v770_v37 = vmax.f32 %v536_v21, %v706_v29  ;;  %v802_v38 = vmax.f32 %v664_v22, %v738_v30 }
 0x11a   :  { %v773_v39 = vmax.f32 %v547_v27, %v709_v33  ;;  %v805_v40 = vmax.f32 %v675_v28, %v741_v34  ;;  %v707_v42 = vmul.f32 0.2, %v539_v35  ;;  %v739_v43 = vmul.f32 0.2, %v667_v36 }
 0x11b   :  { %834 = vst [vmem:[%s1531_s3 + $0xe0] sm:$0xff] %v770_v37  ;;  %866 = vst [vmem:[%s1531_s3 + $0x1e0] sm:$0xff] %v802_v38 }
 0x11c   :  { %837 = vst [vmem:[%s1531_s3 + $0xf8] sm:$0xff] %v773_v39  ;;  %869 = vst [vmem:[%s1531_s3 + $0x1f8] sm:$0xff] %v805_v40  ;;  %v771_v41 = vmax.f32 %v539_v35, %v707_v42  ;;  %v803_v44 = vmax.f32 %v667_v36, %v739_v43 }
 0x11e   :  { %835 = vst [vmem:[%s1531_s3 + $0xe8] sm:$0xff] %v771_v41  ;;  %867 = vst [vmem:[%s1531_s3 + $0x1e8] sm:$0xff] %v803_v44 }

// kernel: pallas_forward.6
= control target key start
LH: loop header
LB: loop body
LE: loop exit
PB: predicated region body
PF: predicated region fallthrough
CT: control target
= control target key end

     0   :  { %v881_v0 = vmov 0   ;;  %vm406_vm0 = vcmask 130048   ;;  %s1159_s1 = inlined_call_operand.vmem [shape: bf16[400,128], index: 1, kind: input, shape index: {}]   ;;  %s1160_s0 = inlined_call_operand.vmem [shape: bf16[128,400], index: 0, kind: input, shape index: {}]   ;;  %s1161_s2 = inlined_call_operand.vmem [shape: f32[1,128], index: 2, kind: input, shape index: {}]   ;;  %s1162_s3 = inlined_call_operand.vmem [shape: f32[128,128], index: 3, kind: output, shape index: {}]  }
   0x1   :  { %528 = vmatprep.subr.bf16.mxu1 %v881_v0  ;;  %v808_v1 = vld [vmem:[%s1159_s1 + $0x78] sm:$0xff]   ;;  %v811_v4 = vld [vmem:[%s1159_s1 + $0x70] sm:$0xff]   ;;  %v814_v7 = vld [vmem:[%s1159_s1 + $0x68] sm:$0xff]  }
   0x2   :  { %v809_v2 = vld [vmem:[%s1159_s1 + $0xb8] sm:$0xff]   ;;  %743 = vmatprep.subr.bf16.mxu0 %v808_v1  ;;  %v812_v5 = vld [vmem:[%s1159_s1 + $0xb0] sm:$0xff]   ;;  %v815_v8 = vld [vmem:[%s1159_s1 + $0xa8] sm:$0xff]  }
   0x3   :  { %v810_v3 = vld [vmem:[%s1159_s1 + $0x38] sm:$0xff]   ;;  %529 = vmatpush1.bf16.msra.mxu1 %v809_v2  ;;  %v813_v6 = vld [vmem:[%s1159_s1 + $0x30] sm:$0xff]   ;;  %v816_v9 = vld [vmem:[%s1159_s1 + $0x28] sm:$0xff]  }
   0x4   :  { %744 = vmatpush3.bf16.msra.mxu0 %v810_v3  ;;  %530 = vmatprep.subr.bf16.mxu1 %v881_v0  ;;  %v817_v10 = vld [vmem:[%s1159_s1 + $0x60] sm:$0xff]   ;;  %v820_v13 = vld [vmem:[%s1159_s1 + $0x58] sm:$0xff]   ;;  %v823_v16 = vld [vmem:[%s1159_s1 + $0x50] sm:$0xff]  }
   0x5   :  { %745 = vmatprep.subr.bf16.mxu0 %v811_v4  ;;  %v818_v11 = vld [vmem:[%s1159_s1 + $0xa0] sm:$0xff]   ;;  %v821_v14 = vld [vmem:[%s1159_s1 + $0x98] sm:$0xff]   ;;  %v824_v17 = vld [vmem:[%s1159_s1 + $0x90] sm:$0xff]  }
   0x6   :  { %v819_v12 = vld [vmem:[%s1159_s1 + $0x20] sm:$0xff]   ;;  %v822_v15 = vld [vmem:[%s1159_s1 + $0x18] sm:$0xff]   ;;  %v825_v18 = vld [vmem:[%s1159_s1 + $0x10] sm:$0xff]  }
   0x7   :  { %531 = vmatpush1.bf16.msra.mxu1 %v812_v5  ;;  %v826_v19 = vld [vmem:[%s1159_s1 + $0x48] sm:$0xff]   ;;  %v829_v22 = vld [vmem:[%s1159_s1 + $0x40] sm:$0xff]  }
   0x8   :  { %746 = vmatpush3.bf16.msra.mxu0 %v813_v6  ;;  %532 = vmatprep.subr.bf16.mxu1 %v881_v0  ;;  %v827_v20 = vld [vmem:[%s1159_s1 + $0x88] sm:$0xff]   ;;  %v834_v23 = vld [vmem:[%s1160_s0 + $0x4] ss:$16 sps:$4 sm:$0xff]   ;;  %v832_v27 = vld [vmem:[%s1160_s0] ss:$16 sps:$4 sm:$0xff]  }
   0x9   :  { %747 = vmatprep.subr.bf16.mxu0 %v814_v7  ;;  %v828_v21 = vld [vmem:[%s1159_s1 + $0x8] sm:$0xff]   ;;  %v830_v24 = vld [vmem:[%s1159_s1 + $0x80] sm:$0xff]   ;;  %463 = vmatprep.mubr.bf16.mxu0 %v834_v23 }
   0xa   :  { %v838_v25 = vld [vmem:[%s1160_s0 + $0xc] ss:$16 sps:$4 sm:$0xff]   ;;  %v831_v26 = vld [vmem:[%s1159_s1] sm:$0xff]   ;;  %v836_v30 = vld [vmem:[%s1160_s0 + $0x8] ss:$16 sps:$4 sm:$0xff]  }
   0xb   :  { %533 = vmatpush1.bf16.msra.mxu1 %v815_v8  ;;  %735 = vmatprep.mubr.msk.bf16.mxu1 %vm406_vm0, %v838_v25  ;;  %v835_v28 = vld [vmem:[%s1159_s1 + $0xc0] sm:$0xff]   ;;  %v842_v31 = vld [vmem:[%s1160_s0 + $0x2c] ss:$16 sps:$4 sm:$0xff]   ;;  %v844_v34 = vld [vmem:[%s1160_s0 + $0x28] ss:$16 sps:$4 sm:$0xff]  }
   0xc   :  { %748 = vmatpush3.bf16.msra.mxu0 %v816_v9  ;;  %534 = vmatprep.subr.bf16.mxu1 %v881_v0  ;;  %v839_v29 = vld [vmem:[%s1160_s0 + $0x24] ss:$16 sps:$4 sm:$0xff]   ;;  %v841_v32 = vld [vmem:[%s1160_s0 + $0x20] ss:$16 sps:$4 sm:$0xff]   ;;  %v848_v35 = vld [vmem:[%s1160_s0 + $0x4c] ss:$16 sps:$4 sm:$0xff]  }
   0xd   :  { %749 = vmatprep.subr.bf16.mxu0 %v817_v10  ;;  %v845_v33 = vld [vmem:[%s1160_s0 + $0x44] ss:$16 sps:$4 sm:$0xff]   ;;  %v847_v36 = vld [vmem:[%s1160_s0 + $0x40] ss:$16 sps:$4 sm:$0xff]   ;;  %v850_v38 = vld [vmem:[%s1160_s0 + $0x48] ss:$16 sps:$4 sm:$0xff]  }
   0xe   :  { %v851_v37 = vld [vmem:[%s1160_s0 + $0x64] ss:$16 sps:$4 sm:$0xff]   ;;  %v854_v39 = vld [vmem:[%s1160_s0 + $0x6c] ss:$16 sps:$4 sm:$0xff]   ;;  %v853_v40 = vld [vmem:[%s1160_s0 + $0x60] ss:$16 sps:$4 sm:$0xff]  }
   0xf   :  { %535 = vmatpush1.bf16.msra.mxu1 %v818_v11  ;;  %v857_v41 = vld [vmem:[%s1160_s0 + $0x84] ss:$16 sps:$4 sm:$0xff]   ;;  %v856_v42 = vld [vmem:[%s1160_s0 + $0x68] ss:$16 sps:$4 sm:$0xff]   ;;  %v860_v43 = vld [vmem:[%s1160_s0 + $0x8c] ss:$16 sps:$4 sm:$0xff]  }
  0x10   :  { %750 = vmatpush3.bf16.msra.mxu0 %v819_v12  ;;  %536 = vmatprep.subr.bf16.mxu1 %v881_v0  ;;  %v859_v44 = vld [vmem:[%s1160_s0 + $0x80] ss:$16 sps:$4 sm:$0xff]   ;;  %v863_v45 = vld [vmem:[%s1160_s0 + $0xa4] ss:$16 sps:$4 sm:$0xff]   ;;  %v862_v46 = vld [vmem:[%s1160_s0 + $0x88] ss:$16 sps:$4 sm:$0xff]  }
  0x11   :  { %751 = vmatprep.subr.bf16.mxu0 %v820_v13  ;;  %v866_v47 = vld [vmem:[%s1160_s0 + $0xac] ss:$16 sps:$4 sm:$0xff]   ;;  %v865_v48 = vld [vmem:[%s1160_s0 + $0xa0] ss:$16 sps:$4 sm:$0xff]   ;;  %v869_v49 = vld [vmem:[%s1160_s0 + $0xc4] ss:$16 sps:$4 sm:$0xff]  }
  0x12   :  { %v868_v50 = vld [vmem:[%s1160_s0 + $0xa8] ss:$16 sps:$4 sm:$0xff]   ;;  %v872_v51 = vld [vmem:[%s1160_s0 + $0xcc] ss:$16 sps:$4 sm:$0xff]   ;;  %v871_v52 = vld [vmem:[%s1160_s0 + $0xc0] ss:$16 sps:$4 sm:$0xff]  }
  0x13   :  { %537 = vmatpush1.bf16.msra.mxu1 %v821_v14  ;;  %v875_v53 = vld [vmem:[%s1160_s0 + $0xe4] ss:$16 sps:$4 sm:$0xff]   ;;  %v874_v54 = vld [vmem:[%s1160_s0 + $0xc8] ss:$16 sps:$4 sm:$0xff]   ;;  %v878_v55 = vld [vmem:[%s1160_s0 + $0xec] ss:$16 sps:$4 sm:$0xff]  }
  0x14   :  { %752 = vmatpush3.bf16.msra.mxu0 %v822_v15  ;;  %538 = vmatprep.subr.bf16.mxu1 %v881_v0  ;;  %v877_v56 = vld [vmem:[%s1160_s0 + $0xe0] ss:$16 sps:$4 sm:$0xff]   ;;  %v880_v57 = vld [vmem:[%s1160_s0 + $0xe8] ss:$16 sps:$4 sm:$0xff]  }
  0x15   :  { %753 = vmatprep.subr.bf16.mxu0 %v823_v16  ;;  %v1093_v60 = vld [vmem:[%s1161_s2] ss:$0 sm:$0xff] }
  0x17   :  { %539 = vmatpush1.bf16.msra.mxu1 %v824_v17 }
  0x18   :  { %754 = vmatpush3.bf16.msra.mxu0 %v825_v18  ;;  %540 = vmatprep.subr.bf16.mxu1 %v881_v0 }
  0x19   :  { %755 = vmatprep.subr.bf16.mxu0 %v826_v19 }
  0x1b   :  { %541 = vmatpush1.bf16.msra.mxu1 %v827_v20 }
  0x1c   :  { %756 = vmatpush3.bf16.msra.mxu0 %v828_v21  ;;  %542 = vmatprep.subr.bf16.mxu1 %v881_v0 }
  0x1d   :  { %757 = vmatprep.subr.bf16.mxu0 %v829_v22 }
  0x1f   :  { %543 = vmatpush1.bf16.msra.mxu1 %v830_v24 }
  0x20   :  { %758 = vmatpush3.bf16.msra.mxu0 %v831_v26  ;;  %558 = vmatprep.subr.bf16.mxu1 %v881_v0 }
  0x23   :  { %464 = vmatmul.mubr.bf16.vlgmr.msra.gmra.mxu0 %v832_v27  ;;  %559 = vmatpush2.bf16.msra.mxu1 %v835_v28 }
  0x24   :  { %471 = vmatprep.mubr.bf16.mxu0 %v839_v29 }
  0x26   :  { %561 = vmatmul.mubr.bf16.vlgmr.msra.gmra.mxu1 %v836_v30 }
  0x27   :  { %736 = vmatprep.mubr.msk.bf16.mxu1 %vm406_vm0, %v842_v31 }
  0x2b   :  { %472 = vmatmul.mubr.bf16.gmra.mxu0 %v841_v32 }
  0x2c   :  { %479 = vmatprep.mubr.bf16.mxu0 %v845_v33 }
  0x2e   :  { %569 = vmatmul.mubr.bf16.gmra.mxu1 %v844_v34 }
  0x2f   :  { %737 = vmatprep.mubr.msk.bf16.mxu1 %vm406_vm0, %v848_v35 }
  0x33   :  { %480 = vmatmul.mubr.bf16.gmra.mxu0 %v847_v36 }
  0x34   :  { %487 = vmatprep.mubr.bf16.mxu0 %v851_v37 }
  0x36   :  { %577 = vmatmul.mubr.bf16.gmra.mxu1 %v850_v38 }
  0x37   :  { %738 = vmatprep.mubr.msk.bf16.mxu1 %vm406_vm0, %v854_v39 }
  0x3b   :  { %488 = vmatmul.mubr.bf16.gmra.mxu0 %v853_v40 }
  0x3c   :  { %495 = vmatprep.mubr.bf16.mxu0 %v857_v41 }
  0x3e   :  { %585 = vmatmul.mubr.bf16.gmra.mxu1 %v856_v42 }
  0x3f   :  { %739 = vmatprep.mubr.msk.bf16.mxu1 %vm406_vm0, %v860_v43 }
  0x43   :  { %496 = vmatmul.mubr.bf16.gmra.mxu0 %v859_v44 }
  0x44   :  { %503 = vmatprep.mubr.bf16.mxu0 %v863_v45 }
  0x46   :  { %593 = vmatmul.mubr.bf16.gmra.mxu1 %v862_v46 }
  0x47   :  { %740 = vmatprep.mubr.msk.bf16.mxu1 %vm406_vm0, %v866_v47 }
  0x4b   :  { %504 = vmatmul.mubr.bf16.gmra.mxu0 %v865_v48 }
  0x4c   :  { %511 = vmatprep.mubr.bf16.mxu0 %v869_v49 }
  0x4e   :  { %601 = vmatmul.mubr.bf16.gmra.mxu1 %v868_v50 }
  0x4f   :  { %741 = vmatprep.mubr.msk.bf16.mxu1 %vm406_vm0, %v872_v51 }
  0x53   :  { %512 = vmatmul.mubr.bf16.gmra.mxu0 %v871_v52 }
  0x54   :  { %519 = vmatprep.mubr.bf16.mxu0 %v875_v53 }
  0x56   :  { %609 = vmatmul.mubr.bf16.gmra.mxu1 %v874_v54 }
  0x57   :  { %742 = vmatprep.mubr.msk.bf16.mxu1 %vm406_vm0, %v878_v55 }
  0x5b   :  { %520 = vmatmul.mubr.bf16.gmra.mxu0 %v877_v56 }
  0x5e   :  { %617 = vmatmul.mubr.bf16.gmra.mxu1 %v880_v57 }
  0xe3   :  { %v759_v58 = vpop.f32.mrf.mxu0 }
  0xe5   :  { %v760_v59 = vpop.f32.mrf.mxu0 }
  0xe6   :  { %v761_v61 = vadd.f32 %v760_v59, %v759_v58  ;;  %v562_v62 = vpop.f32.mrf.mxu1 }
  0xe7   :  { %v762_v63 = vpop.f32.mrf.mxu0 }
  0xe8   :  { %v466_v0 = vadd.f32 %v761_v61, %v1093_v60  ;;  %v564_v1 = vpop.f32.mrf.mxu1 }
  0xe9   :  { %v763_v2 = vpop.f32.mrf.mxu0 }
  0xea   :  { %v563_v3 = vadd.f32 %v562_v62, %v466_v0  ;;  %v764_v4 = vadd.f32 %v763_v2, %v762_v63  ;;  %v565_v5 = vpop.f32.mrf.mxu1 }
  0xeb   :  { %v765_v6 = vpop.f32.mrf.mxu0 }
  0xec   :  { %v625_v7 = vmul.f32 0.2, %v563_v3  ;;  %v469_v8 = vadd.f32 %v764_v4, %v1093_v60  ;;  %v567_v9 = vpop.f32.mrf.mxu1 }
  0xed   :  { %v766_v10 = vpop.f32.mrf.mxu0 }
  0xee   :  { %v641_v11 = vmax.f32 %v563_v3, %v625_v7  ;;  %v566_v12 = vadd.f32 %v565_v5, %v469_v8  ;;  %v767_v13 = vadd.f32 %v766_v10, %v765_v6  ;;  %v570_v14 = vpop.f32.mrf.mxu1 }
  0xef   :  { %v768_v15 = vpop.f32.mrf.mxu0 }
  0xf0   :  { %657 = vst [vmem:[%s1162_s3] sm:$0xff] %v641_v11  ;;  %v626_v16 = vmul.f32 0.2, %v566_v12  ;;  %v474_v17 = vadd.f32 %v767_v13, %v1093_v60  ;;  %v572_v18 = vpop.f32.mrf.mxu1 }
  0xf1   :  { %v769_v19 = vpop.f32.mrf.mxu0 }
  0xf2   :  { %v642_v20 = vmax.f32 %v566_v12, %v626_v16  ;;  %v571_v21 = vadd.f32 %v570_v14, %v474_v17  ;;  %v770_v22 = vadd.f32 %v769_v19, %v768_v15  ;;  %v573_v23 = vpop.f32.mrf.mxu1 }
  0xf3   :  { %v771_v24 = vpop.f32.mrf.mxu0 }
  0xf4   :  { %658 = vst [vmem:[%s1162_s3 + $0x8] sm:$0xff] %v642_v20  ;;  %v627_v25 = vmul.f32 0.2, %v571_v21  ;;  %v477_v26 = vadd.f32 %v770_v22, %v1093_v60  ;;  %v575_v27 = vpop.f32.mrf.mxu1 }
  0xf5   :  { %v772_v28 = vpop.f32.mrf.mxu0 }
  0xf6   :  { %v643_v29 = vmax.f32 %v571_v21, %v627_v25  ;;  %v574_v30 = vadd.f32 %v573_v23, %v477_v26  ;;  %v773_v31 = vadd.f32 %v772_v28, %v771_v24  ;;  %v578_v32 = vpop.f32.mrf.mxu1 }
  0xf7   :  { %v774_v33 = vpop.f32.mrf.mxu0 }
  0xf8   :  { %659 = vst [vmem:[%s1162_s3 + $0x10] sm:$0xff] %v643_v29  ;;  %v628_v34 = vmul.f32 0.2, %v574_v30  ;;  %v482_v35 = vadd.f32 %v773_v31, %v1093_v60  ;;  %v580_v36 = vpop.f32.mrf.mxu1 }
  0xf9   :  { %v775_v37 = vpop.f32.mrf.mxu0 }
  0xfa   :  { %v644_v38 = vmax.f32 %v574_v30, %v628_v34  ;;  %v579_v39 = vadd.f32 %v578_v32, %v482_v35  ;;  %v776_v40 = vadd.f32 %v775_v37, %v774_v33  ;;  %v581_v41 = vpop.f32.mrf.mxu1 }
  0xfb   :  { %v777_v42 = vpop.f32.mrf.mxu0 }
  0xfc   :  { %660 = vst [vmem:[%s1162_s3 + $0x18] sm:$0xff] %v644_v38  ;;  %v629_v43 = vmul.f32 0.2, %v579_v39  ;;  %v485_v44 = vadd.f32 %v776_v40, %v1093_v60  ;;  %v583_v45 = vpop.f32.mrf.mxu1 }
  0xfd   :  { %v778_v46 = vpop.f32.mrf.mxu0 }
  0xfe   :  { %v645_v47 = vmax.f32 %v579_v39, %v629_v43  ;;  %v582_v48 = vadd.f32 %v581_v41, %v485_v44  ;;  %v779_v49 = vadd.f32 %v778_v46, %v777_v42  ;;  %v586_v50 = vpop.f32.mrf.mxu1 }
  0xff   :  { %v780_v51 = vpop.f32.mrf.mxu0 }
 0x100   :  { %661 = vst [vmem:[%s1162_s3 + $0x20] sm:$0xff] %v645_v47  ;;  %v630_v52 = vmul.f32 0.2, %v582_v48  ;;  %v490_v53 = vadd.f32 %v779_v49, %v1093_v60  ;;  %v588_v54 = vpop.f32.mrf.mxu1 }
 0x101   :  { %v781_v55 = vpop.f32.mrf.mxu0 }
 0x102   :  { %v646_v56 = vmax.f32 %v582_v48, %v630_v52  ;;  %v587_v57 = vadd.f32 %v586_v50, %v490_v53  ;;  %v782_v58 = vadd.f32 %v781_v55, %v780_v51  ;;  %v589_v59 = vpop.f32.mrf.mxu1 }
 0x103   :  { %v783_v61 = vpop.f32.mrf.mxu0 }
 0x104   :  { %662 = vst [vmem:[%s1162_s3 + $0x28] sm:$0xff] %v646_v56  ;;  %v631_v62 = vmul.f32 0.2, %v587_v57  ;;  %v493_v63 = vadd.f32 %v782_v58, %v1093_v60  ;;  %v591_v0 = vpop.f32.mrf.mxu1 }
 0x105   :  { %v784_v1 = vpop.f32.mrf.mxu0 }
 0x106   :  { %v647_v2 = vmax.f32 %v587_v57, %v631_v62  ;;  %v590_v3 = vadd.f32 %v589_v59, %v493_v63  ;;  %v785_v4 = vadd.f32 %v784_v1, %v783_v61  ;;  %v594_v5 = vpop.f32.mrf.mxu1 }
 0x107   :  { %v786_v6 = vpop.f32.mrf.mxu0 }
 0x108   :  { %663 = vst [vmem:[%s1162_s3 + $0x30] sm:$0xff] %v647_v2  ;;  %v632_v7 = vmul.f32 0.2, %v590_v3  ;;  %v498_v8 = vadd.f32 %v785_v4, %v1093_v60  ;;  %v596_v9 = vpop.f32.mrf.mxu1 }
 0x109   :  { %v787_v10 = vpop.f32.mrf.mxu0 }
 0x10a   :  { %v648_v11 = vmax.f32 %v590_v3, %v632_v7  ;;  %v595_v12 = vadd.f32 %v594_v5, %v498_v8  ;;  %v788_v13 = vadd.f32 %v787_v10, %v786_v6  ;;  %v597_v14 = vpop.f32.mrf.mxu1 }
 0x10b   :  { %v789_v15 = vpop.f32.mrf.mxu0 }
 0x10c   :  { %664 = vst [vmem:[%s1162_s3 + $0x38] sm:$0xff] %v648_v11  ;;  %v633_v16 = vmul.f32 0.2, %v595_v12  ;;  %v501_v17 = vadd.f32 %v788_v13, %v1093_v60  ;;  %v599_v18 = vpop.f32.mrf.mxu1 }
 0x10d   :  { %v790_v19 = vpop.f32.mrf.mxu0 }
 0x10e   :  { %v649_v20 = vmax.f32 %v595_v12, %v633_v16  ;;  %v598_v21 = vadd.f32 %v597_v14, %v501_v17  ;;  %v791_v22 = vadd.f32 %v790_v19, %v789_v15  ;;  %v602_v23 = vpop.f32.mrf.mxu1 }
 0x10f   :  { %v792_v24 = vpop.f32.mrf.mxu0 }
 0x110   :  { %665 = vst [vmem:[%s1162_s3 + $0x40] sm:$0xff] %v649_v20  ;;  %v634_v25 = vmul.f32 0.2, %v598_v21  ;;  %v506_v26 = vadd.f32 %v791_v22, %v1093_v60  ;;  %v604_v27 = vpop.f32.mrf.mxu1 }
 0x111   :  { %v793_v28 = vpop.f32.mrf.mxu0 }
 0x112   :  { %v650_v29 = vmax.f32 %v598_v21, %v634_v25  ;;  %v603_v30 = vadd.f32 %v602_v23, %v506_v26  ;;  %v794_v31 = vadd.f32 %v793_v28, %v792_v24  ;;  %v605_v32 = vpop.f32.mrf.mxu1 }
 0x113   :  { %v795_v33 = vpop.f32.mrf.mxu0 }
 0x114   :  { %666 = vst [vmem:[%s1162_s3 + $0x48] sm:$0xff] %v650_v29  ;;  %v635_v34 = vmul.f32 0.2, %v603_v30  ;;  %v509_v35 = vadd.f32 %v794_v31, %v1093_v60  ;;  %v607_v36 = vpop.f32.mrf.mxu1 }
 0x115   :  { %v796_v37 = vpop.f32.mrf.mxu0 }
 0x116   :  { %v651_v38 = vmax.f32 %v603_v30, %v635_v34  ;;  %v606_v39 = vadd.f32 %v605_v32, %v509_v35  ;;  %v797_v40 = vadd.f32 %v796_v37, %v795_v33  ;;  %v610_v41 = vpop.f32.mrf.mxu1 }
 0x117   :  { %v798_v42 = vpop.f32.mrf.mxu0 }
 0x118   :  { %667 = vst [vmem:[%s1162_s3 + $0x50] sm:$0xff] %v651_v38  ;;  %v636_v43 = vmul.f32 0.2, %v606_v39  ;;  %v514_v44 = vadd.f32 %v797_v40, %v1093_v60  ;;  %v612_v45 = vpop.f32.mrf.mxu1 }
 0x119   :  { %v799_v46 = vpop.f32.mrf.mxu0 }
 0x11a   :  { %v652_v47 = vmax.f32 %v606_v39, %v636_v43  ;;  %v611_v48 = vadd.f32 %v610_v41, %v514_v44  ;;  %v800_v49 = vadd.f32 %v799_v46, %v798_v42  ;;  %v613_v50 = vpop.f32.mrf.mxu1 }
 0x11b   :  { %v801_v51 = vpop.f32.mrf.mxu0 }
 0x11c   :  { %668 = vst [vmem:[%s1162_s3 + $0x58] sm:$0xff] %v652_v47  ;;  %v637_v52 = vmul.f32 0.2, %v611_v48  ;;  %v517_v53 = vadd.f32 %v800_v49, %v1093_v60  ;;  %v615_v54 = vpop.f32.mrf.mxu1 }
 0x11d   :  { %v802_v55 = vpop.f32.mrf.mxu0 }
 0x11e   :  { %v653_v56 = vmax.f32 %v611_v48, %v637_v52  ;;  %v614_v57 = vadd.f32 %v613_v50, %v517_v53  ;;  %v803_v58 = vadd.f32 %v802_v55, %v801_v51  ;;  %v618_v59 = vpop.f32.mrf.mxu1 }
 0x11f   :  { %v804_v61 = vpop.f32.mrf.mxu0 }
 0x120   :  { %669 = vst [vmem:[%s1162_s3 + $0x60] sm:$0xff] %v653_v56  ;;  %v638_v62 = vmul.f32 0.2, %v614_v57  ;;  %v522_v63 = vadd.f32 %v803_v58, %v1093_v60  ;;  %v620_v0 = vpop.f32.mrf.mxu1 }
 0x121   :  { %v805_v1 = vpop.f32.mrf.mxu0 }
 0x122   :  { %v654_v2 = vmax.f32 %v614_v57, %v638_v62  ;;  %v619_v3 = vadd.f32 %v618_v59, %v522_v63  ;;  %v806_v4 = vadd.f32 %v805_v1, %v804_v61  ;;  %v621_v5 = vpop.f32.mrf.mxu1 }
 0x124   :  { %670 = vst [vmem:[%s1162_s3 + $0x68] sm:$0xff] %v654_v2  ;;  %v639_v6 = vmul.f32 0.2, %v619_v3  ;;  %v525_v7 = vadd.f32 %v806_v4, %v1093_v60  ;;  %v623_v8 = vpop.f32.mrf.mxu1 }
 0x126   :  { %v655_v9 = vmax.f32 %v619_v3, %v639_v6  ;;  %v622_v10 = vadd.f32 %v621_v5, %v525_v7 }
 0x128   :  { %671 = vst [vmem:[%s1162_s3 + $0x70] sm:$0xff] %v655_v9  ;;  %v640_v11 = vmul.f32 0.2, %v622_v10 }
 0x12a   :  { %v656_v12 = vmax.f32 %v622_v10, %v640_v11 }
 0x12c   :  { %672 = vst [vmem:[%s1162_s3 + $0x78] sm:$0xff] %v656_v12 }

// kernel: pallas_forward.7
= control target key start
LH: loop header
LB: loop body
LE: loop exit
PB: predicated region body
PF: predicated region fallthrough
CT: control target
= control target key end

     0   :  { %vm508_vm0 = vcmask 261120   ;;  %s1187_s1 = inlined_call_operand.vmem [shape: bf16[800,128], index: 1, kind: input, shape index: {}]   ;;  %s1188_s0 = inlined_call_operand.vmem [shape: bf16[32,800], index: 0, kind: input, shape index: {}]   ;;  %s1189_s2 = inlined_call_operand.vmem [shape: f32[1,128], index: 2, kind: input, shape index: {}]   ;;  %s1190_s3 = inlined_call_operand.vmem [shape: f32[32,128], index: 3, kind: output, shape index: {}]  }
   0x1   :  { %v890_v0 = vld [vmem:[%s1187_s1 + $0x78] sm:$0xff]   ;;  %v894_v4 = vld [vmem:[%s1187_s1 + $0x70] sm:$0xff]   ;;  %v898_v8 = vld [vmem:[%s1187_s1 + $0x68] sm:$0xff]  }
   0x2   :  { %v891_v1 = vld [vmem:[%s1187_s1 + $0x38] sm:$0xff]   ;;  %794 = vmatprep.subr.bf16.mxu0 %v890_v0  ;;  %v895_v5 = vld [vmem:[%s1187_s1 + $0x30] sm:$0xff]   ;;  %v899_v9 = vld [vmem:[%s1187_s1 + $0x28] sm:$0xff]  }
   0x3   :  { %v892_v2 = vld [vmem:[%s1187_s1 + $0xf8] sm:$0xff]   ;;  %795 = vmatpush3.bf16.msra.mxu0 %v891_v1  ;;  %v896_v6 = vld [vmem:[%s1187_s1 + $0xf0] sm:$0xff]   ;;  %v900_v10 = vld [vmem:[%s1187_s1 + $0xe8] sm:$0xff]  }
   0x4   :  { %v893_v3 = vld [vmem:[%s1187_s1 + $0xb8] sm:$0xff]   ;;  %822 = vmatprep.subr.bf16.mxu1 %v892_v2  ;;  %796 = vmatprep.subr.bf16.mxu0 %v894_v4  ;;  %v897_v7 = vld [vmem:[%s1187_s1 + $0xb0] sm:$0xff]   ;;  %v901_v11 = vld [vmem:[%s1187_s1 + $0xa8] sm:$0xff]  }
   0x5   :  { %823 = vmatpush3.bf16.msra.mxu1 %v893_v3  ;;  %v902_v12 = vld [vmem:[%s1187_s1 + $0x60] sm:$0xff]   ;;  %v906_v16 = vld [vmem:[%s1187_s1 + $0x58] sm:$0xff]   ;;  %v910_v20 = vld [vmem:[%s1187_s1 + $0x50] sm:$0xff]  }
   0x6   :  { %824 = vmatprep.subr.bf16.mxu1 %v896_v6  ;;  %v903_v13 = vld [vmem:[%s1187_s1 + $0x20] sm:$0xff]   ;;  %v907_v17 = vld [vmem:[%s1187_s1 + $0x18] sm:$0xff]   ;;  %v911_v21 = vld [vmem:[%s1187_s1 + $0x10] sm:$0xff]  }
   0x7   :  { %797 = vmatpush3.bf16.msra.mxu0 %v895_v5  ;;  %v904_v14 = vld [vmem:[%s1187_s1 + $0xe0] sm:$0xff]   ;;  %v908_v18 = vld [vmem:[%s1187_s1 + $0xd8] sm:$0xff]   ;;  %v912_v22 = vld [vmem:[%s1187_s1 + $0xd0] sm:$0xff]  }
   0x8   :  { %798 = vmatprep.subr.bf16.mxu0 %v898_v8  ;;  %v905_v15 = vld [vmem:[%s1187_s1 + $0xa0] sm:$0xff]   ;;  %v909_v19 = vld [vmem:[%s1187_s1 + $0x98] sm:$0xff]   ;;  %v913_v23 = vld [vmem:[%s1187_s1 + $0x90] sm:$0xff]  }
   0x9   :  { %825 = vmatpush3.bf16.msra.mxu1 %v897_v7  ;;  %v914_v24 = vld [vmem:[%s1187_s1 + $0x48] sm:$0xff]   ;;  %v918_v28 = vld [vmem:[%s1187_s1 + $0x40] sm:$0xff]   ;;  %v925_v34 = vld [vmem:[%s1187_s1 + $0x178] sm:$0xff]  }
   0xa   :  { %826 = vmatprep.subr.bf16.mxu1 %v900_v10  ;;  %v915_v25 = vld [vmem:[%s1187_s1 + $0x8] sm:$0xff]   ;;  %v919_v29 = vld [vmem:[%s1187_s1] sm:$0xff]   ;;  %v929_v37 = vld [vmem:[%s1187_s1 + $0x138] sm:$0xff]  }
   0xb   :  { %799 = vmatpush3.bf16.msra.mxu0 %v899_v9  ;;  %v916_v26 = vld [vmem:[%s1187_s1 + $0xc8] sm:$0xff]   ;;  %v920_v30 = vld [vmem:[%s1187_s1 + $0xc0] sm:$0xff]   ;;  %v930_v38 = vld [vmem:[%s1187_s1 + $0x170] sm:$0xff]  }
   0xc   :  { %800 = vmatprep.subr.bf16.mxu0 %v902_v12  ;;  %v917_v27 = vld [vmem:[%s1187_s1 + $0x88] sm:$0xff]   ;;  %v921_v31 = vld [vmem:[%s1188_s0] ss:$28 sps:$4 sm:$0xff]   ;;  %v931_v39 = vld [vmem:[%s1187_s1 + $0x130] sm:$0xff]  }
   0xd   :  { %827 = vmatpush3.bf16.msra.mxu1 %v901_v11  ;;  %v923_v32 = vld [vmem:[%s1188_s0 + $0x4] ss:$28 sps:$4 sm:$0xff]   ;;  %v928_v36 = vld [vmem:[%s1188_s0 + $0xc] ss:$28 sps:$4 sm:$0xff]   ;;  %v937_v44 = vld [vmem:[%s1188_s0 + $0x3c] ss:$28 sps:$4 sm:$0xff]  }
   0xe   :  { %828 = vmatprep.subr.bf16.mxu1 %v904_v14  ;;  %v924_v33 = vld [vmem:[%s1187_s1 + $0x80] sm:$0xff]   ;;  %547 = vmatprep.mubr.bf16.mxu0 %v923_v32  ;;  %v932_v40 = vld [vmem:[%s1187_s1 + $0x168] sm:$0xff]   ;;  %v936_v45 = vld [vmem:[%s1187_s1 + $0x158] sm:$0xff]  }
   0xf   :  { %801 = vmatpush3.bf16.msra.mxu0 %v903_v13  ;;  %v926_v35 = vld [vmem:[%s1188_s0 + $0x8] ss:$28 sps:$4 sm:$0xff]   ;;  %596 = vmatprep.mubr.bf16.mxu1 %v928_v36  ;;  %v940_v46 = vld [vmem:[%s1188_s0 + $0x38] ss:$28 sps:$4 sm:$0xff]   ;;  %v943_v48 = vld [vmem:[%s1188_s0 + $0x40] ss:$28 sps:$4 sm:$0xff]  }
  0x10   :  { %802 = vmatprep.subr.bf16.mxu0 %v906_v16  ;;  %v933_v41 = vld [vmem:[%s1187_s1 + $0x128] sm:$0xff]   ;;  %v934_v42 = vld [vmem:[%s1187_s1 + $0x160] sm:$0xff]   ;;  %v939_v49 = vld [vmem:[%s1187_s1 + $0x118] sm:$0xff]  }
  0x11   :  { %829 = vmatpush3.bf16.msra.mxu1 %v905_v15  ;;  %v935_v43 = vld [vmem:[%s1187_s1 + $0x120] sm:$0xff]   ;;  %v944_v50 = vld [vmem:[%s1187_s1 + $0x150] sm:$0xff]   ;;  %v948_v51 = vld [vmem:[%s1187_s1 + $0x188] sm:$0xff]  }
  0x12   :  { %830 = vmatprep.subr.bf16.mxu1 %v908_v18  ;;  %v941_v47 = vld [vmem:[%s1188_s0 + $0x44] ss:$28 sps:$4 sm:$0xff]   ;;  %v945_v52 = vld [vmem:[%s1187_s1 + $0x110] sm:$0xff]   ;;  %v946_v53 = vld [vmem:[%s1187_s1 + $0x148] sm:$0xff]  }
  0x13   :  { %803 = vmatpush3.bf16.msra.mxu0 %v907_v17  ;;  %v953_v54 = vld [vmem:[%s1188_s0 + $0x14] ss:$28 sps:$4 sm:$0xff]   ;;  %v947_v55 = vld [vmem:[%s1187_s1 + $0x108] sm:$0xff]   ;;  %v954_v56 = vld [vmem:[%s1187_s1 + $0x180] sm:$0xff]  }
  0x14   :  { %804 = vmatprep.subr.bf16.mxu0 %v910_v20  ;;  %v955_v57 = vld [vmem:[%s1188_s0 + $0x18] ss:$28 sps:$4 sm:$0xff]   ;;  %v956_v58 = vld [vmem:[%s1188_s0 + $0x50] ss:$28 sps:$4 sm:$0xff]   ;;  %v949_v59 = vld [vmem:[%s1187_s1 + $0x140] sm:$0xff]  }
  0x15   :  { %831 = vmatpush3.bf16.msra.mxu1 %v909_v19  ;;  %v950_v60 = vld [vmem:[%s1187_s1 + $0x100] sm:$0xff]   ;;  %v951_v61 = vld [vmem:[%s1188_s0 + $0x10] ss:$28 sps:$4 sm:$0xff]  }
  0x16   :  { %832 = vmatprep.subr.bf16.mxu1 %v912_v22  ;;  %v957_v62 = vld [vmem:[%s1188_s0 + $0x4c] ss:$28 sps:$4 sm:$0xff]   ;;  %v727_v16 = vld [vmem:[%s1189_s2] ss:$0 sm:$0xff] }
  0x17   :  { %805 = vmatpush3.bf16.msra.mxu0 %v911_v21  ;;  %v959_v63 = vld [vmem:[%s1188_s0 + $0x48] ss:$28 sps:$4 sm:$0xff]  }
  0x18   :  { %806 = vmatprep.subr.bf16.mxu0 %v914_v24 }
  0x19   :  { %833 = vmatpush3.bf16.msra.mxu1 %v913_v23 }
  0x1a   :  { %834 = vmatprep.subr.bf16.mxu1 %v916_v26 }
  0x1b   :  { %807 = vmatpush3.bf16.msra.mxu0 %v915_v25 }
  0x1c   :  { %808 = vmatprep.subr.bf16.mxu0 %v918_v28 }
  0x1d   :  { %835 = vmatpush3.bf16.msra.mxu1 %v917_v27 }
  0x1e   :  { %836 = vmatprep.subr.bf16.mxu1 %v920_v30 }
  0x1f   :  { %809 = vmatpush3.bf16.msra.mxu0 %v919_v29 }
  0x20   :  { %850 = vmatprep.subr.bf16.mxu0 %v925_v34 }
  0x21   :  { %837 = vmatpush3.bf16.msra.mxu1 %v924_v33 }
  0x22   :  { %548 = vmatmul.mubr.bf16.vlgmr.msra.gmra.mxu0 %v921_v31  ;;  %882 = vmatprep.subr.bf16.mxu1 %v948_v51 }
  0x23   :  { %851 = vmatpush3.bf16.msra.mxu0 %v929_v37  ;;  %555 = vmatprep.mubr.bf16.mxu0 %v937_v44 }
  0x24   :  { %597 = vmatmul.mubr.bf16.vlgmr.msra.gmra.mxu1 %v926_v35  ;;  %852 = vmatprep.subr.bf16.mxu0 %v930_v38 }
  0x25   :  { %604 = vmatprep.mubr.bf16.mxu1 %v941_v47  ;;  %883 = vmatpush3.bf16.msra.mxu1 %v948_v51 }
  0x26   :  { %884 = vmatprep.subr.bf16.mxu1 %v954_v56 }
  0x27   :  { %853 = vmatpush3.bf16.msra.mxu0 %v931_v39 }
  0x28   :  { %854 = vmatprep.subr.bf16.mxu0 %v932_v40 }
  0x29   :  { %885 = vmatpush3.bf16.msra.mxu1 %v954_v56 }
  0x2a   :  { %556 = vmatmul.mubr.bf16.gmra.mxu0 %v940_v46 }
  0x2b   :  { %855 = vmatpush3.bf16.msra.mxu0 %v933_v41  ;;  %645 = vmatprep.mubr.bf16.mxu0 %v953_v54 }
  0x2c   :  { %856 = vmatprep.subr.bf16.mxu0 %v934_v42  ;;  %605 = vmatmul.mubr.bf16.gmra.mxu1 %v943_v48 }
  0x2d   :  { %886 = vmatprep.mubr.msk.bf16.mxu1 %vm508_vm0, %v955_v57 }
  0x2f   :  { %857 = vmatpush3.bf16.msra.mxu0 %v935_v43 }
  0x30   :  { %858 = vmatprep.subr.bf16.mxu0 %v936_v45 }
  0x33   :  { %859 = vmatpush3.bf16.msra.mxu0 %v939_v49 }
  0x34   :  { %860 = vmatprep.subr.bf16.mxu0 %v944_v50  ;;  %887 = vmatmul.mubr.msk.bf16.vlgmr.msra.gmra.mxu1 %vm508_vm0, %v956_v58 }
  0x37   :  { %861 = vmatpush3.bf16.msra.mxu0 %v945_v52 }
  0x38   :  { %862 = vmatprep.subr.bf16.mxu0 %v946_v53 }
  0x3b   :  { %863 = vmatpush3.bf16.msra.mxu0 %v947_v55 }
  0x3c   :  { %864 = vmatprep.subr.bf16.mxu0 %v949_v59 }
  0x3f   :  { %865 = vmatpush3.bf16.msra.mxu0 %v950_v60 }
  0x42   :  { %646 = vmatmul.mubr.bf16.vlgmr.msra.gmra.mxu0 %v951_v61 }
  0x43   :  { %653 = vmatprep.mubr.bf16.mxu0 %v957_v62 }
  0x4a   :  { %654 = vmatmul.mubr.bf16.gmra.mxu0 %v959_v63 }
  0xe2   :  { %v810_v1 = vpop.f32.mrf.mxu0 }
  0xe4   :  { %v838_v0 = vpop.f32.mrf.mxu1  ;;  %v811_v3 = vpop.f32.mrf.mxu0 }
  0xe5   :  { %v812_v15 = vadd.f32 %v811_v3, %v810_v1 }
  0xe6   :  { %v839_v2 = vpop.f32.mrf.mxu1  ;;  %v813_v5 = vpop.f32.mrf.mxu0 }
  0xe7   :  { %v550_v19 = vadd.f32 %v812_v15, %v727_v16  ;;  %v840_v20 = vadd.f32 %v839_v2, %v838_v0 }
  0xe8   :  { %v841_v4 = vpop.f32.mrf.mxu1  ;;  %v814_v8 = vpop.f32.mrf.mxu0 }
  0xe9   :  { %v815_v21 = vadd.f32 %v814_v8, %v813_v5  ;;  %v599_v26 = vadd.f32 %v840_v20, %v550_v19 }
  0xea   :  { %v842_v6 = vpop.f32.mrf.mxu1  ;;  %v816_v9 = vpop.f32.mrf.mxu0 }
  0xeb   :  { %v553_v27 = vadd.f32 %v815_v21, %v727_v16  ;;  %v843_v28 = vadd.f32 %v842_v6, %v841_v4 }
  0xec   :  { %v844_v7 = vpop.f32.mrf.mxu1  ;;  %v817_v11 = vpop.f32.mrf.mxu0 }
  0xed   :  { %v818_v24 = vadd.f32 %v817_v11, %v816_v9  ;;  %v602_v37 = vadd.f32 %v843_v28, %v553_v27 }
  0xee   :  { %v845_v10 = vpop.f32.mrf.mxu1  ;;  %v819_v13 = vpop.f32.mrf.mxu0 }
  0xef   :  { %v558_v33 = vadd.f32 %v818_v24, %v727_v16  ;;  %v846_v34 = vadd.f32 %v845_v10, %v844_v7 }
  0xf0   :  { %v847_v12 = vpop.f32.mrf.mxu1  ;;  %v820_v18 = vpop.f32.mrf.mxu0 }
  0xf1   :  { %v821_v35 = vadd.f32 %v820_v18, %v819_v13  ;;  %v607_v44 = vadd.f32 %v846_v34, %v558_v33 }
  0xf2   :  { %v848_v14 = vpop.f32.mrf.mxu1 }
  0xf3   :  { %v561_v45 = vadd.f32 %v821_v35, %v727_v16  ;;  %v849_v47 = vadd.f32 %v848_v14, %v847_v12 }
  0xf4   :  { %v888_v17 = vpop.f32.mrf.mxu1 }
  0xf5   :  { %v610_v55 = vadd.f32 %v849_v47, %v561_v45 }
  0xf6   :  { %v696_v23 = vpop.f32.mrf.mxu1 }
  0xf8   :  { %v889_v31 = vpop.f32.mrf.mxu1 }
  0xfa   :  { %v699_v41 = vpop.f32.mrf.mxu1 }
 0x102   :  { %v866_v22 = vpop.f32.mrf.mxu0 }
 0x104   :  { %v867_v25 = vpop.f32.mrf.mxu0 }
 0x105   :  { %v868_v29 = vadd.f32 %v867_v25, %v866_v22 }
 0x106   :  { %v869_v30 = vpop.f32.mrf.mxu0 }
 0x107   :  { %v648_v32 = vadd.f32 %v868_v29, %v599_v26 }
 0x108   :  { %v870_v36 = vpop.f32.mrf.mxu0 }
 0x109   :  { %v871_v38 = vadd.f32 %v870_v36, %v869_v30  ;;  %v697_v39 = vadd.f32 %v696_v23, %v648_v32 }
 0x10a   :  { %v872_v40 = vpop.f32.mrf.mxu0 }
 0x10b   :  { %v711_v42 = vmul.f32 0.2, %v697_v39  ;;  %v651_v43 = vadd.f32 %v871_v38, %v602_v37 }
 0x10c   :  { %v873_v46 = vpop.f32.mrf.mxu0 }
 0x10d   :  { %v715_v48 = vmax.f32 %v697_v39, %v711_v42  ;;  %v874_v49 = vadd.f32 %v873_v46, %v872_v40  ;;  %v700_v50 = vadd.f32 %v699_v41, %v651_v43 }
 0x10e   :  { %v875_v51 = vpop.f32.mrf.mxu0 }
 0x10f   :  { %719 = vst [vmem:[%s1190_s3] sm:$0xff] %v715_v48  ;;  %v656_v52 = vadd.f32 %v874_v49, %v607_v44  ;;  %v712_v53 = vmul.f32 0.2, %v700_v50 }
 0x110   :  { %v876_v54 = vpop.f32.mrf.mxu0 }
 0x111   :  { %v705_v56 = vadd.f32 %v888_v17, %v656_v52  ;;  %v716_v57 = vmax.f32 %v700_v50, %v712_v53  ;;  %v877_v58 = vadd.f32 %v876_v54, %v875_v51 }
 0x113   :  { %v713_v59 = vmul.f32 0.2, %v705_v56  ;;  %720 = vst [vmem:[%s1190_s3 + $0x8] sm:$0xff] %v716_v57  ;;  %v659_v60 = vadd.f32 %v877_v58, %v610_v55 }
 0x115   :  { %v717_v61 = vmax.f32 %v705_v56, %v713_v59  ;;  %v708_v62 = vadd.f32 %v889_v31, %v659_v60 }
 0x117   :  { %721 = vst [vmem:[%s1190_s3 + $0x10] sm:$0xff] %v717_v61  ;;  %v714_v63 = vmul.f32 0.2, %v708_v62 }
 0x119   :  { %v718_v0 = vmax.f32 %v708_v62, %v714_v63 }
 0x11b   :  { %722 = vst [vmem:[%s1190_s3 + $0x18] sm:$0xff] %v718_v0 }

// kernel: reverse
= control target key start
LH: loop header
LB: loop body
LE: loop exit
PB: predicated region body
PF: predicated region fallthrough
CT: control target
= control target key end

     0   :  { %s37809_s0 = inlined_call_operand.vmem [shape: bf16[1600,64,5,5], index: 0, kind: input, shape index: {}]   ;;  %s37810_s1 = inlined_call_operand.vmem [shape: bf16[1600,64,5,5], index: 1, kind: output, shape index: {}]  }
   0x1   :  { %v28199_v0 = vld [vmem:[%s37809_s0 + $0x2700] sm:$0xff]   ;;  %v28224_v25 = vld [vmem:[%s37809_s0 + $0x2734] sm:$0xff]   ;;  %v28249_v50 = vld [vmem:[%s37809_s0 + $0x2768] sm:$0xff]  }
   0x2   :  { %v28200_v1 = vld [vmem:[%s37809_s0 + $0x1ee0] sm:$0xff]   ;;  %22002 = vst [vmem:[%s37810_s1] sm:$0xff] %v28199_v0  ;;  %v28225_v26 = vld [vmem:[%s37809_s0 + $0x1f14] sm:$0xff]   ;;  %22102 = vst [vmem:[%s37810_s1 + $0x34] sm:$0xff] %v28224_v25 }
   0x3   :  { %v28201_v2 = vld [vmem:[%s37809_s0 + $0x16c0] sm:$0xff]   ;;  %22006 = vst [vmem:[%s37810_s1 + $0x820] sm:$0xff] %v28200_v1  ;;  %v28226_v27 = vld [vmem:[%s37809_s0 + $0x16f4] sm:$0xff]   ;;  %22106 = vst [vmem:[%s37810_s1 + $0x854] sm:$0xff] %v28225_v26 }
   0x4   :  { %v28202_v3 = vld [vmem:[%s37809_s0 + $0xea0] sm:$0xff]   ;;  %22010 = vst [vmem:[%s37810_s1 + $0x1040] sm:$0xff] %v28201_v2  ;;  %v28227_v28 = vld [vmem:[%s37809_s0 + $0xed4] sm:$0xff]   ;;  %22110 = vst [vmem:[%s37810_s1 + $0x1074] sm:$0xff] %v28226_v27 }
   0x5   :  { %v28203_v4 = vld [vmem:[%s37809_s0 + $0x680] sm:$0xff]   ;;  %22014 = vst [vmem:[%s37810_s1 + $0x1860] sm:$0xff] %v28202_v3  ;;  %v28228_v29 = vld [vmem:[%s37809_s0 + $0x6b4] sm:$0xff]   ;;  %22114 = vst [vmem:[%s37810_s1 + $0x1894] sm:$0xff] %v28227_v28 }
   0x6   :  { %v28204_v5 = vld [vmem:[%s37809_s0 + $0x2560] sm:$0xff]   ;;  %22018 = vst [vmem:[%s37810_s1 + $0x2080] sm:$0xff] %v28203_v4  ;;  %v28229_v30 = vld [vmem:[%s37809_s0 + $0x2594] sm:$0xff]   ;;  %22118 = vst [vmem:[%s37810_s1 + $0x20b4] sm:$0xff] %v28228_v29 }
   0x7   :  { %v28205_v6 = vld [vmem:[%s37809_s0 + $0x1d40] sm:$0xff]   ;;  %22022 = vst [vmem:[%s37810_s1 + $0x1a0] sm:$0xff] %v28204_v5  ;;  %v28230_v31 = vld [vmem:[%s37809_s0 + $0x1d74] sm:$0xff]   ;;  %22122 = vst [vmem:[%s37810_s1 + $0x1d4] sm:$0xff] %v28229_v30 }
   0x8   :  { %v28206_v7 = vld [vmem:[%s37809_s0 + $0x1520] sm:$0xff]   ;;  %22026 = vst [vmem:[%s37810_s1 + $0x9c0] sm:$0xff] %v28205_v6  ;;  %v28231_v32 = vld [vmem:[%s37809_s0 + $0x1554] sm:$0xff]   ;;  %22126 = vst [vmem:[%s37810_s1 + $0x9f4] sm:$0xff] %v28230_v31 }
   0x9   :  { %v28207_v8 = vld [vmem:[%s37809_s0 + $0xd00] sm:$0xff]   ;;  %22030 = vst [vmem:[%s37810_s1 + $0x11e0] sm:$0xff] %v28206_v7  ;;  %v28232_v33 = vld [vmem:[%s37809_s0 + $0xd34] sm:$0xff]   ;;  %22130 = vst [vmem:[%s37810_s1 + $0x1214] sm:$0xff] %v28231_v32 }
   0xa   :  { %v28208_v9 = vld [vmem:[%s37809_s0 + $0x4e0] sm:$0xff]   ;;  %22034 = vst [vmem:[%s37810_s1 + $0x1a00] sm:$0xff] %v28207_v8  ;;  %v28233_v34 = vld [vmem:[%s37809_s0 + $0x514] sm:$0xff]   ;;  %22134 = vst [vmem:[%s37810_s1 + $0x1a34] sm:$0xff] %v28232_v33 }
   0xb   :  { %v28209_v10 = vld [vmem:[%s37809_s0 + $0x23c0] sm:$0xff]   ;;  %22038 = vst [vmem:[%s37810_s1 + $0x2220] sm:$0xff] %v28208_v9  ;;  %v28234_v35 = vld [vmem:[%s37809_s0 + $0x23f4] sm:$0xff]   ;;  %22138 = vst [vmem:[%s37810_s1 + $0x2254] sm:$0xff] %v28233_v34 }
   0xc   :  { %v28210_v11 = vld [vmem:[%s37809_s0 + $0x1ba0] sm:$0xff]   ;;  %22042 = vst [vmem:[%s37810_s1 + $0x340] sm:$0xff] %v28209_v10  ;;  %v28235_v36 = vld [vmem:[%s37809_s0 + $0x1bd4] sm:$0xff]   ;;  %22142 = vst [vmem:[%s37810_s1 + $0x374] sm:$0xff] %v28234_v35 }
   0xd   :  { %v28211_v12 = vld [vmem:[%s37809_s0 + $0x1380] sm:$0xff]   ;;  %22046 = vst [vmem:[%s37810_s1 + $0xb60] sm:$0xff] %v28210_v11  ;;  %v28236_v37 = vld [vmem:[%s37809_s0 + $0x13b4] sm:$0xff]   ;;  %22146 = vst [vmem:[%s37810_s1 + $0xb94] sm:$0xff] %v28235_v36 }
   0xe   :  { %v28212_v13 = vld [vmem:[%s37809_s0 + $0xb60] sm:$0xff]   ;;  %22050 = vst [vmem:[%s37810_s1 + $0x1380] sm:$0xff] %v28211_v12  ;;  %v28237_v38 = vld [vmem:[%s37809_s0 + $0xb94] sm:$0xff]   ;;  %22150 = vst [vmem:[%s37810_s1 + $0x13b4] sm:$0xff] %v28236_v37 }
   0xf   :  { %v28213_v14 = vld [vmem:[%s37809_s0 + $0x340] sm:$0xff]   ;;  %22054 = vst [vmem:[%s37810_s1 + $0x1ba0] sm:$0xff] %v28212_v13  ;;  %v28238_v39 = vld [vmem:[%s37809_s0 + $0x374] sm:$0xff]   ;;  %22154 = vst [vmem:[%s37810_s1 + $0x1bd4] sm:$0xff] %v28237_v38 }
  0x10   :  { %v28214_v15 = vld [vmem:[%s37809_s0 + $0x2220] sm:$0xff]   ;;  %22058 = vst [vmem:[%s37810_s1 + $0x23c0] sm:$0xff] %v28213_v14  ;;  %v28239_v40 = vld [vmem:[%s37809_s0 + $0x2254] sm:$0xff]   ;;  %22158 = vst [vmem:[%s37810_s1 + $0x23f4] sm:$0xff] %v28238_v39 }
  0x11   :  { %v28215_v16 = vld [vmem:[%s37809_s0 + $0x1a00] sm:$0xff]   ;;  %22062 = vst [vmem:[%s37810_s1 + $0x4e0] sm:$0xff] %v28214_v15  ;;  %v28240_v41 = vld [vmem:[%s37809_s0 + $0x1a34] sm:$0xff]   ;;  %22162 = vst [vmem:[%s37810_s1 + $0x514] sm:$0xff] %v28239_v40 }
  0x12   :  { %v28216_v17 = vld [vmem:[%s37809_s0 + $0x11e0] sm:$0xff]   ;;  %22066 = vst [vmem:[%s37810_s1 + $0xd00] sm:$0xff] %v28215_v16  ;;  %v28241_v42 = vld [vmem:[%s37809_s0 + $0x1214] sm:$0xff]   ;;  %22166 = vst [vmem:[%s37810_s1 + $0xd34] sm:$0xff] %v28240_v41 }
  0x13   :  { %v28217_v18 = vld [vmem:[%s37809_s0 + $0x9c0] sm:$0xff]   ;;  %22070 = vst [vmem:[%s37810_s1 + $0x1520] sm:$0xff] %v28216_v17  ;;  %v28242_v43 = vld [vmem:[%s37809_s0 + $0x9f4] sm:$0xff]   ;;  %22170 = vst [vmem:[%s37810_s1 + $0x1554] sm:$0xff] %v28241_v42 }
  0x14   :  { %v28218_v19 = vld [vmem:[%s37809_s0 + $0x1a0] sm:$0xff]   ;;  %22074 = vst [vmem:[%s37810_s1 + $0x1d40] sm:$0xff] %v28217_v18  ;;  %v28243_v44 = vld [vmem:[%s37809_s0 + $0x1d4] sm:$0xff]   ;;  %22174 = vst [vmem:[%s37810_s1 + $0x1d74] sm:$0xff] %v28242_v43 }
  0x15   :  { %v28219_v20 = vld [vmem:[%s37809_s0 + $0x2080] sm:$0xff]   ;;  %22078 = vst [vmem:[%s37810_s1 + $0x2560] sm:$0xff] %v28218_v19  ;;  %v28244_v45 = vld [vmem:[%s37809_s0 + $0x20b4] sm:$0xff]   ;;  %22178 = vst [vmem:[%s37810_s1 + $0x2594] sm:$0xff] %v28243_v44 }
  0x16   :  { %v28220_v21 = vld [vmem:[%s37809_s0 + $0x1860] sm:$0xff]   ;;  %22082 = vst [vmem:[%s37810_s1 + $0x680] sm:$0xff] %v28219_v20  ;;  %v28245_v46 = vld [vmem:[%s37809_s0 + $0x1894] sm:$0xff]   ;;  %22182 = vst [vmem:[%s37810_s1 + $0x6b4] sm:$0xff] %v28244_v45 }
  0x17   :  { %v28221_v22 = vld [vmem:[%s37809_s0 + $0x1040] sm:$0xff]   ;;  %22086 = vst [vmem:[%s37810_s1 + $0xea0] sm:$0xff] %v28220_v21  ;;  %v28246_v47 = vld [vmem:[%s37809_s0 + $0x1074] sm:$0xff]   ;;  %22186 = vst [vmem:[%s37810_s1 + $0xed4] sm:$0xff] %v28245_v46 }
  0x18   :  { %v28222_v23 = vld [vmem:[%s37809_s0 + $0x820] sm:$0xff]   ;;  %22090 = vst [vmem:[%s37810_s1 + $0x16c0] sm:$0xff] %v28221_v22  ;;  %v28247_v48 = vld [vmem:[%s37809_s0 + $0x854] sm:$0xff]   ;;  %22190 = vst [vmem:[%s37810_s1 + $0x16f4] sm:$0xff] %v28246_v47 }
  0x19   :  { %v28223_v24 = vld [vmem:[%s37809_s0] sm:$0xff]   ;;  %22094 = vst [vmem:[%s37810_s1 + $0x1ee0] sm:$0xff] %v28222_v23  ;;  %v28248_v49 = vld [vmem:[%s37809_s0 + $0x34] sm:$0xff]   ;;  %22194 = vst [vmem:[%s37810_s1 + $0x1f14] sm:$0xff] %v28247_v48 }
  0x1a   :  { %22098 = vst [vmem:[%s37810_s1 + $0x2700] sm:$0xff] %v28223_v24  ;;  %22198 = vst [vmem:[%s37810_s1 + $0x2734] sm:$0xff] %v28248_v49  ;;  %v28250_v51 = vld [vmem:[%s37809_s0 + $0x1f48] sm:$0xff]   ;;  %v28274_v11 = vld [vmem:[%s37809_s0 + $0x279c] sm:$0xff]  }
  0x1b   :  { %v28251_v52 = vld [vmem:[%s37809_s0 + $0x1728] sm:$0xff]   ;;  %22202 = vst [vmem:[%s37810_s1 + $0x68] sm:$0xff] %v28249_v50  ;;  %22206 = vst [vmem:[%s37810_s1 + $0x888] sm:$0xff] %v28250_v51  ;;  %v28275_v12 = vld [vmem:[%s37809_s0 + $0x1f7c] sm:$0xff]  }
  0x1c   :  { %v28252_v53 = vld [vmem:[%s37809_s0 + $0xf08] sm:$0xff]   ;;  %22210 = vst [vmem:[%s37810_s1 + $0x10a8] sm:$0xff] %v28251_v52  ;;  %v28276_v13 = vld [vmem:[%s37809_s0 + $0x175c] sm:$0xff]   ;;  %22302 = vst [vmem:[%s37810_s1 + $0x9c] sm:$0xff] %v28274_v11 }
  0x1d   :  { %v28253_v54 = vld [vmem:[%s37809_s0 + $0x6e8] sm:$0xff]   ;;  %22214 = vst [vmem:[%s37810_s1 + $0x18c8] sm:$0xff] %v28252_v53  ;;  %22306 = vst [vmem:[%s37810_s1 + $0x8bc] sm:$0xff] %v28275_v12  ;;  %v28277_v14 = vld [vmem:[%s37809_s0 + $0xf3c] sm:$0xff]  }
  0x1e   :  { %v28254_v55 = vld [vmem:[%s37809_s0 + $0x25c8] sm:$0xff]   ;;  %22218 = vst [vmem:[%s37810_s1 + $0x20e8] sm:$0xff] %v28253_v54  ;;  %v28278_v15 = vld [vmem:[%s37809_s0 + $0x71c] sm:$0xff]   ;;  %22310 = vst [vmem:[%s37810_s1 + $0x10dc] sm:$0xff] %v28276_v13 }
  0x1f   :  { %v28255_v56 = vld [vmem:[%s37809_s0 + $0x1da8] sm:$0xff]   ;;  %22222 = vst [vmem:[%s37810_s1 + $0x208] sm:$0xff] %v28254_v55  ;;  %v28279_v16 = vld [vmem:[%s37809_s0 + $0x25fc] sm:$0xff]   ;;  %22314 = vst [vmem:[%s37810_s1 + $0x18fc] sm:$0xff] %v28277_v14 }
  0x20   :  { %v28256_v57 = vld [vmem:[%s37809_s0 + $0x1588] sm:$0xff]   ;;  %22226 = vst [vmem:[%s37810_s1 + $0xa28] sm:$0xff] %v28255_v56  ;;  %22318 = vst [vmem:[%s37810_s1 + $0x211c] sm:$0xff] %v28278_v15  ;;  %v28280_v17 = vld [vmem:[%s37809_s0 + $0x1ddc] sm:$0xff]  }
  0x21   :  { %v28257_v58 = vld [vmem:[%s37809_s0 + $0xd68] sm:$0xff]   ;;  %22230 = vst [vmem:[%s37810_s1 + $0x1248] sm:$0xff] %v28256_v57  ;;  %v28281_v18 = vld [vmem:[%s37809_s0 + $0x15bc] sm:$0xff]   ;;  %22322 = vst [vmem:[%s37810_s1 + $0x23c] sm:$0xff] %v28279_v16 }
  0x22   :  { %v28258_v59 = vld [vmem:[%s37809_s0 + $0x548] sm:$0xff]   ;;  %22234 = vst [vmem:[%s37810_s1 + $0x1a68] sm:$0xff] %v28257_v58  ;;  %v28282_v19 = vld [vmem:[%s37809_s0 + $0xd9c] sm:$0xff]   ;;  %22326 = vst [vmem:[%s37810_s1 + $0xa5c] sm:$0xff] %v28280_v17 }
  0x23   :  { %v28259_v60 = vld [vmem:[%s37809_s0 + $0x2428] sm:$0xff]   ;;  %22238 = vst [vmem:[%s37810_s1 + $0x2288] sm:$0xff] %v28258_v59  ;;  %22330 = vst [vmem:[%s37810_s1 + $0x127c] sm:$0xff] %v28281_v18  ;;  %v28283_v20 = vld [vmem:[%s37809_s0 + $0x57c] sm:$0xff]  }
  0x24   :  { %v28260_v61 = vld [vmem:[%s37809_s0 + $0x1c08] sm:$0xff]   ;;  %22242 = vst [vmem:[%s37810_s1 + $0x3a8] sm:$0xff] %v28259_v60  ;;  %v28284_v21 = vld [vmem:[%s37809_s0 + $0x245c] sm:$0xff]   ;;  %22334 = vst [vmem:[%s37810_s1 + $0x1a9c] sm:$0xff] %v28282_v19 }
  0x25   :  { %v28261_v62 = vld [vmem:[%s37809_s0 + $0x13e8] sm:$0xff]   ;;  %22246 = vst [vmem:[%s37810_s1 + $0xbc8] sm:$0xff] %v28260_v61  ;;  %v28285_v22 = vld [vmem:[%s37809_s0 + $0x1c3c] sm:$0xff]   ;;  %22338 = vst [vmem:[%s37810_s1 + $0x22bc] sm:$0xff] %v28283_v20 }
  0x26   :  { %v28262_v63 = vld [vmem:[%s37809_s0 + $0xbc8] sm:$0xff]   ;;  %22250 = vst [vmem:[%s37810_s1 + $0x13e8] sm:$0xff] %v28261_v62  ;;  %22342 = vst [vmem:[%s37810_s1 + $0x3dc] sm:$0xff] %v28284_v21  ;;  %v28286_v23 = vld [vmem:[%s37809_s0 + $0x141c] sm:$0xff]  }
  0x27   :  { %v28263_v0 = vld [vmem:[%s37809_s0 + $0x3a8] sm:$0xff]   ;;  %22254 = vst [vmem:[%s37810_s1 + $0x1c08] sm:$0xff] %v28262_v63  ;;  %v28287_v24 = vld [vmem:[%s37809_s0 + $0xbfc] sm:$0xff]   ;;  %22346 = vst [vmem:[%s37810_s1 + $0xbfc] sm:$0xff] %v28285_v22 }
  0x28   :  { %v28264_v1 = vld [vmem:[%s37809_s0 + $0x2288] sm:$0xff]   ;;  %22258 = vst [vmem:[%s37810_s1 + $0x2428] sm:$0xff] %v28263_v0  ;;  %v28288_v25 = vld [vmem:[%s37809_s0 + $0x3dc] sm:$0xff]   ;;  %22350 = vst [vmem:[%s37810_s1 + $0x141c] sm:$0xff] %v28286_v23 }
  0x29   :  { %v28265_v2 = vld [vmem:[%s37809_s0 + $0x1a68] sm:$0xff]   ;;  %22262 = vst [vmem:[%s37810_s1 + $0x548] sm:$0xff] %v28264_v1  ;;  %22354 = vst [vmem:[%s37810_s1 + $0x1c3c] sm:$0xff] %v28287_v24  ;;  %v28289_v26 = vld [vmem:[%s37809_s0 + $0x22bc] sm:$0xff]  }
  0x2a   :  { %v28266_v3 = vld [vmem:[%s37809_s0 + $0x1248] sm:$0xff]   ;;  %22266 = vst [vmem:[%s37810_s1 + $0xd68] sm:$0xff] %v28265_v2  ;;  %v28290_v27 = vld [vmem:[%s37809_s0 + $0x1a9c] sm:$0xff]   ;;  %22358 = vst [vmem:[%s37810_s1 + $0x245c] sm:$0xff] %v28288_v25 }
  0x2b   :  { %v28267_v4 = vld [vmem:[%s37809_s0 + $0xa28] sm:$0xff]   ;;  %22270 = vst [vmem:[%s37810_s1 + $0x1588] sm:$0xff] %v28266_v3  ;;  %v28291_v28 = vld [vmem:[%s37809_s0 + $0x127c] sm:$0xff]   ;;  %22362 = vst [vmem:[%s37810_s1 + $0x57c] sm:$0xff] %v28289_v26 }
  0x2c   :  { %v28268_v5 = vld [vmem:[%s37809_s0 + $0x208] sm:$0xff]   ;;  %22274 = vst [vmem:[%s37810_s1 + $0x1da8] sm:$0xff] %v28267_v4  ;;  %22366 = vst [vmem:[%s37810_s1 + $0xd9c] sm:$0xff] %v28290_v27  ;;  %v28292_v29 = vld [vmem:[%s37809_s0 + $0xa5c] sm:$0xff]  }
  0x2d   :  { %v28269_v6 = vld [vmem:[%s37809_s0 + $0x20e8] sm:$0xff]   ;;  %22278 = vst [vmem:[%s37810_s1 + $0x25c8] sm:$0xff] %v28268_v5  ;;  %v28293_v30 = vld [vmem:[%s37809_s0 + $0x23c] sm:$0xff]   ;;  %22370 = vst [vmem:[%s37810_s1 + $0x15bc] sm:$0xff] %v28291_v28 }
  0x2e   :  { %v28270_v7 = vld [vmem:[%s37809_s0 + $0x18c8] sm:$0xff]   ;;  %22282 = vst [vmem:[%s37810_s1 + $0x6e8] sm:$0xff] %v28269_v6  ;;  %v28294_v31 = vld [vmem:[%s37809_s0 + $0x211c] sm:$0xff]   ;;  %22374 = vst [vmem:[%s37810_s1 + $0x1ddc] sm:$0xff] %v28292_v29 }
  0x2f   :  { %v28271_v8 = vld [vmem:[%s37809_s0 + $0x10a8] sm:$0xff]   ;;  %22286 = vst [vmem:[%s37810_s1 + $0xf08] sm:$0xff] %v28270_v7  ;;  %22378 = vst [vmem:[%s37810_s1 + $0x25fc] sm:$0xff] %v28293_v30  ;;  %v28295_v32 = vld [vmem:[%s37809_s0 + $0x18fc] sm:$0xff]  }
  0x30   :  { %v28272_v9 = vld [vmem:[%s37809_s0 + $0x888] sm:$0xff]   ;;  %22290 = vst [vmem:[%s37810_s1 + $0x1728] sm:$0xff] %v28271_v8  ;;  %v28296_v33 = vld [vmem:[%s37809_s0 + $0x10dc] sm:$0xff]   ;;  %22382 = vst [vmem:[%s37810_s1 + $0x71c] sm:$0xff] %v28294_v31 }
  0x31   :  { %v28273_v10 = vld [vmem:[%s37809_s0 + $0x68] sm:$0xff]   ;;  %22294 = vst [vmem:[%s37810_s1 + $0x1f48] sm:$0xff] %v28272_v9  ;;  %v28297_v34 = vld [vmem:[%s37809_s0 + $0x8bc] sm:$0xff]   ;;  %22386 = vst [vmem:[%s37810_s1 + $0xf3c] sm:$0xff] %v28295_v32 }
  0x32   :  { %22298 = vst [vmem:[%s37810_s1 + $0x2768] sm:$0xff] %v28273_v10  ;;  %22390 = vst [vmem:[%s37810_s1 + $0x175c] sm:$0xff] %v28296_v33  ;;  %v28298_v35 = vld [vmem:[%s37809_s0 + $0x9c] sm:$0xff]   ;;  %v28299_v36 = vld [vmem:[%s37809_s0 + $0x27d0] sm:$0xff]  }
  0x33   :  { %22394 = vst [vmem:[%s37810_s1 + $0x1f7c] sm:$0xff] %v28297_v34  ;;  %v28300_v37 = vld [vmem:[%s37809_s0 + $0x1fb0] sm:$0xff]   ;;  %22398 = vst [vmem:[%s37810_s1 + $0x279c] sm:$0xff] %v28298_v35  ;;  %v28324_v61 = vld [vmem:[%s37809_s0 + $0x2804] sm:$0xff]  }
  0x34   :  { %22402 = vst [vmem:[%s37810_s1 + $0xd0] sm:$0xff] %v28299_v36  ;;  %v28301_v38 = vld [vmem:[%s37809_s0 + $0x1790] sm:$0xff]   ;;  %22406 = vst [vmem:[%s37810_s1 + $0x8f0] sm:$0xff] %v28300_v37  ;;  %v28325_v62 = vld [vmem:[%s37809_s0 + $0x1fe4] sm:$0xff]  }
  0x35   :  { %v28302_v39 = vld [vmem:[%s37809_s0 + $0xf70] sm:$0xff]   ;;  %22410 = vst [vmem:[%s37810_s1 + $0x1110] sm:$0xff] %v28301_v38  ;;  %v28326_v63 = vld [vmem:[%s37809_s0 + $0x17c4] sm:$0xff]   ;;  %22502 = vst [vmem:[%s37810_s1 + $0x104] sm:$0xff] %v28324_v61 }
  0x36   :  { %v28303_v40 = vld [vmem:[%s37809_s0 + $0x750] sm:$0xff]   ;;  %22414 = vst [vmem:[%s37810_s1 + $0x1930] sm:$0xff] %v28302_v39  ;;  %v28327_v0 = vld [vmem:[%s37809_s0 + $0xfa4] sm:$0xff]   ;;  %22506 = vst [vmem:[%s37810_s1 + $0x924] sm:$0xff] %v28325_v62 }
  0x37   :  { %v28304_v41 = vld [vmem:[%s37809_s0 + $0x2630] sm:$0xff]   ;;  %22418 = vst [vmem:[%s37810_s1 + $0x2150] sm:$0xff] %v28303_v40  ;;  %22510 = vst [vmem:[%s37810_s1 + $0x1144] sm:$0xff] %v28326_v63  ;;  %v28328_v1 = vld [vmem:[%s37809_s0 + $0x784] sm:$0xff]  }
  0x38   :  { %v28305_v42 = vld [vmem:[%s37809_s0 + $0x1e10] sm:$0xff]   ;;  %22422 = vst [vmem:[%s37810_s1 + $0x270] sm:$0xff] %v28304_v41  ;;  %v28329_v2 = vld [vmem:[%s37809_s0 + $0x2664] sm:$0xff]   ;;  %22514 = vst [vmem:[%s37810_s1 + $0x1964] sm:$0xff] %v28327_v0 }
  0x39   :  { %v28306_v43 = vld [vmem:[%s37809_s0 + $0x15f0] sm:$0xff]   ;;  %22426 = vst [vmem:[%s37810_s1 + $0xa90] sm:$0xff] %v28305_v42  ;;  %v28330_v3 = vld [vmem:[%s37809_s0 + $0x1e44] sm:$0xff]   ;;  %22518 = vst [vmem:[%s37810_s1 + $0x2184] sm:$0xff] %v28328_v1 }
  0x3a   :  { %v28307_v44 = vld [vmem:[%s37809_s0 + $0xdd0] sm:$0xff]   ;;  %22430 = vst [vmem:[%s37810_s1 + $0x12b0] sm:$0xff] %v28306_v43  ;;  %22522 = vst [vmem:[%s37810_s1 + $0x2a4] sm:$0xff] %v28329_v2  ;;  %v28331_v4 = vld [vmem:[%s37809_s0 + $0x1624] sm:$0xff]  }
  0x3b   :  { %v28308_v45 = vld [vmem:[%s37809_s0 + $0x5b0] sm:$0xff]   ;;  %22434 = vst [vmem:[%s37810_s1 + $0x1ad0] sm:$0xff] %v28307_v44  ;;  %v28332_v5 = vld [vmem:[%s37809_s0 + $0xe04] sm:$0xff]   ;;  %22526 = vst [vmem:[%s37810_s1 + $0xac4] sm:$0xff] %v28330_v3 }
  0x3c   :  { %v28309_v46 = vld [vmem:[%s37809_s0 + $0x2490] sm:$0xff]   ;;  %22438 = vst [vmem:[%s37810_s1 + $0x22f0] sm:$0xff] %v28308_v45  ;;  %v28333_v6 = vld [vmem:[%s37809_s0 + $0x5e4] sm:$0xff]   ;;  %22530 = vst [vmem:[%s37810_s1 + $0x12e4] sm:$0xff] %v28331_v4 }
  0x3d   :  { %v28310_v47 = vld [vmem:[%s37809_s0 + $0x1c70] sm:$0xff]   ;;  %22442 = vst [vmem:[%s37810_s1 + $0x410] sm:$0xff] %v28309_v46  ;;  %22534 = vst [vmem:[%s37810_s1 + $0x1b04] sm:$0xff] %v28332_v5  ;;  %v28334_v7 = vld [vmem:[%s37809_s0 + $0x24c4] sm:$0xff]  }
  0x3e   :  { %v28311_v48 = vld [vmem:[%s37809_s0 + $0x1450] sm:$0xff]   ;;  %22446 = vst [vmem:[%s37810_s1 + $0xc30] sm:$0xff] %v28310_v47  ;;  %v28335_v8 = vld [vmem:[%s37809_s0 + $0x1ca4] sm:$0xff]   ;;  %22538 = vst [vmem:[%s37810_s1 + $0x2324] sm:$0xff] %v28333_v6 }
  0x3f   :  { %v28312_v49 = vld [vmem:[%s37809_s0 + $0xc30] sm:$0xff]   ;;  %22450 = vst [vmem:[%s37810_s1 + $0x1450] sm:$0xff] %v28311_v48  ;;  %v28336_v9 = vld [vmem:[%s37809_s0 + $0x1484] sm:$0xff]   ;;  %22542 = vst [vmem:[%s37810_s1 + $0x444] sm:$0xff] %v28334_v7 }
  0x40   :  { %v28313_v50 = vld [vmem:[%s37809_s0 + $0x410] sm:$0xff]   ;;  %22454 = vst [vmem:[%s37810_s1 + $0x1c70] sm:$0xff] %v28312_v49  ;;  %22546 = vst [vmem:[%s37810_s1 + $0xc64] sm:$0xff] %v28335_v8  ;;  %v28337_v10 = vld [vmem:[%s37809_s0 + $0xc64] sm:$0xff]  }
  0x41   :  { %v28314_v51 = vld [vmem:[%s37809_s0 + $0x22f0] sm:$0xff]   ;;  %22458 = vst [vmem:[%s37810_s1 + $0x2490] sm:$0xff] %v28313_v50  ;;  %v28338_v11 = vld [vmem:[%s37809_s0 + $0x444] sm:$0xff]   ;;  %22550 = vst [vmem:[%s37810_s1 + $0x1484] sm:$0xff] %v28336_v9 }
  0x42   :  { %v28315_v52 = vld [vmem:[%s37809_s0 + $0x1ad0] sm:$0xff]   ;;  %22462 = vst [vmem:[%s37810_s1 + $0x5b0] sm:$0xff] %v28314_v51  ;;  %v28339_v12 = vld [vmem:[%s37809_s0 + $0x2324] sm:$0xff]   ;;  %22554 = vst [vmem:[%s37810_s1 + $0x1ca4] sm:$0xff] %v28337_v10 }
  0x43   :  { %v28316_v53 = vld [vmem:[%s37809_s0 + $0x12b0] sm:$0xff]   ;;  %22466 = vst [vmem:[%s37810_s1 + $0xdd0] sm:$0xff] %v28315_v52  ;;  %22558 = vst [vmem:[%s37810_s1 + $0x24c4] sm:$0xff] %v28338_v11  ;;  %v28340_v13 = vld [vmem:[%s37809_s0 + $0x1b04] sm:$0xff]  }
  0x44   :  { %v28317_v54 = vld [vmem:[%s37809_s0 + $0xa90] sm:$0xff]   ;;  %22470 = vst [vmem:[%s37810_s1 + $0x15f0] sm:$0xff] %v28316_v53  ;;  %v28341_v14 = vld [vmem:[%s37809_s0 + $0x12e4] sm:$0xff]   ;;  %22562 = vst [vmem:[%s37810_s1 + $0x5e4] sm:$0xff] %v28339_v12 }
  0x45   :  { %v28318_v55 = vld [vmem:[%s37809_s0 + $0x270] sm:$0xff]   ;;  %22474 = vst [vmem:[%s37810_s1 + $0x1e10] sm:$0xff] %v28317_v54  ;;  %v28342_v15 = vld [vmem:[%s37809_s0 + $0xac4] sm:$0xff]   ;;  %22566 = vst [vmem:[%s37810_s1 + $0xe04] sm:$0xff] %v28340_v13 }
  0x46   :  { %v28319_v56 = vld [vmem:[%s37809_s0 + $0x2150] sm:$0xff]   ;;  %22478 = vst [vmem:[%s37810_s1 + $0x2630] sm:$0xff] %v28318_v55  ;;  %22570 = vst [vmem:[%s37810_s1 + $0x1624] sm:$0xff] %v28341_v14  ;;  %v28343_v16 = vld [vmem:[%s37809_s0 + $0x2a4] sm:$0xff]  }
  0x47   :  { %v28320_v57 = vld [vmem:[%s37809_s0 + $0x1930] sm:$0xff]   ;;  %22482 = vst [vmem:[%s37810_s1 + $0x750] sm:$0xff] %v28319_v56  ;;  %v28344_v17 = vld [vmem:[%s37809_s0 + $0x2184] sm:$0xff]   ;;  %22574 = vst [vmem:[%s37810_s1 + $0x1e44] sm:$0xff] %v28342_v15 }
  0x48   :  { %v28321_v58 = vld [vmem:[%s37809_s0 + $0x1110] sm:$0xff]   ;;  %22486 = vst [vmem:[%s37810_s1 + $0xf70] sm:$0xff] %v28320_v57  ;;  %v28345_v18 = vld [vmem:[%s37809_s0 + $0x1964] sm:$0xff]   ;;  %22578 = vst [vmem:[%s37810_s1 + $0x2664] sm:$0xff] %v28343_v16 }
  0x49   :  { %v28322_v59 = vld [vmem:[%s37809_s0 + $0x8f0] sm:$0xff]   ;;  %22490 = vst [vmem:[%s37810_s1 + $0x1790] sm:$0xff] %v28321_v58  ;;  %22582 = vst [vmem:[%s37810_s1 + $0x784] sm:$0xff] %v28344_v17  ;;  %v28346_v19 = vld [vmem:[%s37809_s0 + $0x1144] sm:$0xff]  }
  0x4a   :  { %v28323_v60 = vld [vmem:[%s37809_s0 + $0xd0] sm:$0xff]   ;;  %22494 = vst [vmem:[%s37810_s1 + $0x1fb0] sm:$0xff] %v28322_v59  ;;  %v28347_v20 = vld [vmem:[%s37809_s0 + $0x924] sm:$0xff]   ;;  %22586 = vst [vmem:[%s37810_s1 + $0xfa4] sm:$0xff] %v28345_v18 }
  0x4b   :  { %22498 = vst [vmem:[%s37810_s1 + $0x27d0] sm:$0xff] %v28323_v60  ;;  %v28348_v21 = vld [vmem:[%s37809_s0 + $0x104] sm:$0xff]   ;;  %22590 = vst [vmem:[%s37810_s1 + $0x17c4] sm:$0xff] %v28346_v19  ;;  %v28349_v22 = vld [vmem:[%s37809_s0 + $0x2838] sm:$0xff]  }
  0x4c   :  { %22594 = vst [vmem:[%s37810_s1 + $0x1fe4] sm:$0xff] %v28347_v20  ;;  %v28350_v23 = vld [vmem:[%s37809_s0 + $0x2018] sm:$0xff]   ;;  %22598 = vst [vmem:[%s37810_s1 + $0x2804] sm:$0xff] %v28348_v21  ;;  %v28374_v47 = vld [vmem:[%s37809_s0 + $0x286c] sm:$0xff]  }
  0x4d   :  { %v28351_v24 = vld [vmem:[%s37809_s0 + $0x17f8] sm:$0xff]   ;;  %22602 = vst [vmem:[%s37810_s1 + $0x138] sm:$0xff] %v28349_v22  ;;  %22606 = vst [vmem:[%s37810_s1 + $0x958] sm:$0xff] %v28350_v23  ;;  %v28375_v48 = vld [vmem:[%s37809_s0 + $0x204c] sm:$0xff]  }
  0x4e   :  { %v28352_v25 = vld [vmem:[%s37809_s0 + $0xfd8] sm:$0xff]   ;;  %22610 = vst [vmem:[%s37810_s1 + $0x1178] sm:$0xff] %v28351_v24  ;;  %22702 = vst [vmem:[%s37810_s1 + $0x16c] sm:$0xff] %v28374_v47  ;;  %v28376_v49 = vld [vmem:[%s37809_s0 + $0x182c] sm:$0xff]  }
  0x4f   :  { %v28353_v26 = vld [vmem:[%s37809_s0 + $0x7b8] sm:$0xff]   ;;  %22614 = vst [vmem:[%s37810_s1 + $0x1998] sm:$0xff] %v28352_v25  ;;  %v28377_v50 = vld [vmem:[%s37809_s0 + $0x100c] sm:$0xff]   ;;  %22706 = vst [vmem:[%s37810_s1 + $0x98c] sm:$0xff] %v28375_v48 }
  0x50   :  { %v28354_v27 = vld [vmem:[%s37809_s0 + $0x2698] sm:$0xff]   ;;  %22618 = vst [vmem:[%s37810_s1 + $0x21b8] sm:$0xff] %v28353_v26  ;;  %v28378_v51 = vld [vmem:[%s37809_s0 + $0x7ec] sm:$0xff]   ;;  %22710 = vst [vmem:[%s37810_s1 + $0x11ac] sm:$0xff] %v28376_v49 }
  0x51   :  { %v28355_v28 = vld [vmem:[%s37809_s0 + $0x1e78] sm:$0xff]   ;;  %22622 = vst [vmem:[%s37810_s1 + $0x2d8] sm:$0xff] %v28354_v27  ;;  %22714 = vst [vmem:[%s37810_s1 + $0x19cc] sm:$0xff] %v28377_v50  ;;  %v28379_v52 = vld [vmem:[%s37809_s0 + $0x26cc] sm:$0xff]  }
  0x52   :  { %v28356_v29 = vld [vmem:[%s37809_s0 + $0x1658] sm:$0xff]   ;;  %22626 = vst [vmem:[%s37810_s1 + $0xaf8] sm:$0xff] %v28355_v28  ;;  %v28380_v53 = vld [vmem:[%s37809_s0 + $0x1eac] sm:$0xff]   ;;  %22718 = vst [vmem:[%s37810_s1 + $0x21ec] sm:$0xff] %v28378_v51 }
  0x53   :  { %v28357_v30 = vld [vmem:[%s37809_s0 + $0xe38] sm:$0xff]   ;;  %22630 = vst [vmem:[%s37810_s1 + $0x1318] sm:$0xff] %v28356_v29  ;;  %v28381_v54 = vld [vmem:[%s37809_s0 + $0x168c] sm:$0xff]   ;;  %22722 = vst [vmem:[%s37810_s1 + $0x30c] sm:$0xff] %v28379_v52 }
  0x54   :  { %v28358_v31 = vld [vmem:[%s37809_s0 + $0x618] sm:$0xff]   ;;  %22634 = vst [vmem:[%s37810_s1 + $0x1b38] sm:$0xff] %v28357_v30  ;;  %22726 = vst [vmem:[%s37810_s1 + $0xb2c] sm:$0xff] %v28380_v53  ;;  %v28382_v55 = vld [vmem:[%s37809_s0 + $0xe6c] sm:$0xff]  }
  0x55   :  { %v28359_v32 = vld [vmem:[%s37809_s0 + $0x24f8] sm:$0xff]   ;;  %22638 = vst [vmem:[%s37810_s1 + $0x2358] sm:$0xff] %v28358_v31  ;;  %v28383_v56 = vld [vmem:[%s37809_s0 + $0x64c] sm:$0xff]   ;;  %22730 = vst [vmem:[%s37810_s1 + $0x134c] sm:$0xff] %v28381_v54 }
  0x56   :  { %v28360_v33 = vld [vmem:[%s37809_s0 + $0x1cd8] sm:$0xff]   ;;  %22642 = vst [vmem:[%s37810_s1 + $0x478] sm:$0xff] %v28359_v32  ;;  %v28384_v57 = vld [vmem:[%s37809_s0 + $0x252c] sm:$0xff]   ;;  %22734 = vst [vmem:[%s37810_s1 + $0x1b6c] sm:$0xff] %v28382_v55 }
  0x57   :  { %v28361_v34 = vld [vmem:[%s37809_s0 + $0x14b8] sm:$0xff]   ;;  %22646 = vst [vmem:[%s37810_s1 + $0xc98] sm:$0xff] %v28360_v33  ;;  %22738 = vst [vmem:[%s37810_s1 + $0x238c] sm:$0xff] %v28383_v56  ;;  %v28385_v58 = vld [vmem:[%s37809_s0 + $0x1d0c] sm:$0xff]  }
  0x58   :  { %v28362_v35 = vld [vmem:[%s37809_s0 + $0xc98] sm:$0xff]   ;;  %22650 = vst [vmem:[%s37810_s1 + $0x14b8] sm:$0xff] %v28361_v34  ;;  %v28386_v59 = vld [vmem:[%s37809_s0 + $0x14ec] sm:$0xff]   ;;  %22742 = vst [vmem:[%s37810_s1 + $0x4ac] sm:$0xff] %v28384_v57 }
  0x59   :  { %v28363_v36 = vld [vmem:[%s37809_s0 + $0x478] sm:$0xff]   ;;  %22654 = vst [vmem:[%s37810_s1 + $0x1cd8] sm:$0xff] %v28362_v35  ;;  %v28387_v60 = vld [vmem:[%s37809_s0 + $0xccc] sm:$0xff]   ;;  %22746 = vst [vmem:[%s37810_s1 + $0xccc] sm:$0xff] %v28385_v58 }
  0x5a   :  { %v28364_v37 = vld [vmem:[%s37809_s0 + $0x2358] sm:$0xff]   ;;  %22658 = vst [vmem:[%s37810_s1 + $0x24f8] sm:$0xff] %v28363_v36  ;;  %22750 = vst [vmem:[%s37810_s1 + $0x14ec] sm:$0xff] %v28386_v59  ;;  %v28388_v61 = vld [vmem:[%s37809_s0 + $0x4ac] sm:$0xff]  }
  0x5b   :  { %v28365_v38 = vld [vmem:[%s37809_s0 + $0x1b38] sm:$0xff]   ;;  %22662 = vst [vmem:[%s37810_s1 + $0x618] sm:$0xff] %v28364_v37  ;;  %v28389_v62 = vld [vmem:[%s37809_s0 + $0x238c] sm:$0xff]   ;;  %22754 = vst [vmem:[%s37810_s1 + $0x1d0c] sm:$0xff] %v28387_v60 }
  0x5c   :  { %v28366_v39 = vld [vmem:[%s37809_s0 + $0x1318] sm:$0xff]   ;;  %22666 = vst [vmem:[%s37810_s1 + $0xe38] sm:$0xff] %v28365_v38  ;;  %v28390_v63 = vld [vmem:[%s37809_s0 + $0x1b6c] sm:$0xff]   ;;  %22758 = vst [vmem:[%s37810_s1 + $0x252c] sm:$0xff] %v28388_v61 }
  0x5d   :  { %v28367_v40 = vld [vmem:[%s37809_s0 + $0xaf8] sm:$0xff]   ;;  %22670 = vst [vmem:[%s37810_s1 + $0x1658] sm:$0xff] %v28366_v39  ;;  %22762 = vst [vmem:[%s37810_s1 + $0x64c] sm:$0xff] %v28389_v62  ;;  %v28391_v0 = vld [vmem:[%s37809_s0 + $0x134c] sm:$0xff]  }
  0x5e   :  { %v28368_v41 = vld [vmem:[%s37809_s0 + $0x2d8] sm:$0xff]   ;;  %22674 = vst [vmem:[%s37810_s1 + $0x1e78] sm:$0xff] %v28367_v40  ;;  %v28392_v1 = vld [vmem:[%s37809_s0 + $0xb2c] sm:$0xff]   ;;  %22766 = vst [vmem:[%s37810_s1 + $0xe6c] sm:$0xff] %v28390_v63 }
  0x5f   :  { %v28369_v42 = vld [vmem:[%s37809_s0 + $0x21b8] sm:$0xff]   ;;  %22678 = vst [vmem:[%s37810_s1 + $0x2698] sm:$0xff] %v28368_v41  ;;  %v28393_v2 = vld [vmem:[%s37809_s0 + $0x30c] sm:$0xff]   ;;  %22770 = vst [vmem:[%s37810_s1 + $0x168c] sm:$0xff] %v28391_v0 }
  0x60   :  { %v28370_v43 = vld [vmem:[%s37809_s0 + $0x1998] sm:$0xff]   ;;  %22682 = vst [vmem:[%s37810_s1 + $0x7b8] sm:$0xff] %v28369_v42  ;;  %22774 = vst [vmem:[%s37810_s1 + $0x1eac] sm:$0xff] %v28392_v1  ;;  %v28394_v3 = vld [vmem:[%s37809_s0 + $0x21ec] sm:$0xff]  }
  0x61   :  { %v28371_v44 = vld [vmem:[%s37809_s0 + $0x1178] sm:$0xff]   ;;  %22686 = vst [vmem:[%s37810_s1 + $0xfd8] sm:$0xff] %v28370_v43  ;;  %v28395_v4 = vld [vmem:[%s37809_s0 + $0x19cc] sm:$0xff]   ;;  %22778 = vst [vmem:[%s37810_s1 + $0x26cc] sm:$0xff] %v28393_v2 }
  0x62   :  { %v28372_v45 = vld [vmem:[%s37809_s0 + $0x958] sm:$0xff]   ;;  %22690 = vst [vmem:[%s37810_s1 + $0x17f8] sm:$0xff] %v28371_v44  ;;  %v28396_v5 = vld [vmem:[%s37809_s0 + $0x11ac] sm:$0xff]   ;;  %22782 = vst [vmem:[%s37810_s1 + $0x7ec] sm:$0xff] %v28394_v3 }
  0x63   :  { %v28373_v46 = vld [vmem:[%s37809_s0 + $0x138] sm:$0xff]   ;;  %22694 = vst [vmem:[%s37810_s1 + $0x2018] sm:$0xff] %v28372_v45  ;;  %22786 = vst [vmem:[%s37810_s1 + $0x100c] sm:$0xff] %v28395_v4  ;;  %v28397_v6 = vld [vmem:[%s37809_s0 + $0x98c] sm:$0xff]  }
  0x64   :  { %22698 = vst [vmem:[%s37810_s1 + $0x2838] sm:$0xff] %v28373_v46  ;;  %v28398_v7 = vld [vmem:[%s37809_s0 + $0x16c] sm:$0xff]   ;;  %22790 = vst [vmem:[%s37810_s1 + $0x182c] sm:$0xff] %v28396_v5  ;;  %v28424_v33 = vld [vmem:[%s37809_s0 + $0x273c] sm:$0xff]  }
  0x65   :  { %22794 = vst [vmem:[%s37810_s1 + $0x204c] sm:$0xff] %v28397_v6  ;;  %22798 = vst [vmem:[%s37810_s1 + $0x286c] sm:$0xff] %v28398_v7  ;;  %v28399_v8 = vld [vmem:[%s37809_s0 + $0x2708] sm:$0xff]   ;;  %v28425_v34 = vld [vmem:[%s37809_s0 + $0x1f1c] sm:$0xff]  }
  0x66   :  { %v28400_v9 = vld [vmem:[%s37809_s0 + $0x1ee8] sm:$0xff]   ;;  %23002 = vst [vmem:[%s37810_s1 + $0x8] sm:$0xff] %v28399_v8  ;;  %23102 = vst [vmem:[%s37810_s1 + $0x3c] sm:$0xff] %v28424_v33  ;;  %v28426_v35 = vld [vmem:[%s37809_s0 + $0x16fc] sm:$0xff]  }
  0x67   :  { %v28401_v10 = vld [vmem:[%s37809_s0 + $0x16c8] sm:$0xff]   ;;  %23006 = vst [vmem:[%s37810_s1 + $0x828] sm:$0xff] %v28400_v9  ;;  %v28427_v36 = vld [vmem:[%s37809_s0 + $0xedc] sm:$0xff]   ;;  %23106 = vst [vmem:[%s37810_s1 + $0x85c] sm:$0xff] %v28425_v34 }
  0x68   :  { %v28402_v11 = vld [vmem:[%s37809_s0 + $0xea8] sm:$0xff]   ;;  %23010 = vst [vmem:[%s37810_s1 + $0x1048] sm:$0xff] %v28401_v10  ;;  %v28428_v37 = vld [vmem:[%s37809_s0 + $0x6bc] sm:$0xff]   ;;  %23110 = vst [vmem:[%s37810_s1 + $0x107c] sm:$0xff] %v28426_v35 }
  0x69   :  { %v28403_v12 = vld [vmem:[%s37809_s0 + $0x688] sm:$0xff]   ;;  %23014 = vst [vmem:[%s37810_s1 + $0x1868] sm:$0xff] %v28402_v11  ;;  %23114 = vst [vmem:[%s37810_s1 + $0x189c] sm:$0xff] %v28427_v36  ;;  %v28429_v38 = vld [vmem:[%s37809_s0 + $0x259c] sm:$0xff]  }
  0x6a   :  { %v28404_v13 = vld [vmem:[%s37809_s0 + $0x2568] sm:$0xff]   ;;  %23018 = vst [vmem:[%s37810_s1 + $0x2088] sm:$0xff] %v28403_v12  ;;  %v28430_v39 = vld [vmem:[%s37809_s0 + $0x1d7c] sm:$0xff]   ;;  %23118 = vst [vmem:[%s37810_s1 + $0x20bc] sm:$0xff] %v28428_v37 }
  0x6b   :  { %v28405_v14 = vld [vmem:[%s37809_s0 + $0x1d48] sm:$0xff]   ;;  %23022 = vst [vmem:[%s37810_s1 + $0x1a8] sm:$0xff] %v28404_v13  ;;  %v28431_v40 = vld [vmem:[%s37809_s0 + $0x155c] sm:$0xff]   ;;  %23122 = vst [vmem:[%s37810_s1 + $0x1dc] sm:$0xff] %v28429_v38 }
  0x6c   :  { %v28406_v15 = vld [vmem:[%s37809_s0 + $0x1528] sm:$0xff]   ;;  %23026 = vst [vmem:[%s37810_s1 + $0x9c8] sm:$0xff] %v28405_v14  ;;  %23126 = vst [vmem:[%s37810_s1 + $0x9fc] sm:$0xff] %v28430_v39  ;;  %v28432_v41 = vld [vmem:[%s37809_s0 + $0xd3c] sm:$0xff]  }
  0x6d   :  { %v28407_v16 = vld [vmem:[%s37809_s0 + $0xd08] sm:$0xff]   ;;  %23030 = vst [vmem:[%s37810_s1 + $0x11e8] sm:$0xff] %v28406_v15  ;;  %v28433_v42 = vld [vmem:[%s37809_s0 + $0x51c] sm:$0xff]   ;;  %23130 = vst [vmem:[%s37810_s1 + $0x121c] sm:$0xff] %v28431_v40 }
  0x6e   :  { %v28408_v17 = vld [vmem:[%s37809_s0 + $0x4e8] sm:$0xff]   ;;  %23034 = vst [vmem:[%s37810_s1 + $0x1a08] sm:$0xff] %v28407_v16  ;;  %v28434_v43 = vld [vmem:[%s37809_s0 + $0x23fc] sm:$0xff]   ;;  %23134 = vst [vmem:[%s37810_s1 + $0x1a3c] sm:$0xff] %v28432_v41 }
  0x6f   :  { %v28409_v18 = vld [vmem:[%s37809_s0 + $0x23c8] sm:$0xff]   ;;  %23038 = vst [vmem:[%s37810_s1 + $0x2228] sm:$0xff] %v28408_v17  ;;  %23138 = vst [vmem:[%s37810_s1 + $0x225c] sm:$0xff] %v28433_v42  ;;  %v28435_v44 = vld [vmem:[%s37809_s0 + $0x1bdc] sm:$0xff]  }
  0x70   :  { %v28410_v19 = vld [vmem:[%s37809_s0 + $0x1ba8] sm:$0xff]   ;;  %23042 = vst [vmem:[%s37810_s1 + $0x348] sm:$0xff] %v28409_v18  ;;  %v28436_v45 = vld [vmem:[%s37809_s0 + $0x13bc] sm:$0xff]   ;;  %23142 = vst [vmem:[%s37810_s1 + $0x37c] sm:$0xff] %v28434_v43 }
  0x71   :  { %v28411_v20 = vld [vmem:[%s37809_s0 + $0x1388] sm:$0xff]   ;;  %23046 = vst [vmem:[%s37810_s1 + $0xb68] sm:$0xff] %v28410_v19  ;;  %v28437_v46 = vld [vmem:[%s37809_s0 + $0xb9c] sm:$0xff]   ;;  %23146 = vst [vmem:[%s37810_s1 + $0xb9c] sm:$0xff] %v28435_v44 }
  0x72   :  { %v28412_v21 = vld [vmem:[%s37809_s0 + $0xb68] sm:$0xff]   ;;  %23050 = vst [vmem:[%s37810_s1 + $0x1388] sm:$0xff] %v28411_v20  ;;  %23150 = vst [vmem:[%s37810_s1 + $0x13bc] sm:$0xff] %v28436_v45  ;;  %v28438_v47 = vld [vmem:[%s37809_s0 + $0x37c] sm:$0xff]  }
  0x73   :  { %v28413_v22 = vld [vmem:[%s37809_s0 + $0x348] sm:$0xff]   ;;  %23054 = vst [vmem:[%s37810_s1 + $0x1ba8] sm:$0xff] %v28412_v21  ;;  %v28439_v48 = vld [vmem:[%s37809_s0 + $0x225c] sm:$0xff]   ;;  %23154 = vst [vmem:[%s37810_s1 + $0x1bdc] sm:$0xff] %v28437_v46 }
  0x74   :  { %v28414_v23 = vld [vmem:[%s37809_s0 + $0x2228] sm:$0xff]   ;;  %23058 = vst [vmem:[%s37810_s1 + $0x23c8] sm:$0xff] %v28413_v22  ;;  %v28440_v49 = vld [vmem:[%s37809_s0 + $0x1a3c] sm:$0xff]   ;;  %23158 = vst [vmem:[%s37810_s1 + $0x23fc] sm:$0xff] %v28438_v47 }
  0x75   :  { %v28415_v24 = vld [vmem:[%s37809_s0 + $0x1a08] sm:$0xff]   ;;  %23062 = vst [vmem:[%s37810_s1 + $0x4e8] sm:$0xff] %v28414_v23  ;;  %23162 = vst [vmem:[%s37810_s1 + $0x51c] sm:$0xff] %v28439_v48  ;;  %v28441_v50 = vld [vmem:[%s37809_s0 + $0x121c] sm:$0xff]  }
  0x76   :  { %v28416_v25 = vld [vmem:[%s37809_s0 + $0x11e8] sm:$0xff]   ;;  %23066 = vst [vmem:[%s37810_s1 + $0xd08] sm:$0xff] %v28415_v24  ;;  %v28442_v51 = vld [vmem:[%s37809_s0 + $0x9fc] sm:$0xff]   ;;  %23166 = vst [vmem:[%s37810_s1 + $0xd3c] sm:$0xff] %v28440_v49 }
  0x77   :  { %v28417_v26 = vld [vmem:[%s37809_s0 + $0x9c8] sm:$0xff]   ;;  %23070 = vst [vmem:[%s37810_s1 + $0x1528] sm:$0xff] %v28416_v25  ;;  %v28443_v52 = vld [vmem:[%s37809_s0 + $0x1dc] sm:$0xff]   ;;  %23170 = vst [vmem:[%s37810_s1 + $0x155c] sm:$0xff] %v28441_v50 }
  0x78   :  { %v28418_v27 = vld [vmem:[%s37809_s0 + $0x1a8] sm:$0xff]   ;;  %23074 = vst [vmem:[%s37810_s1 + $0x1d48] sm:$0xff] %v28417_v26  ;;  %23174 = vst [vmem:[%s37810_s1 + $0x1d7c] sm:$0xff] %v28442_v51  ;;  %v28444_v53 = vld [vmem:[%s37809_s0 + $0x20bc] sm:$0xff]  }
  0x79   :  { %v28419_v28 = vld [vmem:[%s37809_s0 + $0x2088] sm:$0xff]   ;;  %23078 = vst [vmem:[%s37810_s1 + $0x2568] sm:$0xff] %v28418_v27  ;;  %v28445_v54 = vld [vmem:[%s37809_s0 + $0x189c] sm:$0xff]   ;;  %23178 = vst [vmem:[%s37810_s1 + $0x259c] sm:$0xff] %v28443_v52 }
  0x7a   :  { %v28420_v29 = vld [vmem:[%s37809_s0 + $0x1868] sm:$0xff]   ;;  %23082 = vst [vmem:[%s37810_s1 + $0x688] sm:$0xff] %v28419_v28  ;;  %v28446_v55 = vld [vmem:[%s37809_s0 + $0x107c] sm:$0xff]   ;;  %23182 = vst [vmem:[%s37810_s1 + $0x6bc] sm:$0xff] %v28444_v53 }
  0x7b   :  { %v28421_v30 = vld [vmem:[%s37809_s0 + $0x1048] sm:$0xff]   ;;  %23086 = vst [vmem:[%s37810_s1 + $0xea8] sm:$0xff] %v28420_v29  ;;  %23186 = vst [vmem:[%s37810_s1 + $0xedc] sm:$0xff] %v28445_v54  ;;  %v28447_v56 = vld [vmem:[%s37809_s0 + $0x85c] sm:$0xff]  }
  0x7c   :  { %v28422_v31 = vld [vmem:[%s37809_s0 + $0x828] sm:$0xff]   ;;  %23090 = vst [vmem:[%s37810_s1 + $0x16c8] sm:$0xff] %v28421_v30  ;;  %v28448_v57 = vld [vmem:[%s37809_s0 + $0x3c] sm:$0xff]   ;;  %23190 = vst [vmem:[%s37810_s1 + $0x16fc] sm:$0xff] %v28446_v55 }
  0x7d   :  { %v28423_v32 = vld [vmem:[%s37809_s0 + $0x8] sm:$0xff]   ;;  %23094 = vst [vmem:[%s37810_s1 + $0x1ee8] sm:$0xff] %v28422_v31  ;;  %v28449_v58 = vld [vmem:[%s37809_s0 + $0x2770] sm:$0xff]   ;;  %23194 = vst [vmem:[%s37810_s1 + $0x1f1c] sm:$0xff] %v28447_v56 }
  0x7e   :  { %23098 = vst [vmem:[%s37810_s1 + $0x2708] sm:$0xff] %v28423_v32  ;;  %23198 = vst [vmem:[%s37810_s1 + $0x273c] sm:$0xff] %v28448_v57  ;;  %v28450_v59 = vld [vmem:[%s37809_s0 + $0x1f50] sm:$0xff]   ;;  %v28474_v19 = vld [vmem:[%s37809_s0 + $0x27a4] sm:$0xff]  }
  0x7f   :  { %v28451_v60 = vld [vmem:[%s37809_s0 + $0x1730] sm:$0xff]   ;;  %23202 = vst [vmem:[%s37810_s1 + $0x70] sm:$0xff] %v28449_v58  ;;  %23206 = vst [vmem:[%s37810_s1 + $0x890] sm:$0xff] %v28450_v59  ;;  %v28475_v20 = vld [vmem:[%s37809_s0 + $0x1f84] sm:$0xff]  }
  0x80   :  { %v28452_v61 = vld [vmem:[%s37809_s0 + $0xf10] sm:$0xff]   ;;  %23210 = vst [vmem:[%s37810_s1 + $0x10b0] sm:$0xff] %v28451_v60  ;;  %v28476_v21 = vld [vmem:[%s37809_s0 + $0x1764] sm:$0xff]   ;;  %23302 = vst [vmem:[%s37810_s1 + $0xa4] sm:$0xff] %v28474_v19 }
  0x81   :  { %v28453_v62 = vld [vmem:[%s37809_s0 + $0x6f0] sm:$0xff]   ;;  %23214 = vst [vmem:[%s37810_s1 + $0x18d0] sm:$0xff] %v28452_v61  ;;  %23306 = vst [vmem:[%s37810_s1 + $0x8c4] sm:$0xff] %v28475_v20  ;;  %v28477_v22 = vld [vmem:[%s37809_s0 + $0xf44] sm:$0xff]  }
  0x82   :  { %v28454_v63 = vld [vmem:[%s37809_s0 + $0x25d0] sm:$0xff]   ;;  %23218 = vst [vmem:[%s37810_s1 + $0x20f0] sm:$0xff] %v28453_v62  ;;  %v28478_v23 = vld [vmem:[%s37809_s0 + $0x724] sm:$0xff]   ;;  %23310 = vst [vmem:[%s37810_s1 + $0x10e4] sm:$0xff] %v28476_v21 }
  0x83   :  { %v28455_v0 = vld [vmem:[%s37809_s0 + $0x1db0] sm:$0xff]   ;;  %23222 = vst [vmem:[%s37810_s1 + $0x210] sm:$0xff] %v28454_v63  ;;  %v28479_v24 = vld [vmem:[%s37809_s0 + $0x2604] sm:$0xff]   ;;  %23314 = vst [vmem:[%s37810_s1 + $0x1904] sm:$0xff] %v28477_v22 }
  0x84   :  { %v28456_v1 = vld [vmem:[%s37809_s0 + $0x1590] sm:$0xff]   ;;  %23226 = vst [vmem:[%s37810_s1 + $0xa30] sm:$0xff] %v28455_v0  ;;  %23318 = vst [vmem:[%s37810_s1 + $0x2124] sm:$0xff] %v28478_v23  ;;  %v28480_v25 = vld [vmem:[%s37809_s0 + $0x1de4] sm:$0xff]  }
  0x85   :  { %v28457_v2 = vld [vmem:[%s37809_s0 + $0xd70] sm:$0xff]   ;;  %23230 = vst [vmem:[%s37810_s1 + $0x1250] sm:$0xff] %v28456_v1  ;;  %v28481_v26 = vld [vmem:[%s37809_s0 + $0x15c4] sm:$0xff]   ;;  %23322 = vst [vmem:[%s37810_s1 + $0x244] sm:$0xff] %v28479_v24 }
  0x86   :  { %v28458_v3 = vld [vmem:[%s37809_s0 + $0x550] sm:$0xff]   ;;  %23234 = vst [vmem:[%s37810_s1 + $0x1a70] sm:$0xff] %v28457_v2  ;;  %v28482_v27 = vld [vmem:[%s37809_s0 + $0xda4] sm:$0xff]   ;;  %23326 = vst [vmem:[%s37810_s1 + $0xa64] sm:$0xff] %v28480_v25 }
  0x87   :  { %v28459_v4 = vld [vmem:[%s37809_s0 + $0x2430] sm:$0xff]   ;;  %23238 = vst [vmem:[%s37810_s1 + $0x2290] sm:$0xff] %v28458_v3  ;;  %23330 = vst [vmem:[%s37810_s1 + $0x1284] sm:$0xff] %v28481_v26  ;;  %v28483_v28 = vld [vmem:[%s37809_s0 + $0x584] sm:$0xff]  }
  0x88   :  { %v28460_v5 = vld [vmem:[%s37809_s0 + $0x1c10] sm:$0xff]   ;;  %23242 = vst [vmem:[%s37810_s1 + $0x3b0] sm:$0xff] %v28459_v4  ;;  %v28484_v29 = vld [vmem:[%s37809_s0 + $0x2464] sm:$0xff]   ;;  %23334 = vst [vmem:[%s37810_s1 + $0x1aa4] sm:$0xff] %v28482_v27 }
  0x89   :  { %v28461_v6 = vld [vmem:[%s37809_s0 + $0x13f0] sm:$0xff]   ;;  %23246 = vst [vmem:[%s37810_s1 + $0xbd0] sm:$0xff] %v28460_v5  ;;  %v28485_v30 = vld [vmem:[%s37809_s0 + $0x1c44] sm:$0xff]   ;;  %23338 = vst [vmem:[%s37810_s1 + $0x22c4] sm:$0xff] %v28483_v28 }
  0x8a   :  { %v28462_v7 = vld [vmem:[%s37809_s0 + $0xbd0] sm:$0xff]   ;;  %23250 = vst [vmem:[%s37810_s1 + $0x13f0] sm:$0xff] %v28461_v6  ;;  %23342 = vst [vmem:[%s37810_s1 + $0x3e4] sm:$0xff] %v28484_v29  ;;  %v28486_v31 = vld [vmem:[%s37809_s0 + $0x1424] sm:$0xff]  }
  0x8b   :  { %v28463_v8 = vld [vmem:[%s37809_s0 + $0x3b0] sm:$0xff]   ;;  %23254 = vst [vmem:[%s37810_s1 + $0x1c10] sm:$0xff] %v28462_v7  ;;  %v28487_v32 = vld [vmem:[%s37809_s0 + $0xc04] sm:$0xff]   ;;  %23346 = vst [vmem:[%s37810_s1 + $0xc04] sm:$0xff] %v28485_v30 }
  0x8c   :  { %v28464_v9 = vld [vmem:[%s37809_s0 + $0x2290] sm:$0xff]   ;;  %23258 = vst [vmem:[%s37810_s1 + $0x2430] sm:$0xff] %v28463_v8  ;;  %v28488_v33 = vld [vmem:[%s37809_s0 + $0x3e4] sm:$0xff]   ;;  %23350 = vst [vmem:[%s37810_s1 + $0x1424] sm:$0xff] %v28486_v31 }
  0x8d   :  { %v28465_v10 = vld [vmem:[%s37809_s0 + $0x1a70] sm:$0xff]   ;;  %23262 = vst [vmem:[%s37810_s1 + $0x550] sm:$0xff] %v28464_v9  ;;  %23354 = vst [vmem:[%s37810_s1 + $0x1c44] sm:$0xff] %v28487_v32  ;;  %v28489_v34 = vld [vmem:[%s37809_s0 + $0x22c4] sm:$0xff]  }
  0x8e   :  { %v28466_v11 = vld [vmem:[%s37809_s0 + $0x1250] sm:$0xff]   ;;  %23266 = vst [vmem:[%s37810_s1 + $0xd70] sm:$0xff] %v28465_v10  ;;  %v28490_v35 = vld [vmem:[%s37809_s0 + $0x1aa4] sm:$0xff]   ;;  %23358 = vst [vmem:[%s37810_s1 + $0x2464] sm:$0xff] %v28488_v33 }
  0x8f   :  { %v28467_v12 = vld [vmem:[%s37809_s0 + $0xa30] sm:$0xff]   ;;  %23270 = vst [vmem:[%s37810_s1 + $0x1590] sm:$0xff] %v28466_v11  ;;  %v28491_v36 = vld [vmem:[%s37809_s0 + $0x1284] sm:$0xff]   ;;  %23362 = vst [vmem:[%s37810_s1 + $0x584] sm:$0xff] %v28489_v34 }
  0x90   :  { %v28468_v13 = vld [vmem:[%s37809_s0 + $0x210] sm:$0xff]   ;;  %23274 = vst [vmem:[%s37810_s1 + $0x1db0] sm:$0xff] %v28467_v12  ;;  %23366 = vst [vmem:[%s37810_s1 + $0xda4] sm:$0xff] %v28490_v35  ;;  %v28492_v37 = vld [vmem:[%s37809_s0 + $0xa64] sm:$0xff]  }
  0x91   :  { %v28469_v14 = vld [vmem:[%s37809_s0 + $0x20f0] sm:$0xff]   ;;  %23278 = vst [vmem:[%s37810_s1 + $0x25d0] sm:$0xff] %v28468_v13  ;;  %v28493_v38 = vld [vmem:[%s37809_s0 + $0x244] sm:$0xff]   ;;  %23370 = vst [vmem:[%s37810_s1 + $0x15c4] sm:$0xff] %v28491_v36 }
  0x92   :  { %v28470_v15 = vld [vmem:[%s37809_s0 + $0x18d0] sm:$0xff]   ;;  %23282 = vst [vmem:[%s37810_s1 + $0x6f0] sm:$0xff] %v28469_v14  ;;  %v28494_v39 = vld [vmem:[%s37809_s0 + $0x2124] sm:$0xff]   ;;  %23374 = vst [vmem:[%s37810_s1 + $0x1de4] sm:$0xff] %v28492_v37 }
  0x93   :  { %v28471_v16 = vld [vmem:[%s37809_s0 + $0x10b0] sm:$0xff]   ;;  %23286 = vst [vmem:[%s37810_s1 + $0xf10] sm:$0xff] %v28470_v15  ;;  %23378 = vst [vmem:[%s37810_s1 + $0x2604] sm:$0xff] %v28493_v38  ;;  %v28495_v40 = vld [vmem:[%s37809_s0 + $0x1904] sm:$0xff]  }
  0x94   :  { %v28472_v17 = vld [vmem:[%s37809_s0 + $0x890] sm:$0xff]   ;;  %23290 = vst [vmem:[%s37810_s1 + $0x1730] sm:$0xff] %v28471_v16  ;;  %v28496_v41 = vld [vmem:[%s37809_s0 + $0x10e4] sm:$0xff]   ;;  %23382 = vst [vmem:[%s37810_s1 + $0x724] sm:$0xff] %v28494_v39 }
  0x95   :  { %v28473_v18 = vld [vmem:[%s37809_s0 + $0x70] sm:$0xff]   ;;  %23294 = vst [vmem:[%s37810_s1 + $0x1f50] sm:$0xff] %v28472_v17  ;;  %v28497_v42 = vld [vmem:[%s37809_s0 + $0x8c4] sm:$0xff]   ;;  %23386 = vst [vmem:[%s37810_s1 + $0xf44] sm:$0xff] %v28495_v40 }
  0x96   :  { %23298 = vst [vmem:[%s37810_s1 + $0x2770] sm:$0xff] %v28473_v18  ;;  %23390 = vst [vmem:[%s37810_s1 + $0x1764] sm:$0xff] %v28496_v41  ;;  %v28498_v43 = vld [vmem:[%s37809_s0 + $0xa4] sm:$0xff]   ;;  %v28499_v44 = vld [vmem:[%s37809_s0 + $0x27d8] sm:$0xff]  }
  0x97   :  { %23394 = vst [vmem:[%s37810_s1 + $0x1f84] sm:$0xff] %v28497_v42  ;;  %v28500_v45 = vld [vmem:[%s37809_s0 + $0x1fb8] sm:$0xff]   ;;  %23398 = vst [vmem:[%s37810_s1 + $0x27a4] sm:$0xff] %v28498_v43  ;;  %v28524_v5 = vld [vmem:[%s37809_s0 + $0x280c] sm:$0xff]  }
  0x98   :  { %23402 = vst [vmem:[%s37810_s1 + $0xd8] sm:$0xff] %v28499_v44  ;;  %v28501_v46 = vld [vmem:[%s37809_s0 + $0x1798] sm:$0xff]   ;;  %23406 = vst [vmem:[%s37810_s1 + $0x8f8] sm:$0xff] %v28500_v45  ;;  %v28525_v6 = vld [vmem:[%s37809_s0 + $0x1fec] sm:$0xff]  }
  0x99   :  { %v28502_v47 = vld [vmem:[%s37809_s0 + $0xf78] sm:$0xff]   ;;  %23410 = vst [vmem:[%s37810_s1 + $0x1118] sm:$0xff] %v28501_v46  ;;  %v28526_v7 = vld [vmem:[%s37809_s0 + $0x17cc] sm:$0xff]   ;;  %23502 = vst [vmem:[%s37810_s1 + $0x10c] sm:$0xff] %v28524_v5 }
  0x9a   :  { %v28503_v48 = vld [vmem:[%s37809_s0 + $0x758] sm:$0xff]   ;;  %23414 = vst [vmem:[%s37810_s1 + $0x1938] sm:$0xff] %v28502_v47  ;;  %v28527_v8 = vld [vmem:[%s37809_s0 + $0xfac] sm:$0xff]   ;;  %23506 = vst [vmem:[%s37810_s1 + $0x92c] sm:$0xff] %v28525_v6 }
  0x9b   :  { %v28504_v49 = vld [vmem:[%s37809_s0 + $0x2638] sm:$0xff]   ;;  %23418 = vst [vmem:[%s37810_s1 + $0x2158] sm:$0xff] %v28503_v48  ;;  %23510 = vst [vmem:[%s37810_s1 + $0x114c] sm:$0xff] %v28526_v7  ;;  %v28528_v9 = vld [vmem:[%s37809_s0 + $0x78c] sm:$0xff]  }
  0x9c   :  { %v28505_v50 = vld [vmem:[%s37809_s0 + $0x1e18] sm:$0xff]   ;;  %23422 = vst [vmem:[%s37810_s1 + $0x278] sm:$0xff] %v28504_v49  ;;  %v28529_v10 = vld [vmem:[%s37809_s0 + $0x266c] sm:$0xff]   ;;  %23514 = vst [vmem:[%s37810_s1 + $0x196c] sm:$0xff] %v28527_v8 }
  0x9d   :  { %v28506_v51 = vld [vmem:[%s37809_s0 + $0x15f8] sm:$0xff]   ;;  %23426 = vst [vmem:[%s37810_s1 + $0xa98] sm:$0xff] %v28505_v50  ;;  %v28530_v11 = vld [vmem:[%s37809_s0 + $0x1e4c] sm:$0xff]   ;;  %23518 = vst [vmem:[%s37810_s1 + $0x218c] sm:$0xff] %v28528_v9 }
  0x9e   :  { %v28507_v52 = vld [vmem:[%s37809_s0 + $0xdd8] sm:$0xff]   ;;  %23430 = vst [vmem:[%s37810_s1 + $0x12b8] sm:$0xff] %v28506_v51  ;;  %23522 = vst [vmem:[%s37810_s1 + $0x2ac] sm:$0xff] %v28529_v10  ;;  %v28531_v12 = vld [vmem:[%s37809_s0 + $0x162c] sm:$0xff]  }
  0x9f   :  { %v28508_v53 = vld [vmem:[%s37809_s0 + $0x5b8] sm:$0xff]   ;;  %23434 = vst [vmem:[%s37810_s1 + $0x1ad8] sm:$0xff] %v28507_v52  ;;  %v28532_v13 = vld [vmem:[%s37809_s0 + $0xe0c] sm:$0xff]   ;;  %23526 = vst [vmem:[%s37810_s1 + $0xacc] sm:$0xff] %v28530_v11 }
  0xa0   :  { %v28509_v54 = vld [vmem:[%s37809_s0 + $0x2498] sm:$0xff]   ;;  %23438 = vst [vmem:[%s37810_s1 + $0x22f8] sm:$0xff] %v28508_v53  ;;  %v28533_v14 = vld [vmem:[%s37809_s0 + $0x5ec] sm:$0xff]   ;;  %23530 = vst [vmem:[%s37810_s1 + $0x12ec] sm:$0xff] %v28531_v12 }
  0xa1   :  { %v28510_v55 = vld [vmem:[%s37809_s0 + $0x1c78] sm:$0xff]   ;;  %23442 = vst [vmem:[%s37810_s1 + $0x418] sm:$0xff] %v28509_v54  ;;  %23534 = vst [vmem:[%s37810_s1 + $0x1b0c] sm:$0xff] %v28532_v13  ;;  %v28534_v15 = vld [vmem:[%s37809_s0 + $0x24cc] sm:$0xff]  }
  0xa2   :  { %v28511_v56 = vld [vmem:[%s37809_s0 + $0x1458] sm:$0xff]   ;;  %23446 = vst [vmem:[%s37810_s1 + $0xc38] sm:$0xff] %v28510_v55  ;;  %v28535_v16 = vld [vmem:[%s37809_s0 + $0x1cac] sm:$0xff]   ;;  %23538 = vst [vmem:[%s37810_s1 + $0x232c] sm:$0xff] %v28533_v14 }
  0xa3   :  { %v28512_v57 = vld [vmem:[%s37809_s0 + $0xc38] sm:$0xff]   ;;  %23450 = vst [vmem:[%s37810_s1 + $0x1458] sm:$0xff] %v28511_v56  ;;  %v28536_v17 = vld [vmem:[%s37809_s0 + $0x148c] sm:$0xff]   ;;  %23542 = vst [vmem:[%s37810_s1 + $0x44c] sm:$0xff] %v28534_v15 }
  0xa4   :  { %v28513_v58 = vld [vmem:[%s37809_s0 + $0x418] sm:$0xff]   ;;  %23454 = vst [vmem:[%s37810_s1 + $0x1c78] sm:$0xff] %v28512_v57  ;;  %23546 = vst [vmem:[%s37810_s1 + $0xc6c] sm:$0xff] %v28535_v16  ;;  %v28537_v18 = vld [vmem:[%s37809_s0 + $0xc6c] sm:$0xff]  }
  0xa5   :  { %v28514_v59 = vld [vmem:[%s37809_s0 + $0x22f8] sm:$0xff]   ;;  %23458 = vst [vmem:[%s37810_s1 + $0x2498] sm:$0xff] %v28513_v58  ;;  %v28538_v19 = vld [vmem:[%s37809_s0 + $0x44c] sm:$0xff]   ;;  %23550 = vst [vmem:[%s37810_s1 + $0x148c] sm:$0xff] %v28536_v17 }
  0xa6   :  { %v28515_v60 = vld [vmem:[%s37809_s0 + $0x1ad8] sm:$0xff]   ;;  %23462 = vst [vmem:[%s37810_s1 + $0x5b8] sm:$0xff] %v28514_v59  ;;  %v28539_v20 = vld [vmem:[%s37809_s0 + $0x232c] sm:$0xff]   ;;  %23554 = vst [vmem:[%s37810_s1 + $0x1cac] sm:$0xff] %v28537_v18 }
  0xa7   :  { %v28516_v61 = vld [vmem:[%s37809_s0 + $0x12b8] sm:$0xff]   ;;  %23466 = vst [vmem:[%s37810_s1 + $0xdd8] sm:$0xff] %v28515_v60  ;;  %23558 = vst [vmem:[%s37810_s1 + $0x24cc] sm:$0xff] %v28538_v19  ;;  %v28540_v21 = vld [vmem:[%s37809_s0 + $0x1b0c] sm:$0xff]  }
  0xa8   :  { %v28517_v62 = vld [vmem:[%s37809_s0 + $0xa98] sm:$0xff]   ;;  %23470 = vst [vmem:[%s37810_s1 + $0x15f8] sm:$0xff] %v28516_v61  ;;  %v28541_v22 = vld [vmem:[%s37809_s0 + $0x12ec] sm:$0xff]   ;;  %23562 = vst [vmem:[%s37810_s1 + $0x5ec] sm:$0xff] %v28539_v20 }
  0xa9   :  { %v28518_v63 = vld [vmem:[%s37809_s0 + $0x278] sm:$0xff]   ;;  %23474 = vst [vmem:[%s37810_s1 + $0x1e18] sm:$0xff] %v28517_v62  ;;  %v28542_v23 = vld [vmem:[%s37809_s0 + $0xacc] sm:$0xff]   ;;  %23566 = vst [vmem:[%s37810_s1 + $0xe0c] sm:$0xff] %v28540_v21 }
  0xaa   :  { %v28519_v0 = vld [vmem:[%s37809_s0 + $0x2158] sm:$0xff]   ;;  %23478 = vst [vmem:[%s37810_s1 + $0x2638] sm:$0xff] %v28518_v63  ;;  %23570 = vst [vmem:[%s37810_s1 + $0x162c] sm:$0xff] %v28541_v22  ;;  %v28543_v24 = vld [vmem:[%s37809_s0 + $0x2ac] sm:$0xff]  }
  0xab   :  { %v28520_v1 = vld [vmem:[%s37809_s0 + $0x1938] sm:$0xff]   ;;  %23482 = vst [vmem:[%s37810_s1 + $0x758] sm:$0xff] %v28519_v0  ;;  %v28544_v25 = vld [vmem:[%s37809_s0 + $0x218c] sm:$0xff]   ;;  %23574 = vst [vmem:[%s37810_s1 + $0x1e4c] sm:$0xff] %v28542_v23 }
  0xac   :  { %v28521_v2 = vld [vmem:[%s37809_s0 + $0x1118] sm:$0xff]   ;;  %23486 = vst [vmem:[%s37810_s1 + $0xf78] sm:$0xff] %v28520_v1  ;;  %v28545_v26 = vld [vmem:[%s37809_s0 + $0x196c] sm:$0xff]   ;;  %23578 = vst [vmem:[%s37810_s1 + $0x266c] sm:$0xff] %v28543_v24 }
  0xad   :  { %v28522_v3 = vld [vmem:[%s37809_s0 + $0x8f8] sm:$0xff]   ;;  %23490 = vst [vmem:[%s37810_s1 + $0x1798] sm:$0xff] %v28521_v2  ;;  %23582 = vst [vmem:[%s37810_s1 + $0x78c] sm:$0xff] %v28544_v25  ;;  %v28546_v27 = vld [vmem:[%s37809_s0 + $0x114c] sm:$0xff]  }
  0xae   :  { %v28523_v4 = vld [vmem:[%s37809_s0 + $0xd8] sm:$0xff]   ;;  %23494 = vst [vmem:[%s37810_s1 + $0x1fb8] sm:$0xff] %v28522_v3  ;;  %v28547_v28 = vld [vmem:[%s37809_s0 + $0x92c] sm:$0xff]   ;;  %23586 = vst [vmem:[%s37810_s1 + $0xfac] sm:$0xff] %v28545_v26 }
  0xaf   :  { %23498 = vst [vmem:[%s37810_s1 + $0x27d8] sm:$0xff] %v28523_v4  ;;  %v28548_v29 = vld [vmem:[%s37809_s0 + $0x10c] sm:$0xff]   ;;  %23590 = vst [vmem:[%s37810_s1 + $0x17cc] sm:$0xff] %v28546_v27  ;;  %v28549_v30 = vld [vmem:[%s37809_s0 + $0x2840] sm:$0xff]  }
  0xb0   :  { %23594 = vst [vmem:[%s37810_s1 + $0x1fec] sm:$0xff] %v28547_v28  ;;  %v28550_v31 = vld [vmem:[%s37809_s0 + $0x2020] sm:$0xff]   ;;  %23598 = vst [vmem:[%s37810_s1 + $0x280c] sm:$0xff] %v28548_v29  ;;  %v28574_v55 = vld [vmem:[%s37809_s0 + $0x2874] sm:$0xff]  }
  0xb1   :  { %v28551_v32 = vld [vmem:[%s37809_s0 + $0x1800] sm:$0xff]   ;;  %23602 = vst [vmem:[%s37810_s1 + $0x140] sm:$0xff] %v28549_v30  ;;  %23606 = vst [vmem:[%s37810_s1 + $0x960] sm:$0xff] %v28550_v31  ;;  %v28575_v56 = vld [vmem:[%s37809_s0 + $0x2054] sm:$0xff]  }
  0xb2   :  { %v28552_v33 = vld [vmem:[%s37809_s0 + $0xfe0] sm:$0xff]   ;;  %23610 = vst [vmem:[%s37810_s1 + $0x1180] sm:$0xff] %v28551_v32  ;;  %23702 = vst [vmem:[%s37810_s1 + $0x174] sm:$0xff] %v28574_v55  ;;  %v28576_v57 = vld [vmem:[%s37809_s0 + $0x1834] sm:$0xff]  }
  0xb3   :  { %v28553_v34 = vld [vmem:[%s37809_s0 + $0x7c0] sm:$0xff]   ;;  %23614 = vst [vmem:[%s37810_s1 + $0x19a0] sm:$0xff] %v28552_v33  ;;  %v28577_v58 = vld [vmem:[%s37809_s0 + $0x1014] sm:$0xff]   ;;  %23706 = vst [vmem:[%s37810_s1 + $0x994] sm:$0xff] %v28575_v56 }
  0xb4   :  { %v28554_v35 = vld [vmem:[%s37809_s0 + $0x26a0] sm:$0xff]   ;;  %23618 = vst [vmem:[%s37810_s1 + $0x21c0] sm:$0xff] %v28553_v34  ;;  %v28578_v59 = vld [vmem:[%s37809_s0 + $0x7f4] sm:$0xff]   ;;  %23710 = vst [vmem:[%s37810_s1 + $0x11b4] sm:$0xff] %v28576_v57 }
  0xb5   :  { %v28555_v36 = vld [vmem:[%s37809_s0 + $0x1e80] sm:$0xff]   ;;  %23622 = vst [vmem:[%s37810_s1 + $0x2e0] sm:$0xff] %v28554_v35  ;;  %23714 = vst [vmem:[%s37810_s1 + $0x19d4] sm:$0xff] %v28577_v58  ;;  %v28579_v60 = vld [vmem:[%s37809_s0 + $0x26d4] sm:$0xff]  }
  0xb6   :  { %v28556_v37 = vld [vmem:[%s37809_s0 + $0x1660] sm:$0xff]   ;;  %23626 = vst [vmem:[%s37810_s1 + $0xb00] sm:$0xff] %v28555_v36  ;;  %v28580_v61 = vld [vmem:[%s37809_s0 + $0x1eb4] sm:$0xff]   ;;  %23718 = vst [vmem:[%s37810_s1 + $0x21f4] sm:$0xff] %v28578_v59 }
  0xb7   :  { %v28557_v38 = vld [vmem:[%s37809_s0 + $0xe40] sm:$0xff]   ;;  %23630 = vst [vmem:[%s37810_s1 + $0x1320] sm:$0xff] %v28556_v37  ;;  %v28581_v62 = vld [vmem:[%s37809_s0 + $0x1694] sm:$0xff]   ;;  %23722 = vst [vmem:[%s37810_s1 + $0x314] sm:$0xff] %v28579_v60 }
  0xb8   :  { %v28558_v39 = vld [vmem:[%s37809_s0 + $0x620] sm:$0xff]   ;;  %23634 = vst [vmem:[%s37810_s1 + $0x1b40] sm:$0xff] %v28557_v38  ;;  %23726 = vst [vmem:[%s37810_s1 + $0xb34] sm:$0xff] %v28580_v61  ;;  %v28582_v63 = vld [vmem:[%s37809_s0 + $0xe74] sm:$0xff]  }
  0xb9   :  { %v28559_v40 = vld [vmem:[%s37809_s0 + $0x2500] sm:$0xff]   ;;  %23638 = vst [vmem:[%s37810_s1 + $0x2360] sm:$0xff] %v28558_v39  ;;  %v28583_v0 = vld [vmem:[%s37809_s0 + $0x654] sm:$0xff]   ;;  %23730 = vst [vmem:[%s37810_s1 + $0x1354] sm:$0xff] %v28581_v62 }
  0xba   :  { %v28560_v41 = vld [vmem:[%s37809_s0 + $0x1ce0] sm:$0xff]   ;;  %23642 = vst [vmem:[%s37810_s1 + $0x480] sm:$0xff] %v28559_v40  ;;  %v28584_v1 = vld [vmem:[%s37809_s0 + $0x2534] sm:$0xff]   ;;  %23734 = vst [vmem:[%s37810_s1 + $0x1b74] sm:$0xff] %v28582_v63 }
  0xbb   :  { %v28561_v42 = vld [vmem:[%s37809_s0 + $0x14c0] sm:$0xff]   ;;  %23646 = vst [vmem:[%s37810_s1 + $0xca0] sm:$0xff] %v28560_v41  ;;  %23738 = vst [vmem:[%s37810_s1 + $0x2394] sm:$0xff] %v28583_v0  ;;  %v28585_v2 = vld [vmem:[%s37809_s0 + $0x1d14] sm:$0xff]  }
  0xbc   :  { %v28562_v43 = vld [vmem:[%s37809_s0 + $0xca0] sm:$0xff]   ;;  %23650 = vst [vmem:[%s37810_s1 + $0x14c0] sm:$0xff] %v28561_v42  ;;  %v28586_v3 = vld [vmem:[%s37809_s0 + $0x14f4] sm:$0xff]   ;;  %23742 = vst [vmem:[%s37810_s1 + $0x4b4] sm:$0xff] %v28584_v1 }
  0xbd   :  { %v28563_v44 = vld [vmem:[%s37809_s0 + $0x480] sm:$0xff]   ;;  %23654 = vst [vmem:[%s37810_s1 + $0x1ce0] sm:$0xff] %v28562_v43  ;;  %v28587_v4 = vld [vmem:[%s37809_s0 + $0xcd4] sm:$0xff]   ;;  %23746 = vst [vmem:[%s37810_s1 + $0xcd4] sm:$0xff] %v28585_v2 }
  0xbe   :  { %v28564_v45 = vld [vmem:[%s37809_s0 + $0x2360] sm:$0xff]   ;;  %23658 = vst [vmem:[%s37810_s1 + $0x2500] sm:$0xff] %v28563_v44  ;;  %23750 = vst [vmem:[%s37810_s1 + $0x14f4] sm:$0xff] %v28586_v3  ;;  %v28588_v5 = vld [vmem:[%s37809_s0 + $0x4b4] sm:$0xff]  }
  0xbf   :  { %v28565_v46 = vld [vmem:[%s37809_s0 + $0x1b40] sm:$0xff]   ;;  %23662 = vst [vmem:[%s37810_s1 + $0x620] sm:$0xff] %v28564_v45  ;;  %v28589_v6 = vld [vmem:[%s37809_s0 + $0x2394] sm:$0xff]   ;;  %23754 = vst [vmem:[%s37810_s1 + $0x1d14] sm:$0xff] %v28587_v4 }
  0xc0   :  { %v28566_v47 = vld [vmem:[%s37809_s0 + $0x1320] sm:$0xff]   ;;  %23666 = vst [vmem:[%s37810_s1 + $0xe40] sm:$0xff] %v28565_v46  ;;  %v28590_v7 = vld [vmem:[%s37809_s0 + $0x1b74] sm:$0xff]   ;;  %23758 = vst [vmem:[%s37810_s1 + $0x2534] sm:$0xff] %v28588_v5 }
  0xc1   :  { %v28567_v48 = vld [vmem:[%s37809_s0 + $0xb00] sm:$0xff]   ;;  %23670 = vst [vmem:[%s37810_s1 + $0x1660] sm:$0xff] %v28566_v47  ;;  %23762 = vst [vmem:[%s37810_s1 + $0x654] sm:$0xff] %v28589_v6  ;;  %v28591_v8 = vld [vmem:[%s37809_s0 + $0x1354] sm:$0xff]  }
  0xc2   :  { %v28568_v49 = vld [vmem:[%s37809_s0 + $0x2e0] sm:$0xff]   ;;  %23674 = vst [vmem:[%s37810_s1 + $0x1e80] sm:$0xff] %v28567_v48  ;;  %v28592_v9 = vld [vmem:[%s37809_s0 + $0xb34] sm:$0xff]   ;;  %23766 = vst [vmem:[%s37810_s1 + $0xe74] sm:$0xff] %v28590_v7 }
  0xc3   :  { %v28569_v50 = vld [vmem:[%s37809_s0 + $0x21c0] sm:$0xff]   ;;  %23678 = vst [vmem:[%s37810_s1 + $0x26a0] sm:$0xff] %v28568_v49  ;;  %v28593_v10 = vld [vmem:[%s37809_s0 + $0x314] sm:$0xff]   ;;  %23770 = vst [vmem:[%s37810_s1 + $0x1694] sm:$0xff] %v28591_v8 }
  0xc4   :  { %v28570_v51 = vld [vmem:[%s37809_s0 + $0x19a0] sm:$0xff]   ;;  %23682 = vst [vmem:[%s37810_s1 + $0x7c0] sm:$0xff] %v28569_v50  ;;  %23774 = vst [vmem:[%s37810_s1 + $0x1eb4] sm:$0xff] %v28592_v9  ;;  %v28594_v11 = vld [vmem:[%s37809_s0 + $0x21f4] sm:$0xff]  }
  0xc5   :  { %v28571_v52 = vld [vmem:[%s37809_s0 + $0x1180] sm:$0xff]   ;;  %23686 = vst [vmem:[%s37810_s1 + $0xfe0] sm:$0xff] %v28570_v51  ;;  %v28595_v12 = vld [vmem:[%s37809_s0 + $0x19d4] sm:$0xff]   ;;  %23778 = vst [vmem:[%s37810_s1 + $0x26d4] sm:$0xff] %v28593_v10 }
  0xc6   :  { %v28572_v53 = vld [vmem:[%s37809_s0 + $0x960] sm:$0xff]   ;;  %23690 = vst [vmem:[%s37810_s1 + $0x1800] sm:$0xff] %v28571_v52  ;;  %v28596_v13 = vld [vmem:[%s37809_s0 + $0x11b4] sm:$0xff]   ;;  %23782 = vst [vmem:[%s37810_s1 + $0x7f4] sm:$0xff] %v28594_v11 }
  0xc7   :  { %v28573_v54 = vld [vmem:[%s37809_s0 + $0x140] sm:$0xff]   ;;  %23694 = vst [vmem:[%s37810_s1 + $0x2020] sm:$0xff] %v28572_v53  ;;  %23786 = vst [vmem:[%s37810_s1 + $0x1014] sm:$0xff] %v28595_v12  ;;  %v28597_v14 = vld [vmem:[%s37809_s0 + $0x994] sm:$0xff]  }
  0xc8   :  { %23698 = vst [vmem:[%s37810_s1 + $0x2840] sm:$0xff] %v28573_v54  ;;  %v28598_v15 = vld [vmem:[%s37809_s0 + $0x174] sm:$0xff]   ;;  %23790 = vst [vmem:[%s37810_s1 + $0x1834] sm:$0xff] %v28596_v13  ;;  %v28624_v41 = vld [vmem:[%s37809_s0 + $0x2744] sm:$0xff]  }
  0xc9   :  { %23794 = vst [vmem:[%s37810_s1 + $0x2054] sm:$0xff] %v28597_v14  ;;  %23798 = vst [vmem:[%s37810_s1 + $0x2874] sm:$0xff] %v28598_v15  ;;  %v28599_v16 = vld [vmem:[%s37809_s0 + $0x2710] sm:$0xff]   ;;  %v28625_v42 = vld [vmem:[%s37809_s0 + $0x1f24] sm:$0xff]  }
  0xca   :  { %v28600_v17 = vld [vmem:[%s37809_s0 + $0x1ef0] sm:$0xff]   ;;  %24002 = vst [vmem:[%s37810_s1 + $0x10] sm:$0xff] %v28599_v16  ;;  %24102 = vst [vmem:[%s37810_s1 + $0x44] sm:$0xff] %v28624_v41  ;;  %v28626_v43 = vld [vmem:[%s37809_s0 + $0x1704] sm:$0xff]  }
  0xcb   :  { %v28601_v18 = vld [vmem:[%s37809_s0 + $0x16d0] sm:$0xff]   ;;  %24006 = vst [vmem:[%s37810_s1 + $0x830] sm:$0xff] %v28600_v17  ;;  %v28627_v44 = vld [vmem:[%s37809_s0 + $0xee4] sm:$0xff]   ;;  %24106 = vst [vmem:[%s37810_s1 + $0x864] sm:$0xff] %v28625_v42 }
  0xcc   :  { %v28602_v19 = vld [vmem:[%s37809_s0 + $0xeb0] sm:$0xff]   ;;  %24010 = vst [vmem:[%s37810_s1 + $0x1050] sm:$0xff] %v28601_v18  ;;  %v28628_v45 = vld [vmem:[%s37809_s0 + $0x6c4] sm:$0xff]   ;;  %24110 = vst [vmem:[%s37810_s1 + $0x1084] sm:$0xff] %v28626_v43 }
  0xcd   :  { %v28603_v20 = vld [vmem:[%s37809_s0 + $0x690] sm:$0xff]   ;;  %24014 = vst [vmem:[%s37810_s1 + $0x1870] sm:$0xff] %v28602_v19  ;;  %24114 = vst [vmem:[%s37810_s1 + $0x18a4] sm:$0xff] %v28627_v44  ;;  %v28629_v46 = vld [vmem:[%s37809_s0 + $0x25a4] sm:$0xff]  }
  0xce   :  { %v28604_v21 = vld [vmem:[%s37809_s0 + $0x2570] sm:$0xff]   ;;  %24018 = vst [vmem:[%s37810_s1 + $0x2090] sm:$0xff] %v28603_v20  ;;  %v28630_v47 = vld [vmem:[%s37809_s0 + $0x1d84] sm:$0xff]   ;;  %24118 = vst [vmem:[%s37810_s1 + $0x20c4] sm:$0xff] %v28628_v45 }
  0xcf   :  { %v28605_v22 = vld [vmem:[%s37809_s0 + $0x1d50] sm:$0xff]   ;;  %24022 = vst [vmem:[%s37810_s1 + $0x1b0] sm:$0xff] %v28604_v21  ;;  %v28631_v48 = vld [vmem:[%s37809_s0 + $0x1564] sm:$0xff]   ;;  %24122 = vst [vmem:[%s37810_s1 + $0x1e4] sm:$0xff] %v28629_v46 }
  0xd0   :  { %v28606_v23 = vld [vmem:[%s37809_s0 + $0x1530] sm:$0xff]   ;;  %24026 = vst [vmem:[%s37810_s1 + $0x9d0] sm:$0xff] %v28605_v22  ;;  %24126 = vst [vmem:[%s37810_s1 + $0xa04] sm:$0xff] %v28630_v47  ;;  %v28632_v49 = vld [vmem:[%s37809_s0 + $0xd44] sm:$0xff]  }
  0xd1   :  { %v28607_v24 = vld [vmem:[%s37809_s0 + $0xd10] sm:$0xff]   ;;  %24030 = vst [vmem:[%s37810_s1 + $0x11f0] sm:$0xff] %v28606_v23  ;;  %v28633_v50 = vld [vmem:[%s37809_s0 + $0x524] sm:$0xff]   ;;  %24130 = vst [vmem:[%s37810_s1 + $0x1224] sm:$0xff] %v28631_v48 }
  0xd2   :  { %v28608_v25 = vld [vmem:[%s37809_s0 + $0x4f0] sm:$0xff]   ;;  %24034 = vst [vmem:[%s37810_s1 + $0x1a10] sm:$0xff] %v28607_v24  ;;  %v28634_v51 = vld [vmem:[%s37809_s0 + $0x2404] sm:$0xff]   ;;  %24134 = vst [vmem:[%s37810_s1 + $0x1a44] sm:$0xff] %v28632_v49 }
  0xd3   :  { %v28609_v26 = vld [vmem:[%s37809_s0 + $0x23d0] sm:$0xff]   ;;  %24038 = vst [vmem:[%s37810_s1 + $0x2230] sm:$0xff] %v28608_v25  ;;  %24138 = vst [vmem:[%s37810_s1 + $0x2264] sm:$0xff] %v28633_v50  ;;  %v28635_v52 = vld [vmem:[%s37809_s0 + $0x1be4] sm:$0xff]  }
  0xd4   :  { %v28610_v27 = vld [vmem:[%s37809_s0 + $0x1bb0] sm:$0xff]   ;;  %24042 = vst [vmem:[%s37810_s1 + $0x350] sm:$0xff] %v28609_v26  ;;  %v28636_v53 = vld [vmem:[%s37809_s0 + $0x13c4] sm:$0xff]   ;;  %24142 = vst [vmem:[%s37810_s1 + $0x384] sm:$0xff] %v28634_v51 }
  0xd5   :  { %v28611_v28 = vld [vmem:[%s37809_s0 + $0x1390] sm:$0xff]   ;;  %24046 = vst [vmem:[%s37810_s1 + $0xb70] sm:$0xff] %v28610_v27  ;;  %v28637_v54 = vld [vmem:[%s37809_s0 + $0xba4] sm:$0xff]   ;;  %24146 = vst [vmem:[%s37810_s1 + $0xba4] sm:$0xff] %v28635_v52 }
  0xd6   :  { %v28612_v29 = vld [vmem:[%s37809_s0 + $0xb70] sm:$0xff]   ;;  %24050 = vst [vmem:[%s37810_s1 + $0x1390] sm:$0xff] %v28611_v28  ;;  %24150 = vst [vmem:[%s37810_s1 + $0x13c4] sm:$0xff] %v28636_v53  ;;  %v28638_v55 = vld [vmem:[%s37809_s0 + $0x384] sm:$0xff]  }
  0xd7   :  { %v28613_v30 = vld [vmem:[%s37809_s0 + $0x350] sm:$0xff]   ;;  %24054 = vst [vmem:[%s37810_s1 + $0x1bb0] sm:$0xff] %v28612_v29  ;;  %v28639_v56 = vld [vmem:[%s37809_s0 + $0x2264] sm:$0xff]   ;;  %24154 = vst [vmem:[%s37810_s1 + $0x1be4] sm:$0xff] %v28637_v54 }
  0xd8   :  { %v28614_v31 = vld [vmem:[%s37809_s0 + $0x2230] sm:$0xff]   ;;  %24058 = vst [vmem:[%s37810_s1 + $0x23d0] sm:$0xff] %v28613_v30  ;;  %v28640_v57 = vld [vmem:[%s37809_s0 + $0x1a44] sm:$0xff]   ;;  %24158 = vst [vmem:[%s37810_s1 + $0x2404] sm:$0xff] %v28638_v55 }
  0xd9   :  { %v28615_v32 = vld [vmem:[%s37809_s0 + $0x1a10] sm:$0xff]   ;;  %24062 = vst [vmem:[%s37810_s1 + $0x4f0] sm:$0xff] %v28614_v31  ;;  %24162 = vst [vmem:[%s37810_s1 + $0x524] sm:$0xff] %v28639_v56  ;;  %v28641_v58 = vld [vmem:[%s37809_s0 + $0x1224] sm:$0xff]  }
  0xda   :  { %v28616_v33 = vld [vmem:[%s37809_s0 + $0x11f0] sm:$0xff]   ;;  %24066 = vst [vmem:[%s37810_s1 + $0xd10] sm:$0xff] %v28615_v32  ;;  %v28642_v59 = vld [vmem:[%s37809_s0 + $0xa04] sm:$0xff]   ;;  %24166 = vst [vmem:[%s37810_s1 + $0xd44] sm:$0xff] %v28640_v57 }
  0xdb   :  { %v28617_v34 = vld [vmem:[%s37809_s0 + $0x9d0] sm:$0xff]   ;;  %24070 = vst [vmem:[%s37810_s1 + $0x1530] sm:$0xff] %v28616_v33  ;;  %v28643_v60 = vld [vmem:[%s37809_s0 + $0x1e4] sm:$0xff]   ;;  %24170 = vst [vmem:[%s37810_s1 + $0x1564] sm:$0xff] %v28641_v58 }
  0xdc   :  { %v28618_v35 = vld [vmem:[%s37809_s0 + $0x1b0] sm:$0xff]   ;;  %24074 = vst [vmem:[%s37810_s1 + $0x1d50] sm:$0xff] %v28617_v34  ;;  %24174 = vst [vmem:[%s37810_s1 + $0x1d84] sm:$0xff] %v28642_v59  ;;  %v28644_v61 = vld [vmem:[%s37809_s0 + $0x20c4] sm:$0xff]  }
  0xdd   :  { %v28619_v36 = vld [vmem:[%s37809_s0 + $0x2090] sm:$0xff]   ;;  %24078 = vst [vmem:[%s37810_s1 + $0x2570] sm:$0xff] %v28618_v35  ;;  %v28645_v62 = vld [vmem:[%s37809_s0 + $0x18a4] sm:$0xff]   ;;  %24178 = vst [vmem:[%s37810_s1 + $0x25a4] sm:$0xff] %v28643_v60 }
  0xde   :  { %v28620_v37 = vld [vmem:[%s37809_s0 + $0x1870] sm:$0xff]   ;;  %24082 = vst [vmem:[%s37810_s1 + $0x690] sm:$0xff] %v28619_v36  ;;  %v28646_v63 = vld [vmem:[%s37809_s0 + $0x1084] sm:$0xff]   ;;  %24182 = vst [vmem:[%s37810_s1 + $0x6c4] sm:$0xff] %v28644_v61 }
  0xdf   :  { %v28621_v38 = vld [vmem:[%s37809_s0 + $0x1050] sm:$0xff]   ;;  %24086 = vst [vmem:[%s37810_s1 + $0xeb0] sm:$0xff] %v28620_v37  ;;  %24186 = vst [vmem:[%s37810_s1 + $0xee4] sm:$0xff] %v28645_v62  ;;  %v28647_v0 = vld [vmem:[%s37809_s0 + $0x864] sm:$0xff]  }
  0xe0   :  { %v28622_v39 = vld [vmem:[%s37809_s0 + $0x830] sm:$0xff]   ;;  %24090 = vst [vmem:[%s37810_s1 + $0x16d0] sm:$0xff] %v28621_v38  ;;  %v28648_v1 = vld [vmem:[%s37809_s0 + $0x44] sm:$0xff]   ;;  %24190 = vst [vmem:[%s37810_s1 + $0x1704] sm:$0xff] %v28646_v63 }
  0xe1   :  { %v28623_v40 = vld [vmem:[%s37809_s0 + $0x10] sm:$0xff]   ;;  %24094 = vst [vmem:[%s37810_s1 + $0x1ef0] sm:$0xff] %v28622_v39  ;;  %v28649_v2 = vld [vmem:[%s37809_s0 + $0x2778] sm:$0xff]   ;;  %24194 = vst [vmem:[%s37810_s1 + $0x1f24] sm:$0xff] %v28647_v0 }
  0xe2   :  { %24098 = vst [vmem:[%s37810_s1 + $0x2710] sm:$0xff] %v28623_v40  ;;  %24198 = vst [vmem:[%s37810_s1 + $0x2744] sm:$0xff] %v28648_v1  ;;  %v28650_v3 = vld [vmem:[%s37809_s0 + $0x1f58] sm:$0xff]   ;;  %v28674_v27 = vld [vmem:[%s37809_s0 + $0x27ac] sm:$0xff]  }
  0xe3   :  { %v28651_v4 = vld [vmem:[%s37809_s0 + $0x1738] sm:$0xff]   ;;  %24202 = vst [vmem:[%s37810_s1 + $0x78] sm:$0xff] %v28649_v2  ;;  %24206 = vst [vmem:[%s37810_s1 + $0x898] sm:$0xff] %v28650_v3  ;;  %v28675_v28 = vld [vmem:[%s37809_s0 + $0x1f8c] sm:$0xff]  }
  0xe4   :  { %v28652_v5 = vld [vmem:[%s37809_s0 + $0xf18] sm:$0xff]   ;;  %24210 = vst [vmem:[%s37810_s1 + $0x10b8] sm:$0xff] %v28651_v4  ;;  %v28676_v29 = vld [vmem:[%s37809_s0 + $0x176c] sm:$0xff]   ;;  %24302 = vst [vmem:[%s37810_s1 + $0xac] sm:$0xff] %v28674_v27 }
  0xe5   :  { %v28653_v6 = vld [vmem:[%s37809_s0 + $0x6f8] sm:$0xff]   ;;  %24214 = vst [vmem:[%s37810_s1 + $0x18d8] sm:$0xff] %v28652_v5  ;;  %24306 = vst [vmem:[%s37810_s1 + $0x8cc] sm:$0xff] %v28675_v28  ;;  %v28677_v30 = vld [vmem:[%s37809_s0 + $0xf4c] sm:$0xff]  }
  0xe6   :  { %v28654_v7 = vld [vmem:[%s37809_s0 + $0x25d8] sm:$0xff]   ;;  %24218 = vst [vmem:[%s37810_s1 + $0x20f8] sm:$0xff] %v28653_v6  ;;  %v28678_v31 = vld [vmem:[%s37809_s0 + $0x72c] sm:$0xff]   ;;  %24310 = vst [vmem:[%s37810_s1 + $0x10ec] sm:$0xff] %v28676_v29 }
  0xe7   :  { %v28655_v8 = vld [vmem:[%s37809_s0 + $0x1db8] sm:$0xff]   ;;  %24222 = vst [vmem:[%s37810_s1 + $0x218] sm:$0xff] %v28654_v7  ;;  %v28679_v32 = vld [vmem:[%s37809_s0 + $0x260c] sm:$0xff]   ;;  %24314 = vst [vmem:[%s37810_s1 + $0x190c] sm:$0xff] %v28677_v30 }
  0xe8   :  { %v28656_v9 = vld [vmem:[%s37809_s0 + $0x1598] sm:$0xff]   ;;  %24226 = vst [vmem:[%s37810_s1 + $0xa38] sm:$0xff] %v28655_v8  ;;  %24318 = vst [vmem:[%s37810_s1 + $0x212c] sm:$0xff] %v28678_v31  ;;  %v28680_v33 = vld [vmem:[%s37809_s0 + $0x1dec] sm:$0xff]  }
  0xe9   :  { %v28657_v10 = vld [vmem:[%s37809_s0 + $0xd78] sm:$0xff]   ;;  %24230 = vst [vmem:[%s37810_s1 + $0x1258] sm:$0xff] %v28656_v9  ;;  %v28681_v34 = vld [vmem:[%s37809_s0 + $0x15cc] sm:$0xff]   ;;  %24322 = vst [vmem:[%s37810_s1 + $0x24c] sm:$0xff] %v28679_v32 }
  0xea   :  { %v28658_v11 = vld [vmem:[%s37809_s0 + $0x558] sm:$0xff]   ;;  %24234 = vst [vmem:[%s37810_s1 + $0x1a78] sm:$0xff] %v28657_v10  ;;  %v28682_v35 = vld [vmem:[%s37809_s0 + $0xdac] sm:$0xff]   ;;  %24326 = vst [vmem:[%s37810_s1 + $0xa6c] sm:$0xff] %v28680_v33 }
  0xeb   :  { %v28659_v12 = vld [vmem:[%s37809_s0 + $0x2438] sm:$0xff]   ;;  %24238 = vst [vmem:[%s37810_s1 + $0x2298] sm:$0xff] %v28658_v11  ;;  %24330 = vst [vmem:[%s37810_s1 + $0x128c] sm:$0xff] %v28681_v34  ;;  %v28683_v36 = vld [vmem:[%s37809_s0 + $0x58c] sm:$0xff]  }
  0xec   :  { %v28660_v13 = vld [vmem:[%s37809_s0 + $0x1c18] sm:$0xff]   ;;  %24242 = vst [vmem:[%s37810_s1 + $0x3b8] sm:$0xff] %v28659_v12  ;;  %v28684_v37 = vld [vmem:[%s37809_s0 + $0x246c] sm:$0xff]   ;;  %24334 = vst [vmem:[%s37810_s1 + $0x1aac] sm:$0xff] %v28682_v35 }
  0xed   :  { %v28661_v14 = vld [vmem:[%s37809_s0 + $0x13f8] sm:$0xff]   ;;  %24246 = vst [vmem:[%s37810_s1 + $0xbd8] sm:$0xff] %v28660_v13  ;;  %v28685_v38 = vld [vmem:[%s37809_s0 + $0x1c4c] sm:$0xff]   ;;  %24338 = vst [vmem:[%s37810_s1 + $0x22cc] sm:$0xff] %v28683_v36 }
  0xee   :  { %v28662_v15 = vld [vmem:[%s37809_s0 + $0xbd8] sm:$0xff]   ;;  %24250 = vst [vmem:[%s37810_s1 + $0x13f8] sm:$0xff] %v28661_v14  ;;  %24342 = vst [vmem:[%s37810_s1 + $0x3ec] sm:$0xff] %v28684_v37  ;;  %v28686_v39 = vld [vmem:[%s37809_s0 + $0x142c] sm:$0xff]  }
  0xef   :  { %v28663_v16 = vld [vmem:[%s37809_s0 + $0x3b8] sm:$0xff]   ;;  %24254 = vst [vmem:[%s37810_s1 + $0x1c18] sm:$0xff] %v28662_v15  ;;  %v28687_v40 = vld [vmem:[%s37809_s0 + $0xc0c] sm:$0xff]   ;;  %24346 = vst [vmem:[%s37810_s1 + $0xc0c] sm:$0xff] %v28685_v38 }
  0xf0   :  { %v28664_v17 = vld [vmem:[%s37809_s0 + $0x2298] sm:$0xff]   ;;  %24258 = vst [vmem:[%s37810_s1 + $0x2438] sm:$0xff] %v28663_v16  ;;  %v28688_v41 = vld [vmem:[%s37809_s0 + $0x3ec] sm:$0xff]   ;;  %24350 = vst [vmem:[%s37810_s1 + $0x142c] sm:$0xff] %v28686_v39 }
  0xf1   :  { %v28665_v18 = vld [vmem:[%s37809_s0 + $0x1a78] sm:$0xff]   ;;  %24262 = vst [vmem:[%s37810_s1 + $0x558] sm:$0xff] %v28664_v17  ;;  %24354 = vst [vmem:[%s37810_s1 + $0x1c4c] sm:$0xff] %v28687_v40  ;;  %v28689_v42 = vld [vmem:[%s37809_s0 + $0x22cc] sm:$0xff]  }
  0xf2   :  { %v28666_v19 = vld [vmem:[%s37809_s0 + $0x1258] sm:$0xff]   ;;  %24266 = vst [vmem:[%s37810_s1 + $0xd78] sm:$0xff] %v28665_v18  ;;  %v28690_v43 = vld [vmem:[%s37809_s0 + $0x1aac] sm:$0xff]   ;;  %24358 = vst [vmem:[%s37810_s1 + $0x246c] sm:$0xff] %v28688_v41 }
  0xf3   :  { %v28667_v20 = vld [vmem:[%s37809_s0 + $0xa38] sm:$0xff]   ;;  %24270 = vst [vmem:[%s37810_s1 + $0x1598] sm:$0xff] %v28666_v19  ;;  %v28691_v44 = vld [vmem:[%s37809_s0 + $0x128c] sm:$0xff]   ;;  %24362 = vst [vmem:[%s37810_s1 + $0x58c] sm:$0xff] %v28689_v42 }
  0xf4   :  { %v28668_v21 = vld [vmem:[%s37809_s0 + $0x218] sm:$0xff]   ;;  %24274 = vst [vmem:[%s37810_s1 + $0x1db8] sm:$0xff] %v28667_v20  ;;  %24366 = vst [vmem:[%s37810_s1 + $0xdac] sm:$0xff] %v28690_v43  ;;  %v28692_v45 = vld [vmem:[%s37809_s0 + $0xa6c] sm:$0xff]  }
  0xf5   :  { %v28669_v22 = vld [vmem:[%s37809_s0 + $0x20f8] sm:$0xff]   ;;  %24278 = vst [vmem:[%s37810_s1 + $0x25d8] sm:$0xff] %v28668_v21  ;;  %v28693_v46 = vld [vmem:[%s37809_s0 + $0x24c] sm:$0xff]   ;;  %24370 = vst [vmem:[%s37810_s1 + $0x15cc] sm:$0xff] %v28691_v44 }
  0xf6   :  { %v28670_v23 = vld [vmem:[%s37809_s0 + $0x18d8] sm:$0xff]   ;;  %24282 = vst [vmem:[%s37810_s1 + $0x6f8] sm:$0xff] %v28669_v22  ;;  %v28694_v47 = vld [vmem:[%s37809_s0 + $0x212c] sm:$0xff]   ;;  %24374 = vst [vmem:[%s37810_s1 + $0x1dec] sm:$0xff] %v28692_v45 }
  0xf7   :  { %v28671_v24 = vld [vmem:[%s37809_s0 + $0x10b8] sm:$0xff]   ;;  %24286 = vst [vmem:[%s37810_s1 + $0xf18] sm:$0xff] %v28670_v23  ;;  %24378 = vst [vmem:[%s37810_s1 + $0x260c] sm:$0xff] %v28693_v46  ;;  %v28695_v48 = vld [vmem:[%s37809_s0 + $0x190c] sm:$0xff]  }
  0xf8   :  { %v28672_v25 = vld [vmem:[%s37809_s0 + $0x898] sm:$0xff]   ;;  %24290 = vst [vmem:[%s37810_s1 + $0x1738] sm:$0xff] %v28671_v24  ;;  %v28696_v49 = vld [vmem:[%s37809_s0 + $0x10ec] sm:$0xff]   ;;  %24382 = vst [vmem:[%s37810_s1 + $0x72c] sm:$0xff] %v28694_v47 }
  0xf9   :  { %v28673_v26 = vld [vmem:[%s37809_s0 + $0x78] sm:$0xff]   ;;  %24294 = vst [vmem:[%s37810_s1 + $0x1f58] sm:$0xff] %v28672_v25  ;;  %v28697_v50 = vld [vmem:[%s37809_s0 + $0x8cc] sm:$0xff]   ;;  %24386 = vst [vmem:[%s37810_s1 + $0xf4c] sm:$0xff] %v28695_v48 }
  0xfa   :  { %24298 = vst [vmem:[%s37810_s1 + $0x2778] sm:$0xff] %v28673_v26  ;;  %24390 = vst [vmem:[%s37810_s1 + $0x176c] sm:$0xff] %v28696_v49  ;;  %v28698_v51 = vld [vmem:[%s37809_s0 + $0xac] sm:$0xff]   ;;  %v28699_v52 = vld [vmem:[%s37809_s0 + $0x27e0] sm:$0xff]  }
  0xfb   :  { %24394 = vst [vmem:[%s37810_s1 + $0x1f8c] sm:$0xff] %v28697_v50  ;;  %v28700_v53 = vld [vmem:[%s37809_s0 + $0x1fc0] sm:$0xff]   ;;  %24398 = vst [vmem:[%s37810_s1 + $0x27ac] sm:$0xff] %v28698_v51  ;;  %v28724_v13 = vld [vmem:[%s37809_s0 + $0x2814] sm:$0xff]  }
  0xfc   :  { %24402 = vst [vmem:[%s37810_s1 + $0xe0] sm:$0xff] %v28699_v52  ;;  %v28701_v54 = vld [vmem:[%s37809_s0 + $0x17a0] sm:$0xff]   ;;  %24406 = vst [vmem:[%s37810_s1 + $0x900] sm:$0xff] %v28700_v53  ;;  %v28725_v14 = vld [vmem:[%s37809_s0 + $0x1ff4] sm:$0xff]  }
  0xfd   :  { %v28702_v55 = vld [vmem:[%s37809_s0 + $0xf80] sm:$0xff]   ;;  %24410 = vst [vmem:[%s37810_s1 + $0x1120] sm:$0xff] %v28701_v54  ;;  %v28726_v15 = vld [vmem:[%s37809_s0 + $0x17d4] sm:$0xff]   ;;  %24502 = vst [vmem:[%s37810_s1 + $0x114] sm:$0xff] %v28724_v13 }
  0xfe   :  { %v28703_v56 = vld [vmem:[%s37809_s0 + $0x760] sm:$0xff]   ;;  %24414 = vst [vmem:[%s37810_s1 + $0x1940] sm:$0xff] %v28702_v55  ;;  %v28727_v16 = vld [vmem:[%s37809_s0 + $0xfb4] sm:$0xff]   ;;  %24506 = vst [vmem:[%s37810_s1 + $0x934] sm:$0xff] %v28725_v14 }
  0xff   :  { %v28704_v57 = vld [vmem:[%s37809_s0 + $0x2640] sm:$0xff]   ;;  %24418 = vst [vmem:[%s37810_s1 + $0x2160] sm:$0xff] %v28703_v56  ;;  %24510 = vst [vmem:[%s37810_s1 + $0x1154] sm:$0xff] %v28726_v15  ;;  %v28728_v17 = vld [vmem:[%s37809_s0 + $0x794] sm:$0xff]  }
 0x100   :  { %v28705_v58 = vld [vmem:[%s37809_s0 + $0x1e20] sm:$0xff]   ;;  %24422 = vst [vmem:[%s37810_s1 + $0x280] sm:$0xff] %v28704_v57  ;;  %v28729_v18 = vld [vmem:[%s37809_s0 + $0x2674] sm:$0xff]   ;;  %24514 = vst [vmem:[%s37810_s1 + $0x1974] sm:$0xff] %v28727_v16 }
 0x101   :  { %v28706_v59 = vld [vmem:[%s37809_s0 + $0x1600] sm:$0xff]   ;;  %24426 = vst [vmem:[%s37810_s1 + $0xaa0] sm:$0xff] %v28705_v58  ;;  %v28730_v19 = vld [vmem:[%s37809_s0 + $0x1e54] sm:$0xff]   ;;  %24518 = vst [vmem:[%s37810_s1 + $0x2194] sm:$0xff] %v28728_v17 }
 0x102   :  { %v28707_v60 = vld [vmem:[%s37809_s0 + $0xde0] sm:$0xff]   ;;  %24430 = vst [vmem:[%s37810_s1 + $0x12c0] sm:$0xff] %v28706_v59  ;;  %24522 = vst [vmem:[%s37810_s1 + $0x2b4] sm:$0xff] %v28729_v18  ;;  %v28731_v20 = vld [vmem:[%s37809_s0 + $0x1634] sm:$0xff]  }
 0x103   :  { %v28708_v61 = vld [vmem:[%s37809_s0 + $0x5c0] sm:$0xff]   ;;  %24434 = vst [vmem:[%s37810_s1 + $0x1ae0] sm:$0xff] %v28707_v60  ;;  %v28732_v21 = vld [vmem:[%s37809_s0 + $0xe14] sm:$0xff]   ;;  %24526 = vst [vmem:[%s37810_s1 + $0xad4] sm:$0xff] %v28730_v19 }
 0x104   :  { %v28709_v62 = vld [vmem:[%s37809_s0 + $0x24a0] sm:$0xff]   ;;  %24438 = vst [vmem:[%s37810_s1 + $0x2300] sm:$0xff] %v28708_v61  ;;  %v28733_v22 = vld [vmem:[%s37809_s0 + $0x5f4] sm:$0xff]   ;;  %24530 = vst [vmem:[%s37810_s1 + $0x12f4] sm:$0xff] %v28731_v20 }
 0x105   :  { %v28710_v63 = vld [vmem:[%s37809_s0 + $0x1c80] sm:$0xff]   ;;  %24442 = vst [vmem:[%s37810_s1 + $0x420] sm:$0xff] %v28709_v62  ;;  %24534 = vst [vmem:[%s37810_s1 + $0x1b14] sm:$0xff] %v28732_v21  ;;  %v28734_v23 = vld [vmem:[%s37809_s0 + $0x24d4] sm:$0xff]  }
 0x106   :  { %v28711_v0 = vld [vmem:[%s37809_s0 + $0x1460] sm:$0xff]   ;;  %24446 = vst [vmem:[%s37810_s1 + $0xc40] sm:$0xff] %v28710_v63  ;;  %v28735_v24 = vld [vmem:[%s37809_s0 + $0x1cb4] sm:$0xff]   ;;  %24538 = vst [vmem:[%s37810_s1 + $0x2334] sm:$0xff] %v28733_v22 }
 0x107   :  { %v28712_v1 = vld [vmem:[%s37809_s0 + $0xc40] sm:$0xff]   ;;  %24450 = vst [vmem:[%s37810_s1 + $0x1460] sm:$0xff] %v28711_v0  ;;  %v28736_v25 = vld [vmem:[%s37809_s0 + $0x1494] sm:$0xff]   ;;  %24542 = vst [vmem:[%s37810_s1 + $0x454] sm:$0xff] %v28734_v23 }
 0x108   :  { %v28713_v2 = vld [vmem:[%s37809_s0 + $0x420] sm:$0xff]   ;;  %24454 = vst [vmem:[%s37810_s1 + $0x1c80] sm:$0xff] %v28712_v1  ;;  %24546 = vst [vmem:[%s37810_s1 + $0xc74] sm:$0xff] %v28735_v24  ;;  %v28737_v26 = vld [vmem:[%s37809_s0 + $0xc74] sm:$0xff]  }
 0x109   :  { %v28714_v3 = vld [vmem:[%s37809_s0 + $0x2300] sm:$0xff]   ;;  %24458 = vst [vmem:[%s37810_s1 + $0x24a0] sm:$0xff] %v28713_v2  ;;  %v28738_v27 = vld [vmem:[%s37809_s0 + $0x454] sm:$0xff]   ;;  %24550 = vst [vmem:[%s37810_s1 + $0x1494] sm:$0xff] %v28736_v25 }
 0x10a   :  { %v28715_v4 = vld [vmem:[%s37809_s0 + $0x1ae0] sm:$0xff]   ;;  %24462 = vst [vmem:[%s37810_s1 + $0x5c0] sm:$0xff] %v28714_v3  ;;  %v28739_v28 = vld [vmem:[%s37809_s0 + $0x2334] sm:$0xff]   ;;  %24554 = vst [vmem:[%s37810_s1 + $0x1cb4] sm:$0xff] %v28737_v26 }
 0x10b   :  { %v28716_v5 = vld [vmem:[%s37809_s0 + $0x12c0] sm:$0xff]   ;;  %24466 = vst [vmem:[%s37810_s1 + $0xde0] sm:$0xff] %v28715_v4  ;;  %24558 = vst [vmem:[%s37810_s1 + $0x24d4] sm:$0xff] %v28738_v27  ;;  %v28740_v29 = vld [vmem:[%s37809_s0 + $0x1b14] sm:$0xff]  }
 0x10c   :  { %v28717_v6 = vld [vmem:[%s37809_s0 + $0xaa0] sm:$0xff]   ;;  %24470 = vst [vmem:[%s37810_s1 + $0x1600] sm:$0xff] %v28716_v5  ;;  %v28741_v30 = vld [vmem:[%s37809_s0 + $0x12f4] sm:$0xff]   ;;  %24562 = vst [vmem:[%s37810_s1 + $0x5f4] sm:$0xff] %v28739_v28 }
 0x10d   :  { %v28718_v7 = vld [vmem:[%s37809_s0 + $0x280] sm:$0xff]   ;;  %24474 = vst [vmem:[%s37810_s1 + $0x1e20] sm:$0xff] %v28717_v6  ;;  %v28742_v31 = vld [vmem:[%s37809_s0 + $0xad4] sm:$0xff]   ;;  %24566 = vst [vmem:[%s37810_s1 + $0xe14] sm:$0xff] %v28740_v29 }
 0x10e   :  { %v28719_v8 = vld [vmem:[%s37809_s0 + $0x2160] sm:$0xff]   ;;  %24478 = vst [vmem:[%s37810_s1 + $0x2640] sm:$0xff] %v28718_v7  ;;  %24570 = vst [vmem:[%s37810_s1 + $0x1634] sm:$0xff] %v28741_v30  ;;  %v28743_v32 = vld [vmem:[%s37809_s0 + $0x2b4] sm:$0xff]  }
 0x10f   :  { %v28720_v9 = vld [vmem:[%s37809_s0 + $0x1940] sm:$0xff]   ;;  %24482 = vst [vmem:[%s37810_s1 + $0x760] sm:$0xff] %v28719_v8  ;;  %v28744_v33 = vld [vmem:[%s37809_s0 + $0x2194] sm:$0xff]   ;;  %24574 = vst [vmem:[%s37810_s1 + $0x1e54] sm:$0xff] %v28742_v31 }
 0x110   :  { %v28721_v10 = vld [vmem:[%s37809_s0 + $0x1120] sm:$0xff]   ;;  %24486 = vst [vmem:[%s37810_s1 + $0xf80] sm:$0xff] %v28720_v9  ;;  %v28745_v34 = vld [vmem:[%s37809_s0 + $0x1974] sm:$0xff]   ;;  %24578 = vst [vmem:[%s37810_s1 + $0x2674] sm:$0xff] %v28743_v32 }
 0x111   :  { %v28722_v11 = vld [vmem:[%s37809_s0 + $0x900] sm:$0xff]   ;;  %24490 = vst [vmem:[%s37810_s1 + $0x17a0] sm:$0xff] %v28721_v10  ;;  %24582 = vst [vmem:[%s37810_s1 + $0x794] sm:$0xff] %v28744_v33  ;;  %v28746_v35 = vld [vmem:[%s37809_s0 + $0x1154] sm:$0xff]  }
 0x112   :  { %v28723_v12 = vld [vmem:[%s37809_s0 + $0xe0] sm:$0xff]   ;;  %24494 = vst [vmem:[%s37810_s1 + $0x1fc0] sm:$0xff] %v28722_v11  ;;  %v28747_v36 = vld [vmem:[%s37809_s0 + $0x934] sm:$0xff]   ;;  %24586 = vst [vmem:[%s37810_s1 + $0xfb4] sm:$0xff] %v28745_v34 }
 0x113   :  { %24498 = vst [vmem:[%s37810_s1 + $0x27e0] sm:$0xff] %v28723_v12  ;;  %v28748_v37 = vld [vmem:[%s37809_s0 + $0x114] sm:$0xff]   ;;  %24590 = vst [vmem:[%s37810_s1 + $0x17d4] sm:$0xff] %v28746_v35  ;;  %v28749_v38 = vld [vmem:[%s37809_s0 + $0x2848] sm:$0xff]  }
 0x114   :  { %24594 = vst [vmem:[%s37810_s1 + $0x1ff4] sm:$0xff] %v28747_v36  ;;  %v28750_v39 = vld [vmem:[%s37809_s0 + $0x2028] sm:$0xff]   ;;  %24598 = vst [vmem:[%s37810_s1 + $0x2814] sm:$0xff] %v28748_v37  ;;  %v28774_v63 = vld [vmem:[%s37809_s0 + $0x287c] sm:$0xff]  }
 0x115   :  { %v28751_v40 = vld [vmem:[%s37809_s0 + $0x1808] sm:$0xff]   ;;  %24602 = vst [vmem:[%s37810_s1 + $0x148] sm:$0xff] %v28749_v38  ;;  %24606 = vst [vmem:[%s37810_s1 + $0x968] sm:$0xff] %v28750_v39  ;;  %v28775_v0 = vld [vmem:[%s37809_s0 + $0x205c] sm:$0xff]  }
 0x116   :  { %v28752_v41 = vld [vmem:[%s37809_s0 + $0xfe8] sm:$0xff]   ;;  %24610 = vst [vmem:[%s37810_s1 + $0x1188] sm:$0xff] %v28751_v40  ;;  %24702 = vst [vmem:[%s37810_s1 + $0x17c] sm:$0xff] %v28774_v63  ;;  %v28776_v1 = vld [vmem:[%s37809_s0 + $0x183c] sm:$0xff]  }
 0x117   :  { %v28753_v42 = vld [vmem:[%s37809_s0 + $0x7c8] sm:$0xff]   ;;  %24614 = vst [vmem:[%s37810_s1 + $0x19a8] sm:$0xff] %v28752_v41  ;;  %v28777_v2 = vld [vmem:[%s37809_s0 + $0x101c] sm:$0xff]   ;;  %24706 = vst [vmem:[%s37810_s1 + $0x99c] sm:$0xff] %v28775_v0 }
 0x118   :  { %v28754_v43 = vld [vmem:[%s37809_s0 + $0x26a8] sm:$0xff]   ;;  %24618 = vst [vmem:[%s37810_s1 + $0x21c8] sm:$0xff] %v28753_v42  ;;  %v28778_v3 = vld [vmem:[%s37809_s0 + $0x7fc] sm:$0xff]   ;;  %24710 = vst [vmem:[%s37810_s1 + $0x11bc] sm:$0xff] %v28776_v1 }
 0x119   :  { %v28755_v44 = vld [vmem:[%s37809_s0 + $0x1e88] sm:$0xff]   ;;  %24622 = vst [vmem:[%s37810_s1 + $0x2e8] sm:$0xff] %v28754_v43  ;;  %24714 = vst [vmem:[%s37810_s1 + $0x19dc] sm:$0xff] %v28777_v2  ;;  %v28779_v4 = vld [vmem:[%s37809_s0 + $0x26dc] sm:$0xff]  }
 0x11a   :  { %v28756_v45 = vld [vmem:[%s37809_s0 + $0x1668] sm:$0xff]   ;;  %24626 = vst [vmem:[%s37810_s1 + $0xb08] sm:$0xff] %v28755_v44  ;;  %v28780_v5 = vld [vmem:[%s37809_s0 + $0x1ebc] sm:$0xff]   ;;  %24718 = vst [vmem:[%s37810_s1 + $0x21fc] sm:$0xff] %v28778_v3 }
 0x11b   :  { %v28757_v46 = vld [vmem:[%s37809_s0 + $0xe48] sm:$0xff]   ;;  %24630 = vst [vmem:[%s37810_s1 + $0x1328] sm:$0xff] %v28756_v45  ;;  %v28781_v6 = vld [vmem:[%s37809_s0 + $0x169c] sm:$0xff]   ;;  %24722 = vst [vmem:[%s37810_s1 + $0x31c] sm:$0xff] %v28779_v4 }
 0x11c   :  { %v28758_v47 = vld [vmem:[%s37809_s0 + $0x628] sm:$0xff]   ;;  %24634 = vst [vmem:[%s37810_s1 + $0x1b48] sm:$0xff] %v28757_v46  ;;  %24726 = vst [vmem:[%s37810_s1 + $0xb3c] sm:$0xff] %v28780_v5  ;;  %v28782_v7 = vld [vmem:[%s37809_s0 + $0xe7c] sm:$0xff]  }
 0x11d   :  { %v28759_v48 = vld [vmem:[%s37809_s0 + $0x2508] sm:$0xff]   ;;  %24638 = vst [vmem:[%s37810_s1 + $0x2368] sm:$0xff] %v28758_v47  ;;  %v28783_v8 = vld [vmem:[%s37809_s0 + $0x65c] sm:$0xff]   ;;  %24730 = vst [vmem:[%s37810_s1 + $0x135c] sm:$0xff] %v28781_v6 }
 0x11e   :  { %v28760_v49 = vld [vmem:[%s37809_s0 + $0x1ce8] sm:$0xff]   ;;  %24642 = vst [vmem:[%s37810_s1 + $0x488] sm:$0xff] %v28759_v48  ;;  %v28784_v9 = vld [vmem:[%s37809_s0 + $0x253c] sm:$0xff]   ;;  %24734 = vst [vmem:[%s37810_s1 + $0x1b7c] sm:$0xff] %v28782_v7 }
 0x11f   :  { %v28761_v50 = vld [vmem:[%s37809_s0 + $0x14c8] sm:$0xff]   ;;  %24646 = vst [vmem:[%s37810_s1 + $0xca8] sm:$0xff] %v28760_v49  ;;  %24738 = vst [vmem:[%s37810_s1 + $0x239c] sm:$0xff] %v28783_v8  ;;  %v28785_v10 = vld [vmem:[%s37809_s0 + $0x1d1c] sm:$0xff]  }
 0x120   :  { %v28762_v51 = vld [vmem:[%s37809_s0 + $0xca8] sm:$0xff]   ;;  %24650 = vst [vmem:[%s37810_s1 + $0x14c8] sm:$0xff] %v28761_v50  ;;  %v28786_v11 = vld [vmem:[%s37809_s0 + $0x14fc] sm:$0xff]   ;;  %24742 = vst [vmem:[%s37810_s1 + $0x4bc] sm:$0xff] %v28784_v9 }
 0x121   :  { %v28763_v52 = vld [vmem:[%s37809_s0 + $0x488] sm:$0xff]   ;;  %24654 = vst [vmem:[%s37810_s1 + $0x1ce8] sm:$0xff] %v28762_v51  ;;  %v28787_v12 = vld [vmem:[%s37809_s0 + $0xcdc] sm:$0xff]   ;;  %24746 = vst [vmem:[%s37810_s1 + $0xcdc] sm:$0xff] %v28785_v10 }
 0x122   :  { %v28764_v53 = vld [vmem:[%s37809_s0 + $0x2368] sm:$0xff]   ;;  %24658 = vst [vmem:[%s37810_s1 + $0x2508] sm:$0xff] %v28763_v52  ;;  %24750 = vst [vmem:[%s37810_s1 + $0x14fc] sm:$0xff] %v28786_v11  ;;  %v28788_v13 = vld [vmem:[%s37809_s0 + $0x4bc] sm:$0xff]  }
 0x123   :  { %v28765_v54 = vld [vmem:[%s37809_s0 + $0x1b48] sm:$0xff]   ;;  %24662 = vst [vmem:[%s37810_s1 + $0x628] sm:$0xff] %v28764_v53  ;;  %v28789_v14 = vld [vmem:[%s37809_s0 + $0x239c] sm:$0xff]   ;;  %24754 = vst [vmem:[%s37810_s1 + $0x1d1c] sm:$0xff] %v28787_v12 }
 0x124   :  { %v28766_v55 = vld [vmem:[%s37809_s0 + $0x1328] sm:$0xff]   ;;  %24666 = vst [vmem:[%s37810_s1 + $0xe48] sm:$0xff] %v28765_v54  ;;  %v28790_v15 = vld [vmem:[%s37809_s0 + $0x1b7c] sm:$0xff]   ;;  %24758 = vst [vmem:[%s37810_s1 + $0x253c] sm:$0xff] %v28788_v13 }
 0x125   :  { %v28767_v56 = vld [vmem:[%s37809_s0 + $0xb08] sm:$0xff]   ;;  %24670 = vst [vmem:[%s37810_s1 + $0x1668] sm:$0xff] %v28766_v55  ;;  %24762 = vst [vmem:[%s37810_s1 + $0x65c] sm:$0xff] %v28789_v14  ;;  %v28791_v16 = vld [vmem:[%s37809_s0 + $0x135c] sm:$0xff]  }
 0x126   :  { %v28768_v57 = vld [vmem:[%s37809_s0 + $0x2e8] sm:$0xff]   ;;  %24674 = vst [vmem:[%s37810_s1 + $0x1e88] sm:$0xff] %v28767_v56  ;;  %v28792_v17 = vld [vmem:[%s37809_s0 + $0xb3c] sm:$0xff]   ;;  %24766 = vst [vmem:[%s37810_s1 + $0xe7c] sm:$0xff] %v28790_v15 }
 0x127   :  { %v28769_v58 = vld [vmem:[%s37809_s0 + $0x21c8] sm:$0xff]   ;;  %24678 = vst [vmem:[%s37810_s1 + $0x26a8] sm:$0xff] %v28768_v57  ;;  %v28793_v18 = vld [vmem:[%s37809_s0 + $0x31c] sm:$0xff]   ;;  %24770 = vst [vmem:[%s37810_s1 + $0x169c] sm:$0xff] %v28791_v16 }
 0x128   :  { %v28770_v59 = vld [vmem:[%s37809_s0 + $0x19a8] sm:$0xff]   ;;  %24682 = vst [vmem:[%s37810_s1 + $0x7c8] sm:$0xff] %v28769_v58  ;;  %24774 = vst [vmem:[%s37810_s1 + $0x1ebc] sm:$0xff] %v28792_v17  ;;  %v28794_v19 = vld [vmem:[%s37809_s0 + $0x21fc] sm:$0xff]  }
 0x129   :  { %v28771_v60 = vld [vmem:[%s37809_s0 + $0x1188] sm:$0xff]   ;;  %24686 = vst [vmem:[%s37810_s1 + $0xfe8] sm:$0xff] %v28770_v59  ;;  %v28795_v20 = vld [vmem:[%s37809_s0 + $0x19dc] sm:$0xff]   ;;  %24778 = vst [vmem:[%s37810_s1 + $0x26dc] sm:$0xff] %v28793_v18 }
 0x12a   :  { %v28772_v61 = vld [vmem:[%s37809_s0 + $0x968] sm:$0xff]   ;;  %24690 = vst [vmem:[%s37810_s1 + $0x1808] sm:$0xff] %v28771_v60  ;;  %v28796_v21 = vld [vmem:[%s37809_s0 + $0x11bc] sm:$0xff]   ;;  %24782 = vst [vmem:[%s37810_s1 + $0x7fc] sm:$0xff] %v28794_v19 }
 0x12b   :  { %v28773_v62 = vld [vmem:[%s37809_s0 + $0x148] sm:$0xff]   ;;  %24694 = vst [vmem:[%s37810_s1 + $0x2028] sm:$0xff] %v28772_v61  ;;  %24786 = vst [vmem:[%s37810_s1 + $0x101c] sm:$0xff] %v28795_v20  ;;  %v28797_v22 = vld [vmem:[%s37809_s0 + $0x99c] sm:$0xff]  }
 0x12c   :  { %24698 = vst [vmem:[%s37810_s1 + $0x2848] sm:$0xff] %v28773_v62  ;;  %v28798_v23 = vld [vmem:[%s37809_s0 + $0x17c] sm:$0xff]   ;;  %24790 = vst [vmem:[%s37810_s1 + $0x183c] sm:$0xff] %v28796_v21  ;;  %v28824_v49 = vld [vmem:[%s37809_s0 + $0x274c] sm:$0xff]  }
 0x12d   :  { %24794 = vst [vmem:[%s37810_s1 + $0x205c] sm:$0xff] %v28797_v22  ;;  %24798 = vst [vmem:[%s37810_s1 + $0x287c] sm:$0xff] %v28798_v23  ;;  %v28799_v24 = vld [vmem:[%s37809_s0 + $0x2718] sm:$0xff]   ;;  %v28825_v50 = vld [vmem:[%s37809_s0 + $0x1f2c] sm:$0xff]  }
 0x12e   :  { %v28800_v25 = vld [vmem:[%s37809_s0 + $0x1ef8] sm:$0xff]   ;;  %25002 = vst [vmem:[%s37810_s1 + $0x18] sm:$0xff] %v28799_v24  ;;  %25102 = vst [vmem:[%s37810_s1 + $0x4c] sm:$0xff] %v28824_v49  ;;  %v28826_v51 = vld [vmem:[%s37809_s0 + $0x170c] sm:$0xff]  }
 0x12f   :  { %v28801_v26 = vld [vmem:[%s37809_s0 + $0x16d8] sm:$0xff]   ;;  %25006 = vst [vmem:[%s37810_s1 + $0x838] sm:$0xff] %v28800_v25  ;;  %v28827_v52 = vld [vmem:[%s37809_s0 + $0xeec] sm:$0xff]   ;;  %25106 = vst [vmem:[%s37810_s1 + $0x86c] sm:$0xff] %v28825_v50 }
 0x130   :  { %v28802_v27 = vld [vmem:[%s37809_s0 + $0xeb8] sm:$0xff]   ;;  %25010 = vst [vmem:[%s37810_s1 + $0x1058] sm:$0xff] %v28801_v26  ;;  %v28828_v53 = vld [vmem:[%s37809_s0 + $0x6cc] sm:$0xff]   ;;  %25110 = vst [vmem:[%s37810_s1 + $0x108c] sm:$0xff] %v28826_v51 }
 0x131   :  { %v28803_v28 = vld [vmem:[%s37809_s0 + $0x698] sm:$0xff]   ;;  %25014 = vst [vmem:[%s37810_s1 + $0x1878] sm:$0xff] %v28802_v27  ;;  %25114 = vst [vmem:[%s37810_s1 + $0x18ac] sm:$0xff] %v28827_v52  ;;  %v28829_v54 = vld [vmem:[%s37809_s0 + $0x25ac] sm:$0xff]  }
 0x132   :  { %v28804_v29 = vld [vmem:[%s37809_s0 + $0x2578] sm:$0xff]   ;;  %25018 = vst [vmem:[%s37810_s1 + $0x2098] sm:$0xff] %v28803_v28  ;;  %v28830_v55 = vld [vmem:[%s37809_s0 + $0x1d8c] sm:$0xff]   ;;  %25118 = vst [vmem:[%s37810_s1 + $0x20cc] sm:$0xff] %v28828_v53 }
 0x133   :  { %v28805_v30 = vld [vmem:[%s37809_s0 + $0x1d58] sm:$0xff]   ;;  %25022 = vst [vmem:[%s37810_s1 + $0x1b8] sm:$0xff] %v28804_v29  ;;  %v28831_v56 = vld [vmem:[%s37809_s0 + $0x156c] sm:$0xff]   ;;  %25122 = vst [vmem:[%s37810_s1 + $0x1ec] sm:$0xff] %v28829_v54 }
 0x134   :  { %v28806_v31 = vld [vmem:[%s37809_s0 + $0x1538] sm:$0xff]   ;;  %25026 = vst [vmem:[%s37810_s1 + $0x9d8] sm:$0xff] %v28805_v30  ;;  %25126 = vst [vmem:[%s37810_s1 + $0xa0c] sm:$0xff] %v28830_v55  ;;  %v28832_v57 = vld [vmem:[%s37809_s0 + $0xd4c] sm:$0xff]  }
 0x135   :  { %v28807_v32 = vld [vmem:[%s37809_s0 + $0xd18] sm:$0xff]   ;;  %25030 = vst [vmem:[%s37810_s1 + $0x11f8] sm:$0xff] %v28806_v31  ;;  %v28833_v58 = vld [vmem:[%s37809_s0 + $0x52c] sm:$0xff]   ;;  %25130 = vst [vmem:[%s37810_s1 + $0x122c] sm:$0xff] %v28831_v56 }
 0x136   :  { %v28808_v33 = vld [vmem:[%s37809_s0 + $0x4f8] sm:$0xff]   ;;  %25034 = vst [vmem:[%s37810_s1 + $0x1a18] sm:$0xff] %v28807_v32  ;;  %v28834_v59 = vld [vmem:[%s37809_s0 + $0x240c] sm:$0xff]   ;;  %25134 = vst [vmem:[%s37810_s1 + $0x1a4c] sm:$0xff] %v28832_v57 }
 0x137   :  { %v28809_v34 = vld [vmem:[%s37809_s0 + $0x23d8] sm:$0xff]   ;;  %25038 = vst [vmem:[%s37810_s1 + $0x2238] sm:$0xff] %v28808_v33  ;;  %25138 = vst [vmem:[%s37810_s1 + $0x226c] sm:$0xff] %v28833_v58  ;;  %v28835_v60 = vld [vmem:[%s37809_s0 + $0x1bec] sm:$0xff]  }
 0x138   :  { %v28810_v35 = vld [vmem:[%s37809_s0 + $0x1bb8] sm:$0xff]   ;;  %25042 = vst [vmem:[%s37810_s1 + $0x358] sm:$0xff] %v28809_v34  ;;  %v28836_v61 = vld [vmem:[%s37809_s0 + $0x13cc] sm:$0xff]   ;;  %25142 = vst [vmem:[%s37810_s1 + $0x38c] sm:$0xff] %v28834_v59 }
 0x139   :  { %v28811_v36 = vld [vmem:[%s37809_s0 + $0x1398] sm:$0xff]   ;;  %25046 = vst [vmem:[%s37810_s1 + $0xb78] sm:$0xff] %v28810_v35  ;;  %v28837_v62 = vld [vmem:[%s37809_s0 + $0xbac] sm:$0xff]   ;;  %25146 = vst [vmem:[%s37810_s1 + $0xbac] sm:$0xff] %v28835_v60 }
 0x13a   :  { %v28812_v37 = vld [vmem:[%s37809_s0 + $0xb78] sm:$0xff]   ;;  %25050 = vst [vmem:[%s37810_s1 + $0x1398] sm:$0xff] %v28811_v36  ;;  %25150 = vst [vmem:[%s37810_s1 + $0x13cc] sm:$0xff] %v28836_v61  ;;  %v28838_v63 = vld [vmem:[%s37809_s0 + $0x38c] sm:$0xff]  }
 0x13b   :  { %v28813_v38 = vld [vmem:[%s37809_s0 + $0x358] sm:$0xff]   ;;  %25054 = vst [vmem:[%s37810_s1 + $0x1bb8] sm:$0xff] %v28812_v37  ;;  %v28839_v0 = vld [vmem:[%s37809_s0 + $0x226c] sm:$0xff]   ;;  %25154 = vst [vmem:[%s37810_s1 + $0x1bec] sm:$0xff] %v28837_v62 }
 0x13c   :  { %v28814_v39 = vld [vmem:[%s37809_s0 + $0x2238] sm:$0xff]   ;;  %25058 = vst [vmem:[%s37810_s1 + $0x23d8] sm:$0xff] %v28813_v38  ;;  %v28840_v1 = vld [vmem:[%s37809_s0 + $0x1a4c] sm:$0xff]   ;;  %25158 = vst [vmem:[%s37810_s1 + $0x240c] sm:$0xff] %v28838_v63 }
 0x13d   :  { %v28815_v40 = vld [vmem:[%s37809_s0 + $0x1a18] sm:$0xff]   ;;  %25062 = vst [vmem:[%s37810_s1 + $0x4f8] sm:$0xff] %v28814_v39  ;;  %25162 = vst [vmem:[%s37810_s1 + $0x52c] sm:$0xff] %v28839_v0  ;;  %v28841_v2 = vld [vmem:[%s37809_s0 + $0x122c] sm:$0xff]  }
 0x13e   :  { %v28816_v41 = vld [vmem:[%s37809_s0 + $0x11f8] sm:$0xff]   ;;  %25066 = vst [vmem:[%s37810_s1 + $0xd18] sm:$0xff] %v28815_v40  ;;  %v28842_v3 = vld [vmem:[%s37809_s0 + $0xa0c] sm:$0xff]   ;;  %25166 = vst [vmem:[%s37810_s1 + $0xd4c] sm:$0xff] %v28840_v1 }
 0x13f   :  { %v28817_v42 = vld [vmem:[%s37809_s0 + $0x9d8] sm:$0xff]   ;;  %25070 = vst [vmem:[%s37810_s1 + $0x1538] sm:$0xff] %v28816_v41  ;;  %v28843_v4 = vld [vmem:[%s37809_s0 + $0x1ec] sm:$0xff]   ;;  %25170 = vst [vmem:[%s37810_s1 + $0x156c] sm:$0xff] %v28841_v2 }
 0x140   :  { %v28818_v43 = vld [vmem:[%s37809_s0 + $0x1b8] sm:$0xff]   ;;  %25074 = vst [vmem:[%s37810_s1 + $0x1d58] sm:$0xff] %v28817_v42  ;;  %25174 = vst [vmem:[%s37810_s1 + $0x1d8c] sm:$0xff] %v28842_v3  ;;  %v28844_v5 = vld [vmem:[%s37809_s0 + $0x20cc] sm:$0xff]  }
 0x141   :  { %v28819_v44 = vld [vmem:[%s37809_s0 + $0x2098] sm:$0xff]   ;;  %25078 = vst [vmem:[%s37810_s1 + $0x2578] sm:$0xff] %v28818_v43  ;;  %v28845_v6 = vld [vmem:[%s37809_s0 + $0x18ac] sm:$0xff]   ;;  %25178 = vst [vmem:[%s37810_s1 + $0x25ac] sm:$0xff] %v28843_v4 }
 0x142   :  { %v28820_v45 = vld [vmem:[%s37809_s0 + $0x1878] sm:$0xff]   ;;  %25082 = vst [vmem:[%s37810_s1 + $0x698] sm:$0xff] %v28819_v44  ;;  %v28846_v7 = vld [vmem:[%s37809_s0 + $0x108c] sm:$0xff]   ;;  %25182 = vst [vmem:[%s37810_s1 + $0x6cc] sm:$0xff] %v28844_v5 }
 0x143   :  { %v28821_v46 = vld [vmem:[%s37809_s0 + $0x1058] sm:$0xff]   ;;  %25086 = vst [vmem:[%s37810_s1 + $0xeb8] sm:$0xff] %v28820_v45  ;;  %25186 = vst [vmem:[%s37810_s1 + $0xeec] sm:$0xff] %v28845_v6  ;;  %v28847_v8 = vld [vmem:[%s37809_s0 + $0x86c] sm:$0xff]  }
 0x144   :  { %v28822_v47 = vld [vmem:[%s37809_s0 + $0x838] sm:$0xff]   ;;  %25090 = vst [vmem:[%s37810_s1 + $0x16d8] sm:$0xff] %v28821_v46  ;;  %v28848_v9 = vld [vmem:[%s37809_s0 + $0x4c] sm:$0xff]   ;;  %25190 = vst [vmem:[%s37810_s1 + $0x170c] sm:$0xff] %v28846_v7 }
 0x145   :  { %v28823_v48 = vld [vmem:[%s37809_s0 + $0x18] sm:$0xff]   ;;  %25094 = vst [vmem:[%s37810_s1 + $0x1ef8] sm:$0xff] %v28822_v47  ;;  %v28849_v10 = vld [vmem:[%s37809_s0 + $0x2780] sm:$0xff]   ;;  %25194 = vst [vmem:[%s37810_s1 + $0x1f2c] sm:$0xff] %v28847_v8 }
 0x146   :  { %25098 = vst [vmem:[%s37810_s1 + $0x2718] sm:$0xff] %v28823_v48  ;;  %25198 = vst [vmem:[%s37810_s1 + $0x274c] sm:$0xff] %v28848_v9  ;;  %v28850_v11 = vld [vmem:[%s37809_s0 + $0x1f60] sm:$0xff]   ;;  %v28874_v35 = vld [vmem:[%s37809_s0 + $0x27b4] sm:$0xff]  }
 0x147   :  { %v28851_v12 = vld [vmem:[%s37809_s0 + $0x1740] sm:$0xff]   ;;  %25202 = vst [vmem:[%s37810_s1 + $0x80] sm:$0xff] %v28849_v10  ;;  %25206 = vst [vmem:[%s37810_s1 + $0x8a0] sm:$0xff] %v28850_v11  ;;  %v28875_v36 = vld [vmem:[%s37809_s0 + $0x1f94] sm:$0xff]  }
 0x148   :  { %v28852_v13 = vld [vmem:[%s37809_s0 + $0xf20] sm:$0xff]   ;;  %25210 = vst [vmem:[%s37810_s1 + $0x10c0] sm:$0xff] %v28851_v12  ;;  %v28876_v37 = vld [vmem:[%s37809_s0 + $0x1774] sm:$0xff]   ;;  %25302 = vst [vmem:[%s37810_s1 + $0xb4] sm:$0xff] %v28874_v35 }
 0x149   :  { %v28853_v14 = vld [vmem:[%s37809_s0 + $0x700] sm:$0xff]   ;;  %25214 = vst [vmem:[%s37810_s1 + $0x18e0] sm:$0xff] %v28852_v13  ;;  %25306 = vst [vmem:[%s37810_s1 + $0x8d4] sm:$0xff] %v28875_v36  ;;  %v28877_v38 = vld [vmem:[%s37809_s0 + $0xf54] sm:$0xff]  }
 0x14a   :  { %v28854_v15 = vld [vmem:[%s37809_s0 + $0x25e0] sm:$0xff]   ;;  %25218 = vst [vmem:[%s37810_s1 + $0x2100] sm:$0xff] %v28853_v14  ;;  %v28878_v39 = vld [vmem:[%s37809_s0 + $0x734] sm:$0xff]   ;;  %25310 = vst [vmem:[%s37810_s1 + $0x10f4] sm:$0xff] %v28876_v37 }
 0x14b   :  { %v28855_v16 = vld [vmem:[%s37809_s0 + $0x1dc0] sm:$0xff]   ;;  %25222 = vst [vmem:[%s37810_s1 + $0x220] sm:$0xff] %v28854_v15  ;;  %v28879_v40 = vld [vmem:[%s37809_s0 + $0x2614] sm:$0xff]   ;;  %25314 = vst [vmem:[%s37810_s1 + $0x1914] sm:$0xff] %v28877_v38 }
 0x14c   :  { %v28856_v17 = vld [vmem:[%s37809_s0 + $0x15a0] sm:$0xff]   ;;  %25226 = vst [vmem:[%s37810_s1 + $0xa40] sm:$0xff] %v28855_v16  ;;  %25318 = vst [vmem:[%s37810_s1 + $0x2134] sm:$0xff] %v28878_v39  ;;  %v28880_v41 = vld [vmem:[%s37809_s0 + $0x1df4] sm:$0xff]  }
 0x14d   :  { %v28857_v18 = vld [vmem:[%s37809_s0 + $0xd80] sm:$0xff]   ;;  %25230 = vst [vmem:[%s37810_s1 + $0x1260] sm:$0xff] %v28856_v17  ;;  %v28881_v42 = vld [vmem:[%s37809_s0 + $0x15d4] sm:$0xff]   ;;  %25322 = vst [vmem:[%s37810_s1 + $0x254] sm:$0xff] %v28879_v40 }
 0x14e   :  { %v28858_v19 = vld [vmem:[%s37809_s0 + $0x560] sm:$0xff]   ;;  %25234 = vst [vmem:[%s37810_s1 + $0x1a80] sm:$0xff] %v28857_v18  ;;  %v28882_v43 = vld [vmem:[%s37809_s0 + $0xdb4] sm:$0xff]   ;;  %25326 = vst [vmem:[%s37810_s1 + $0xa74] sm:$0xff] %v28880_v41 }
 0x14f   :  { %v28859_v20 = vld [vmem:[%s37809_s0 + $0x2440] sm:$0xff]   ;;  %25238 = vst [vmem:[%s37810_s1 + $0x22a0] sm:$0xff] %v28858_v19  ;;  %25330 = vst [vmem:[%s37810_s1 + $0x1294] sm:$0xff] %v28881_v42  ;;  %v28883_v44 = vld [vmem:[%s37809_s0 + $0x594] sm:$0xff]  }
 0x150   :  { %v28860_v21 = vld [vmem:[%s37809_s0 + $0x1c20] sm:$0xff]   ;;  %25242 = vst [vmem:[%s37810_s1 + $0x3c0] sm:$0xff] %v28859_v20  ;;  %v28884_v45 = vld [vmem:[%s37809_s0 + $0x2474] sm:$0xff]   ;;  %25334 = vst [vmem:[%s37810_s1 + $0x1ab4] sm:$0xff] %v28882_v43 }
 0x151   :  { %v28861_v22 = vld [vmem:[%s37809_s0 + $0x1400] sm:$0xff]   ;;  %25246 = vst [vmem:[%s37810_s1 + $0xbe0] sm:$0xff] %v28860_v21  ;;  %v28885_v46 = vld [vmem:[%s37809_s0 + $0x1c54] sm:$0xff]   ;;  %25338 = vst [vmem:[%s37810_s1 + $0x22d4] sm:$0xff] %v28883_v44 }
 0x152   :  { %v28862_v23 = vld [vmem:[%s37809_s0 + $0xbe0] sm:$0xff]   ;;  %25250 = vst [vmem:[%s37810_s1 + $0x1400] sm:$0xff] %v28861_v22  ;;  %25342 = vst [vmem:[%s37810_s1 + $0x3f4] sm:$0xff] %v28884_v45  ;;  %v28886_v47 = vld [vmem:[%s37809_s0 + $0x1434] sm:$0xff]  }
 0x153   :  { %v28863_v24 = vld [vmem:[%s37809_s0 + $0x3c0] sm:$0xff]   ;;  %25254 = vst [vmem:[%s37810_s1 + $0x1c20] sm:$0xff] %v28862_v23  ;;  %v28887_v48 = vld [vmem:[%s37809_s0 + $0xc14] sm:$0xff]   ;;  %25346 = vst [vmem:[%s37810_s1 + $0xc14] sm:$0xff] %v28885_v46 }
 0x154   :  { %v28864_v25 = vld [vmem:[%s37809_s0 + $0x22a0] sm:$0xff]   ;;  %25258 = vst [vmem:[%s37810_s1 + $0x2440] sm:$0xff] %v28863_v24  ;;  %v28888_v49 = vld [vmem:[%s37809_s0 + $0x3f4] sm:$0xff]   ;;  %25350 = vst [vmem:[%s37810_s1 + $0x1434] sm:$0xff] %v28886_v47 }
 0x155   :  { %v28865_v26 = vld [vmem:[%s37809_s0 + $0x1a80] sm:$0xff]   ;;  %25262 = vst [vmem:[%s37810_s1 + $0x560] sm:$0xff] %v28864_v25  ;;  %25354 = vst [vmem:[%s37810_s1 + $0x1c54] sm:$0xff] %v28887_v48  ;;  %v28889_v50 = vld [vmem:[%s37809_s0 + $0x22d4] sm:$0xff]  }
 0x156   :  { %v28866_v27 = vld [vmem:[%s37809_s0 + $0x1260] sm:$0xff]   ;;  %25266 = vst [vmem:[%s37810_s1 + $0xd80] sm:$0xff] %v28865_v26  ;;  %v28890_v51 = vld [vmem:[%s37809_s0 + $0x1ab4] sm:$0xff]   ;;  %25358 = vst [vmem:[%s37810_s1 + $0x2474] sm:$0xff] %v28888_v49 }
 0x157   :  { %v28867_v28 = vld [vmem:[%s37809_s0 + $0xa40] sm:$0xff]   ;;  %25270 = vst [vmem:[%s37810_s1 + $0x15a0] sm:$0xff] %v28866_v27  ;;  %v28891_v52 = vld [vmem:[%s37809_s0 + $0x1294] sm:$0xff]   ;;  %25362 = vst [vmem:[%s37810_s1 + $0x594] sm:$0xff] %v28889_v50 }
 0x158   :  { %v28868_v29 = vld [vmem:[%s37809_s0 + $0x220] sm:$0xff]   ;;  %25274 = vst [vmem:[%s37810_s1 + $0x1dc0] sm:$0xff] %v28867_v28  ;;  %25366 = vst [vmem:[%s37810_s1 + $0xdb4] sm:$0xff] %v28890_v51  ;;  %v28892_v53 = vld [vmem:[%s37809_s0 + $0xa74] sm:$0xff]  }
 0x159   :  { %v28869_v30 = vld [vmem:[%s37809_s0 + $0x2100] sm:$0xff]   ;;  %25278 = vst [vmem:[%s37810_s1 + $0x25e0] sm:$0xff] %v28868_v29  ;;  %v28893_v54 = vld [vmem:[%s37809_s0 + $0x254] sm:$0xff]   ;;  %25370 = vst [vmem:[%s37810_s1 + $0x15d4] sm:$0xff] %v28891_v52 }
 0x15a   :  { %v28870_v31 = vld [vmem:[%s37809_s0 + $0x18e0] sm:$0xff]   ;;  %25282 = vst [vmem:[%s37810_s1 + $0x700] sm:$0xff] %v28869_v30  ;;  %v28894_v55 = vld [vmem:[%s37809_s0 + $0x2134] sm:$0xff]   ;;  %25374 = vst [vmem:[%s37810_s1 + $0x1df4] sm:$0xff] %v28892_v53 }
 0x15b   :  { %v28871_v32 = vld [vmem:[%s37809_s0 + $0x10c0] sm:$0xff]   ;;  %25286 = vst [vmem:[%s37810_s1 + $0xf20] sm:$0xff] %v28870_v31  ;;  %25378 = vst [vmem:[%s37810_s1 + $0x2614] sm:$0xff] %v28893_v54  ;;  %v28895_v56 = vld [vmem:[%s37809_s0 + $0x1914] sm:$0xff]  }
 0x15c   :  { %v28872_v33 = vld [vmem:[%s37809_s0 + $0x8a0] sm:$0xff]   ;;  %25290 = vst [vmem:[%s37810_s1 + $0x1740] sm:$0xff] %v28871_v32  ;;  %v28896_v57 = vld [vmem:[%s37809_s0 + $0x10f4] sm:$0xff]   ;;  %25382 = vst [vmem:[%s37810_s1 + $0x734] sm:$0xff] %v28894_v55 }
 0x15d   :  { %v28873_v34 = vld [vmem:[%s37809_s0 + $0x80] sm:$0xff]   ;;  %25294 = vst [vmem:[%s37810_s1 + $0x1f60] sm:$0xff] %v28872_v33  ;;  %v28897_v58 = vld [vmem:[%s37809_s0 + $0x8d4] sm:$0xff]   ;;  %25386 = vst [vmem:[%s37810_s1 + $0xf54] sm:$0xff] %v28895_v56 }
 0x15e   :  { %25298 = vst [vmem:[%s37810_s1 + $0x2780] sm:$0xff] %v28873_v34  ;;  %25390 = vst [vmem:[%s37810_s1 + $0x1774] sm:$0xff] %v28896_v57  ;;  %v28898_v59 = vld [vmem:[%s37809_s0 + $0xb4] sm:$0xff]   ;;  %v28899_v60 = vld [vmem:[%s37809_s0 + $0x27e8] sm:$0xff]  }
 0x15f   :  { %25394 = vst [vmem:[%s37810_s1 + $0x1f94] sm:$0xff] %v28897_v58  ;;  %v28900_v61 = vld [vmem:[%s37809_s0 + $0x1fc8] sm:$0xff]   ;;  %25398 = vst [vmem:[%s37810_s1 + $0x27b4] sm:$0xff] %v28898_v59  ;;  %v28924_v21 = vld [vmem:[%s37809_s0 + $0x281c] sm:$0xff]  }
 0x160   :  { %25402 = vst [vmem:[%s37810_s1 + $0xe8] sm:$0xff] %v28899_v60  ;;  %v28901_v62 = vld [vmem:[%s37809_s0 + $0x17a8] sm:$0xff]   ;;  %25406 = vst [vmem:[%s37810_s1 + $0x908] sm:$0xff] %v28900_v61  ;;  %v28925_v22 = vld [vmem:[%s37809_s0 + $0x1ffc] sm:$0xff]  }
 0x161   :  { %v28902_v63 = vld [vmem:[%s37809_s0 + $0xf88] sm:$0xff]   ;;  %25410 = vst [vmem:[%s37810_s1 + $0x1128] sm:$0xff] %v28901_v62  ;;  %v28926_v23 = vld [vmem:[%s37809_s0 + $0x17dc] sm:$0xff]   ;;  %25502 = vst [vmem:[%s37810_s1 + $0x11c] sm:$0xff] %v28924_v21 }
 0x162   :  { %v28903_v0 = vld [vmem:[%s37809_s0 + $0x768] sm:$0xff]   ;;  %25414 = vst [vmem:[%s37810_s1 + $0x1948] sm:$0xff] %v28902_v63  ;;  %v28927_v24 = vld [vmem:[%s37809_s0 + $0xfbc] sm:$0xff]   ;;  %25506 = vst [vmem:[%s37810_s1 + $0x93c] sm:$0xff] %v28925_v22 }
 0x163   :  { %v28904_v1 = vld [vmem:[%s37809_s0 + $0x2648] sm:$0xff]   ;;  %25418 = vst [vmem:[%s37810_s1 + $0x2168] sm:$0xff] %v28903_v0  ;;  %25510 = vst [vmem:[%s37810_s1 + $0x115c] sm:$0xff] %v28926_v23  ;;  %v28928_v25 = vld [vmem:[%s37809_s0 + $0x79c] sm:$0xff]  }
 0x164   :  { %v28905_v2 = vld [vmem:[%s37809_s0 + $0x1e28] sm:$0xff]   ;;  %25422 = vst [vmem:[%s37810_s1 + $0x288] sm:$0xff] %v28904_v1  ;;  %v28929_v26 = vld [vmem:[%s37809_s0 + $0x267c] sm:$0xff]   ;;  %25514 = vst [vmem:[%s37810_s1 + $0x197c] sm:$0xff] %v28927_v24 }
 0x165   :  { %v28906_v3 = vld [vmem:[%s37809_s0 + $0x1608] sm:$0xff]   ;;  %25426 = vst [vmem:[%s37810_s1 + $0xaa8] sm:$0xff] %v28905_v2  ;;  %v28930_v27 = vld [vmem:[%s37809_s0 + $0x1e5c] sm:$0xff]   ;;  %25518 = vst [vmem:[%s37810_s1 + $0x219c] sm:$0xff] %v28928_v25 }
 0x166   :  { %v28907_v4 = vld [vmem:[%s37809_s0 + $0xde8] sm:$0xff]   ;;  %25430 = vst [vmem:[%s37810_s1 + $0x12c8] sm:$0xff] %v28906_v3  ;;  %25522 = vst [vmem:[%s37810_s1 + $0x2bc] sm:$0xff] %v28929_v26  ;;  %v28931_v28 = vld [vmem:[%s37809_s0 + $0x163c] sm:$0xff]  }
 0x167   :  { %v28908_v5 = vld [vmem:[%s37809_s0 + $0x5c8] sm:$0xff]   ;;  %25434 = vst [vmem:[%s37810_s1 + $0x1ae8] sm:$0xff] %v28907_v4  ;;  %v28932_v29 = vld [vmem:[%s37809_s0 + $0xe1c] sm:$0xff]   ;;  %25526 = vst [vmem:[%s37810_s1 + $0xadc] sm:$0xff] %v28930_v27 }
 0x168   :  { %v28909_v6 = vld [vmem:[%s37809_s0 + $0x24a8] sm:$0xff]   ;;  %25438 = vst [vmem:[%s37810_s1 + $0x2308] sm:$0xff] %v28908_v5  ;;  %v28933_v30 = vld [vmem:[%s37809_s0 + $0x5fc] sm:$0xff]   ;;  %25530 = vst [vmem:[%s37810_s1 + $0x12fc] sm:$0xff] %v28931_v28 }
 0x169   :  { %v28910_v7 = vld [vmem:[%s37809_s0 + $0x1c88] sm:$0xff]   ;;  %25442 = vst [vmem:[%s37810_s1 + $0x428] sm:$0xff] %v28909_v6  ;;  %25534 = vst [vmem:[%s37810_s1 + $0x1b1c] sm:$0xff] %v28932_v29  ;;  %v28934_v31 = vld [vmem:[%s37809_s0 + $0x24dc] sm:$0xff]  }
 0x16a   :  { %v28911_v8 = vld [vmem:[%s37809_s0 + $0x1468] sm:$0xff]   ;;  %25446 = vst [vmem:[%s37810_s1 + $0xc48] sm:$0xff] %v28910_v7  ;;  %v28935_v32 = vld [vmem:[%s37809_s0 + $0x1cbc] sm:$0xff]   ;;  %25538 = vst [vmem:[%s37810_s1 + $0x233c] sm:$0xff] %v28933_v30 }
 0x16b   :  { %v28912_v9 = vld [vmem:[%s37809_s0 + $0xc48] sm:$0xff]   ;;  %25450 = vst [vmem:[%s37810_s1 + $0x1468] sm:$0xff] %v28911_v8  ;;  %v28936_v33 = vld [vmem:[%s37809_s0 + $0x149c] sm:$0xff]   ;;  %25542 = vst [vmem:[%s37810_s1 + $0x45c] sm:$0xff] %v28934_v31 }
 0x16c   :  { %v28913_v10 = vld [vmem:[%s37809_s0 + $0x428] sm:$0xff]   ;;  %25454 = vst [vmem:[%s37810_s1 + $0x1c88] sm:$0xff] %v28912_v9  ;;  %25546 = vst [vmem:[%s37810_s1 + $0xc7c] sm:$0xff] %v28935_v32  ;;  %v28937_v34 = vld [vmem:[%s37809_s0 + $0xc7c] sm:$0xff]  }
 0x16d   :  { %v28914_v11 = vld [vmem:[%s37809_s0 + $0x2308] sm:$0xff]   ;;  %25458 = vst [vmem:[%s37810_s1 + $0x24a8] sm:$0xff] %v28913_v10  ;;  %v28938_v35 = vld [vmem:[%s37809_s0 + $0x45c] sm:$0xff]   ;;  %25550 = vst [vmem:[%s37810_s1 + $0x149c] sm:$0xff] %v28936_v33 }
 0x16e   :  { %v28915_v12 = vld [vmem:[%s37809_s0 + $0x1ae8] sm:$0xff]   ;;  %25462 = vst [vmem:[%s37810_s1 + $0x5c8] sm:$0xff] %v28914_v11  ;;  %v28939_v36 = vld [vmem:[%s37809_s0 + $0x233c] sm:$0xff]   ;;  %25554 = vst [vmem:[%s37810_s1 + $0x1cbc] sm:$0xff] %v28937_v34 }
 0x16f   :  { %v28916_v13 = vld [vmem:[%s37809_s0 + $0x12c8] sm:$0xff]   ;;  %25466 = vst [vmem:[%s37810_s1 + $0xde8] sm:$0xff] %v28915_v12  ;;  %25558 = vst [vmem:[%s37810_s1 + $0x24dc] sm:$0xff] %v28938_v35  ;;  %v28940_v37 = vld [vmem:[%s37809_s0 + $0x1b1c] sm:$0xff]  }
 0x170   :  { %v28917_v14 = vld [vmem:[%s37809_s0 + $0xaa8] sm:$0xff]   ;;  %25470 = vst [vmem:[%s37810_s1 + $0x1608] sm:$0xff] %v28916_v13  ;;  %v28941_v38 = vld [vmem:[%s37809_s0 + $0x12fc] sm:$0xff]   ;;  %25562 = vst [vmem:[%s37810_s1 + $0x5fc] sm:$0xff] %v28939_v36 }
 0x171   :  { %v28918_v15 = vld [vmem:[%s37809_s0 + $0x288] sm:$0xff]   ;;  %25474 = vst [vmem:[%s37810_s1 + $0x1e28] sm:$0xff] %v28917_v14  ;;  %v28942_v39 = vld [vmem:[%s37809_s0 + $0xadc] sm:$0xff]   ;;  %25566 = vst [vmem:[%s37810_s1 + $0xe1c] sm:$0xff] %v28940_v37 }
 0x172   :  { %v28919_v16 = vld [vmem:[%s37809_s0 + $0x2168] sm:$0xff]   ;;  %25478 = vst [vmem:[%s37810_s1 + $0x2648] sm:$0xff] %v28918_v15  ;;  %25570 = vst [vmem:[%s37810_s1 + $0x163c] sm:$0xff] %v28941_v38  ;;  %v28943_v40 = vld [vmem:[%s37809_s0 + $0x2bc] sm:$0xff]  }
 0x173   :  { %v28920_v17 = vld [vmem:[%s37809_s0 + $0x1948] sm:$0xff]   ;;  %25482 = vst [vmem:[%s37810_s1 + $0x768] sm:$0xff] %v28919_v16  ;;  %v28944_v41 = vld [vmem:[%s37809_s0 + $0x219c] sm:$0xff]   ;;  %25574 = vst [vmem:[%s37810_s1 + $0x1e5c] sm:$0xff] %v28942_v39 }
 0x174   :  { %v28921_v18 = vld [vmem:[%s37809_s0 + $0x1128] sm:$0xff]   ;;  %25486 = vst [vmem:[%s37810_s1 + $0xf88] sm:$0xff] %v28920_v17  ;;  %v28945_v42 = vld [vmem:[%s37809_s0 + $0x197c] sm:$0xff]   ;;  %25578 = vst [vmem:[%s37810_s1 + $0x267c] sm:$0xff] %v28943_v40 }
 0x175   :  { %v28922_v19 = vld [vmem:[%s37809_s0 + $0x908] sm:$0xff]   ;;  %25490 = vst [vmem:[%s37810_s1 + $0x17a8] sm:$0xff] %v28921_v18  ;;  %25582 = vst [vmem:[%s37810_s1 + $0x79c] sm:$0xff] %v28944_v41  ;;  %v28946_v43 = vld [vmem:[%s37809_s0 + $0x115c] sm:$0xff]  }
 0x176   :  { %v28923_v20 = vld [vmem:[%s37809_s0 + $0xe8] sm:$0xff]   ;;  %25494 = vst [vmem:[%s37810_s1 + $0x1fc8] sm:$0xff] %v28922_v19  ;;  %v28947_v44 = vld [vmem:[%s37809_s0 + $0x93c] sm:$0xff]   ;;  %25586 = vst [vmem:[%s37810_s1 + $0xfbc] sm:$0xff] %v28945_v42 }
 0x177   :  { %25498 = vst [vmem:[%s37810_s1 + $0x27e8] sm:$0xff] %v28923_v20  ;;  %v28948_v45 = vld [vmem:[%s37809_s0 + $0x11c] sm:$0xff]   ;;  %25590 = vst [vmem:[%s37810_s1 + $0x17dc] sm:$0xff] %v28946_v43  ;;  %v28949_v46 = vld [vmem:[%s37809_s0 + $0x2850] sm:$0xff]  }
 0x178   :  { %25594 = vst [vmem:[%s37810_s1 + $0x1ffc] sm:$0xff] %v28947_v44  ;;  %v28950_v47 = vld [vmem:[%s37809_s0 + $0x2030] sm:$0xff]   ;;  %25598 = vst [vmem:[%s37810_s1 + $0x281c] sm:$0xff] %v28948_v45  ;;  %v28974_v7 = vld [vmem:[%s37809_s0 + $0x2884] sm:$0xff]  }
 0x179   :  { %v28951_v48 = vld [vmem:[%s37809_s0 + $0x1810] sm:$0xff]   ;;  %25602 = vst [vmem:[%s37810_s1 + $0x150] sm:$0xff] %v28949_v46  ;;  %25606 = vst [vmem:[%s37810_s1 + $0x970] sm:$0xff] %v28950_v47  ;;  %v28975_v8 = vld [vmem:[%s37809_s0 + $0x2064] sm:$0xff]  }
 0x17a   :  { %v28952_v49 = vld [vmem:[%s37809_s0 + $0xff0] sm:$0xff]   ;;  %25610 = vst [vmem:[%s37810_s1 + $0x1190] sm:$0xff] %v28951_v48  ;;  %25702 = vst [vmem:[%s37810_s1 + $0x184] sm:$0xff] %v28974_v7  ;;  %v28976_v9 = vld [vmem:[%s37809_s0 + $0x1844] sm:$0xff]  }
 0x17b   :  { %v28953_v50 = vld [vmem:[%s37809_s0 + $0x7d0] sm:$0xff]   ;;  %25614 = vst [vmem:[%s37810_s1 + $0x19b0] sm:$0xff] %v28952_v49  ;;  %v28977_v10 = vld [vmem:[%s37809_s0 + $0x1024] sm:$0xff]   ;;  %25706 = vst [vmem:[%s37810_s1 + $0x9a4] sm:$0xff] %v28975_v8 }
 0x17c   :  { %v28954_v51 = vld [vmem:[%s37809_s0 + $0x26b0] sm:$0xff]   ;;  %25618 = vst [vmem:[%s37810_s1 + $0x21d0] sm:$0xff] %v28953_v50  ;;  %v28978_v11 = vld [vmem:[%s37809_s0 + $0x804] sm:$0xff]   ;;  %25710 = vst [vmem:[%s37810_s1 + $0x11c4] sm:$0xff] %v28976_v9 }
 0x17d   :  { %v28955_v52 = vld [vmem:[%s37809_s0 + $0x1e90] sm:$0xff]   ;;  %25622 = vst [vmem:[%s37810_s1 + $0x2f0] sm:$0xff] %v28954_v51  ;;  %25714 = vst [vmem:[%s37810_s1 + $0x19e4] sm:$0xff] %v28977_v10  ;;  %v28979_v12 = vld [vmem:[%s37809_s0 + $0x26e4] sm:$0xff]  }
 0x17e   :  { %v28956_v53 = vld [vmem:[%s37809_s0 + $0x1670] sm:$0xff]   ;;  %25626 = vst [vmem:[%s37810_s1 + $0xb10] sm:$0xff] %v28955_v52  ;;  %v28980_v13 = vld [vmem:[%s37809_s0 + $0x1ec4] sm:$0xff]   ;;  %25718 = vst [vmem:[%s37810_s1 + $0x2204] sm:$0xff] %v28978_v11 }
 0x17f   :  { %v28957_v54 = vld [vmem:[%s37809_s0 + $0xe50] sm:$0xff]   ;;  %25630 = vst [vmem:[%s37810_s1 + $0x1330] sm:$0xff] %v28956_v53  ;;  %v28981_v14 = vld [vmem:[%s37809_s0 + $0x16a4] sm:$0xff]   ;;  %25722 = vst [vmem:[%s37810_s1 + $0x324] sm:$0xff] %v28979_v12 }
 0x180   :  { %v28958_v55 = vld [vmem:[%s37809_s0 + $0x630] sm:$0xff]   ;;  %25634 = vst [vmem:[%s37810_s1 + $0x1b50] sm:$0xff] %v28957_v54  ;;  %25726 = vst [vmem:[%s37810_s1 + $0xb44] sm:$0xff] %v28980_v13  ;;  %v28982_v15 = vld [vmem:[%s37809_s0 + $0xe84] sm:$0xff]  }
 0x181   :  { %v28959_v56 = vld [vmem:[%s37809_s0 + $0x2510] sm:$0xff]   ;;  %25638 = vst [vmem:[%s37810_s1 + $0x2370] sm:$0xff] %v28958_v55  ;;  %v28983_v16 = vld [vmem:[%s37809_s0 + $0x664] sm:$0xff]   ;;  %25730 = vst [vmem:[%s37810_s1 + $0x1364] sm:$0xff] %v28981_v14 }
 0x182   :  { %v28960_v57 = vld [vmem:[%s37809_s0 + $0x1cf0] sm:$0xff]   ;;  %25642 = vst [vmem:[%s37810_s1 + $0x490] sm:$0xff] %v28959_v56  ;;  %v28984_v17 = vld [vmem:[%s37809_s0 + $0x2544] sm:$0xff]   ;;  %25734 = vst [vmem:[%s37810_s1 + $0x1b84] sm:$0xff] %v28982_v15 }
 0x183   :  { %v28961_v58 = vld [vmem:[%s37809_s0 + $0x14d0] sm:$0xff]   ;;  %25646 = vst [vmem:[%s37810_s1 + $0xcb0] sm:$0xff] %v28960_v57  ;;  %25738 = vst [vmem:[%s37810_s1 + $0x23a4] sm:$0xff] %v28983_v16  ;;  %v28985_v18 = vld [vmem:[%s37809_s0 + $0x1d24] sm:$0xff]  }
 0x184   :  { %v28962_v59 = vld [vmem:[%s37809_s0 + $0xcb0] sm:$0xff]   ;;  %25650 = vst [vmem:[%s37810_s1 + $0x14d0] sm:$0xff] %v28961_v58  ;;  %v28986_v19 = vld [vmem:[%s37809_s0 + $0x1504] sm:$0xff]   ;;  %25742 = vst [vmem:[%s37810_s1 + $0x4c4] sm:$0xff] %v28984_v17 }
 0x185   :  { %v28963_v60 = vld [vmem:[%s37809_s0 + $0x490] sm:$0xff]   ;;  %25654 = vst [vmem:[%s37810_s1 + $0x1cf0] sm:$0xff] %v28962_v59  ;;  %v28987_v20 = vld [vmem:[%s37809_s0 + $0xce4] sm:$0xff]   ;;  %25746 = vst [vmem:[%s37810_s1 + $0xce4] sm:$0xff] %v28985_v18 }
 0x186   :  { %v28964_v61 = vld [vmem:[%s37809_s0 + $0x2370] sm:$0xff]   ;;  %25658 = vst [vmem:[%s37810_s1 + $0x2510] sm:$0xff] %v28963_v60  ;;  %25750 = vst [vmem:[%s37810_s1 + $0x1504] sm:$0xff] %v28986_v19  ;;  %v28988_v21 = vld [vmem:[%s37809_s0 + $0x4c4] sm:$0xff]  }
 0x187   :  { %v28965_v62 = vld [vmem:[%s37809_s0 + $0x1b50] sm:$0xff]   ;;  %25662 = vst [vmem:[%s37810_s1 + $0x630] sm:$0xff] %v28964_v61  ;;  %v28989_v22 = vld [vmem:[%s37809_s0 + $0x23a4] sm:$0xff]   ;;  %25754 = vst [vmem:[%s37810_s1 + $0x1d24] sm:$0xff] %v28987_v20 }
 0x188   :  { %v28966_v63 = vld [vmem:[%s37809_s0 + $0x1330] sm:$0xff]   ;;  %25666 = vst [vmem:[%s37810_s1 + $0xe50] sm:$0xff] %v28965_v62  ;;  %v28990_v23 = vld [vmem:[%s37809_s0 + $0x1b84] sm:$0xff]   ;;  %25758 = vst [vmem:[%s37810_s1 + $0x2544] sm:$0xff] %v28988_v21 }
 0x189   :  { %v28967_v0 = vld [vmem:[%s37809_s0 + $0xb10] sm:$0xff]   ;;  %25670 = vst [vmem:[%s37810_s1 + $0x1670] sm:$0xff] %v28966_v63  ;;  %25762 = vst [vmem:[%s37810_s1 + $0x664] sm:$0xff] %v28989_v22  ;;  %v28991_v24 = vld [vmem:[%s37809_s0 + $0x1364] sm:$0xff]  }
 0x18a   :  { %v28968_v1 = vld [vmem:[%s37809_s0 + $0x2f0] sm:$0xff]   ;;  %25674 = vst [vmem:[%s37810_s1 + $0x1e90] sm:$0xff] %v28967_v0  ;;  %v28992_v25 = vld [vmem:[%s37809_s0 + $0xb44] sm:$0xff]   ;;  %25766 = vst [vmem:[%s37810_s1 + $0xe84] sm:$0xff] %v28990_v23 }
 0x18b   :  { %v28969_v2 = vld [vmem:[%s37809_s0 + $0x21d0] sm:$0xff]   ;;  %25678 = vst [vmem:[%s37810_s1 + $0x26b0] sm:$0xff] %v28968_v1  ;;  %v28993_v26 = vld [vmem:[%s37809_s0 + $0x324] sm:$0xff]   ;;  %25770 = vst [vmem:[%s37810_s1 + $0x16a4] sm:$0xff] %v28991_v24 }
 0x18c   :  { %v28970_v3 = vld [vmem:[%s37809_s0 + $0x19b0] sm:$0xff]   ;;  %25682 = vst [vmem:[%s37810_s1 + $0x7d0] sm:$0xff] %v28969_v2  ;;  %25774 = vst [vmem:[%s37810_s1 + $0x1ec4] sm:$0xff] %v28992_v25  ;;  %v28994_v27 = vld [vmem:[%s37809_s0 + $0x2204] sm:$0xff]  }
 0x18d   :  { %v28971_v4 = vld [vmem:[%s37809_s0 + $0x1190] sm:$0xff]   ;;  %25686 = vst [vmem:[%s37810_s1 + $0xff0] sm:$0xff] %v28970_v3  ;;  %v28995_v28 = vld [vmem:[%s37809_s0 + $0x19e4] sm:$0xff]   ;;  %25778 = vst [vmem:[%s37810_s1 + $0x26e4] sm:$0xff] %v28993_v26 }
 0x18e   :  { %v28972_v5 = vld [vmem:[%s37809_s0 + $0x970] sm:$0xff]   ;;  %25690 = vst [vmem:[%s37810_s1 + $0x1810] sm:$0xff] %v28971_v4  ;;  %v28996_v29 = vld [vmem:[%s37809_s0 + $0x11c4] sm:$0xff]   ;;  %25782 = vst [vmem:[%s37810_s1 + $0x804] sm:$0xff] %v28994_v27 }
 0x18f   :  { %v28973_v6 = vld [vmem:[%s37809_s0 + $0x150] sm:$0xff]   ;;  %25694 = vst [vmem:[%s37810_s1 + $0x2030] sm:$0xff] %v28972_v5  ;;  %25786 = vst [vmem:[%s37810_s1 + $0x1024] sm:$0xff] %v28995_v28  ;;  %v28997_v30 = vld [vmem:[%s37809_s0 + $0x9a4] sm:$0xff]  }
 0x190   :  { %25698 = vst [vmem:[%s37810_s1 + $0x2850] sm:$0xff] %v28973_v6  ;;  %v28998_v31 = vld [vmem:[%s37809_s0 + $0x184] sm:$0xff]   ;;  %25790 = vst [vmem:[%s37810_s1 + $0x1844] sm:$0xff] %v28996_v29  ;;  %v29024_v57 = vld [vmem:[%s37809_s0 + $0x2754] sm:$0xff]  }
 0x191   :  { %25794 = vst [vmem:[%s37810_s1 + $0x2064] sm:$0xff] %v28997_v30  ;;  %25798 = vst [vmem:[%s37810_s1 + $0x2884] sm:$0xff] %v28998_v31  ;;  %v28999_v32 = vld [vmem:[%s37809_s0 + $0x2720] sm:$0xff]   ;;  %v29025_v58 = vld [vmem:[%s37809_s0 + $0x1f34] sm:$0xff]  }
 0x192   :  { %v29000_v33 = vld [vmem:[%s37809_s0 + $0x1f00] sm:$0xff]   ;;  %26002 = vst [vmem:[%s37810_s1 + $0x20] sm:$0xff] %v28999_v32  ;;  %26102 = vst [vmem:[%s37810_s1 + $0x54] sm:$0xff] %v29024_v57  ;;  %v29026_v59 = vld [vmem:[%s37809_s0 + $0x1714] sm:$0xff]  }
 0x193   :  { %v29001_v34 = vld [vmem:[%s37809_s0 + $0x16e0] sm:$0xff]   ;;  %26006 = vst [vmem:[%s37810_s1 + $0x840] sm:$0xff] %v29000_v33  ;;  %v29027_v60 = vld [vmem:[%s37809_s0 + $0xef4] sm:$0xff]   ;;  %26106 = vst [vmem:[%s37810_s1 + $0x874] sm:$0xff] %v29025_v58 }
 0x194   :  { %v29002_v35 = vld [vmem:[%s37809_s0 + $0xec0] sm:$0xff]   ;;  %26010 = vst [vmem:[%s37810_s1 + $0x1060] sm:$0xff] %v29001_v34  ;;  %v29028_v61 = vld [vmem:[%s37809_s0 + $0x6d4] sm:$0xff]   ;;  %26110 = vst [vmem:[%s37810_s1 + $0x1094] sm:$0xff] %v29026_v59 }
 0x195   :  { %v29003_v36 = vld [vmem:[%s37809_s0 + $0x6a0] sm:$0xff]   ;;  %26014 = vst [vmem:[%s37810_s1 + $0x1880] sm:$0xff] %v29002_v35  ;;  %26114 = vst [vmem:[%s37810_s1 + $0x18b4] sm:$0xff] %v29027_v60  ;;  %v29029_v62 = vld [vmem:[%s37809_s0 + $0x25b4] sm:$0xff]  }
 0x196   :  { %v29004_v37 = vld [vmem:[%s37809_s0 + $0x2580] sm:$0xff]   ;;  %26018 = vst [vmem:[%s37810_s1 + $0x20a0] sm:$0xff] %v29003_v36  ;;  %v29030_v63 = vld [vmem:[%s37809_s0 + $0x1d94] sm:$0xff]   ;;  %26118 = vst [vmem:[%s37810_s1 + $0x20d4] sm:$0xff] %v29028_v61 }
 0x197   :  { %v29005_v38 = vld [vmem:[%s37809_s0 + $0x1d60] sm:$0xff]   ;;  %26022 = vst [vmem:[%s37810_s1 + $0x1c0] sm:$0xff] %v29004_v37  ;;  %v29031_v0 = vld [vmem:[%s37809_s0 + $0x1574] sm:$0xff]   ;;  %26122 = vst [vmem:[%s37810_s1 + $0x1f4] sm:$0xff] %v29029_v62 }
 0x198   :  { %v29006_v39 = vld [vmem:[%s37809_s0 + $0x1540] sm:$0xff]   ;;  %26026 = vst [vmem:[%s37810_s1 + $0x9e0] sm:$0xff] %v29005_v38  ;;  %26126 = vst [vmem:[%s37810_s1 + $0xa14] sm:$0xff] %v29030_v63  ;;  %v29032_v1 = vld [vmem:[%s37809_s0 + $0xd54] sm:$0xff]  }
 0x199   :  { %v29007_v40 = vld [vmem:[%s37809_s0 + $0xd20] sm:$0xff]   ;;  %26030 = vst [vmem:[%s37810_s1 + $0x1200] sm:$0xff] %v29006_v39  ;;  %v29033_v2 = vld [vmem:[%s37809_s0 + $0x534] sm:$0xff]   ;;  %26130 = vst [vmem:[%s37810_s1 + $0x1234] sm:$0xff] %v29031_v0 }
 0x19a   :  { %v29008_v41 = vld [vmem:[%s37809_s0 + $0x500] sm:$0xff]   ;;  %26034 = vst [vmem:[%s37810_s1 + $0x1a20] sm:$0xff] %v29007_v40  ;;  %v29034_v3 = vld [vmem:[%s37809_s0 + $0x2414] sm:$0xff]   ;;  %26134 = vst [vmem:[%s37810_s1 + $0x1a54] sm:$0xff] %v29032_v1 }
 0x19b   :  { %v29009_v42 = vld [vmem:[%s37809_s0 + $0x23e0] sm:$0xff]   ;;  %26038 = vst [vmem:[%s37810_s1 + $0x2240] sm:$0xff] %v29008_v41  ;;  %26138 = vst [vmem:[%s37810_s1 + $0x2274] sm:$0xff] %v29033_v2  ;;  %v29035_v4 = vld [vmem:[%s37809_s0 + $0x1bf4] sm:$0xff]  }
 0x19c   :  { %v29010_v43 = vld [vmem:[%s37809_s0 + $0x1bc0] sm:$0xff]   ;;  %26042 = vst [vmem:[%s37810_s1 + $0x360] sm:$0xff] %v29009_v42  ;;  %v29036_v5 = vld [vmem:[%s37809_s0 + $0x13d4] sm:$0xff]   ;;  %26142 = vst [vmem:[%s37810_s1 + $0x394] sm:$0xff] %v29034_v3 }
 0x19d   :  { %v29011_v44 = vld [vmem:[%s37809_s0 + $0x13a0] sm:$0xff]   ;;  %26046 = vst [vmem:[%s37810_s1 + $0xb80] sm:$0xff] %v29010_v43  ;;  %v29037_v6 = vld [vmem:[%s37809_s0 + $0xbb4] sm:$0xff]   ;;  %26146 = vst [vmem:[%s37810_s1 + $0xbb4] sm:$0xff] %v29035_v4 }
 0x19e   :  { %v29012_v45 = vld [vmem:[%s37809_s0 + $0xb80] sm:$0xff]   ;;  %26050 = vst [vmem:[%s37810_s1 + $0x13a0] sm:$0xff] %v29011_v44  ;;  %26150 = vst [vmem:[%s37810_s1 + $0x13d4] sm:$0xff] %v29036_v5  ;;  %v29038_v7 = vld [vmem:[%s37809_s0 + $0x394] sm:$0xff]  }
 0x19f   :  { %v29013_v46 = vld [vmem:[%s37809_s0 + $0x360] sm:$0xff]   ;;  %26054 = vst [vmem:[%s37810_s1 + $0x1bc0] sm:$0xff] %v29012_v45  ;;  %v29039_v8 = vld [vmem:[%s37809_s0 + $0x2274] sm:$0xff]   ;;  %26154 = vst [vmem:[%s37810_s1 + $0x1bf4] sm:$0xff] %v29037_v6 }
 0x1a0   :  { %v29014_v47 = vld [vmem:[%s37809_s0 + $0x2240] sm:$0xff]   ;;  %26058 = vst [vmem:[%s37810_s1 + $0x23e0] sm:$0xff] %v29013_v46  ;;  %v29040_v9 = vld [vmem:[%s37809_s0 + $0x1a54] sm:$0xff]   ;;  %26158 = vst [vmem:[%s37810_s1 + $0x2414] sm:$0xff] %v29038_v7 }
 0x1a1   :  { %v29015_v48 = vld [vmem:[%s37809_s0 + $0x1a20] sm:$0xff]   ;;  %26062 = vst [vmem:[%s37810_s1 + $0x500] sm:$0xff] %v29014_v47  ;;  %26162 = vst [vmem:[%s37810_s1 + $0x534] sm:$0xff] %v29039_v8  ;;  %v29041_v10 = vld [vmem:[%s37809_s0 + $0x1234] sm:$0xff]  }
 0x1a2   :  { %v29016_v49 = vld [vmem:[%s37809_s0 + $0x1200] sm:$0xff]   ;;  %26066 = vst [vmem:[%s37810_s1 + $0xd20] sm:$0xff] %v29015_v48  ;;  %v29042_v11 = vld [vmem:[%s37809_s0 + $0xa14] sm:$0xff]   ;;  %26166 = vst [vmem:[%s37810_s1 + $0xd54] sm:$0xff] %v29040_v9 }
 0x1a3   :  { %v29017_v50 = vld [vmem:[%s37809_s0 + $0x9e0] sm:$0xff]   ;;  %26070 = vst [vmem:[%s37810_s1 + $0x1540] sm:$0xff] %v29016_v49  ;;  %v29043_v12 = vld [vmem:[%s37809_s0 + $0x1f4] sm:$0xff]   ;;  %26170 = vst [vmem:[%s37810_s1 + $0x1574] sm:$0xff] %v29041_v10 }
 0x1a4   :  { %v29018_v51 = vld [vmem:[%s37809_s0 + $0x1c0] sm:$0xff]   ;;  %26074 = vst [vmem:[%s37810_s1 + $0x1d60] sm:$0xff] %v29017_v50  ;;  %26174 = vst [vmem:[%s37810_s1 + $0x1d94] sm:$0xff] %v29042_v11  ;;  %v29044_v13 = vld [vmem:[%s37809_s0 + $0x20d4] sm:$0xff]  }
 0x1a5   :  { %v29019_v52 = vld [vmem:[%s37809_s0 + $0x20a0] sm:$0xff]   ;;  %26078 = vst [vmem:[%s37810_s1 + $0x2580] sm:$0xff] %v29018_v51  ;;  %v29045_v14 = vld [vmem:[%s37809_s0 + $0x18b4] sm:$0xff]   ;;  %26178 = vst [vmem:[%s37810_s1 + $0x25b4] sm:$0xff] %v29043_v12 }
 0x1a6   :  { %v29020_v53 = vld [vmem:[%s37809_s0 + $0x1880] sm:$0xff]   ;;  %26082 = vst [vmem:[%s37810_s1 + $0x6a0] sm:$0xff] %v29019_v52  ;;  %v29046_v15 = vld [vmem:[%s37809_s0 + $0x1094] sm:$0xff]   ;;  %26182 = vst [vmem:[%s37810_s1 + $0x6d4] sm:$0xff] %v29044_v13 }
 0x1a7   :  { %v29021_v54 = vld [vmem:[%s37809_s0 + $0x1060] sm:$0xff]   ;;  %26086 = vst [vmem:[%s37810_s1 + $0xec0] sm:$0xff] %v29020_v53  ;;  %26186 = vst [vmem:[%s37810_s1 + $0xef4] sm:$0xff] %v29045_v14  ;;  %v29047_v16 = vld [vmem:[%s37809_s0 + $0x874] sm:$0xff]  }
 0x1a8   :  { %v29022_v55 = vld [vmem:[%s37809_s0 + $0x840] sm:$0xff]   ;;  %26090 = vst [vmem:[%s37810_s1 + $0x16e0] sm:$0xff] %v29021_v54  ;;  %v29048_v17 = vld [vmem:[%s37809_s0 + $0x54] sm:$0xff]   ;;  %26190 = vst [vmem:[%s37810_s1 + $0x1714] sm:$0xff] %v29046_v15 }
 0x1a9   :  { %v29023_v56 = vld [vmem:[%s37809_s0 + $0x20] sm:$0xff]   ;;  %26094 = vst [vmem:[%s37810_s1 + $0x1f00] sm:$0xff] %v29022_v55  ;;  %v29049_v18 = vld [vmem:[%s37809_s0 + $0x2788] sm:$0xff]   ;;  %26194 = vst [vmem:[%s37810_s1 + $0x1f34] sm:$0xff] %v29047_v16 }
 0x1aa   :  { %26098 = vst [vmem:[%s37810_s1 + $0x2720] sm:$0xff] %v29023_v56  ;;  %26198 = vst [vmem:[%s37810_s1 + $0x2754] sm:$0xff] %v29048_v17  ;;  %v29050_v19 = vld [vmem:[%s37809_s0 + $0x1f68] sm:$0xff]   ;;  %v29074_v43 = vld [vmem:[%s37809_s0 + $0x27bc] sm:$0xff]  }
 0x1ab   :  { %v29051_v20 = vld [vmem:[%s37809_s0 + $0x1748] sm:$0xff]   ;;  %26202 = vst [vmem:[%s37810_s1 + $0x88] sm:$0xff] %v29049_v18  ;;  %26206 = vst [vmem:[%s37810_s1 + $0x8a8] sm:$0xff] %v29050_v19  ;;  %v29075_v44 = vld [vmem:[%s37809_s0 + $0x1f9c] sm:$0xff]  }
 0x1ac   :  { %v29052_v21 = vld [vmem:[%s37809_s0 + $0xf28] sm:$0xff]   ;;  %26210 = vst [vmem:[%s37810_s1 + $0x10c8] sm:$0xff] %v29051_v20  ;;  %v29076_v45 = vld [vmem:[%s37809_s0 + $0x177c] sm:$0xff]   ;;  %26302 = vst [vmem:[%s37810_s1 + $0xbc] sm:$0xff] %v29074_v43 }
 0x1ad   :  { %v29053_v22 = vld [vmem:[%s37809_s0 + $0x708] sm:$0xff]   ;;  %26214 = vst [vmem:[%s37810_s1 + $0x18e8] sm:$0xff] %v29052_v21  ;;  %26306 = vst [vmem:[%s37810_s1 + $0x8dc] sm:$0xff] %v29075_v44  ;;  %v29077_v46 = vld [vmem:[%s37809_s0 + $0xf5c] sm:$0xff]  }
 0x1ae   :  { %v29054_v23 = vld [vmem:[%s37809_s0 + $0x25e8] sm:$0xff]   ;;  %26218 = vst [vmem:[%s37810_s1 + $0x2108] sm:$0xff] %v29053_v22  ;;  %v29078_v47 = vld [vmem:[%s37809_s0 + $0x73c] sm:$0xff]   ;;  %26310 = vst [vmem:[%s37810_s1 + $0x10fc] sm:$0xff] %v29076_v45 }
 0x1af   :  { %v29055_v24 = vld [vmem:[%s37809_s0 + $0x1dc8] sm:$0xff]   ;;  %26222 = vst [vmem:[%s37810_s1 + $0x228] sm:$0xff] %v29054_v23  ;;  %v29079_v48 = vld [vmem:[%s37809_s0 + $0x261c] sm:$0xff]   ;;  %26314 = vst [vmem:[%s37810_s1 + $0x191c] sm:$0xff] %v29077_v46 }
 0x1b0   :  { %v29056_v25 = vld [vmem:[%s37809_s0 + $0x15a8] sm:$0xff]   ;;  %26226 = vst [vmem:[%s37810_s1 + $0xa48] sm:$0xff] %v29055_v24  ;;  %26318 = vst [vmem:[%s37810_s1 + $0x213c] sm:$0xff] %v29078_v47  ;;  %v29080_v49 = vld [vmem:[%s37809_s0 + $0x1dfc] sm:$0xff]  }
 0x1b1   :  { %v29057_v26 = vld [vmem:[%s37809_s0 + $0xd88] sm:$0xff]   ;;  %26230 = vst [vmem:[%s37810_s1 + $0x1268] sm:$0xff] %v29056_v25  ;;  %v29081_v50 = vld [vmem:[%s37809_s0 + $0x15dc] sm:$0xff]   ;;  %26322 = vst [vmem:[%s37810_s1 + $0x25c] sm:$0xff] %v29079_v48 }
 0x1b2   :  { %v29058_v27 = vld [vmem:[%s37809_s0 + $0x568] sm:$0xff]   ;;  %26234 = vst [vmem:[%s37810_s1 + $0x1a88] sm:$0xff] %v29057_v26  ;;  %v29082_v51 = vld [vmem:[%s37809_s0 + $0xdbc] sm:$0xff]   ;;  %26326 = vst [vmem:[%s37810_s1 + $0xa7c] sm:$0xff] %v29080_v49 }
 0x1b3   :  { %v29059_v28 = vld [vmem:[%s37809_s0 + $0x2448] sm:$0xff]   ;;  %26238 = vst [vmem:[%s37810_s1 + $0x22a8] sm:$0xff] %v29058_v27  ;;  %26330 = vst [vmem:[%s37810_s1 + $0x129c] sm:$0xff] %v29081_v50  ;;  %v29083_v52 = vld [vmem:[%s37809_s0 + $0x59c] sm:$0xff]  }
 0x1b4   :  { %v29060_v29 = vld [vmem:[%s37809_s0 + $0x1c28] sm:$0xff]   ;;  %26242 = vst [vmem:[%s37810_s1 + $0x3c8] sm:$0xff] %v29059_v28  ;;  %v29084_v53 = vld [vmem:[%s37809_s0 + $0x247c] sm:$0xff]   ;;  %26334 = vst [vmem:[%s37810_s1 + $0x1abc] sm:$0xff] %v29082_v51 }
 0x1b5   :  { %v29061_v30 = vld [vmem:[%s37809_s0 + $0x1408] sm:$0xff]   ;;  %26246 = vst [vmem:[%s37810_s1 + $0xbe8] sm:$0xff] %v29060_v29  ;;  %v29085_v54 = vld [vmem:[%s37809_s0 + $0x1c5c] sm:$0xff]   ;;  %26338 = vst [vmem:[%s37810_s1 + $0x22dc] sm:$0xff] %v29083_v52 }
 0x1b6   :  { %v29062_v31 = vld [vmem:[%s37809_s0 + $0xbe8] sm:$0xff]   ;;  %26250 = vst [vmem:[%s37810_s1 + $0x1408] sm:$0xff] %v29061_v30  ;;  %26342 = vst [vmem:[%s37810_s1 + $0x3fc] sm:$0xff] %v29084_v53  ;;  %v29086_v55 = vld [vmem:[%s37809_s0 + $0x143c] sm:$0xff]  }
 0x1b7   :  { %v29063_v32 = vld [vmem:[%s37809_s0 + $0x3c8] sm:$0xff]   ;;  %26254 = vst [vmem:[%s37810_s1 + $0x1c28] sm:$0xff] %v29062_v31  ;;  %v29087_v56 = vld [vmem:[%s37809_s0 + $0xc1c] sm:$0xff]   ;;  %26346 = vst [vmem:[%s37810_s1 + $0xc1c] sm:$0xff] %v29085_v54 }
 0x1b8   :  { %v29064_v33 = vld [vmem:[%s37809_s0 + $0x22a8] sm:$0xff]   ;;  %26258 = vst [vmem:[%s37810_s1 + $0x2448] sm:$0xff] %v29063_v32  ;;  %v29088_v57 = vld [vmem:[%s37809_s0 + $0x3fc] sm:$0xff]   ;;  %26350 = vst [vmem:[%s37810_s1 + $0x143c] sm:$0xff] %v29086_v55 }
 0x1b9   :  { %v29065_v34 = vld [vmem:[%s37809_s0 + $0x1a88] sm:$0xff]   ;;  %26262 = vst [vmem:[%s37810_s1 + $0x568] sm:$0xff] %v29064_v33  ;;  %26354 = vst [vmem:[%s37810_s1 + $0x1c5c] sm:$0xff] %v29087_v56  ;;  %v29089_v58 = vld [vmem:[%s37809_s0 + $0x22dc] sm:$0xff]  }
 0x1ba   :  { %v29066_v35 = vld [vmem:[%s37809_s0 + $0x1268] sm:$0xff]   ;;  %26266 = vst [vmem:[%s37810_s1 + $0xd88] sm:$0xff] %v29065_v34  ;;  %v29090_v59 = vld [vmem:[%s37809_s0 + $0x1abc] sm:$0xff]   ;;  %26358 = vst [vmem:[%s37810_s1 + $0x247c] sm:$0xff] %v29088_v57 }
 0x1bb   :  { %v29067_v36 = vld [vmem:[%s37809_s0 + $0xa48] sm:$0xff]   ;;  %26270 = vst [vmem:[%s37810_s1 + $0x15a8] sm:$0xff] %v29066_v35  ;;  %v29091_v60 = vld [vmem:[%s37809_s0 + $0x129c] sm:$0xff]   ;;  %26362 = vst [vmem:[%s37810_s1 + $0x59c] sm:$0xff] %v29089_v58 }
 0x1bc   :  { %v29068_v37 = vld [vmem:[%s37809_s0 + $0x228] sm:$0xff]   ;;  %26274 = vst [vmem:[%s37810_s1 + $0x1dc8] sm:$0xff] %v29067_v36  ;;  %26366 = vst [vmem:[%s37810_s1 + $0xdbc] sm:$0xff] %v29090_v59  ;;  %v29092_v61 = vld [vmem:[%s37809_s0 + $0xa7c] sm:$0xff]  }
 0x1bd   :  { %v29069_v38 = vld [vmem:[%s37809_s0 + $0x2108] sm:$0xff]   ;;  %26278 = vst [vmem:[%s37810_s1 + $0x25e8] sm:$0xff] %v29068_v37  ;;  %v29093_v62 = vld [vmem:[%s37809_s0 + $0x25c] sm:$0xff]   ;;  %26370 = vst [vmem:[%s37810_s1 + $0x15dc] sm:$0xff] %v29091_v60 }
 0x1be   :  { %v29070_v39 = vld [vmem:[%s37809_s0 + $0x18e8] sm:$0xff]   ;;  %26282 = vst [vmem:[%s37810_s1 + $0x708] sm:$0xff] %v29069_v38  ;;  %v29094_v63 = vld [vmem:[%s37809_s0 + $0x213c] sm:$0xff]   ;;  %26374 = vst [vmem:[%s37810_s1 + $0x1dfc] sm:$0xff] %v29092_v61 }
 0x1bf   :  { %v29071_v40 = vld [vmem:[%s37809_s0 + $0x10c8] sm:$0xff]   ;;  %26286 = vst [vmem:[%s37810_s1 + $0xf28] sm:$0xff] %v29070_v39  ;;  %26378 = vst [vmem:[%s37810_s1 + $0x261c] sm:$0xff] %v29093_v62  ;;  %v29095_v0 = vld [vmem:[%s37809_s0 + $0x191c] sm:$0xff]  }
 0x1c0   :  { %v29072_v41 = vld [vmem:[%s37809_s0 + $0x8a8] sm:$0xff]   ;;  %26290 = vst [vmem:[%s37810_s1 + $0x1748] sm:$0xff] %v29071_v40  ;;  %v29096_v1 = vld [vmem:[%s37809_s0 + $0x10fc] sm:$0xff]   ;;  %26382 = vst [vmem:[%s37810_s1 + $0x73c] sm:$0xff] %v29094_v63 }
 0x1c1   :  { %v29073_v42 = vld [vmem:[%s37809_s0 + $0x88] sm:$0xff]   ;;  %26294 = vst [vmem:[%s37810_s1 + $0x1f68] sm:$0xff] %v29072_v41  ;;  %v29097_v2 = vld [vmem:[%s37809_s0 + $0x8dc] sm:$0xff]   ;;  %26386 = vst [vmem:[%s37810_s1 + $0xf5c] sm:$0xff] %v29095_v0 }
 0x1c2   :  { %26298 = vst [vmem:[%s37810_s1 + $0x2788] sm:$0xff] %v29073_v42  ;;  %26390 = vst [vmem:[%s37810_s1 + $0x177c] sm:$0xff] %v29096_v1  ;;  %v29098_v3 = vld [vmem:[%s37809_s0 + $0xbc] sm:$0xff]   ;;  %v29099_v4 = vld [vmem:[%s37809_s0 + $0x27f0] sm:$0xff]  }
 0x1c3   :  { %26394 = vst [vmem:[%s37810_s1 + $0x1f9c] sm:$0xff] %v29097_v2  ;;  %v29100_v5 = vld [vmem:[%s37809_s0 + $0x1fd0] sm:$0xff]   ;;  %26398 = vst [vmem:[%s37810_s1 + $0x27bc] sm:$0xff] %v29098_v3  ;;  %v29124_v29 = vld [vmem:[%s37809_s0 + $0x2824] sm:$0xff]  }
 0x1c4   :  { %26402 = vst [vmem:[%s37810_s1 + $0xf0] sm:$0xff] %v29099_v4  ;;  %v29101_v6 = vld [vmem:[%s37809_s0 + $0x17b0] sm:$0xff]   ;;  %26406 = vst [vmem:[%s37810_s1 + $0x910] sm:$0xff] %v29100_v5  ;;  %v29125_v30 = vld [vmem:[%s37809_s0 + $0x2004] sm:$0xff]  }
 0x1c5   :  { %v29102_v7 = vld [vmem:[%s37809_s0 + $0xf90] sm:$0xff]   ;;  %26410 = vst [vmem:[%s37810_s1 + $0x1130] sm:$0xff] %v29101_v6  ;;  %v29126_v31 = vld [vmem:[%s37809_s0 + $0x17e4] sm:$0xff]   ;;  %26502 = vst [vmem:[%s37810_s1 + $0x124] sm:$0xff] %v29124_v29 }
 0x1c6   :  { %v29103_v8 = vld [vmem:[%s37809_s0 + $0x770] sm:$0xff]   ;;  %26414 = vst [vmem:[%s37810_s1 + $0x1950] sm:$0xff] %v29102_v7  ;;  %v29127_v32 = vld [vmem:[%s37809_s0 + $0xfc4] sm:$0xff]   ;;  %26506 = vst [vmem:[%s37810_s1 + $0x944] sm:$0xff] %v29125_v30 }
 0x1c7   :  { %v29104_v9 = vld [vmem:[%s37809_s0 + $0x2650] sm:$0xff]   ;;  %26418 = vst [vmem:[%s37810_s1 + $0x2170] sm:$0xff] %v29103_v8  ;;  %26510 = vst [vmem:[%s37810_s1 + $0x1164] sm:$0xff] %v29126_v31  ;;  %v29128_v33 = vld [vmem:[%s37809_s0 + $0x7a4] sm:$0xff]  }
 0x1c8   :  { %v29105_v10 = vld [vmem:[%s37809_s0 + $0x1e30] sm:$0xff]   ;;  %26422 = vst [vmem:[%s37810_s1 + $0x290] sm:$0xff] %v29104_v9  ;;  %v29129_v34 = vld [vmem:[%s37809_s0 + $0x2684] sm:$0xff]   ;;  %26514 = vst [vmem:[%s37810_s1 + $0x1984] sm:$0xff] %v29127_v32 }
 0x1c9   :  { %v29106_v11 = vld [vmem:[%s37809_s0 + $0x1610] sm:$0xff]   ;;  %26426 = vst [vmem:[%s37810_s1 + $0xab0] sm:$0xff] %v29105_v10  ;;  %v29130_v35 = vld [vmem:[%s37809_s0 + $0x1e64] sm:$0xff]   ;;  %26518 = vst [vmem:[%s37810_s1 + $0x21a4] sm:$0xff] %v29128_v33 }
 0x1ca   :  { %v29107_v12 = vld [vmem:[%s37809_s0 + $0xdf0] sm:$0xff]   ;;  %26430 = vst [vmem:[%s37810_s1 + $0x12d0] sm:$0xff] %v29106_v11  ;;  %26522 = vst [vmem:[%s37810_s1 + $0x2c4] sm:$0xff] %v29129_v34  ;;  %v29131_v36 = vld [vmem:[%s37809_s0 + $0x1644] sm:$0xff]  }
 0x1cb   :  { %v29108_v13 = vld [vmem:[%s37809_s0 + $0x5d0] sm:$0xff]   ;;  %26434 = vst [vmem:[%s37810_s1 + $0x1af0] sm:$0xff] %v29107_v12  ;;  %v29132_v37 = vld [vmem:[%s37809_s0 + $0xe24] sm:$0xff]   ;;  %26526 = vst [vmem:[%s37810_s1 + $0xae4] sm:$0xff] %v29130_v35 }
 0x1cc   :  { %v29109_v14 = vld [vmem:[%s37809_s0 + $0x24b0] sm:$0xff]   ;;  %26438 = vst [vmem:[%s37810_s1 + $0x2310] sm:$0xff] %v29108_v13  ;;  %v29133_v38 = vld [vmem:[%s37809_s0 + $0x604] sm:$0xff]   ;;  %26530 = vst [vmem:[%s37810_s1 + $0x1304] sm:$0xff] %v29131_v36 }
 0x1cd   :  { %v29110_v15 = vld [vmem:[%s37809_s0 + $0x1c90] sm:$0xff]   ;;  %26442 = vst [vmem:[%s37810_s1 + $0x430] sm:$0xff] %v29109_v14  ;;  %26534 = vst [vmem:[%s37810_s1 + $0x1b24] sm:$0xff] %v29132_v37  ;;  %v29134_v39 = vld [vmem:[%s37809_s0 + $0x24e4] sm:$0xff]  }
 0x1ce   :  { %v29111_v16 = vld [vmem:[%s37809_s0 + $0x1470] sm:$0xff]   ;;  %26446 = vst [vmem:[%s37810_s1 + $0xc50] sm:$0xff] %v29110_v15  ;;  %v29135_v40 = vld [vmem:[%s37809_s0 + $0x1cc4] sm:$0xff]   ;;  %26538 = vst [vmem:[%s37810_s1 + $0x2344] sm:$0xff] %v29133_v38 }
 0x1cf   :  { %v29112_v17 = vld [vmem:[%s37809_s0 + $0xc50] sm:$0xff]   ;;  %26450 = vst [vmem:[%s37810_s1 + $0x1470] sm:$0xff] %v29111_v16  ;;  %v29136_v41 = vld [vmem:[%s37809_s0 + $0x14a4] sm:$0xff]   ;;  %26542 = vst [vmem:[%s37810_s1 + $0x464] sm:$0xff] %v29134_v39 }
 0x1d0   :  { %v29113_v18 = vld [vmem:[%s37809_s0 + $0x430] sm:$0xff]   ;;  %26454 = vst [vmem:[%s37810_s1 + $0x1c90] sm:$0xff] %v29112_v17  ;;  %26546 = vst [vmem:[%s37810_s1 + $0xc84] sm:$0xff] %v29135_v40  ;;  %v29137_v42 = vld [vmem:[%s37809_s0 + $0xc84] sm:$0xff]  }
 0x1d1   :  { %v29114_v19 = vld [vmem:[%s37809_s0 + $0x2310] sm:$0xff]   ;;  %26458 = vst [vmem:[%s37810_s1 + $0x24b0] sm:$0xff] %v29113_v18  ;;  %v29138_v43 = vld [vmem:[%s37809_s0 + $0x464] sm:$0xff]   ;;  %26550 = vst [vmem:[%s37810_s1 + $0x14a4] sm:$0xff] %v29136_v41 }
 0x1d2   :  { %v29115_v20 = vld [vmem:[%s37809_s0 + $0x1af0] sm:$0xff]   ;;  %26462 = vst [vmem:[%s37810_s1 + $0x5d0] sm:$0xff] %v29114_v19  ;;  %v29139_v44 = vld [vmem:[%s37809_s0 + $0x2344] sm:$0xff]   ;;  %26554 = vst [vmem:[%s37810_s1 + $0x1cc4] sm:$0xff] %v29137_v42 }
 0x1d3   :  { %v29116_v21 = vld [vmem:[%s37809_s0 + $0x12d0] sm:$0xff]   ;;  %26466 = vst [vmem:[%s37810_s1 + $0xdf0] sm:$0xff] %v29115_v20  ;;  %26558 = vst [vmem:[%s37810_s1 + $0x24e4] sm:$0xff] %v29138_v43  ;;  %v29140_v45 = vld [vmem:[%s37809_s0 + $0x1b24] sm:$0xff]  }
 0x1d4   :  { %v29117_v22 = vld [vmem:[%s37809_s0 + $0xab0] sm:$0xff]   ;;  %26470 = vst [vmem:[%s37810_s1 + $0x1610] sm:$0xff] %v29116_v21  ;;  %v29141_v46 = vld [vmem:[%s37809_s0 + $0x1304] sm:$0xff]   ;;  %26562 = vst [vmem:[%s37810_s1 + $0x604] sm:$0xff] %v29139_v44 }
 0x1d5   :  { %v29118_v23 = vld [vmem:[%s37809_s0 + $0x290] sm:$0xff]   ;;  %26474 = vst [vmem:[%s37810_s1 + $0x1e30] sm:$0xff] %v29117_v22  ;;  %v29142_v47 = vld [vmem:[%s37809_s0 + $0xae4] sm:$0xff]   ;;  %26566 = vst [vmem:[%s37810_s1 + $0xe24] sm:$0xff] %v29140_v45 }
 0x1d6   :  { %v29119_v24 = vld [vmem:[%s37809_s0 + $0x2170] sm:$0xff]   ;;  %26478 = vst [vmem:[%s37810_s1 + $0x2650] sm:$0xff] %v29118_v23  ;;  %26570 = vst [vmem:[%s37810_s1 + $0x1644] sm:$0xff] %v29141_v46  ;;  %v29143_v48 = vld [vmem:[%s37809_s0 + $0x2c4] sm:$0xff]  }
 0x1d7   :  { %v29120_v25 = vld [vmem:[%s37809_s0 + $0x1950] sm:$0xff]   ;;  %26482 = vst [vmem:[%s37810_s1 + $0x770] sm:$0xff] %v29119_v24  ;;  %v29144_v49 = vld [vmem:[%s37809_s0 + $0x21a4] sm:$0xff]   ;;  %26574 = vst [vmem:[%s37810_s1 + $0x1e64] sm:$0xff] %v29142_v47 }
 0x1d8   :  { %v29121_v26 = vld [vmem:[%s37809_s0 + $0x1130] sm:$0xff]   ;;  %26486 = vst [vmem:[%s37810_s1 + $0xf90] sm:$0xff] %v29120_v25  ;;  %v29145_v50 = vld [vmem:[%s37809_s0 + $0x1984] sm:$0xff]   ;;  %26578 = vst [vmem:[%s37810_s1 + $0x2684] sm:$0xff] %v29143_v48 }
 0x1d9   :  { %v29122_v27 = vld [vmem:[%s37809_s0 + $0x910] sm:$0xff]   ;;  %26490 = vst [vmem:[%s37810_s1 + $0x17b0] sm:$0xff] %v29121_v26  ;;  %26582 = vst [vmem:[%s37810_s1 + $0x7a4] sm:$0xff] %v29144_v49  ;;  %v29146_v51 = vld [vmem:[%s37809_s0 + $0x1164] sm:$0xff]  }
 0x1da   :  { %v29123_v28 = vld [vmem:[%s37809_s0 + $0xf0] sm:$0xff]   ;;  %26494 = vst [vmem:[%s37810_s1 + $0x1fd0] sm:$0xff] %v29122_v27  ;;  %v29147_v52 = vld [vmem:[%s37809_s0 + $0x944] sm:$0xff]   ;;  %26586 = vst [vmem:[%s37810_s1 + $0xfc4] sm:$0xff] %v29145_v50 }
 0x1db   :  { %26498 = vst [vmem:[%s37810_s1 + $0x27f0] sm:$0xff] %v29123_v28  ;;  %v29148_v53 = vld [vmem:[%s37809_s0 + $0x124] sm:$0xff]   ;;  %26590 = vst [vmem:[%s37810_s1 + $0x17e4] sm:$0xff] %v29146_v51  ;;  %v29149_v54 = vld [vmem:[%s37809_s0 + $0x2858] sm:$0xff]  }
 0x1dc   :  { %26594 = vst [vmem:[%s37810_s1 + $0x2004] sm:$0xff] %v29147_v52  ;;  %v29150_v55 = vld [vmem:[%s37809_s0 + $0x2038] sm:$0xff]   ;;  %26598 = vst [vmem:[%s37810_s1 + $0x2824] sm:$0xff] %v29148_v53  ;;  %v29174_v15 = vld [vmem:[%s37809_s0 + $0x288c] sm:$0xff]  }
 0x1dd   :  { %v29151_v56 = vld [vmem:[%s37809_s0 + $0x1818] sm:$0xff]   ;;  %26602 = vst [vmem:[%s37810_s1 + $0x158] sm:$0xff] %v29149_v54  ;;  %26606 = vst [vmem:[%s37810_s1 + $0x978] sm:$0xff] %v29150_v55  ;;  %v29175_v16 = vld [vmem:[%s37809_s0 + $0x206c] sm:$0xff]  }
 0x1de   :  { %v29152_v57 = vld [vmem:[%s37809_s0 + $0xff8] sm:$0xff]   ;;  %26610 = vst [vmem:[%s37810_s1 + $0x1198] sm:$0xff] %v29151_v56  ;;  %26702 = vst [vmem:[%s37810_s1 + $0x18c] sm:$0xff] %v29174_v15  ;;  %v29176_v17 = vld [vmem:[%s37809_s0 + $0x184c] sm:$0xff]  }
 0x1df   :  { %v29153_v58 = vld [vmem:[%s37809_s0 + $0x7d8] sm:$0xff]   ;;  %26614 = vst [vmem:[%s37810_s1 + $0x19b8] sm:$0xff] %v29152_v57  ;;  %v29177_v18 = vld [vmem:[%s37809_s0 + $0x102c] sm:$0xff]   ;;  %26706 = vst [vmem:[%s37810_s1 + $0x9ac] sm:$0xff] %v29175_v16 }
 0x1e0   :  { %v29154_v59 = vld [vmem:[%s37809_s0 + $0x26b8] sm:$0xff]   ;;  %26618 = vst [vmem:[%s37810_s1 + $0x21d8] sm:$0xff] %v29153_v58  ;;  %v29178_v19 = vld [vmem:[%s37809_s0 + $0x80c] sm:$0xff]   ;;  %26710 = vst [vmem:[%s37810_s1 + $0x11cc] sm:$0xff] %v29176_v17 }
 0x1e1   :  { %v29155_v60 = vld [vmem:[%s37809_s0 + $0x1e98] sm:$0xff]   ;;  %26622 = vst [vmem:[%s37810_s1 + $0x2f8] sm:$0xff] %v29154_v59  ;;  %26714 = vst [vmem:[%s37810_s1 + $0x19ec] sm:$0xff] %v29177_v18  ;;  %v29179_v20 = vld [vmem:[%s37809_s0 + $0x26ec] sm:$0xff]  }
 0x1e2   :  { %v29156_v61 = vld [vmem:[%s37809_s0 + $0x1678] sm:$0xff]   ;;  %26626 = vst [vmem:[%s37810_s1 + $0xb18] sm:$0xff] %v29155_v60  ;;  %v29180_v21 = vld [vmem:[%s37809_s0 + $0x1ecc] sm:$0xff]   ;;  %26718 = vst [vmem:[%s37810_s1 + $0x220c] sm:$0xff] %v29178_v19 }
 0x1e3   :  { %v29157_v62 = vld [vmem:[%s37809_s0 + $0xe58] sm:$0xff]   ;;  %26630 = vst [vmem:[%s37810_s1 + $0x1338] sm:$0xff] %v29156_v61  ;;  %v29181_v22 = vld [vmem:[%s37809_s0 + $0x16ac] sm:$0xff]   ;;  %26722 = vst [vmem:[%s37810_s1 + $0x32c] sm:$0xff] %v29179_v20 }
 0x1e4   :  { %v29158_v63 = vld [vmem:[%s37809_s0 + $0x638] sm:$0xff]   ;;  %26634 = vst [vmem:[%s37810_s1 + $0x1b58] sm:$0xff] %v29157_v62  ;;  %26726 = vst [vmem:[%s37810_s1 + $0xb4c] sm:$0xff] %v29180_v21  ;;  %v29182_v23 = vld [vmem:[%s37809_s0 + $0xe8c] sm:$0xff]  }
 0x1e5   :  { %v29159_v0 = vld [vmem:[%s37809_s0 + $0x2518] sm:$0xff]   ;;  %26638 = vst [vmem:[%s37810_s1 + $0x2378] sm:$0xff] %v29158_v63  ;;  %v29183_v24 = vld [vmem:[%s37809_s0 + $0x66c] sm:$0xff]   ;;  %26730 = vst [vmem:[%s37810_s1 + $0x136c] sm:$0xff] %v29181_v22 }
 0x1e6   :  { %v29160_v1 = vld [vmem:[%s37809_s0 + $0x1cf8] sm:$0xff]   ;;  %26642 = vst [vmem:[%s37810_s1 + $0x498] sm:$0xff] %v29159_v0  ;;  %v29184_v25 = vld [vmem:[%s37809_s0 + $0x254c] sm:$0xff]   ;;  %26734 = vst [vmem:[%s37810_s1 + $0x1b8c] sm:$0xff] %v29182_v23 }
 0x1e7   :  { %v29161_v2 = vld [vmem:[%s37809_s0 + $0x14d8] sm:$0xff]   ;;  %26646 = vst [vmem:[%s37810_s1 + $0xcb8] sm:$0xff] %v29160_v1  ;;  %26738 = vst [vmem:[%s37810_s1 + $0x23ac] sm:$0xff] %v29183_v24  ;;  %v29185_v26 = vld [vmem:[%s37809_s0 + $0x1d2c] sm:$0xff]  }
 0x1e8   :  { %v29162_v3 = vld [vmem:[%s37809_s0 + $0xcb8] sm:$0xff]   ;;  %26650 = vst [vmem:[%s37810_s1 + $0x14d8] sm:$0xff] %v29161_v2  ;;  %v29186_v27 = vld [vmem:[%s37809_s0 + $0x150c] sm:$0xff]   ;;  %26742 = vst [vmem:[%s37810_s1 + $0x4cc] sm:$0xff] %v29184_v25 }
 0x1e9   :  { %v29163_v4 = vld [vmem:[%s37809_s0 + $0x498] sm:$0xff]   ;;  %26654 = vst [vmem:[%s37810_s1 + $0x1cf8] sm:$0xff] %v29162_v3  ;;  %v29187_v28 = vld [vmem:[%s37809_s0 + $0xcec] sm:$0xff]   ;;  %26746 = vst [vmem:[%s37810_s1 + $0xcec] sm:$0xff] %v29185_v26 }
 0x1ea   :  { %v29164_v5 = vld [vmem:[%s37809_s0 + $0x2378] sm:$0xff]   ;;  %26658 = vst [vmem:[%s37810_s1 + $0x2518] sm:$0xff] %v29163_v4  ;;  %26750 = vst [vmem:[%s37810_s1 + $0x150c] sm:$0xff] %v29186_v27  ;;  %v29188_v29 = vld [vmem:[%s37809_s0 + $0x4cc] sm:$0xff]  }
 0x1eb   :  { %v29165_v6 = vld [vmem:[%s37809_s0 + $0x1b58] sm:$0xff]   ;;  %26662 = vst [vmem:[%s37810_s1 + $0x638] sm:$0xff] %v29164_v5  ;;  %v29189_v30 = vld [vmem:[%s37809_s0 + $0x23ac] sm:$0xff]   ;;  %26754 = vst [vmem:[%s37810_s1 + $0x1d2c] sm:$0xff] %v29187_v28 }
 0x1ec   :  { %v29166_v7 = vld [vmem:[%s37809_s0 + $0x1338] sm:$0xff]   ;;  %26666 = vst [vmem:[%s37810_s1 + $0xe58] sm:$0xff] %v29165_v6  ;;  %v29190_v31 = vld [vmem:[%s37809_s0 + $0x1b8c] sm:$0xff]   ;;  %26758 = vst [vmem:[%s37810_s1 + $0x254c] sm:$0xff] %v29188_v29 }
 0x1ed   :  { %v29167_v8 = vld [vmem:[%s37809_s0 + $0xb18] sm:$0xff]   ;;  %26670 = vst [vmem:[%s37810_s1 + $0x1678] sm:$0xff] %v29166_v7  ;;  %26762 = vst [vmem:[%s37810_s1 + $0x66c] sm:$0xff] %v29189_v30  ;;  %v29191_v32 = vld [vmem:[%s37809_s0 + $0x136c] sm:$0xff]  }
 0x1ee   :  { %v29168_v9 = vld [vmem:[%s37809_s0 + $0x2f8] sm:$0xff]   ;;  %26674 = vst [vmem:[%s37810_s1 + $0x1e98] sm:$0xff] %v29167_v8  ;;  %v29192_v33 = vld [vmem:[%s37809_s0 + $0xb4c] sm:$0xff]   ;;  %26766 = vst [vmem:[%s37810_s1 + $0xe8c] sm:$0xff] %v29190_v31 }
 0x1ef   :  { %v29169_v10 = vld [vmem:[%s37809_s0 + $0x21d8] sm:$0xff]   ;;  %26678 = vst [vmem:[%s37810_s1 + $0x26b8] sm:$0xff] %v29168_v9  ;;  %v29193_v34 = vld [vmem:[%s37809_s0 + $0x32c] sm:$0xff]   ;;  %26770 = vst [vmem:[%s37810_s1 + $0x16ac] sm:$0xff] %v29191_v32 }
 0x1f0   :  { %v29170_v11 = vld [vmem:[%s37809_s0 + $0x19b8] sm:$0xff]   ;;  %26682 = vst [vmem:[%s37810_s1 + $0x7d8] sm:$0xff] %v29169_v10  ;;  %26774 = vst [vmem:[%s37810_s1 + $0x1ecc] sm:$0xff] %v29192_v33  ;;  %v29194_v35 = vld [vmem:[%s37809_s0 + $0x220c] sm:$0xff]  }
 0x1f1   :  { %v29171_v12 = vld [vmem:[%s37809_s0 + $0x1198] sm:$0xff]   ;;  %26686 = vst [vmem:[%s37810_s1 + $0xff8] sm:$0xff] %v29170_v11  ;;  %v29195_v36 = vld [vmem:[%s37809_s0 + $0x19ec] sm:$0xff]   ;;  %26778 = vst [vmem:[%s37810_s1 + $0x26ec] sm:$0xff] %v29193_v34 }
 0x1f2   :  { %v29172_v13 = vld [vmem:[%s37809_s0 + $0x978] sm:$0xff]   ;;  %26690 = vst [vmem:[%s37810_s1 + $0x1818] sm:$0xff] %v29171_v12  ;;  %v29196_v37 = vld [vmem:[%s37809_s0 + $0x11cc] sm:$0xff]   ;;  %26782 = vst [vmem:[%s37810_s1 + $0x80c] sm:$0xff] %v29194_v35 }
 0x1f3   :  { %v29173_v14 = vld [vmem:[%s37809_s0 + $0x158] sm:$0xff]   ;;  %26694 = vst [vmem:[%s37810_s1 + $0x2038] sm:$0xff] %v29172_v13  ;;  %26786 = vst [vmem:[%s37810_s1 + $0x102c] sm:$0xff] %v29195_v36  ;;  %v29197_v38 = vld [vmem:[%s37809_s0 + $0x9ac] sm:$0xff]  }
 0x1f4   :  { %26698 = vst [vmem:[%s37810_s1 + $0x2858] sm:$0xff] %v29173_v14  ;;  %v29198_v39 = vld [vmem:[%s37809_s0 + $0x18c] sm:$0xff]   ;;  %26790 = vst [vmem:[%s37810_s1 + $0x184c] sm:$0xff] %v29196_v37  ;;  %v29224_v1 = vld [vmem:[%s37809_s0 + $0x275c] sm:$0xff]  }
 0x1f5   :  { %26794 = vst [vmem:[%s37810_s1 + $0x206c] sm:$0xff] %v29197_v38  ;;  %26798 = vst [vmem:[%s37810_s1 + $0x288c] sm:$0xff] %v29198_v39  ;;  %v29199_v40 = vld [vmem:[%s37809_s0 + $0x2728] sm:$0xff]   ;;  %v29225_v2 = vld [vmem:[%s37809_s0 + $0x1f3c] sm:$0xff]  }
 0x1f6   :  { %v29200_v41 = vld [vmem:[%s37809_s0 + $0x1f08] sm:$0xff]   ;;  %27002 = vst [vmem:[%s37810_s1 + $0x28] sm:$0xff] %v29199_v40  ;;  %27102 = vst [vmem:[%s37810_s1 + $0x5c] sm:$0xff] %v29224_v1  ;;  %v29226_v3 = vld [vmem:[%s37809_s0 + $0x171c] sm:$0xff]  }
 0x1f7   :  { %v29201_v42 = vld [vmem:[%s37809_s0 + $0x16e8] sm:$0xff]   ;;  %27006 = vst [vmem:[%s37810_s1 + $0x848] sm:$0xff] %v29200_v41  ;;  %v29227_v4 = vld [vmem:[%s37809_s0 + $0xefc] sm:$0xff]   ;;  %27106 = vst [vmem:[%s37810_s1 + $0x87c] sm:$0xff] %v29225_v2 }
 0x1f8   :  { %v29202_v43 = vld [vmem:[%s37809_s0 + $0xec8] sm:$0xff]   ;;  %27010 = vst [vmem:[%s37810_s1 + $0x1068] sm:$0xff] %v29201_v42  ;;  %v29228_v5 = vld [vmem:[%s37809_s0 + $0x6dc] sm:$0xff]   ;;  %27110 = vst [vmem:[%s37810_s1 + $0x109c] sm:$0xff] %v29226_v3 }
 0x1f9   :  { %v29203_v44 = vld [vmem:[%s37809_s0 + $0x6a8] sm:$0xff]   ;;  %27014 = vst [vmem:[%s37810_s1 + $0x1888] sm:$0xff] %v29202_v43  ;;  %27114 = vst [vmem:[%s37810_s1 + $0x18bc] sm:$0xff] %v29227_v4  ;;  %v29229_v6 = vld [vmem:[%s37809_s0 + $0x25bc] sm:$0xff]  }
 0x1fa   :  { %v29204_v45 = vld [vmem:[%s37809_s0 + $0x2588] sm:$0xff]   ;;  %27018 = vst [vmem:[%s37810_s1 + $0x20a8] sm:$0xff] %v29203_v44  ;;  %v29230_v7 = vld [vmem:[%s37809_s0 + $0x1d9c] sm:$0xff]   ;;  %27118 = vst [vmem:[%s37810_s1 + $0x20dc] sm:$0xff] %v29228_v5 }
 0x1fb   :  { %v29205_v46 = vld [vmem:[%s37809_s0 + $0x1d68] sm:$0xff]   ;;  %27022 = vst [vmem:[%s37810_s1 + $0x1c8] sm:$0xff] %v29204_v45  ;;  %v29231_v8 = vld [vmem:[%s37809_s0 + $0x157c] sm:$0xff]   ;;  %27122 = vst [vmem:[%s37810_s1 + $0x1fc] sm:$0xff] %v29229_v6 }
 0x1fc   :  { %v29206_v47 = vld [vmem:[%s37809_s0 + $0x1548] sm:$0xff]   ;;  %27026 = vst [vmem:[%s37810_s1 + $0x9e8] sm:$0xff] %v29205_v46  ;;  %27126 = vst [vmem:[%s37810_s1 + $0xa1c] sm:$0xff] %v29230_v7  ;;  %v29232_v9 = vld [vmem:[%s37809_s0 + $0xd5c] sm:$0xff]  }
 0x1fd   :  { %v29207_v48 = vld [vmem:[%s37809_s0 + $0xd28] sm:$0xff]   ;;  %27030 = vst [vmem:[%s37810_s1 + $0x1208] sm:$0xff] %v29206_v47  ;;  %v29233_v10 = vld [vmem:[%s37809_s0 + $0x53c] sm:$0xff]   ;;  %27130 = vst [vmem:[%s37810_s1 + $0x123c] sm:$0xff] %v29231_v8 }
 0x1fe   :  { %v29208_v49 = vld [vmem:[%s37809_s0 + $0x508] sm:$0xff]   ;;  %27034 = vst [vmem:[%s37810_s1 + $0x1a28] sm:$0xff] %v29207_v48  ;;  %v29234_v11 = vld [vmem:[%s37809_s0 + $0x241c] sm:$0xff]   ;;  %27134 = vst [vmem:[%s37810_s1 + $0x1a5c] sm:$0xff] %v29232_v9 }
 0x1ff   :  { %v29209_v50 = vld [vmem:[%s37809_s0 + $0x23e8] sm:$0xff]   ;;  %27038 = vst [vmem:[%s37810_s1 + $0x2248] sm:$0xff] %v29208_v49  ;;  %27138 = vst [vmem:[%s37810_s1 + $0x227c] sm:$0xff] %v29233_v10  ;;  %v29235_v12 = vld [vmem:[%s37809_s0 + $0x1bfc] sm:$0xff]  }
 0x200   :  { %v29210_v51 = vld [vmem:[%s37809_s0 + $0x1bc8] sm:$0xff]   ;;  %27042 = vst [vmem:[%s37810_s1 + $0x368] sm:$0xff] %v29209_v50  ;;  %v29236_v13 = vld [vmem:[%s37809_s0 + $0x13dc] sm:$0xff]   ;;  %27142 = vst [vmem:[%s37810_s1 + $0x39c] sm:$0xff] %v29234_v11 }
 0x201   :  { %v29211_v52 = vld [vmem:[%s37809_s0 + $0x13a8] sm:$0xff]   ;;  %27046 = vst [vmem:[%s37810_s1 + $0xb88] sm:$0xff] %v29210_v51  ;;  %v29237_v14 = vld [vmem:[%s37809_s0 + $0xbbc] sm:$0xff]   ;;  %27146 = vst [vmem:[%s37810_s1 + $0xbbc] sm:$0xff] %v29235_v12 }
 0x202   :  { %v29212_v53 = vld [vmem:[%s37809_s0 + $0xb88] sm:$0xff]   ;;  %27050 = vst [vmem:[%s37810_s1 + $0x13a8] sm:$0xff] %v29211_v52  ;;  %27150 = vst [vmem:[%s37810_s1 + $0x13dc] sm:$0xff] %v29236_v13  ;;  %v29238_v15 = vld [vmem:[%s37809_s0 + $0x39c] sm:$0xff]  }
 0x203   :  { %v29213_v54 = vld [vmem:[%s37809_s0 + $0x368] sm:$0xff]   ;;  %27054 = vst [vmem:[%s37810_s1 + $0x1bc8] sm:$0xff] %v29212_v53  ;;  %v29239_v16 = vld [vmem:[%s37809_s0 + $0x227c] sm:$0xff]   ;;  %27154 = vst [vmem:[%s37810_s1 + $0x1bfc] sm:$0xff] %v29237_v14 }
 0x204   :  { %v29214_v55 = vld [vmem:[%s37809_s0 + $0x2248] sm:$0xff]   ;;  %27058 = vst [vmem:[%s37810_s1 + $0x23e8] sm:$0xff] %v29213_v54  ;;  %v29240_v17 = vld [vmem:[%s37809_s0 + $0x1a5c] sm:$0xff]   ;;  %27158 = vst [vmem:[%s37810_s1 + $0x241c] sm:$0xff] %v29238_v15 }
 0x205   :  { %v29215_v56 = vld [vmem:[%s37809_s0 + $0x1a28] sm:$0xff]   ;;  %27062 = vst [vmem:[%s37810_s1 + $0x508] sm:$0xff] %v29214_v55  ;;  %27162 = vst [vmem:[%s37810_s1 + $0x53c] sm:$0xff] %v29239_v16  ;;  %v29241_v18 = vld [vmem:[%s37809_s0 + $0x123c] sm:$0xff]  }
 0x206   :  { %v29216_v57 = vld [vmem:[%s37809_s0 + $0x1208] sm:$0xff]   ;;  %27066 = vst [vmem:[%s37810_s1 + $0xd28] sm:$0xff] %v29215_v56  ;;  %v29242_v19 = vld [vmem:[%s37809_s0 + $0xa1c] sm:$0xff]   ;;  %27166 = vst [vmem:[%s37810_s1 + $0xd5c] sm:$0xff] %v29240_v17 }
 0x207   :  { %v29217_v58 = vld [vmem:[%s37809_s0 + $0x9e8] sm:$0xff]   ;;  %27070 = vst [vmem:[%s37810_s1 + $0x1548] sm:$0xff] %v29216_v57  ;;  %v29243_v20 = vld [vmem:[%s37809_s0 + $0x1fc] sm:$0xff]   ;;  %27170 = vst [vmem:[%s37810_s1 + $0x157c] sm:$0xff] %v29241_v18 }
 0x208   :  { %v29218_v59 = vld [vmem:[%s37809_s0 + $0x1c8] sm:$0xff]   ;;  %27074 = vst [vmem:[%s37810_s1 + $0x1d68] sm:$0xff] %v29217_v58  ;;  %27174 = vst [vmem:[%s37810_s1 + $0x1d9c] sm:$0xff] %v29242_v19  ;;  %v29244_v21 = vld [vmem:[%s37809_s0 + $0x20dc] sm:$0xff]  }
 0x209   :  { %v29219_v60 = vld [vmem:[%s37809_s0 + $0x20a8] sm:$0xff]   ;;  %27078 = vst [vmem:[%s37810_s1 + $0x2588] sm:$0xff] %v29218_v59  ;;  %v29245_v22 = vld [vmem:[%s37809_s0 + $0x18bc] sm:$0xff]   ;;  %27178 = vst [vmem:[%s37810_s1 + $0x25bc] sm:$0xff] %v29243_v20 }
 0x20a   :  { %v29220_v61 = vld [vmem:[%s37809_s0 + $0x1888] sm:$0xff]   ;;  %27082 = vst [vmem:[%s37810_s1 + $0x6a8] sm:$0xff] %v29219_v60  ;;  %v29246_v23 = vld [vmem:[%s37809_s0 + $0x109c] sm:$0xff]   ;;  %27182 = vst [vmem:[%s37810_s1 + $0x6dc] sm:$0xff] %v29244_v21 }
 0x20b   :  { %v29221_v62 = vld [vmem:[%s37809_s0 + $0x1068] sm:$0xff]   ;;  %27086 = vst [vmem:[%s37810_s1 + $0xec8] sm:$0xff] %v29220_v61  ;;  %27186 = vst [vmem:[%s37810_s1 + $0xefc] sm:$0xff] %v29245_v22  ;;  %v29247_v24 = vld [vmem:[%s37809_s0 + $0x87c] sm:$0xff]  }
 0x20c   :  { %v29222_v63 = vld [vmem:[%s37809_s0 + $0x848] sm:$0xff]   ;;  %27090 = vst [vmem:[%s37810_s1 + $0x16e8] sm:$0xff] %v29221_v62  ;;  %v29248_v25 = vld [vmem:[%s37809_s0 + $0x5c] sm:$0xff]   ;;  %27190 = vst [vmem:[%s37810_s1 + $0x171c] sm:$0xff] %v29246_v23 }
 0x20d   :  { %v29223_v0 = vld [vmem:[%s37809_s0 + $0x28] sm:$0xff]   ;;  %27094 = vst [vmem:[%s37810_s1 + $0x1f08] sm:$0xff] %v29222_v63  ;;  %v29249_v26 = vld [vmem:[%s37809_s0 + $0x2790] sm:$0xff]   ;;  %27194 = vst [vmem:[%s37810_s1 + $0x1f3c] sm:$0xff] %v29247_v24 }
 0x20e   :  { %27098 = vst [vmem:[%s37810_s1 + $0x2728] sm:$0xff] %v29223_v0  ;;  %27198 = vst [vmem:[%s37810_s1 + $0x275c] sm:$0xff] %v29248_v25  ;;  %v29250_v27 = vld [vmem:[%s37809_s0 + $0x1f70] sm:$0xff]   ;;  %v29274_v51 = vld [vmem:[%s37809_s0 + $0x27c4] sm:$0xff]  }
 0x20f   :  { %v29251_v28 = vld [vmem:[%s37809_s0 + $0x1750] sm:$0xff]   ;;  %27202 = vst [vmem:[%s37810_s1 + $0x90] sm:$0xff] %v29249_v26  ;;  %27206 = vst [vmem:[%s37810_s1 + $0x8b0] sm:$0xff] %v29250_v27  ;;  %v29275_v52 = vld [vmem:[%s37809_s0 + $0x1fa4] sm:$0xff]  }
 0x210   :  { %v29252_v29 = vld [vmem:[%s37809_s0 + $0xf30] sm:$0xff]   ;;  %27210 = vst [vmem:[%s37810_s1 + $0x10d0] sm:$0xff] %v29251_v28  ;;  %v29276_v53 = vld [vmem:[%s37809_s0 + $0x1784] sm:$0xff]   ;;  %27302 = vst [vmem:[%s37810_s1 + $0xc4] sm:$0xff] %v29274_v51 }
 0x211   :  { %v29253_v30 = vld [vmem:[%s37809_s0 + $0x710] sm:$0xff]   ;;  %27214 = vst [vmem:[%s37810_s1 + $0x18f0] sm:$0xff] %v29252_v29  ;;  %27306 = vst [vmem:[%s37810_s1 + $0x8e4] sm:$0xff] %v29275_v52  ;;  %v29277_v54 = vld [vmem:[%s37809_s0 + $0xf64] sm:$0xff]  }
 0x212   :  { %v29254_v31 = vld [vmem:[%s37809_s0 + $0x25f0] sm:$0xff]   ;;  %27218 = vst [vmem:[%s37810_s1 + $0x2110] sm:$0xff] %v29253_v30  ;;  %v29278_v55 = vld [vmem:[%s37809_s0 + $0x744] sm:$0xff]   ;;  %27310 = vst [vmem:[%s37810_s1 + $0x1104] sm:$0xff] %v29276_v53 }
 0x213   :  { %v29255_v32 = vld [vmem:[%s37809_s0 + $0x1dd0] sm:$0xff]   ;;  %27222 = vst [vmem:[%s37810_s1 + $0x230] sm:$0xff] %v29254_v31  ;;  %v29279_v56 = vld [vmem:[%s37809_s0 + $0x2624] sm:$0xff]   ;;  %27314 = vst [vmem:[%s37810_s1 + $0x1924] sm:$0xff] %v29277_v54 }
 0x214   :  { %v29256_v33 = vld [vmem:[%s37809_s0 + $0x15b0] sm:$0xff]   ;;  %27226 = vst [vmem:[%s37810_s1 + $0xa50] sm:$0xff] %v29255_v32  ;;  %27318 = vst [vmem:[%s37810_s1 + $0x2144] sm:$0xff] %v29278_v55  ;;  %v29280_v57 = vld [vmem:[%s37809_s0 + $0x1e04] sm:$0xff]  }
 0x215   :  { %v29257_v34 = vld [vmem:[%s37809_s0 + $0xd90] sm:$0xff]   ;;  %27230 = vst [vmem:[%s37810_s1 + $0x1270] sm:$0xff] %v29256_v33  ;;  %v29281_v58 = vld [vmem:[%s37809_s0 + $0x15e4] sm:$0xff]   ;;  %27322 = vst [vmem:[%s37810_s1 + $0x264] sm:$0xff] %v29279_v56 }
 0x216   :  { %v29258_v35 = vld [vmem:[%s37809_s0 + $0x570] sm:$0xff]   ;;  %27234 = vst [vmem:[%s37810_s1 + $0x1a90] sm:$0xff] %v29257_v34  ;;  %v29282_v59 = vld [vmem:[%s37809_s0 + $0xdc4] sm:$0xff]   ;;  %27326 = vst [vmem:[%s37810_s1 + $0xa84] sm:$0xff] %v29280_v57 }
 0x217   :  { %v29259_v36 = vld [vmem:[%s37809_s0 + $0x2450] sm:$0xff]   ;;  %27238 = vst [vmem:[%s37810_s1 + $0x22b0] sm:$0xff] %v29258_v35  ;;  %27330 = vst [vmem:[%s37810_s1 + $0x12a4] sm:$0xff] %v29281_v58  ;;  %v29283_v60 = vld [vmem:[%s37809_s0 + $0x5a4] sm:$0xff]  }
 0x218   :  { %v29260_v37 = vld [vmem:[%s37809_s0 + $0x1c30] sm:$0xff]   ;;  %27242 = vst [vmem:[%s37810_s1 + $0x3d0] sm:$0xff] %v29259_v36  ;;  %v29284_v61 = vld [vmem:[%s37809_s0 + $0x2484] sm:$0xff]   ;;  %27334 = vst [vmem:[%s37810_s1 + $0x1ac4] sm:$0xff] %v29282_v59 }
 0x219   :  { %v29261_v38 = vld [vmem:[%s37809_s0 + $0x1410] sm:$0xff]   ;;  %27246 = vst [vmem:[%s37810_s1 + $0xbf0] sm:$0xff] %v29260_v37  ;;  %v29285_v62 = vld [vmem:[%s37809_s0 + $0x1c64] sm:$0xff]   ;;  %27338 = vst [vmem:[%s37810_s1 + $0x22e4] sm:$0xff] %v29283_v60 }
 0x21a   :  { %v29262_v39 = vld [vmem:[%s37809_s0 + $0xbf0] sm:$0xff]   ;;  %27250 = vst [vmem:[%s37810_s1 + $0x1410] sm:$0xff] %v29261_v38  ;;  %27342 = vst [vmem:[%s37810_s1 + $0x404] sm:$0xff] %v29284_v61  ;;  %v29286_v63 = vld [vmem:[%s37809_s0 + $0x1444] sm:$0xff]  }
 0x21b   :  { %v29263_v40 = vld [vmem:[%s37809_s0 + $0x3d0] sm:$0xff]   ;;  %27254 = vst [vmem:[%s37810_s1 + $0x1c30] sm:$0xff] %v29262_v39  ;;  %v29287_v0 = vld [vmem:[%s37809_s0 + $0xc24] sm:$0xff]   ;;  %27346 = vst [vmem:[%s37810_s1 + $0xc24] sm:$0xff] %v29285_v62 }
 0x21c   :  { %v29264_v41 = vld [vmem:[%s37809_s0 + $0x22b0] sm:$0xff]   ;;  %27258 = vst [vmem:[%s37810_s1 + $0x2450] sm:$0xff] %v29263_v40  ;;  %v29288_v1 = vld [vmem:[%s37809_s0 + $0x404] sm:$0xff]   ;;  %27350 = vst [vmem:[%s37810_s1 + $0x1444] sm:$0xff] %v29286_v63 }
 0x21d   :  { %v29265_v42 = vld [vmem:[%s37809_s0 + $0x1a90] sm:$0xff]   ;;  %27262 = vst [vmem:[%s37810_s1 + $0x570] sm:$0xff] %v29264_v41  ;;  %27354 = vst [vmem:[%s37810_s1 + $0x1c64] sm:$0xff] %v29287_v0  ;;  %v29289_v2 = vld [vmem:[%s37809_s0 + $0x22e4] sm:$0xff]  }
 0x21e   :  { %v29266_v43 = vld [vmem:[%s37809_s0 + $0x1270] sm:$0xff]   ;;  %27266 = vst [vmem:[%s37810_s1 + $0xd90] sm:$0xff] %v29265_v42  ;;  %v29290_v3 = vld [vmem:[%s37809_s0 + $0x1ac4] sm:$0xff]   ;;  %27358 = vst [vmem:[%s37810_s1 + $0x2484] sm:$0xff] %v29288_v1 }
 0x21f   :  { %v29267_v44 = vld [vmem:[%s37809_s0 + $0xa50] sm:$0xff]   ;;  %27270 = vst [vmem:[%s37810_s1 + $0x15b0] sm:$0xff] %v29266_v43  ;;  %v29291_v4 = vld [vmem:[%s37809_s0 + $0x12a4] sm:$0xff]   ;;  %27362 = vst [vmem:[%s37810_s1 + $0x5a4] sm:$0xff] %v29289_v2 }
 0x220   :  { %v29268_v45 = vld [vmem:[%s37809_s0 + $0x230] sm:$0xff]   ;;  %27274 = vst [vmem:[%s37810_s1 + $0x1dd0] sm:$0xff] %v29267_v44  ;;  %27366 = vst [vmem:[%s37810_s1 + $0xdc4] sm:$0xff] %v29290_v3  ;;  %v29292_v5 = vld [vmem:[%s37809_s0 + $0xa84] sm:$0xff]  }
 0x221   :  { %v29269_v46 = vld [vmem:[%s37809_s0 + $0x2110] sm:$0xff]   ;;  %27278 = vst [vmem:[%s37810_s1 + $0x25f0] sm:$0xff] %v29268_v45  ;;  %v29293_v6 = vld [vmem:[%s37809_s0 + $0x264] sm:$0xff]   ;;  %27370 = vst [vmem:[%s37810_s1 + $0x15e4] sm:$0xff] %v29291_v4 }
 0x222   :  { %v29270_v47 = vld [vmem:[%s37809_s0 + $0x18f0] sm:$0xff]   ;;  %27282 = vst [vmem:[%s37810_s1 + $0x710] sm:$0xff] %v29269_v46  ;;  %v29294_v7 = vld [vmem:[%s37809_s0 + $0x2144] sm:$0xff]   ;;  %27374 = vst [vmem:[%s37810_s1 + $0x1e04] sm:$0xff] %v29292_v5 }
 0x223   :  { %v29271_v48 = vld [vmem:[%s37809_s0 + $0x10d0] sm:$0xff]   ;;  %27286 = vst [vmem:[%s37810_s1 + $0xf30] sm:$0xff] %v29270_v47  ;;  %27378 = vst [vmem:[%s37810_s1 + $0x2624] sm:$0xff] %v29293_v6  ;;  %v29295_v8 = vld [vmem:[%s37809_s0 + $0x1924] sm:$0xff]  }
 0x224   :  { %v29272_v49 = vld [vmem:[%s37809_s0 + $0x8b0] sm:$0xff]   ;;  %27290 = vst [vmem:[%s37810_s1 + $0x1750] sm:$0xff] %v29271_v48  ;;  %v29296_v9 = vld [vmem:[%s37809_s0 + $0x1104] sm:$0xff]   ;;  %27382 = vst [vmem:[%s37810_s1 + $0x744] sm:$0xff] %v29294_v7 }
 0x225   :  { %v29273_v50 = vld [vmem:[%s37809_s0 + $0x90] sm:$0xff]   ;;  %27294 = vst [vmem:[%s37810_s1 + $0x1f70] sm:$0xff] %v29272_v49  ;;  %v29297_v10 = vld [vmem:[%s37809_s0 + $0x8e4] sm:$0xff]   ;;  %27386 = vst [vmem:[%s37810_s1 + $0xf64] sm:$0xff] %v29295_v8 }
 0x226   :  { %27298 = vst [vmem:[%s37810_s1 + $0x2790] sm:$0xff] %v29273_v50  ;;  %27390 = vst [vmem:[%s37810_s1 + $0x1784] sm:$0xff] %v29296_v9  ;;  %v29298_v11 = vld [vmem:[%s37809_s0 + $0xc4] sm:$0xff]   ;;  %v29299_v12 = vld [vmem:[%s37809_s0 + $0x27f8] sm:$0xff]  }
 0x227   :  { %27394 = vst [vmem:[%s37810_s1 + $0x1fa4] sm:$0xff] %v29297_v10  ;;  %v29300_v13 = vld [vmem:[%s37809_s0 + $0x1fd8] sm:$0xff]   ;;  %27398 = vst [vmem:[%s37810_s1 + $0x27c4] sm:$0xff] %v29298_v11  ;;  %v29324_v37 = vld [vmem:[%s37809_s0 + $0x282c] sm:$0xff]  }
 0x228   :  { %27402 = vst [vmem:[%s37810_s1 + $0xf8] sm:$0xff] %v29299_v12  ;;  %v29301_v14 = vld [vmem:[%s37809_s0 + $0x17b8] sm:$0xff]   ;;  %27406 = vst [vmem:[%s37810_s1 + $0x918] sm:$0xff] %v29300_v13  ;;  %v29325_v38 = vld [vmem:[%s37809_s0 + $0x200c] sm:$0xff]  }
 0x229   :  { %v29302_v15 = vld [vmem:[%s37809_s0 + $0xf98] sm:$0xff]   ;;  %27410 = vst [vmem:[%s37810_s1 + $0x1138] sm:$0xff] %v29301_v14  ;;  %v29326_v39 = vld [vmem:[%s37809_s0 + $0x17ec] sm:$0xff]   ;;  %27502 = vst [vmem:[%s37810_s1 + $0x12c] sm:$0xff] %v29324_v37 }
 0x22a   :  { %v29303_v16 = vld [vmem:[%s37809_s0 + $0x778] sm:$0xff]   ;;  %27414 = vst [vmem:[%s37810_s1 + $0x1958] sm:$0xff] %v29302_v15  ;;  %v29327_v40 = vld [vmem:[%s37809_s0 + $0xfcc] sm:$0xff]   ;;  %27506 = vst [vmem:[%s37810_s1 + $0x94c] sm:$0xff] %v29325_v38 }
 0x22b   :  { %v29304_v17 = vld [vmem:[%s37809_s0 + $0x2658] sm:$0xff]   ;;  %27418 = vst [vmem:[%s37810_s1 + $0x2178] sm:$0xff] %v29303_v16  ;;  %27510 = vst [vmem:[%s37810_s1 + $0x116c] sm:$0xff] %v29326_v39  ;;  %v29328_v41 = vld [vmem:[%s37809_s0 + $0x7ac] sm:$0xff]  }
 0x22c   :  { %v29305_v18 = vld [vmem:[%s37809_s0 + $0x1e38] sm:$0xff]   ;;  %27422 = vst [vmem:[%s37810_s1 + $0x298] sm:$0xff] %v29304_v17  ;;  %v29329_v42 = vld [vmem:[%s37809_s0 + $0x268c] sm:$0xff]   ;;  %27514 = vst [vmem:[%s37810_s1 + $0x198c] sm:$0xff] %v29327_v40 }
 0x22d   :  { %v29306_v19 = vld [vmem:[%s37809_s0 + $0x1618] sm:$0xff]   ;;  %27426 = vst [vmem:[%s37810_s1 + $0xab8] sm:$0xff] %v29305_v18  ;;  %v29330_v43 = vld [vmem:[%s37809_s0 + $0x1e6c] sm:$0xff]   ;;  %27518 = vst [vmem:[%s37810_s1 + $0x21ac] sm:$0xff] %v29328_v41 }
 0x22e   :  { %v29307_v20 = vld [vmem:[%s37809_s0 + $0xdf8] sm:$0xff]   ;;  %27430 = vst [vmem:[%s37810_s1 + $0x12d8] sm:$0xff] %v29306_v19  ;;  %27522 = vst [vmem:[%s37810_s1 + $0x2cc] sm:$0xff] %v29329_v42  ;;  %v29331_v44 = vld [vmem:[%s37809_s0 + $0x164c] sm:$0xff]  }
 0x22f   :  { %v29308_v21 = vld [vmem:[%s37809_s0 + $0x5d8] sm:$0xff]   ;;  %27434 = vst [vmem:[%s37810_s1 + $0x1af8] sm:$0xff] %v29307_v20  ;;  %v29332_v45 = vld [vmem:[%s37809_s0 + $0xe2c] sm:$0xff]   ;;  %27526 = vst [vmem:[%s37810_s1 + $0xaec] sm:$0xff] %v29330_v43 }
 0x230   :  { %v29309_v22 = vld [vmem:[%s37809_s0 + $0x24b8] sm:$0xff]   ;;  %27438 = vst [vmem:[%s37810_s1 + $0x2318] sm:$0xff] %v29308_v21  ;;  %v29333_v46 = vld [vmem:[%s37809_s0 + $0x60c] sm:$0xff]   ;;  %27530 = vst [vmem:[%s37810_s1 + $0x130c] sm:$0xff] %v29331_v44 }
 0x231   :  { %v29310_v23 = vld [vmem:[%s37809_s0 + $0x1c98] sm:$0xff]   ;;  %27442 = vst [vmem:[%s37810_s1 + $0x438] sm:$0xff] %v29309_v22  ;;  %27534 = vst [vmem:[%s37810_s1 + $0x1b2c] sm:$0xff] %v29332_v45  ;;  %v29334_v47 = vld [vmem:[%s37809_s0 + $0x24ec] sm:$0xff]  }
 0x232   :  { %v29311_v24 = vld [vmem:[%s37809_s0 + $0x1478] sm:$0xff]   ;;  %27446 = vst [vmem:[%s37810_s1 + $0xc58] sm:$0xff] %v29310_v23  ;;  %v29335_v48 = vld [vmem:[%s37809_s0 + $0x1ccc] sm:$0xff]   ;;  %27538 = vst [vmem:[%s37810_s1 + $0x234c] sm:$0xff] %v29333_v46 }
 0x233   :  { %v29312_v25 = vld [vmem:[%s37809_s0 + $0xc58] sm:$0xff]   ;;  %27450 = vst [vmem:[%s37810_s1 + $0x1478] sm:$0xff] %v29311_v24  ;;  %v29336_v49 = vld [vmem:[%s37809_s0 + $0x14ac] sm:$0xff]   ;;  %27542 = vst [vmem:[%s37810_s1 + $0x46c] sm:$0xff] %v29334_v47 }
 0x234   :  { %v29313_v26 = vld [vmem:[%s37809_s0 + $0x438] sm:$0xff]   ;;  %27454 = vst [vmem:[%s37810_s1 + $0x1c98] sm:$0xff] %v29312_v25  ;;  %27546 = vst [vmem:[%s37810_s1 + $0xc8c] sm:$0xff] %v29335_v48  ;;  %v29337_v50 = vld [vmem:[%s37809_s0 + $0xc8c] sm:$0xff]  }
 0x235   :  { %v29314_v27 = vld [vmem:[%s37809_s0 + $0x2318] sm:$0xff]   ;;  %27458 = vst [vmem:[%s37810_s1 + $0x24b8] sm:$0xff] %v29313_v26  ;;  %v29338_v51 = vld [vmem:[%s37809_s0 + $0x46c] sm:$0xff]   ;;  %27550 = vst [vmem:[%s37810_s1 + $0x14ac] sm:$0xff] %v29336_v49 }
 0x236   :  { %v29315_v28 = vld [vmem:[%s37809_s0 + $0x1af8] sm:$0xff]   ;;  %27462 = vst [vmem:[%s37810_s1 + $0x5d8] sm:$0xff] %v29314_v27  ;;  %v29339_v52 = vld [vmem:[%s37809_s0 + $0x234c] sm:$0xff]   ;;  %27554 = vst [vmem:[%s37810_s1 + $0x1ccc] sm:$0xff] %v29337_v50 }
 0x237   :  { %v29316_v29 = vld [vmem:[%s37809_s0 + $0x12d8] sm:$0xff]   ;;  %27466 = vst [vmem:[%s37810_s1 + $0xdf8] sm:$0xff] %v29315_v28  ;;  %27558 = vst [vmem:[%s37810_s1 + $0x24ec] sm:$0xff] %v29338_v51  ;;  %v29340_v53 = vld [vmem:[%s37809_s0 + $0x1b2c] sm:$0xff]  }
 0x238   :  { %v29317_v30 = vld [vmem:[%s37809_s0 + $0xab8] sm:$0xff]   ;;  %27470 = vst [vmem:[%s37810_s1 + $0x1618] sm:$0xff] %v29316_v29  ;;  %v29341_v54 = vld [vmem:[%s37809_s0 + $0x130c] sm:$0xff]   ;;  %27562 = vst [vmem:[%s37810_s1 + $0x60c] sm:$0xff] %v29339_v52 }
 0x239   :  { %v29318_v31 = vld [vmem:[%s37809_s0 + $0x298] sm:$0xff]   ;;  %27474 = vst [vmem:[%s37810_s1 + $0x1e38] sm:$0xff] %v29317_v30  ;;  %v29342_v55 = vld [vmem:[%s37809_s0 + $0xaec] sm:$0xff]   ;;  %27566 = vst [vmem:[%s37810_s1 + $0xe2c] sm:$0xff] %v29340_v53 }
 0x23a   :  { %v29319_v32 = vld [vmem:[%s37809_s0 + $0x2178] sm:$0xff]   ;;  %27478 = vst [vmem:[%s37810_s1 + $0x2658] sm:$0xff] %v29318_v31  ;;  %27570 = vst [vmem:[%s37810_s1 + $0x164c] sm:$0xff] %v29341_v54  ;;  %v29343_v56 = vld [vmem:[%s37809_s0 + $0x2cc] sm:$0xff]  }
 0x23b   :  { %v29320_v33 = vld [vmem:[%s37809_s0 + $0x1958] sm:$0xff]   ;;  %27482 = vst [vmem:[%s37810_s1 + $0x778] sm:$0xff] %v29319_v32  ;;  %v29344_v57 = vld [vmem:[%s37809_s0 + $0x21ac] sm:$0xff]   ;;  %27574 = vst [vmem:[%s37810_s1 + $0x1e6c] sm:$0xff] %v29342_v55 }
 0x23c   :  { %v29321_v34 = vld [vmem:[%s37809_s0 + $0x1138] sm:$0xff]   ;;  %27486 = vst [vmem:[%s37810_s1 + $0xf98] sm:$0xff] %v29320_v33  ;;  %v29345_v58 = vld [vmem:[%s37809_s0 + $0x198c] sm:$0xff]   ;;  %27578 = vst [vmem:[%s37810_s1 + $0x268c] sm:$0xff] %v29343_v56 }
 0x23d   :  { %v29322_v35 = vld [vmem:[%s37809_s0 + $0x918] sm:$0xff]   ;;  %27490 = vst [vmem:[%s37810_s1 + $0x17b8] sm:$0xff] %v29321_v34  ;;  %27582 = vst [vmem:[%s37810_s1 + $0x7ac] sm:$0xff] %v29344_v57  ;;  %v29346_v59 = vld [vmem:[%s37809_s0 + $0x116c] sm:$0xff]  }
 0x23e   :  { %v29323_v36 = vld [vmem:[%s37809_s0 + $0xf8] sm:$0xff]   ;;  %27494 = vst [vmem:[%s37810_s1 + $0x1fd8] sm:$0xff] %v29322_v35  ;;  %v29347_v60 = vld [vmem:[%s37809_s0 + $0x94c] sm:$0xff]   ;;  %27586 = vst [vmem:[%s37810_s1 + $0xfcc] sm:$0xff] %v29345_v58 }
 0x23f   :  { %27498 = vst [vmem:[%s37810_s1 + $0x27f8] sm:$0xff] %v29323_v36  ;;  %v29348_v61 = vld [vmem:[%s37809_s0 + $0x12c] sm:$0xff]   ;;  %27590 = vst [vmem:[%s37810_s1 + $0x17ec] sm:$0xff] %v29346_v59  ;;  %v29349_v62 = vld [vmem:[%s37809_s0 + $0x2860] sm:$0xff]  }
 0x240   :  { %27594 = vst [vmem:[%s37810_s1 + $0x200c] sm:$0xff] %v29347_v60  ;;  %v29350_v63 = vld [vmem:[%s37809_s0 + $0x2040] sm:$0xff]   ;;  %27598 = vst [vmem:[%s37810_s1 + $0x282c] sm:$0xff] %v29348_v61  ;;  %v29374_v23 = vld [vmem:[%s37809_s0 + $0x2894] sm:$0xff]  }
 0x241   :  { %v29351_v0 = vld [vmem:[%s37809_s0 + $0x1820] sm:$0xff]   ;;  %27602 = vst [vmem:[%s37810_s1 + $0x160] sm:$0xff] %v29349_v62  ;;  %27606 = vst [vmem:[%s37810_s1 + $0x980] sm:$0xff] %v29350_v63  ;;  %v29375_v24 = vld [vmem:[%s37809_s0 + $0x2074] sm:$0xff]  }
 0x242   :  { %v29352_v1 = vld [vmem:[%s37809_s0 + $0x1000] sm:$0xff]   ;;  %27610 = vst [vmem:[%s37810_s1 + $0x11a0] sm:$0xff] %v29351_v0  ;;  %27702 = vst [vmem:[%s37810_s1 + $0x194] sm:$0xff] %v29374_v23  ;;  %v29376_v25 = vld [vmem:[%s37809_s0 + $0x1854] sm:$0xff]  }
 0x243   :  { %v29353_v2 = vld [vmem:[%s37809_s0 + $0x7e0] sm:$0xff]   ;;  %27614 = vst [vmem:[%s37810_s1 + $0x19c0] sm:$0xff] %v29352_v1  ;;  %v29377_v26 = vld [vmem:[%s37809_s0 + $0x1034] sm:$0xff]   ;;  %27706 = vst [vmem:[%s37810_s1 + $0x9b4] sm:$0xff] %v29375_v24 }
 0x244   :  { %v29354_v3 = vld [vmem:[%s37809_s0 + $0x26c0] sm:$0xff]   ;;  %27618 = vst [vmem:[%s37810_s1 + $0x21e0] sm:$0xff] %v29353_v2  ;;  %v29378_v27 = vld [vmem:[%s37809_s0 + $0x814] sm:$0xff]   ;;  %27710 = vst [vmem:[%s37810_s1 + $0x11d4] sm:$0xff] %v29376_v25 }
 0x245   :  { %v29355_v4 = vld [vmem:[%s37809_s0 + $0x1ea0] sm:$0xff]   ;;  %27622 = vst [vmem:[%s37810_s1 + $0x300] sm:$0xff] %v29354_v3  ;;  %27714 = vst [vmem:[%s37810_s1 + $0x19f4] sm:$0xff] %v29377_v26  ;;  %v29379_v28 = vld [vmem:[%s37809_s0 + $0x26f4] sm:$0xff]  }
 0x246   :  { %v29356_v5 = vld [vmem:[%s37809_s0 + $0x1680] sm:$0xff]   ;;  %27626 = vst [vmem:[%s37810_s1 + $0xb20] sm:$0xff] %v29355_v4  ;;  %v29380_v29 = vld [vmem:[%s37809_s0 + $0x1ed4] sm:$0xff]   ;;  %27718 = vst [vmem:[%s37810_s1 + $0x2214] sm:$0xff] %v29378_v27 }
 0x247   :  { %v29357_v6 = vld [vmem:[%s37809_s0 + $0xe60] sm:$0xff]   ;;  %27630 = vst [vmem:[%s37810_s1 + $0x1340] sm:$0xff] %v29356_v5  ;;  %v29381_v30 = vld [vmem:[%s37809_s0 + $0x16b4] sm:$0xff]   ;;  %27722 = vst [vmem:[%s37810_s1 + $0x334] sm:$0xff] %v29379_v28 }
 0x248   :  { %v29358_v7 = vld [vmem:[%s37809_s0 + $0x640] sm:$0xff]   ;;  %27634 = vst [vmem:[%s37810_s1 + $0x1b60] sm:$0xff] %v29357_v6  ;;  %27726 = vst [vmem:[%s37810_s1 + $0xb54] sm:$0xff] %v29380_v29  ;;  %v29382_v31 = vld [vmem:[%s37809_s0 + $0xe94] sm:$0xff]  }
 0x249   :  { %v29359_v8 = vld [vmem:[%s37809_s0 + $0x2520] sm:$0xff]   ;;  %27638 = vst [vmem:[%s37810_s1 + $0x2380] sm:$0xff] %v29358_v7  ;;  %v29383_v32 = vld [vmem:[%s37809_s0 + $0x674] sm:$0xff]   ;;  %27730 = vst [vmem:[%s37810_s1 + $0x1374] sm:$0xff] %v29381_v30 }
 0x24a   :  { %v29360_v9 = vld [vmem:[%s37809_s0 + $0x1d00] sm:$0xff]   ;;  %27642 = vst [vmem:[%s37810_s1 + $0x4a0] sm:$0xff] %v29359_v8  ;;  %v29384_v33 = vld [vmem:[%s37809_s0 + $0x2554] sm:$0xff]   ;;  %27734 = vst [vmem:[%s37810_s1 + $0x1b94] sm:$0xff] %v29382_v31 }
 0x24b   :  { %v29361_v10 = vld [vmem:[%s37809_s0 + $0x14e0] sm:$0xff]   ;;  %27646 = vst [vmem:[%s37810_s1 + $0xcc0] sm:$0xff] %v29360_v9  ;;  %27738 = vst [vmem:[%s37810_s1 + $0x23b4] sm:$0xff] %v29383_v32  ;;  %v29385_v34 = vld [vmem:[%s37809_s0 + $0x1d34] sm:$0xff]  }
 0x24c   :  { %v29362_v11 = vld [vmem:[%s37809_s0 + $0xcc0] sm:$0xff]   ;;  %27650 = vst [vmem:[%s37810_s1 + $0x14e0] sm:$0xff] %v29361_v10  ;;  %v29386_v35 = vld [vmem:[%s37809_s0 + $0x1514] sm:$0xff]   ;;  %27742 = vst [vmem:[%s37810_s1 + $0x4d4] sm:$0xff] %v29384_v33 }
 0x24d   :  { %v29363_v12 = vld [vmem:[%s37809_s0 + $0x4a0] sm:$0xff]   ;;  %27654 = vst [vmem:[%s37810_s1 + $0x1d00] sm:$0xff] %v29362_v11  ;;  %v29387_v36 = vld [vmem:[%s37809_s0 + $0xcf4] sm:$0xff]   ;;  %27746 = vst [vmem:[%s37810_s1 + $0xcf4] sm:$0xff] %v29385_v34 }
 0x24e   :  { %v29364_v13 = vld [vmem:[%s37809_s0 + $0x2380] sm:$0xff]   ;;  %27658 = vst [vmem:[%s37810_s1 + $0x2520] sm:$0xff] %v29363_v12  ;;  %27750 = vst [vmem:[%s37810_s1 + $0x1514] sm:$0xff] %v29386_v35  ;;  %v29388_v37 = vld [vmem:[%s37809_s0 + $0x4d4] sm:$0xff]  }
 0x24f   :  { %v29365_v14 = vld [vmem:[%s37809_s0 + $0x1b60] sm:$0xff]   ;;  %27662 = vst [vmem:[%s37810_s1 + $0x640] sm:$0xff] %v29364_v13  ;;  %v29389_v38 = vld [vmem:[%s37809_s0 + $0x23b4] sm:$0xff]   ;;  %27754 = vst [vmem:[%s37810_s1 + $0x1d34] sm:$0xff] %v29387_v36 }
 0x250   :  { %v29366_v15 = vld [vmem:[%s37809_s0 + $0x1340] sm:$0xff]   ;;  %27666 = vst [vmem:[%s37810_s1 + $0xe60] sm:$0xff] %v29365_v14  ;;  %v29390_v39 = vld [vmem:[%s37809_s0 + $0x1b94] sm:$0xff]   ;;  %27758 = vst [vmem:[%s37810_s1 + $0x2554] sm:$0xff] %v29388_v37 }
 0x251   :  { %v29367_v16 = vld [vmem:[%s37809_s0 + $0xb20] sm:$0xff]   ;;  %27670 = vst [vmem:[%s37810_s1 + $0x1680] sm:$0xff] %v29366_v15  ;;  %27762 = vst [vmem:[%s37810_s1 + $0x674] sm:$0xff] %v29389_v38  ;;  %v29391_v40 = vld [vmem:[%s37809_s0 + $0x1374] sm:$0xff]  }
 0x252   :  { %v29368_v17 = vld [vmem:[%s37809_s0 + $0x300] sm:$0xff]   ;;  %27674 = vst [vmem:[%s37810_s1 + $0x1ea0] sm:$0xff] %v29367_v16  ;;  %v29392_v41 = vld [vmem:[%s37809_s0 + $0xb54] sm:$0xff]   ;;  %27766 = vst [vmem:[%s37810_s1 + $0xe94] sm:$0xff] %v29390_v39 }
 0x253   :  { %v29369_v18 = vld [vmem:[%s37809_s0 + $0x21e0] sm:$0xff]   ;;  %27678 = vst [vmem:[%s37810_s1 + $0x26c0] sm:$0xff] %v29368_v17  ;;  %v29393_v42 = vld [vmem:[%s37809_s0 + $0x334] sm:$0xff]   ;;  %27770 = vst [vmem:[%s37810_s1 + $0x16b4] sm:$0xff] %v29391_v40 }
 0x254   :  { %v29370_v19 = vld [vmem:[%s37809_s0 + $0x19c0] sm:$0xff]   ;;  %27682 = vst [vmem:[%s37810_s1 + $0x7e0] sm:$0xff] %v29369_v18  ;;  %27774 = vst [vmem:[%s37810_s1 + $0x1ed4] sm:$0xff] %v29392_v41  ;;  %v29394_v43 = vld [vmem:[%s37809_s0 + $0x2214] sm:$0xff]  }
 0x255   :  { %v29371_v20 = vld [vmem:[%s37809_s0 + $0x11a0] sm:$0xff]   ;;  %27686 = vst [vmem:[%s37810_s1 + $0x1000] sm:$0xff] %v29370_v19  ;;  %v29395_v44 = vld [vmem:[%s37809_s0 + $0x19f4] sm:$0xff]   ;;  %27778 = vst [vmem:[%s37810_s1 + $0x26f4] sm:$0xff] %v29393_v42 }
 0x256   :  { %v29372_v21 = vld [vmem:[%s37809_s0 + $0x980] sm:$0xff]   ;;  %27690 = vst [vmem:[%s37810_s1 + $0x1820] sm:$0xff] %v29371_v20  ;;  %v29396_v45 = vld [vmem:[%s37809_s0 + $0x11d4] sm:$0xff]   ;;  %27782 = vst [vmem:[%s37810_s1 + $0x814] sm:$0xff] %v29394_v43 }
 0x257   :  { %v29373_v22 = vld [vmem:[%s37809_s0 + $0x160] sm:$0xff]   ;;  %27694 = vst [vmem:[%s37810_s1 + $0x2040] sm:$0xff] %v29372_v21  ;;  %27786 = vst [vmem:[%s37810_s1 + $0x1034] sm:$0xff] %v29395_v44  ;;  %v29397_v46 = vld [vmem:[%s37809_s0 + $0x9b4] sm:$0xff]  }
 0x258   :  { %27698 = vst [vmem:[%s37810_s1 + $0x2860] sm:$0xff] %v29373_v22  ;;  %v29398_v47 = vld [vmem:[%s37809_s0 + $0x194] sm:$0xff]   ;;  %27790 = vst [vmem:[%s37810_s1 + $0x1854] sm:$0xff] %v29396_v45  ;;  %v27799_v48 = vld [vmem:[%s37809_s0 + $0x2730] sm:$0xf] }
 0x259   :  { %v27801_v49 = vld [vmem:[%s37809_s0 + $0x1f10] sm:$0xf]  ;;  %27794 = vst [vmem:[%s37810_s1 + $0x2074] sm:$0xff] %v29397_v46  ;;  %27798 = vst [vmem:[%s37810_s1 + $0x2894] sm:$0xff] %v29398_v47  ;;  %v27849_v9 = vld [vmem:[%s37809_s0 + $0x2764] sm:$0xf] }
 0x25a   :  { %v27803_v50 = vld [vmem:[%s37809_s0 + $0x16f0] sm:$0xf]  ;;  %27800 = vst [vmem:[%s37810_s1 + $0x30] sm:$0xf] %v27799_v48  ;;  %27802 = vst [vmem:[%s37810_s1 + $0x850] sm:$0xf] %v27801_v49 }
 0x25b   :  { %27804 = vst [vmem:[%s37810_s1 + $0x1070] sm:$0xf] %v27803_v50  ;;  %v27805_v51 = vld [vmem:[%s37809_s0 + $0xed0] sm:$0xf]  ;;  %v27851_v10 = vld [vmem:[%s37809_s0 + $0x1f44] sm:$0xf] }
 0x25c   :  { %v27807_v52 = vld [vmem:[%s37809_s0 + $0x6b0] sm:$0xf]  ;;  %27806 = vst [vmem:[%s37810_s1 + $0x1890] sm:$0xf] %v27805_v51  ;;  %27850 = vst [vmem:[%s37810_s1 + $0x64] sm:$0xf] %v27849_v9 }
 0x25d   :  { %v27809_v53 = vld [vmem:[%s37809_s0 + $0x2590] sm:$0xf]  ;;  %27808 = vst [vmem:[%s37810_s1 + $0x20b0] sm:$0xf] %v27807_v52  ;;  %27852 = vst [vmem:[%s37810_s1 + $0x884] sm:$0xf] %v27851_v10 }
 0x25e   :  { %27810 = vst [vmem:[%s37810_s1 + $0x1d0] sm:$0xf] %v27809_v53  ;;  %v27811_v54 = vld [vmem:[%s37809_s0 + $0x1d70] sm:$0xf]  ;;  %v27853_v11 = vld [vmem:[%s37809_s0 + $0x1724] sm:$0xf] }
 0x25f   :  { %v27813_v55 = vld [vmem:[%s37809_s0 + $0x1550] sm:$0xf]  ;;  %27812 = vst [vmem:[%s37810_s1 + $0x9f0] sm:$0xf] %v27811_v54  ;;  %v27855_v12 = vld [vmem:[%s37809_s0 + $0xf04] sm:$0xf] }
 0x260   :  { %v27815_v56 = vld [vmem:[%s37809_s0 + $0xd30] sm:$0xf]  ;;  %27814 = vst [vmem:[%s37810_s1 + $0x1210] sm:$0xf] %v27813_v55  ;;  %v27857_v13 = vld [vmem:[%s37809_s0 + $0x6e4] sm:$0xf] }
 0x261   :  { %27816 = vst [vmem:[%s37810_s1 + $0x1a30] sm:$0xf] %v27815_v56  ;;  %v27817_v57 = vld [vmem:[%s37809_s0 + $0x510] sm:$0xf]  ;;  %27854 = vst [vmem:[%s37810_s1 + $0x10a4] sm:$0xf] %v27853_v11 }
 0x262   :  { %v27819_v58 = vld [vmem:[%s37809_s0 + $0x23f0] sm:$0xf]  ;;  %27818 = vst [vmem:[%s37810_s1 + $0x2250] sm:$0xf] %v27817_v57  ;;  %27856 = vst [vmem:[%s37810_s1 + $0x18c4] sm:$0xf] %v27855_v12 }
 0x263   :  { %v27821_v59 = vld [vmem:[%s37809_s0 + $0x1bd0] sm:$0xf]  ;;  %27820 = vst [vmem:[%s37810_s1 + $0x370] sm:$0xf] %v27819_v58  ;;  %27858 = vst [vmem:[%s37810_s1 + $0x20e4] sm:$0xf] %v27857_v13 }
 0x264   :  { %27822 = vst [vmem:[%s37810_s1 + $0xb90] sm:$0xf] %v27821_v59  ;;  %v27823_v60 = vld [vmem:[%s37809_s0 + $0x13b0] sm:$0xf]  ;;  %v27859_v14 = vld [vmem:[%s37809_s0 + $0x25c4] sm:$0xf] }
 0x265   :  { %v27825_v61 = vld [vmem:[%s37809_s0 + $0xb90] sm:$0xf]  ;;  %27824 = vst [vmem:[%s37810_s1 + $0x13b0] sm:$0xf] %v27823_v60  ;;  %v27861_v15 = vld [vmem:[%s37809_s0 + $0x1da4] sm:$0xf] }
 0x266   :  { %v27827_v62 = vld [vmem:[%s37809_s0 + $0x370] sm:$0xf]  ;;  %27826 = vst [vmem:[%s37810_s1 + $0x1bd0] sm:$0xf] %v27825_v61  ;;  %v27863_v16 = vld [vmem:[%s37809_s0 + $0x1584] sm:$0xf] }
 0x267   :  { %27828 = vst [vmem:[%s37810_s1 + $0x23f0] sm:$0xf] %v27827_v62  ;;  %v27829_v63 = vld [vmem:[%s37809_s0 + $0x2250] sm:$0xf]  ;;  %27860 = vst [vmem:[%s37810_s1 + $0x204] sm:$0xf] %v27859_v14 }
 0x268   :  { %v27831_v0 = vld [vmem:[%s37809_s0 + $0x1a30] sm:$0xf]  ;;  %27830 = vst [vmem:[%s37810_s1 + $0x510] sm:$0xf] %v27829_v63  ;;  %27862 = vst [vmem:[%s37810_s1 + $0xa24] sm:$0xf] %v27861_v15 }
 0x269   :  { %v27833_v1 = vld [vmem:[%s37809_s0 + $0x1210] sm:$0xf]  ;;  %27832 = vst [vmem:[%s37810_s1 + $0xd30] sm:$0xf] %v27831_v0  ;;  %27864 = vst [vmem:[%s37810_s1 + $0x1244] sm:$0xf] %v27863_v16 }
 0x26a   :  { %27834 = vst [vmem:[%s37810_s1 + $0x1550] sm:$0xf] %v27833_v1  ;;  %v27835_v2 = vld [vmem:[%s37809_s0 + $0x9f0] sm:$0xf]  ;;  %v27865_v17 = vld [vmem:[%s37809_s0 + $0xd64] sm:$0xf] }
 0x26b   :  { %v27837_v3 = vld [vmem:[%s37809_s0 + $0x1d0] sm:$0xf]  ;;  %27836 = vst [vmem:[%s37810_s1 + $0x1d70] sm:$0xf] %v27835_v2  ;;  %v27867_v18 = vld [vmem:[%s37809_s0 + $0x544] sm:$0xf] }
 0x26c   :  { %v27839_v4 = vld [vmem:[%s37809_s0 + $0x20b0] sm:$0xf]  ;;  %27838 = vst [vmem:[%s37810_s1 + $0x2590] sm:$0xf] %v27837_v3  ;;  %v27869_v19 = vld [vmem:[%s37809_s0 + $0x2424] sm:$0xf] }
 0x26d   :  { %27840 = vst [vmem:[%s37810_s1 + $0x6b0] sm:$0xf] %v27839_v4  ;;  %v27841_v5 = vld [vmem:[%s37809_s0 + $0x1890] sm:$0xf]  ;;  %27866 = vst [vmem:[%s37810_s1 + $0x1a64] sm:$0xf] %v27865_v17 }
 0x26e   :  { %v27843_v6 = vld [vmem:[%s37809_s0 + $0x1070] sm:$0xf]  ;;  %27842 = vst [vmem:[%s37810_s1 + $0xed0] sm:$0xf] %v27841_v5  ;;  %27868 = vst [vmem:[%s37810_s1 + $0x2284] sm:$0xf] %v27867_v18 }
 0x26f   :  { %v27845_v7 = vld [vmem:[%s37809_s0 + $0x850] sm:$0xf]  ;;  %27844 = vst [vmem:[%s37810_s1 + $0x16f0] sm:$0xf] %v27843_v6  ;;  %27870 = vst [vmem:[%s37810_s1 + $0x3a4] sm:$0xf] %v27869_v19 }
 0x270   :  { %27846 = vst [vmem:[%s37810_s1 + $0x1f10] sm:$0xf] %v27845_v7  ;;  %v27847_v8 = vld [vmem:[%s37809_s0 + $0x30] sm:$0xf]  ;;  %v27871_v20 = vld [vmem:[%s37809_s0 + $0x1c04] sm:$0xf] }
 0x271   :  { %27848 = vst [vmem:[%s37810_s1 + $0x2730] sm:$0xf] %v27847_v8  ;;  %v27873_v21 = vld [vmem:[%s37809_s0 + $0x13e4] sm:$0xf]  ;;  %27872 = vst [vmem:[%s37810_s1 + $0xbc4] sm:$0xf] %v27871_v20 }
 0x272   :  { %v27875_v22 = vld [vmem:[%s37809_s0 + $0xbc4] sm:$0xf]  ;;  %27874 = vst [vmem:[%s37810_s1 + $0x13e4] sm:$0xf] %v27873_v21  ;;  %v27899_v34 = vld [vmem:[%s37809_s0 + $0x2798] sm:$0xf] }
 0x273   :  { %27876 = vst [vmem:[%s37810_s1 + $0x1c04] sm:$0xf] %v27875_v22  ;;  %v27877_v23 = vld [vmem:[%s37809_s0 + $0x3a4] sm:$0xf]  ;;  %27900 = vst [vmem:[%s37810_s1 + $0x98] sm:$0xf] %v27899_v34 }
 0x274   :  { %v27879_v24 = vld [vmem:[%s37809_s0 + $0x2284] sm:$0xf]  ;;  %27878 = vst [vmem:[%s37810_s1 + $0x2424] sm:$0xf] %v27877_v23  ;;  %v27901_v35 = vld [vmem:[%s37809_s0 + $0x1f78] sm:$0xf] }
 0x275   :  { %v27881_v25 = vld [vmem:[%s37809_s0 + $0x1a64] sm:$0xf]  ;;  %27880 = vst [vmem:[%s37810_s1 + $0x544] sm:$0xf] %v27879_v24  ;;  %v27903_v36 = vld [vmem:[%s37809_s0 + $0x1758] sm:$0xf] }
 0x276   :  { %27882 = vst [vmem:[%s37810_s1 + $0xd64] sm:$0xf] %v27881_v25  ;;  %v27883_v26 = vld [vmem:[%s37809_s0 + $0x1244] sm:$0xf]  ;;  %v27905_v37 = vld [vmem:[%s37809_s0 + $0xf38] sm:$0xf] }
 0x277   :  { %v27885_v27 = vld [vmem:[%s37809_s0 + $0xa24] sm:$0xf]  ;;  %27884 = vst [vmem:[%s37810_s1 + $0x1584] sm:$0xf] %v27883_v26  ;;  %27902 = vst [vmem:[%s37810_s1 + $0x8b8] sm:$0xf] %v27901_v35 }
 0x278   :  { %v27887_v28 = vld [vmem:[%s37809_s0 + $0x204] sm:$0xf]  ;;  %27886 = vst [vmem:[%s37810_s1 + $0x1da4] sm:$0xf] %v27885_v27  ;;  %27904 = vst [vmem:[%s37810_s1 + $0x10d8] sm:$0xf] %v27903_v36 }
 0x279   :  { %27888 = vst [vmem:[%s37810_s1 + $0x25c4] sm:$0xf] %v27887_v28  ;;  %v27889_v29 = vld [vmem:[%s37809_s0 + $0x20e4] sm:$0xf]  ;;  %27906 = vst [vmem:[%s37810_s1 + $0x18f8] sm:$0xf] %v27905_v37 }
 0x27a   :  { %v27891_v30 = vld [vmem:[%s37809_s0 + $0x18c4] sm:$0xf]  ;;  %27890 = vst [vmem:[%s37810_s1 + $0x6e4] sm:$0xf] %v27889_v29  ;;  %v27907_v38 = vld [vmem:[%s37809_s0 + $0x718] sm:$0xf] }
 0x27b   :  { %v27893_v31 = vld [vmem:[%s37809_s0 + $0x10a4] sm:$0xf]  ;;  %27892 = vst [vmem:[%s37810_s1 + $0xf04] sm:$0xf] %v27891_v30  ;;  %v27909_v39 = vld [vmem:[%s37809_s0 + $0x25f8] sm:$0xf] }
 0x27c   :  { %27894 = vst [vmem:[%s37810_s1 + $0x1724] sm:$0xf] %v27893_v31  ;;  %v27895_v32 = vld [vmem:[%s37809_s0 + $0x884] sm:$0xf]  ;;  %v27911_v40 = vld [vmem:[%s37809_s0 + $0x1dd8] sm:$0xf] }
 0x27d   :  { %v27897_v33 = vld [vmem:[%s37809_s0 + $0x64] sm:$0xf]  ;;  %27896 = vst [vmem:[%s37810_s1 + $0x1f44] sm:$0xf] %v27895_v32  ;;  %27908 = vst [vmem:[%s37810_s1 + $0x2118] sm:$0xf] %v27907_v38 }
 0x27e   :  { %27898 = vst [vmem:[%s37810_s1 + $0x2764] sm:$0xf] %v27897_v33  ;;  %27910 = vst [vmem:[%s37810_s1 + $0x238] sm:$0xf] %v27909_v39  ;;  %v27913_v41 = vld [vmem:[%s37809_s0 + $0x15b8] sm:$0xf] }
 0x27f   :  { %27912 = vst [vmem:[%s37810_s1 + $0xa58] sm:$0xf] %v27911_v40  ;;  %v27915_v42 = vld [vmem:[%s37809_s0 + $0xd98] sm:$0xf]  ;;  %27914 = vst [vmem:[%s37810_s1 + $0x1278] sm:$0xf] %v27913_v41 }
 0x280   :  { %v27917_v43 = vld [vmem:[%s37809_s0 + $0x578] sm:$0xf]  ;;  %27916 = vst [vmem:[%s37810_s1 + $0x1a98] sm:$0xf] %v27915_v42  ;;  %v27949_v59 = vld [vmem:[%s37809_s0 + $0x27cc] sm:$0xf] }
 0x281   :  { %27918 = vst [vmem:[%s37810_s1 + $0x22b8] sm:$0xf] %v27917_v43  ;;  %v27919_v44 = vld [vmem:[%s37809_s0 + $0x2458] sm:$0xf]  ;;  %v27951_v60 = vld [vmem:[%s37809_s0 + $0x1fac] sm:$0xf] }
 0x282   :  { %v27921_v45 = vld [vmem:[%s37809_s0 + $0x1c38] sm:$0xf]  ;;  %27920 = vst [vmem:[%s37810_s1 + $0x3d8] sm:$0xf] %v27919_v44  ;;  %v27953_v61 = vld [vmem:[%s37809_s0 + $0x178c] sm:$0xf] }
 0x283   :  { %v27923_v46 = vld [vmem:[%s37809_s0 + $0x1418] sm:$0xf]  ;;  %27922 = vst [vmem:[%s37810_s1 + $0xbf8] sm:$0xf] %v27921_v45  ;;  %27950 = vst [vmem:[%s37810_s1 + $0xcc] sm:$0xf] %v27949_v59 }
 0x284   :  { %27924 = vst [vmem:[%s37810_s1 + $0x1418] sm:$0xf] %v27923_v46  ;;  %v27925_v47 = vld [vmem:[%s37809_s0 + $0xbf8] sm:$0xf]  ;;  %27952 = vst [vmem:[%s37810_s1 + $0x8ec] sm:$0xf] %v27951_v60 }
 0x285   :  { %v27927_v48 = vld [vmem:[%s37809_s0 + $0x3d8] sm:$0xf]  ;;  %27926 = vst [vmem:[%s37810_s1 + $0x1c38] sm:$0xf] %v27925_v47  ;;  %27954 = vst [vmem:[%s37810_s1 + $0x110c] sm:$0xf] %v27953_v61 }
 0x286   :  { %v27929_v49 = vld [vmem:[%s37809_s0 + $0x22b8] sm:$0xf]  ;;  %27928 = vst [vmem:[%s37810_s1 + $0x2458] sm:$0xf] %v27927_v48  ;;  %v27955_v62 = vld [vmem:[%s37809_s0 + $0xf6c] sm:$0xf] }
 0x287   :  { %27930 = vst [vmem:[%s37810_s1 + $0x578] sm:$0xf] %v27929_v49  ;;  %v27931_v50 = vld [vmem:[%s37809_s0 + $0x1a98] sm:$0xf]  ;;  %v27957_v63 = vld [vmem:[%s37809_s0 + $0x74c] sm:$0xf] }
 0x288   :  { %v27933_v51 = vld [vmem:[%s37809_s0 + $0x1278] sm:$0xf]  ;;  %27932 = vst [vmem:[%s37810_s1 + $0xd98] sm:$0xf] %v27931_v50  ;;  %v27959_v0 = vld [vmem:[%s37809_s0 + $0x262c] sm:$0xf] }
 0x289   :  { %v27935_v52 = vld [vmem:[%s37809_s0 + $0xa58] sm:$0xf]  ;;  %27934 = vst [vmem:[%s37810_s1 + $0x15b8] sm:$0xf] %v27933_v51  ;;  %27956 = vst [vmem:[%s37810_s1 + $0x192c] sm:$0xf] %v27955_v62 }
 0x28a   :  { %27936 = vst [vmem:[%s37810_s1 + $0x1dd8] sm:$0xf] %v27935_v52  ;;  %v27937_v53 = vld [vmem:[%s37809_s0 + $0x238] sm:$0xf]  ;;  %27958 = vst [vmem:[%s37810_s1 + $0x214c] sm:$0xf] %v27957_v63 }
 0x28b   :  { %v27939_v54 = vld [vmem:[%s37809_s0 + $0x2118] sm:$0xf]  ;;  %27938 = vst [vmem:[%s37810_s1 + $0x25f8] sm:$0xf] %v27937_v53  ;;  %27960 = vst [vmem:[%s37810_s1 + $0x26c] sm:$0xf] %v27959_v0 }
 0x28c   :  { %v27941_v55 = vld [vmem:[%s37809_s0 + $0x18f8] sm:$0xf]  ;;  %27940 = vst [vmem:[%s37810_s1 + $0x718] sm:$0xf] %v27939_v54  ;;  %v27961_v1 = vld [vmem:[%s37809_s0 + $0x1e0c] sm:$0xf] }
 0x28d   :  { %27942 = vst [vmem:[%s37810_s1 + $0xf38] sm:$0xf] %v27941_v55  ;;  %v27943_v56 = vld [vmem:[%s37809_s0 + $0x10d8] sm:$0xf]  ;;  %v27963_v2 = vld [vmem:[%s37809_s0 + $0x15ec] sm:$0xf] }
 0x28e   :  { %v27945_v57 = vld [vmem:[%s37809_s0 + $0x8b8] sm:$0xf]  ;;  %27944 = vst [vmem:[%s37810_s1 + $0x1758] sm:$0xf] %v27943_v56  ;;  %v27965_v3 = vld [vmem:[%s37809_s0 + $0xdcc] sm:$0xf] }
 0x28f   :  { %v27947_v58 = vld [vmem:[%s37809_s0 + $0x98] sm:$0xf]  ;;  %27946 = vst [vmem:[%s37810_s1 + $0x1f78] sm:$0xf] %v27945_v57  ;;  %27962 = vst [vmem:[%s37810_s1 + $0xa8c] sm:$0xf] %v27961_v1 }
 0x290   :  { %27948 = vst [vmem:[%s37810_s1 + $0x2798] sm:$0xf] %v27947_v58  ;;  %27964 = vst [vmem:[%s37810_s1 + $0x12ac] sm:$0xf] %v27963_v2  ;;  %v27967_v4 = vld [vmem:[%s37809_s0 + $0x5ac] sm:$0xf] }
 0x291   :  { %27966 = vst [vmem:[%s37810_s1 + $0x1acc] sm:$0xf] %v27965_v3  ;;  %v27969_v5 = vld [vmem:[%s37809_s0 + $0x248c] sm:$0xf]  ;;  %27968 = vst [vmem:[%s37810_s1 + $0x22ec] sm:$0xf] %v27967_v4 }
 0x292   :  { %v27971_v6 = vld [vmem:[%s37809_s0 + $0x1c6c] sm:$0xf]  ;;  %27970 = vst [vmem:[%s37810_s1 + $0x40c] sm:$0xf] %v27969_v5  ;;  %v27999_v20 = vld [vmem:[%s37809_s0 + $0x2800] sm:$0xf] }
 0x293   :  { %27972 = vst [vmem:[%s37810_s1 + $0xc2c] sm:$0xf] %v27971_v6  ;;  %v27973_v7 = vld [vmem:[%s37809_s0 + $0x144c] sm:$0xf]  ;;  %v28001_v21 = vld [vmem:[%s37809_s0 + $0x1fe0] sm:$0xf] }
 0x294   :  { %v27975_v8 = vld [vmem:[%s37809_s0 + $0xc2c] sm:$0xf]  ;;  %27974 = vst [vmem:[%s37810_s1 + $0x144c] sm:$0xf] %v27973_v7  ;;  %28000 = vst [vmem:[%s37810_s1 + $0x100] sm:$0xf] %v27999_v20 }
 0x295   :  { %v27977_v9 = vld [vmem:[%s37809_s0 + $0x40c] sm:$0xf]  ;;  %27976 = vst [vmem:[%s37810_s1 + $0x1c6c] sm:$0xf] %v27975_v8  ;;  %28002 = vst [vmem:[%s37810_s1 + $0x920] sm:$0xf] %v28001_v21 }
 0x296   :  { %27978 = vst [vmem:[%s37810_s1 + $0x248c] sm:$0xf] %v27977_v9  ;;  %v27979_v10 = vld [vmem:[%s37809_s0 + $0x22ec] sm:$0xf]  ;;  %v28003_v22 = vld [vmem:[%s37809_s0 + $0x17c0] sm:$0xf] }
 0x297   :  { %v27981_v11 = vld [vmem:[%s37809_s0 + $0x1acc] sm:$0xf]  ;;  %27980 = vst [vmem:[%s37810_s1 + $0x5ac] sm:$0xf] %v27979_v10  ;;  %v28005_v23 = vld [vmem:[%s37809_s0 + $0xfa0] sm:$0xf] }
 0x298   :  { %v27983_v12 = vld [vmem:[%s37809_s0 + $0x12ac] sm:$0xf]  ;;  %27982 = vst [vmem:[%s37810_s1 + $0xdcc] sm:$0xf] %v27981_v11  ;;  %v28007_v24 = vld [vmem:[%s37809_s0 + $0x780] sm:$0xf] }
 0x299   :  { %27984 = vst [vmem:[%s37810_s1 + $0x15ec] sm:$0xf] %v27983_v12  ;;  %v27985_v13 = vld [vmem:[%s37809_s0 + $0xa8c] sm:$0xf]  ;;  %28004 = vst [vmem:[%s37810_s1 + $0x1140] sm:$0xf] %v28003_v22 }
 0x29a   :  { %v27987_v14 = vld [vmem:[%s37809_s0 + $0x26c] sm:$0xf]  ;;  %27986 = vst [vmem:[%s37810_s1 + $0x1e0c] sm:$0xf] %v27985_v13  ;;  %28006 = vst [vmem:[%s37810_s1 + $0x1960] sm:$0xf] %v28005_v23 }
 0x29b   :  { %v27989_v15 = vld [vmem:[%s37809_s0 + $0x214c] sm:$0xf]  ;;  %27988 = vst [vmem:[%s37810_s1 + $0x262c] sm:$0xf] %v27987_v14  ;;  %28008 = vst [vmem:[%s37810_s1 + $0x2180] sm:$0xf] %v28007_v24 }
 0x29c   :  { %27990 = vst [vmem:[%s37810_s1 + $0x74c] sm:$0xf] %v27989_v15  ;;  %v27991_v16 = vld [vmem:[%s37809_s0 + $0x192c] sm:$0xf]  ;;  %v28009_v25 = vld [vmem:[%s37809_s0 + $0x2660] sm:$0xf] }
 0x29d   :  { %v27993_v17 = vld [vmem:[%s37809_s0 + $0x110c] sm:$0xf]  ;;  %27992 = vst [vmem:[%s37810_s1 + $0xf6c] sm:$0xf] %v27991_v16  ;;  %v28011_v26 = vld [vmem:[%s37809_s0 + $0x1e40] sm:$0xf] }
 0x29e   :  { %v27995_v18 = vld [vmem:[%s37809_s0 + $0x8ec] sm:$0xf]  ;;  %27994 = vst [vmem:[%s37810_s1 + $0x178c] sm:$0xf] %v27993_v17  ;;  %v28013_v27 = vld [vmem:[%s37809_s0 + $0x1620] sm:$0xf] }
 0x29f   :  { %27996 = vst [vmem:[%s37810_s1 + $0x1fac] sm:$0xf] %v27995_v18  ;;  %v27997_v19 = vld [vmem:[%s37809_s0 + $0xcc] sm:$0xf]  ;;  %28010 = vst [vmem:[%s37810_s1 + $0x2a0] sm:$0xf] %v28009_v25 }
 0x2a0   :  { %27998 = vst [vmem:[%s37810_s1 + $0x27cc] sm:$0xf] %v27997_v19  ;;  %28012 = vst [vmem:[%s37810_s1 + $0xac0] sm:$0xf] %v28011_v26  ;;  %v28015_v28 = vld [vmem:[%s37809_s0 + $0xe00] sm:$0xf] }
 0x2a1   :  { %28014 = vst [vmem:[%s37810_s1 + $0x12e0] sm:$0xf] %v28013_v27  ;;  %v28017_v29 = vld [vmem:[%s37809_s0 + $0x5e0] sm:$0xf]  ;;  %28016 = vst [vmem:[%s37810_s1 + $0x1b00] sm:$0xf] %v28015_v28 }
 0x2a2   :  { %v28019_v30 = vld [vmem:[%s37809_s0 + $0x24c0] sm:$0xf]  ;;  %28018 = vst [vmem:[%s37810_s1 + $0x2320] sm:$0xf] %v28017_v29  ;;  %v28049_v45 = vld [vmem:[%s37809_s0 + $0x2834] sm:$0xf] }
 0x2a3   :  { %28020 = vst [vmem:[%s37810_s1 + $0x440] sm:$0xf] %v28019_v30  ;;  %v28021_v31 = vld [vmem:[%s37809_s0 + $0x1ca0] sm:$0xf]  ;;  %28050 = vst [vmem:[%s37810_s1 + $0x134] sm:$0xf] %v28049_v45 }
 0x2a4   :  { %v28023_v32 = vld [vmem:[%s37809_s0 + $0x1480] sm:$0xf]  ;;  %28022 = vst [vmem:[%s37810_s1 + $0xc60] sm:$0xf] %v28021_v31  ;;  %v28051_v46 = vld [vmem:[%s37809_s0 + $0x2014] sm:$0xf] }
 0x2a5   :  { %v28025_v33 = vld [vmem:[%s37809_s0 + $0xc60] sm:$0xf]  ;;  %28024 = vst [vmem:[%s37810_s1 + $0x1480] sm:$0xf] %v28023_v32  ;;  %v28053_v47 = vld [vmem:[%s37809_s0 + $0x17f4] sm:$0xf] }
 0x2a6   :  { %28026 = vst [vmem:[%s37810_s1 + $0x1ca0] sm:$0xf] %v28025_v33  ;;  %v28027_v34 = vld [vmem:[%s37809_s0 + $0x440] sm:$0xf]  ;;  %v28055_v48 = vld [vmem:[%s37809_s0 + $0xfd4] sm:$0xf] }
 0x2a7   :  { %v28029_v35 = vld [vmem:[%s37809_s0 + $0x2320] sm:$0xf]  ;;  %28028 = vst [vmem:[%s37810_s1 + $0x24c0] sm:$0xf] %v28027_v34  ;;  %28052 = vst [vmem:[%s37810_s1 + $0x954] sm:$0xf] %v28051_v46 }
 0x2a8   :  { %v28031_v36 = vld [vmem:[%s37809_s0 + $0x1b00] sm:$0xf]  ;;  %28030 = vst [vmem:[%s37810_s1 + $0x5e0] sm:$0xf] %v28029_v35  ;;  %28054 = vst [vmem:[%s37810_s1 + $0x1174] sm:$0xf] %v28053_v47 }
 0x2a9   :  { %28032 = vst [vmem:[%s37810_s1 + $0xe00] sm:$0xf] %v28031_v36  ;;  %v28033_v37 = vld [vmem:[%s37809_s0 + $0x12e0] sm:$0xf]  ;;  %28056 = vst [vmem:[%s37810_s1 + $0x1994] sm:$0xf] %v28055_v48 }
 0x2aa   :  { %v28035_v38 = vld [vmem:[%s37809_s0 + $0xac0] sm:$0xf]  ;;  %28034 = vst [vmem:[%s37810_s1 + $0x1620] sm:$0xf] %v28033_v37  ;;  %v28057_v49 = vld [vmem:[%s37809_s0 + $0x7b4] sm:$0xf] }
 0x2ab   :  { %v28037_v39 = vld [vmem:[%s37809_s0 + $0x2a0] sm:$0xf]  ;;  %28036 = vst [vmem:[%s37810_s1 + $0x1e40] sm:$0xf] %v28035_v38  ;;  %v28059_v50 = vld [vmem:[%s37809_s0 + $0x2694] sm:$0xf] }
 0x2ac   :  { %28038 = vst [vmem:[%s37810_s1 + $0x2660] sm:$0xf] %v28037_v39  ;;  %v28039_v40 = vld [vmem:[%s37809_s0 + $0x2180] sm:$0xf]  ;;  %v28061_v51 = vld [vmem:[%s37809_s0 + $0x1e74] sm:$0xf] }
 0x2ad   :  { %v28041_v41 = vld [vmem:[%s37809_s0 + $0x1960] sm:$0xf]  ;;  %28040 = vst [vmem:[%s37810_s1 + $0x780] sm:$0xf] %v28039_v40  ;;  %28058 = vst [vmem:[%s37810_s1 + $0x21b4] sm:$0xf] %v28057_v49 }
 0x2ae   :  { %v28043_v42 = vld [vmem:[%s37809_s0 + $0x1140] sm:$0xf]  ;;  %28042 = vst [vmem:[%s37810_s1 + $0xfa0] sm:$0xf] %v28041_v41  ;;  %28060 = vst [vmem:[%s37810_s1 + $0x2d4] sm:$0xf] %v28059_v50 }
 0x2af   :  { %28044 = vst [vmem:[%s37810_s1 + $0x17c0] sm:$0xf] %v28043_v42  ;;  %v28045_v43 = vld [vmem:[%s37809_s0 + $0x920] sm:$0xf]  ;;  %28062 = vst [vmem:[%s37810_s1 + $0xaf4] sm:$0xf] %v28061_v51 }
 0x2b0   :  { %v28047_v44 = vld [vmem:[%s37809_s0 + $0x100] sm:$0xf]  ;;  %28046 = vst [vmem:[%s37810_s1 + $0x1fe0] sm:$0xf] %v28045_v43  ;;  %v28063_v52 = vld [vmem:[%s37809_s0 + $0x1654] sm:$0xf] }
 0x2b1   :  { %28048 = vst [vmem:[%s37810_s1 + $0x2800] sm:$0xf] %v28047_v44  ;;  %v28065_v53 = vld [vmem:[%s37809_s0 + $0xe34] sm:$0xf]  ;;  %28064 = vst [vmem:[%s37810_s1 + $0x1314] sm:$0xf] %v28063_v52 }
 0x2b2   :  { %v28067_v54 = vld [vmem:[%s37809_s0 + $0x614] sm:$0xf]  ;;  %28066 = vst [vmem:[%s37810_s1 + $0x1b34] sm:$0xf] %v28065_v53  ;;  %v28099_v6 = vld [vmem:[%s37809_s0 + $0x2868] sm:$0xf] }
 0x2b3   :  { %28068 = vst [vmem:[%s37810_s1 + $0x2354] sm:$0xf] %v28067_v54  ;;  %v28069_v55 = vld [vmem:[%s37809_s0 + $0x24f4] sm:$0xf]  ;;  %v28101_v7 = vld [vmem:[%s37809_s0 + $0x2048] sm:$0xf] }
 0x2b4   :  { %v28071_v56 = vld [vmem:[%s37809_s0 + $0x1cd4] sm:$0xf]  ;;  %28070 = vst [vmem:[%s37810_s1 + $0x474] sm:$0xf] %v28069_v55  ;;  %v28103_v8 = vld [vmem:[%s37809_s0 + $0x1828] sm:$0xf] }
 0x2b5   :  { %v28073_v57 = vld [vmem:[%s37809_s0 + $0x14b4] sm:$0xf]  ;;  %28072 = vst [vmem:[%s37810_s1 + $0xc94] sm:$0xf] %v28071_v56  ;;  %28100 = vst [vmem:[%s37810_s1 + $0x168] sm:$0xf] %v28099_v6 }
 0x2b6   :  { %28074 = vst [vmem:[%s37810_s1 + $0x14b4] sm:$0xf] %v28073_v57  ;;  %v28075_v58 = vld [vmem:[%s37809_s0 + $0xc94] sm:$0xf]  ;;  %28102 = vst [vmem:[%s37810_s1 + $0x988] sm:$0xf] %v28101_v7 }
 0x2b7   :  { %v28077_v59 = vld [vmem:[%s37809_s0 + $0x474] sm:$0xf]  ;;  %28076 = vst [vmem:[%s37810_s1 + $0x1cd4] sm:$0xf] %v28075_v58  ;;  %28104 = vst [vmem:[%s37810_s1 + $0x11a8] sm:$0xf] %v28103_v8 }
 0x2b8   :  { %v28079_v60 = vld [vmem:[%s37809_s0 + $0x2354] sm:$0xf]  ;;  %28078 = vst [vmem:[%s37810_s1 + $0x24f4] sm:$0xf] %v28077_v59  ;;  %v28105_v9 = vld [vmem:[%s37809_s0 + $0x1008] sm:$0xf] }
 0x2b9   :  { %28080 = vst [vmem:[%s37810_s1 + $0x614] sm:$0xf] %v28079_v60  ;;  %v28081_v61 = vld [vmem:[%s37809_s0 + $0x1b34] sm:$0xf]  ;;  %v28107_v10 = vld [vmem:[%s37809_s0 + $0x7e8] sm:$0xf] }
 0x2ba   :  { %v28083_v62 = vld [vmem:[%s37809_s0 + $0x1314] sm:$0xf]  ;;  %28082 = vst [vmem:[%s37810_s1 + $0xe34] sm:$0xf] %v28081_v61  ;;  %v28109_v11 = vld [vmem:[%s37809_s0 + $0x26c8] sm:$0xf] }
 0x2bb   :  { %v28085_v63 = vld [vmem:[%s37809_s0 + $0xaf4] sm:$0xf]  ;;  %28084 = vst [vmem:[%s37810_s1 + $0x1654] sm:$0xf] %v28083_v62  ;;  %28106 = vst [vmem:[%s37810_s1 + $0x19c8] sm:$0xf] %v28105_v9 }
 0x2bc   :  { %28086 = vst [vmem:[%s37810_s1 + $0x1e74] sm:$0xf] %v28085_v63  ;;  %v28087_v0 = vld [vmem:[%s37809_s0 + $0x2d4] sm:$0xf]  ;;  %28108 = vst [vmem:[%s37810_s1 + $0x21e8] sm:$0xf] %v28107_v10 }
 0x2bd   :  { %v28089_v1 = vld [vmem:[%s37809_s0 + $0x21b4] sm:$0xf]  ;;  %28088 = vst [vmem:[%s37810_s1 + $0x2694] sm:$0xf] %v28087_v0  ;;  %28110 = vst [vmem:[%s37810_s1 + $0x308] sm:$0xf] %v28109_v11 }
 0x2be   :  { %v28091_v2 = vld [vmem:[%s37809_s0 + $0x1994] sm:$0xf]  ;;  %28090 = vst [vmem:[%s37810_s1 + $0x7b4] sm:$0xf] %v28089_v1  ;;  %v28111_v12 = vld [vmem:[%s37809_s0 + $0x1ea8] sm:$0xf] }
 0x2bf   :  { %28092 = vst [vmem:[%s37810_s1 + $0xfd4] sm:$0xf] %v28091_v2  ;;  %v28093_v3 = vld [vmem:[%s37809_s0 + $0x1174] sm:$0xf]  ;;  %v28113_v13 = vld [vmem:[%s37809_s0 + $0x1688] sm:$0xf] }
 0x2c0   :  { %v28095_v4 = vld [vmem:[%s37809_s0 + $0x954] sm:$0xf]  ;;  %28094 = vst [vmem:[%s37810_s1 + $0x17f4] sm:$0xf] %v28093_v3  ;;  %v28115_v14 = vld [vmem:[%s37809_s0 + $0xe68] sm:$0xf] }
 0x2c1   :  { %v28097_v5 = vld [vmem:[%s37809_s0 + $0x134] sm:$0xf]  ;;  %28096 = vst [vmem:[%s37810_s1 + $0x2014] sm:$0xf] %v28095_v4  ;;  %28112 = vst [vmem:[%s37810_s1 + $0xb28] sm:$0xf] %v28111_v12 }
 0x2c2   :  { %28098 = vst [vmem:[%s37810_s1 + $0x2834] sm:$0xf] %v28097_v5  ;;  %28114 = vst [vmem:[%s37810_s1 + $0x1348] sm:$0xf] %v28113_v13  ;;  %v28117_v15 = vld [vmem:[%s37809_s0 + $0x648] sm:$0xf] }
 0x2c3   :  { %28116 = vst [vmem:[%s37810_s1 + $0x1b68] sm:$0xf] %v28115_v14  ;;  %v28119_v16 = vld [vmem:[%s37809_s0 + $0x2528] sm:$0xf]  ;;  %28118 = vst [vmem:[%s37810_s1 + $0x2388] sm:$0xf] %v28117_v15 }
 0x2c4   :  { %v28121_v17 = vld [vmem:[%s37809_s0 + $0x1d08] sm:$0xf]  ;;  %28120 = vst [vmem:[%s37810_s1 + $0x4a8] sm:$0xf] %v28119_v16  ;;  %v28149_v31 = vld [vmem:[%s37809_s0 + $0x289c] sm:$0xf] }
 0x2c5   :  { %28122 = vst [vmem:[%s37810_s1 + $0xcc8] sm:$0xf] %v28121_v17  ;;  %v28123_v18 = vld [vmem:[%s37809_s0 + $0x14e8] sm:$0xf]  ;;  %v28151_v32 = vld [vmem:[%s37809_s0 + $0x207c] sm:$0xf] }
 0x2c6   :  { %v28125_v19 = vld [vmem:[%s37809_s0 + $0xcc8] sm:$0xf]  ;;  %28124 = vst [vmem:[%s37810_s1 + $0x14e8] sm:$0xf] %v28123_v18  ;;  %28150 = vst [vmem:[%s37810_s1 + $0x19c] sm:$0xf] %v28149_v31 }
 0x2c7   :  { %v28127_v20 = vld [vmem:[%s37809_s0 + $0x4a8] sm:$0xf]  ;;  %28126 = vst [vmem:[%s37810_s1 + $0x1d08] sm:$0xf] %v28125_v19  ;;  %28152 = vst [vmem:[%s37810_s1 + $0x9bc] sm:$0xf] %v28151_v32 }
 0x2c8   :  { %28128 = vst [vmem:[%s37810_s1 + $0x2528] sm:$0xf] %v28127_v20  ;;  %v28129_v21 = vld [vmem:[%s37809_s0 + $0x2388] sm:$0xf]  ;;  %v28153_v33 = vld [vmem:[%s37809_s0 + $0x185c] sm:$0xf] }
 0x2c9   :  { %v28131_v22 = vld [vmem:[%s37809_s0 + $0x1b68] sm:$0xf]  ;;  %28130 = vst [vmem:[%s37810_s1 + $0x648] sm:$0xf] %v28129_v21  ;;  %v28155_v34 = vld [vmem:[%s37809_s0 + $0x103c] sm:$0xf] }
 0x2ca   :  { %v28133_v23 = vld [vmem:[%s37809_s0 + $0x1348] sm:$0xf]  ;;  %28132 = vst [vmem:[%s37810_s1 + $0xe68] sm:$0xf] %v28131_v22  ;;  %v28157_v35 = vld [vmem:[%s37809_s0 + $0x81c] sm:$0xf] }
 0x2cb   :  { %28134 = vst [vmem:[%s37810_s1 + $0x1688] sm:$0xf] %v28133_v23  ;;  %v28135_v24 = vld [vmem:[%s37809_s0 + $0xb28] sm:$0xf]  ;;  %28154 = vst [vmem:[%s37810_s1 + $0x11dc] sm:$0xf] %v28153_v33 }
 0x2cc   :  { %v28137_v25 = vld [vmem:[%s37809_s0 + $0x308] sm:$0xf]  ;;  %28136 = vst [vmem:[%s37810_s1 + $0x1ea8] sm:$0xf] %v28135_v24  ;;  %28156 = vst [vmem:[%s37810_s1 + $0x19fc] sm:$0xf] %v28155_v34 }
 0x2cd   :  { %v28139_v26 = vld [vmem:[%s37809_s0 + $0x21e8] sm:$0xf]  ;;  %28138 = vst [vmem:[%s37810_s1 + $0x26c8] sm:$0xf] %v28137_v25  ;;  %28158 = vst [vmem:[%s37810_s1 + $0x221c] sm:$0xf] %v28157_v35 }
 0x2ce   :  { %28140 = vst [vmem:[%s37810_s1 + $0x7e8] sm:$0xf] %v28139_v26  ;;  %v28141_v27 = vld [vmem:[%s37809_s0 + $0x19c8] sm:$0xf]  ;;  %v28159_v36 = vld [vmem:[%s37809_s0 + $0x26fc] sm:$0xf] }
 0x2cf   :  { %v28143_v28 = vld [vmem:[%s37809_s0 + $0x11a8] sm:$0xf]  ;;  %28142 = vst [vmem:[%s37810_s1 + $0x1008] sm:$0xf] %v28141_v27  ;;  %v28161_v37 = vld [vmem:[%s37809_s0 + $0x1edc] sm:$0xf] }
 0x2d0   :  { %v28145_v29 = vld [vmem:[%s37809_s0 + $0x988] sm:$0xf]  ;;  %28144 = vst [vmem:[%s37810_s1 + $0x1828] sm:$0xf] %v28143_v28  ;;  %v28163_v38 = vld [vmem:[%s37809_s0 + $0x16bc] sm:$0xf] }
 0x2d1   :  { %28146 = vst [vmem:[%s37810_s1 + $0x2048] sm:$0xf] %v28145_v29  ;;  %v28147_v30 = vld [vmem:[%s37809_s0 + $0x168] sm:$0xf]  ;;  %28160 = vst [vmem:[%s37810_s1 + $0x33c] sm:$0xf] %v28159_v36 }
 0x2d2   :  { %28148 = vst [vmem:[%s37810_s1 + $0x2868] sm:$0xf] %v28147_v30  ;;  %28162 = vst [vmem:[%s37810_s1 + $0xb5c] sm:$0xf] %v28161_v37  ;;  %v28165_v39 = vld [vmem:[%s37809_s0 + $0xe9c] sm:$0xf] }
 0x2d3   :  { %28164 = vst [vmem:[%s37810_s1 + $0x137c] sm:$0xf] %v28163_v38  ;;  %v28167_v40 = vld [vmem:[%s37809_s0 + $0x67c] sm:$0xf]  ;;  %28166 = vst [vmem:[%s37810_s1 + $0x1b9c] sm:$0xf] %v28165_v39 }
 0x2d4   :  { %v28169_v41 = vld [vmem:[%s37809_s0 + $0x255c] sm:$0xf]  ;;  %28168 = vst [vmem:[%s37810_s1 + $0x23bc] sm:$0xf] %v28167_v40 }
 0x2d5   :  { %28170 = vst [vmem:[%s37810_s1 + $0x4dc] sm:$0xf] %v28169_v41  ;;  %v28171_v42 = vld [vmem:[%s37809_s0 + $0x1d3c] sm:$0xf] }
 0x2d6   :  { %v28173_v43 = vld [vmem:[%s37809_s0 + $0x151c] sm:$0xf]  ;;  %28172 = vst [vmem:[%s37810_s1 + $0xcfc] sm:$0xf] %v28171_v42 }
 0x2d7   :  { %v28175_v44 = vld [vmem:[%s37809_s0 + $0xcfc] sm:$0xf]  ;;  %28174 = vst [vmem:[%s37810_s1 + $0x151c] sm:$0xf] %v28173_v43 }
 0x2d8   :  { %28176 = vst [vmem:[%s37810_s1 + $0x1d3c] sm:$0xf] %v28175_v44  ;;  %v28177_v45 = vld [vmem:[%s37809_s0 + $0x4dc] sm:$0xf] }
 0x2d9   :  { %v28179_v46 = vld [vmem:[%s37809_s0 + $0x23bc] sm:$0xf]  ;;  %28178 = vst [vmem:[%s37810_s1 + $0x255c] sm:$0xf] %v28177_v45 }
 0x2da   :  { %v28181_v47 = vld [vmem:[%s37809_s0 + $0x1b9c] sm:$0xf]  ;;  %28180 = vst [vmem:[%s37810_s1 + $0x67c] sm:$0xf] %v28179_v46 }
 0x2db   :  { %28182 = vst [vmem:[%s37810_s1 + $0xe9c] sm:$0xf] %v28181_v47  ;;  %v28183_v48 = vld [vmem:[%s37809_s0 + $0x137c] sm:$0xf] }
 0x2dc   :  { %v28185_v49 = vld [vmem:[%s37809_s0 + $0xb5c] sm:$0xf]  ;;  %28184 = vst [vmem:[%s37810_s1 + $0x16bc] sm:$0xf] %v28183_v48 }
 0x2dd   :  { %v28187_v50 = vld [vmem:[%s37809_s0 + $0x33c] sm:$0xf]  ;;  %28186 = vst [vmem:[%s37810_s1 + $0x1edc] sm:$0xf] %v28185_v49 }
 0x2de   :  { %28188 = vst [vmem:[%s37810_s1 + $0x26fc] sm:$0xf] %v28187_v50  ;;  %v28189_v51 = vld [vmem:[%s37809_s0 + $0x221c] sm:$0xf] }
 0x2df   :  { %v28191_v52 = vld [vmem:[%s37809_s0 + $0x19fc] sm:$0xf]  ;;  %28190 = vst [vmem:[%s37810_s1 + $0x81c] sm:$0xf] %v28189_v51 }
 0x2e0   :  { %v28193_v53 = vld [vmem:[%s37809_s0 + $0x11dc] sm:$0xf]  ;;  %28192 = vst [vmem:[%s37810_s1 + $0x103c] sm:$0xf] %v28191_v52 }
 0x2e1   :  { %28194 = vst [vmem:[%s37810_s1 + $0x185c] sm:$0xf] %v28193_v53  ;;  %v28195_v54 = vld [vmem:[%s37809_s0 + $0x9bc] sm:$0xf] }
 0x2e2   :  { %v28197_v55 = vld [vmem:[%s37809_s0 + $0x19c] sm:$0xf]  ;;  %28196 = vst [vmem:[%s37810_s1 + $0x207c] sm:$0xf] %v28195_v54 }
 0x2e3   :  { %28198 = vst [vmem:[%s37810_s1 + $0x289c] sm:$0xf] %v28197_v55 }

// kernel: pallas_forward.8
= control target key start
LH: loop header
LB: loop body
LE: loop exit
PB: predicated region body
PF: predicated region fallthrough
CT: control target
= control target key end

     0   :  { %vm1545_vm0 = vmmov 0   ;;  %vm874_vm1 = vcmask 523264   ;;  %s1893_s1 = inlined_call_operand.vmem [shape: bf16[1600,128], index: 1, kind: input, shape index: {}]   ;;  %s1894_s0 = inlined_call_operand.vmem [shape: bf16[8,1600], index: 0, kind: input, shape index: {}]   ;;  %s1895_s2 = inlined_call_operand.vmem [shape: f32[1,128], index: 2, kind: input, shape index: {}]   ;;  %s1896_s3 = inlined_call_operand.vmem [shape: f32[8,128], index: 3, kind: output, shape index: {}]  }
   0x1   :  { %v1431_v0 = vld [vmem:[%s1893_s1 + $0x78] sm:$0xff]   ;;  %v1435_v4 = vld [vmem:[%s1893_s1 + $0x70] sm:$0xff]   ;;  %v1439_v8 = vld [vmem:[%s1893_s1 + $0x68] sm:$0xff]  }
   0x2   :  { %v1432_v1 = vld [vmem:[%s1893_s1 + $0x38] sm:$0xff]   ;;  %1280 = vmatprep.subr.bf16.mxu0 %v1431_v0  ;;  %v1436_v5 = vld [vmem:[%s1893_s1 + $0x30] sm:$0xff]   ;;  %v1440_v9 = vld [vmem:[%s1893_s1 + $0x28] sm:$0xff]  }
   0x3   :  { %v1433_v2 = vld [vmem:[%s1893_s1 + $0xf8] sm:$0xff]   ;;  %1281 = vmatpush3.bf16.msra.mxu0 %v1432_v1  ;;  %v1437_v6 = vld [vmem:[%s1893_s1 + $0xf0] sm:$0xff]   ;;  %v1441_v10 = vld [vmem:[%s1893_s1 + $0xe8] sm:$0xff]  }
   0x4   :  { %v1434_v3 = vld [vmem:[%s1893_s1 + $0xb8] sm:$0xff]   ;;  %1302 = vmatprep.subr.bf16.mxu1 %v1433_v2  ;;  %1282 = vmatprep.subr.bf16.mxu0 %v1435_v4  ;;  %v1438_v7 = vld [vmem:[%s1893_s1 + $0xb0] sm:$0xff]   ;;  %v1442_v11 = vld [vmem:[%s1893_s1 + $0xa8] sm:$0xff]  }
   0x5   :  { %1303 = vmatpush3.bf16.msra.mxu1 %v1434_v3  ;;  %v1443_v12 = vld [vmem:[%s1893_s1 + $0x60] sm:$0xff]   ;;  %v1447_v16 = vld [vmem:[%s1893_s1 + $0x58] sm:$0xff]   ;;  %v1451_v20 = vld [vmem:[%s1893_s1 + $0x50] sm:$0xff]  }
   0x6   :  { %1304 = vmatprep.subr.bf16.mxu1 %v1437_v6  ;;  %v1444_v13 = vld [vmem:[%s1893_s1 + $0x20] sm:$0xff]   ;;  %v1448_v17 = vld [vmem:[%s1893_s1 + $0x18] sm:$0xff]   ;;  %v1452_v21 = vld [vmem:[%s1893_s1 + $0x10] sm:$0xff]  }
   0x7   :  { %1283 = vmatpush3.bf16.msra.mxu0 %v1436_v5  ;;  %v1445_v14 = vld [vmem:[%s1893_s1 + $0xe0] sm:$0xff]   ;;  %v1449_v18 = vld [vmem:[%s1893_s1 + $0xd8] sm:$0xff]   ;;  %v1453_v22 = vld [vmem:[%s1893_s1 + $0xd0] sm:$0xff]  }
   0x8   :  { %1284 = vmatprep.subr.bf16.mxu0 %v1439_v8  ;;  %v1446_v15 = vld [vmem:[%s1893_s1 + $0xa0] sm:$0xff]   ;;  %v1450_v19 = vld [vmem:[%s1893_s1 + $0x98] sm:$0xff]   ;;  %v1454_v23 = vld [vmem:[%s1893_s1 + $0x90] sm:$0xff]  }
   0x9   :  { %1305 = vmatpush3.bf16.msra.mxu1 %v1438_v7  ;;  %v1455_v24 = vld [vmem:[%s1893_s1 + $0x48] sm:$0xff]   ;;  %v1459_v28 = vld [vmem:[%s1893_s1 + $0x40] sm:$0xff]   ;;  %v1465_v35 = vld [vmem:[%s1893_s1 + $0x178] sm:$0xff]  }
   0xa   :  { %1306 = vmatprep.subr.bf16.mxu1 %v1441_v10  ;;  %v1456_v25 = vld [vmem:[%s1893_s1 + $0x8] sm:$0xff]   ;;  %v1460_v29 = vld [vmem:[%s1893_s1] sm:$0xff]   ;;  %v1468_v39 = vld [vmem:[%s1893_s1 + $0x138] sm:$0xff]  }
   0xb   :  { %1285 = vmatpush3.bf16.msra.mxu0 %v1440_v9  ;;  %v1457_v26 = vld [vmem:[%s1893_s1 + $0xc8] sm:$0xff]   ;;  %v1461_v30 = vld [vmem:[%s1893_s1 + $0xc0] sm:$0xff]   ;;  %v1469_v40 = vld [vmem:[%s1893_s1 + $0x1f8] sm:$0xff]  }
   0xc   :  { %1286 = vmatprep.subr.bf16.mxu0 %v1443_v12  ;;  %v1458_v27 = vld [vmem:[%s1893_s1 + $0x88] sm:$0xff]   ;;  %v15_v31 = vld [vmem:[%s1894_s0] sm:$0xff]  ;;  %v1470_v41 = vld [vmem:[%s1893_s1 + $0x1b8] sm:$0xff]  }
   0xd   :  { %1307 = vmatpush3.bf16.msra.mxu1 %v1442_v11  ;;  %v1166_v32 = vcombine.low %v15_v31, %v15_v31  ;;  %v1167_v33 = vcombine.high %v15_v31, %v15_v31  ;;  %v1464_v34 = vld [vmem:[%s1893_s1 + $0x80] sm:$0xff]   ;;  %v16_v36 = vld [vmem:[%s1894_s0 + $0x8] sm:$0xff]  ;;  %v1471_v42 = vld [vmem:[%s1893_s1 + $0x170] sm:$0xff]  }
   0xe   :  { %1308 = vmatprep.subr.bf16.mxu1 %v1445_v14  ;;  %v1168_v37 = vcombine.low %v16_v36, %v16_v36  ;;  %v1169_v38 = vcombine.high %v16_v36, %v16_v36  ;;  %v1472_v43 = vld [vmem:[%s1893_s1 + $0x130] sm:$0xff]   ;;  %v1475_v46 = vld [vmem:[%s1893_s1 + $0x168] sm:$0xff]   ;;  %v1479_v50 = vld [vmem:[%s1893_s1 + $0x160] sm:$0xff]  }
   0xf   :  { %1287 = vmatpush3.bf16.msra.mxu0 %v1444_v13  ;;  %910 = vmatprep.mubr.bf16.mxu0 %v1167_v33  ;;  %v1473_v44 = vld [vmem:[%s1893_s1 + $0x1f0] sm:$0xff]   ;;  %v1476_v47 = vld [vmem:[%s1893_s1 + $0x128] sm:$0xff]   ;;  %v1480_v51 = vld [vmem:[%s1893_s1 + $0x120] sm:$0xff]  }
  0x10   :  { %1288 = vmatprep.subr.bf16.mxu0 %v1447_v16  ;;  %950 = vmatprep.mubr.bf16.mxu1 %v1169_v38  ;;  %v1474_v45 = vld [vmem:[%s1893_s1 + $0x1b0] sm:$0xff]   ;;  %v1477_v48 = vld [vmem:[%s1893_s1 + $0x1e8] sm:$0xff]   ;;  %v1481_v52 = vld [vmem:[%s1893_s1 + $0x1e0] sm:$0xff]  }
  0x11   :  { %1309 = vmatpush3.bf16.msra.mxu1 %v1446_v15  ;;  %v1478_v49 = vld [vmem:[%s1893_s1 + $0x1a8] sm:$0xff]   ;;  %v1482_v53 = vld [vmem:[%s1893_s1 + $0x1a0] sm:$0xff]   ;;  %v1483_v54 = vld [vmem:[%s1893_s1 + $0x158] sm:$0xff]  }
  0x12   :  { %1310 = vmatprep.subr.bf16.mxu1 %v1449_v18  ;;  %v1484_v55 = vld [vmem:[%s1893_s1 + $0x118] sm:$0xff]   ;;  %v1487_v58 = vld [vmem:[%s1893_s1 + $0x150] sm:$0xff]   ;;  %v1491_v62 = vld [vmem:[%s1893_s1 + $0x148] sm:$0xff]  }
  0x13   :  { %1289 = vmatpush3.bf16.msra.mxu0 %v1448_v17  ;;  %v1485_v56 = vld [vmem:[%s1893_s1 + $0x1d8] sm:$0xff]   ;;  %v1488_v59 = vld [vmem:[%s1893_s1 + $0x110] sm:$0xff]   ;;  %v1492_v63 = vld [vmem:[%s1893_s1 + $0x108] sm:$0xff]  }
  0x14   :  { %1290 = vmatprep.subr.bf16.mxu0 %v1451_v20  ;;  %v1486_v57 = vld [vmem:[%s1893_s1 + $0x198] sm:$0xff]   ;;  %v1489_v60 = vld [vmem:[%s1893_s1 + $0x1d0] sm:$0xff]   ;;  %v1493_v0 = vld [vmem:[%s1893_s1 + $0x1c8] sm:$0xff]  }
  0x15   :  { %1311 = vmatpush3.bf16.msra.mxu1 %v1450_v19  ;;  %v1490_v61 = vld [vmem:[%s1893_s1 + $0x190] sm:$0xff]   ;;  %v1494_v1 = vld [vmem:[%s1893_s1 + $0x188] sm:$0xff]   ;;  %v1495_v2 = vld [vmem:[%s1893_s1 + $0x140] sm:$0xff]  }
  0x16   :  { %1312 = vmatprep.subr.bf16.mxu1 %v1453_v22  ;;  %v1496_v3 = vld [vmem:[%s1893_s1 + $0x100] sm:$0xff]   ;;  %v17_v5 = vld [vmem:[%s1894_s0 + $0x10] sm:$0xff]  ;;  %v1501_v9 = vld [vmem:[%s1893_s1 + $0x278] sm:$0xff]  }
  0x17   :  { %1291 = vmatpush3.bf16.msra.mxu0 %v1452_v21  ;;  %v1497_v4 = vld [vmem:[%s1893_s1 + $0x1c0] sm:$0xff]   ;;  %v1170_v6 = vcombine.low %v17_v5, %v17_v5  ;;  %v1171_v7 = vcombine.high %v17_v5, %v17_v5  ;;  %v18_v10 = vld [vmem:[%s1894_s0 + $0x18] sm:$0xff]  ;;  %v1507_v16 = vld [vmem:[%s1893_s1 + $0x270] sm:$0xff]  }
  0x18   :  { %1292 = vmatprep.subr.bf16.mxu0 %v1455_v24  ;;  %v1500_v8 = vld [vmem:[%s1893_s1 + $0x180] sm:$0xff]   ;;  %v1172_v11 = vcombine.low %v18_v10, %v18_v10  ;;  %v1173_v12 = vcombine.high %v18_v10, %v18_v10  ;;  %v1504_v13 = vld [vmem:[%s1893_s1 + $0x238] sm:$0xff]   ;;  %v1508_v17 = vld [vmem:[%s1893_s1 + $0x230] sm:$0xff]  }
  0x19   :  { %1313 = vmatpush3.bf16.msra.mxu1 %v1454_v23  ;;  %v1505_v14 = vld [vmem:[%s1893_s1 + $0x2f8] sm:$0xff]   ;;  %v1509_v18 = vld [vmem:[%s1893_s1 + $0x2f0] sm:$0xff]   ;;  %v1511_v20 = vld [vmem:[%s1893_s1 + $0x268] sm:$0xff]  }
  0x1a   :  { %1314 = vmatprep.subr.bf16.mxu1 %v1457_v26  ;;  %v1506_v15 = vld [vmem:[%s1893_s1 + $0x2b8] sm:$0xff]   ;;  %v1510_v19 = vld [vmem:[%s1893_s1 + $0x2b0] sm:$0xff]   ;;  %v1512_v21 = vld [vmem:[%s1893_s1 + $0x228] sm:$0xff]  }
  0x1b   :  { %1293 = vmatpush3.bf16.msra.mxu0 %v1456_v25  ;;  %v1513_v22 = vld [vmem:[%s1893_s1 + $0x2e8] sm:$0xff]   ;;  %v1515_v24 = vld [vmem:[%s1893_s1 + $0x260] sm:$0xff]   ;;  %v1522_v31 = vld [vmem:[%s1893_s1 + $0x298] sm:$0xff]  }
  0x1c   :  { %1294 = vmatprep.subr.bf16.mxu0 %v1459_v28  ;;  %v1514_v23 = vld [vmem:[%s1893_s1 + $0x2a8] sm:$0xff]   ;;  %v1516_v25 = vld [vmem:[%s1893_s1 + $0x220] sm:$0xff]   ;;  %v1519_v28 = vld [vmem:[%s1893_s1 + $0x258] sm:$0xff]  }
  0x1d   :  { %1315 = vmatpush3.bf16.msra.mxu1 %v1458_v27  ;;  %v1517_v26 = vld [vmem:[%s1893_s1 + $0x2e0] sm:$0xff]   ;;  %v1524_v33 = vld [vmem:[%s1893_s1 + $0x210] sm:$0xff]   ;;  %v1527_v36 = vld [vmem:[%s1893_s1 + $0x248] sm:$0xff]  }
  0x1e   :  { %1316 = vmatprep.subr.bf16.mxu1 %v1461_v30  ;;  %v1518_v27 = vld [vmem:[%s1893_s1 + $0x2a0] sm:$0xff]   ;;  %v1521_v30 = vld [vmem:[%s1893_s1 + $0x2d8] sm:$0xff]   ;;  %v1529_v38 = vld [vmem:[%s1893_s1 + $0x2c8] sm:$0xff]  }
  0x1f   :  { %1295 = vmatpush3.bf16.msra.mxu0 %v1460_v29  ;;  %v1520_v29 = vld [vmem:[%s1893_s1 + $0x218] sm:$0xff]  }
  0x20   :  { %1324 = vmatprep.subr.bf16.mxu0 %v1465_v35  ;;  %v1526_v35 = vld [vmem:[%s1893_s1 + $0x290] sm:$0xff]  }
  0x21   :  { %1317 = vmatpush3.bf16.msra.mxu1 %v1464_v34  ;;  %v1525_v34 = vld [vmem:[%s1893_s1 + $0x2d0] sm:$0xff]  }
  0x22   :  { %911 = vmatmul.mubr.bf16.vlgmr.msra.gmra.mxu0 %v1166_v32  ;;  %1346 = vmatprep.subr.bf16.mxu1 %v1469_v40  ;;  %v1523_v32 = vld [vmem:[%s1893_s1 + $0x250] sm:$0xff]   ;;  %v1531_v40 = vld [vmem:[%s1893_s1 + $0x240] sm:$0xff]  }
  0x23   :  { %1325 = vmatpush3.bf16.msra.mxu0 %v1468_v39  ;;  %990 = vmatprep.mubr.bf16.mxu0 %v1171_v7  ;;  %v1530_v39 = vld [vmem:[%s1893_s1 + $0x288] sm:$0xff]  }
  0x24   :  { %951 = vmatmul.mubr.bf16.vlgmr.msra.gmra.mxu1 %v1168_v37  ;;  %1326 = vmatprep.subr.bf16.mxu0 %v1471_v42  ;;  %v1528_v37 = vld [vmem:[%s1893_s1 + $0x208] sm:$0xff]   ;;  %v1533_v42 = vld [vmem:[%s1893_s1 + $0x2c0] sm:$0xff]  }
  0x25   :  { %1347 = vmatpush3.bf16.msra.mxu1 %v1470_v41  ;;  %1030 = vmatprep.mubr.bf16.mxu1 %v1173_v12  ;;  %v1532_v41 = vld [vmem:[%s1893_s1 + $0x200] sm:$0xff]  }
  0x26   :  { %1348 = vmatprep.subr.bf16.mxu1 %v1473_v44 }
  0x27   :  { %1327 = vmatpush3.bf16.msra.mxu0 %v1472_v43  ;;  %v19_v43 = vld [vmem:[%s1894_s0 + $0x20] sm:$0xff] }
  0x28   :  { %1328 = vmatprep.subr.bf16.mxu0 %v1475_v46  ;;  %v1174_v44 = vcombine.low %v19_v43, %v19_v43  ;;  %v1536_v46 = vld [vmem:[%s1893_s1 + $0x280] sm:$0xff]  }
  0x29   :  { %1349 = vmatpush3.bf16.msra.mxu1 %v1474_v45  ;;  %v1175_v45 = vcombine.high %v19_v43, %v19_v43 }
  0x2a   :  { %1350 = vmatprep.subr.bf16.mxu1 %v1477_v48  ;;  %v1544_v48 = vmov 0.0  }
  0x2b   :  { %1329 = vmatpush3.bf16.msra.mxu0 %v1476_v47  ;;  %v20_v47 = vld [vmem:[%s1894_s0 + $0x28] sm:$0xff] }
  0x2c   :  { %1330 = vmatprep.subr.bf16.mxu0 %v1479_v50  ;;  %v1177_v50 = vcombine.high %v20_v47, %v20_v47 }
  0x2d   :  { %1351 = vmatpush3.bf16.msra.mxu1 %v1478_v49  ;;  %v1176_v49 = vcombine.low %v20_v47, %v20_v47 }
  0x2e   :  { %1352 = vmatprep.subr.bf16.mxu1 %v1481_v52  ;;  %v1540_v52 = vld [vmem:[%s1893_s1 + $0x310] sm:$0xff]  }
  0x2f   :  { %1331 = vmatpush3.bf16.msra.mxu0 %v1480_v51  ;;  %v1539_v51 = vld [vmem:[%s1893_s1 + $0x318] sm:$0xff]  }
  0x30   :  { %1332 = vmatprep.subr.bf16.mxu0 %v1483_v54  ;;  %v1542_v54 = vld [vmem:[%s1893_s1 + $0x300] sm:$0xff]  }
  0x31   :  { %1353 = vmatpush3.bf16.msra.mxu1 %v1482_v53  ;;  %v1541_v53 = vld [vmem:[%s1893_s1 + $0x308] sm:$0xff]  }
  0x32   :  { %1354 = vmatprep.subr.bf16.mxu1 %v1485_v56 }
  0x33   :  { %1333 = vmatpush3.bf16.msra.mxu0 %v1484_v55  ;;  %v1543_v55 = vld [vmem:[%s1894_s0 + $0x30] ss:$0 sps:$4 sm:$0xff]  }
  0x34   :  { %1334 = vmatprep.subr.bf16.mxu0 %v1487_v58 }
  0x35   :  { %1355 = vmatpush3.bf16.msra.mxu1 %v1486_v57  ;;  %v1165_v57 = vld [vmem:[%s1895_s2] ss:$0 sm:$0xff] }
  0x36   :  { %1356 = vmatprep.subr.bf16.mxu1 %v1489_v60 }
  0x37   :  { %1335 = vmatpush3.bf16.msra.mxu0 %v1488_v59 }
  0x38   :  { %1336 = vmatprep.subr.bf16.mxu0 %v1491_v62 }
  0x39   :  { %1357 = vmatpush3.bf16.msra.mxu1 %v1490_v61 }
  0x3a   :  { %1358 = vmatprep.subr.bf16.mxu1 %v1493_v0 }
  0x3b   :  { %1337 = vmatpush3.bf16.msra.mxu0 %v1492_v63 }
  0x3c   :  { %1338 = vmatprep.subr.bf16.mxu0 %v1495_v2 }
  0x3d   :  { %1359 = vmatpush3.bf16.msra.mxu1 %v1494_v1 }
  0x3e   :  { %1360 = vmatprep.subr.bf16.mxu1 %v1497_v4 }
  0x3f   :  { %1339 = vmatpush3.bf16.msra.mxu0 %v1496_v3 }
  0x40   :  { %1368 = vmatprep.subr.bf16.mxu0 %v1501_v9 }
  0x41   :  { %1361 = vmatpush3.bf16.msra.mxu1 %v1500_v8 }
  0x42   :  { %991 = vmatmul.mubr.bf16.vlgmr.msra.gmra.mxu0 %v1170_v6  ;;  %1390 = vmatprep.subr.bf16.mxu1 %v1505_v14 }
  0x43   :  { %1369 = vmatpush3.bf16.msra.mxu0 %v1504_v13  ;;  %1070 = vmatprep.mubr.bf16.mxu0 %v1175_v45 }
  0x44   :  { %1031 = vmatmul.mubr.bf16.vlgmr.msra.gmra.mxu1 %v1172_v11  ;;  %1370 = vmatprep.subr.bf16.mxu0 %v1507_v16 }
  0x45   :  { %1391 = vmatpush3.bf16.msra.mxu1 %v1506_v15  ;;  %1110 = vmatprep.mubr.bf16.mxu1 %v1177_v50 }
  0x46   :  { %1392 = vmatprep.subr.bf16.mxu1 %v1509_v18 }
  0x47   :  { %1371 = vmatpush3.bf16.msra.mxu0 %v1508_v17 }
  0x48   :  { %1372 = vmatprep.subr.bf16.mxu0 %v1511_v20 }
  0x49   :  { %1393 = vmatpush3.bf16.msra.mxu1 %v1510_v19 }
  0x4a   :  { %1394 = vmatprep.subr.bf16.mxu1 %v1513_v22 }
  0x4b   :  { %1373 = vmatpush3.bf16.msra.mxu0 %v1512_v21 }
  0x4c   :  { %1374 = vmatprep.subr.bf16.mxu0 %v1515_v24 }
  0x4d   :  { %1395 = vmatpush3.bf16.msra.mxu1 %v1514_v23 }
  0x4e   :  { %1396 = vmatprep.subr.bf16.mxu1 %v1517_v26 }
  0x4f   :  { %1375 = vmatpush3.bf16.msra.mxu0 %v1516_v25 }
  0x50   :  { %1376 = vmatprep.subr.bf16.mxu0 %v1519_v28 }
  0x51   :  { %1397 = vmatpush3.bf16.msra.mxu1 %v1518_v27 }
  0x52   :  { %1398 = vmatprep.subr.bf16.mxu1 %v1521_v30 }
  0x53   :  { %1377 = vmatpush3.bf16.msra.mxu0 %v1520_v29 }
  0x54   :  { %1378 = vmatprep.subr.bf16.mxu0 %v1523_v32 }
  0x55   :  { %1399 = vmatpush3.bf16.msra.mxu1 %v1522_v31 }
  0x56   :  { %1400 = vmatprep.subr.bf16.mxu1 %v1525_v34 }
  0x57   :  { %1379 = vmatpush3.bf16.msra.mxu0 %v1524_v33 }
  0x58   :  { %1380 = vmatprep.subr.bf16.mxu0 %v1527_v36 }
  0x59   :  { %1401 = vmatpush3.bf16.msra.mxu1 %v1526_v35 }
  0x5a   :  { %1402 = vmatprep.subr.bf16.mxu1 %v1529_v38 }
  0x5b   :  { %1381 = vmatpush3.bf16.msra.mxu0 %v1528_v37 }
  0x5c   :  { %1382 = vmatprep.subr.bf16.mxu0 %v1531_v40 }
  0x5d   :  { %1403 = vmatpush3.bf16.msra.mxu1 %v1530_v39 }
  0x5e   :  { %1404 = vmatprep.subr.bf16.mxu1 %v1533_v42 }
  0x5f   :  { %1383 = vmatpush3.bf16.msra.mxu0 %v1532_v41 }
  0x60   :  { %1417 = vmatprep.subr.bf16.mxu0 %v1544_v48 }
  0x61   :  { %1405 = vmatpush3.bf16.msra.mxu1 %v1536_v46 }
  0x62   :  { %1071 = vmatmul.mubr.bf16.vlgmr.msra.gmra.mxu0 %v1174_v44 }
  0x63   :  { %1418 = vmatpush3.bf16.msra.mxu0 %v1539_v51  ;;  %1425 = vmatprep.mubr.msk.bf16.mxu0 %vm1545_vm0, %v1544_v48 }
  0x64   :  { %1111 = vmatmul.mubr.bf16.vlgmr.msra.gmra.mxu1 %v1176_v49  ;;  %1419 = vmatprep.subr.bf16.mxu0 %v1544_v48 }
  0x67   :  { %1420 = vmatpush3.bf16.msra.mxu0 %v1540_v52 }
  0x68   :  { %1421 = vmatprep.subr.bf16.mxu0 %v1544_v48 }
  0x6b   :  { %1422 = vmatpush3.bf16.msra.mxu0 %v1541_v53 }
  0x6c   :  { %1423 = vmatprep.subr.bf16.mxu0 %v1544_v48 }
  0x6f   :  { %1424 = vmatpush3.bf16.msra.mxu0 %v1542_v54 }
  0x72   :  { %1426 = vmatmul.mubr.msk.bf16.vlgmr.msra.gmra.mxu0 %vm874_vm1, %v1543_v55 }
  0xe2   :  { %v1296_v56 = vpop.f32.mrf.mxu0 }
  0xe4   :  { %v1297_v58 = vpop.f32.mrf.mxu0  ;;  %v1318_v59 = vpop.f32.mrf.mxu1 }
  0xe5   :  { %v1298_v60 = vadd.f32 %v1297_v58, %v1296_v56 }
  0xe6   :  { %v1299_v61 = vpop.f32.mrf.mxu0  ;;  %v1319_v62 = vpop.f32.mrf.mxu1 }
  0xe7   :  { %v913_v63 = vadd.f32 %v1298_v60, %v1165_v57  ;;  %v1320_v0 = vadd.f32 %v1319_v62, %v1318_v59 }
  0xe8   :  { %v1300_v1 = vpop.f32.mrf.mxu0  ;;  %v1321_v2 = vpop.f32.mrf.mxu1 }
  0xe9   :  { %v953_v3 = vadd.f32 %v1320_v0, %v913_v63 }
  0xea   :  { %v1322_v4 = vpop.f32.mrf.mxu1 }
 0x102   :  { %v1340_v5 = vpop.f32.mrf.mxu0 }
 0x104   :  { %v1341_v6 = vpop.f32.mrf.mxu0  ;;  %v1362_v7 = vpop.f32.mrf.mxu1 }
 0x105   :  { %v1342_v14 = vadd.f32 %v1341_v6, %v1340_v5 }
 0x106   :  { %v1343_v8 = vpop.f32.mrf.mxu0  ;;  %v1363_v9 = vpop.f32.mrf.mxu1 }
 0x107   :  { %v993_v19 = vadd.f32 %v1342_v14, %v953_v3  ;;  %v1364_v20 = vadd.f32 %v1363_v9, %v1362_v7 }
 0x108   :  { %v1344_v10 = vpop.f32.mrf.mxu0  ;;  %v1365_v11 = vpop.f32.mrf.mxu1 }
 0x109   :  { %v1033_v25 = vadd.f32 %v1364_v20, %v993_v19 }
 0x10a   :  { %v1366_v12 = vpop.f32.mrf.mxu1 }
 0x122   :  { %v1384_v13 = vpop.f32.mrf.mxu0 }
 0x124   :  { %v1385_v15 = vpop.f32.mrf.mxu0  ;;  %v1406_v16 = vpop.f32.mrf.mxu1 }
 0x125   :  { %v1386_v23 = vadd.f32 %v1385_v15, %v1384_v13 }
 0x126   :  { %v1387_v17 = vpop.f32.mrf.mxu0  ;;  %v1407_v18 = vpop.f32.mrf.mxu1 }
 0x127   :  { %v1073_v26 = vadd.f32 %v1386_v23, %v1033_v25  ;;  %v1408_v27 = vadd.f32 %v1407_v18, %v1406_v16 }
 0x128   :  { %v1388_v21 = vpop.f32.mrf.mxu0  ;;  %v1409_v22 = vpop.f32.mrf.mxu1 }
 0x129   :  { %v1113_v28 = vadd.f32 %v1408_v27, %v1073_v26 }
 0x12a   :  { %v1410_v24 = vpop.f32.mrf.mxu1 }
 0x132   :  { %v1152_v29 = vpop.f32.mrf.mxu0 }
 0x133   :  { %v1153_v30 = vadd.f32 %v1152_v29, %v1113_v28 }
 0x134   :  { %v1427_v31 = vpop.f32.mrf.mxu0 }
 0x135   :  { %v1158_v32 = vmul.f32 0.2, %v1153_v30 }
 0x136   :  { %v1155_v33 = vpop.f32.mrf.mxu0 }
 0x137   :  { %v1159_v34 = vmax.f32 %v1153_v30, %v1158_v32 }
 0x138   :  { %v1428_v35 = vpop.f32.mrf.mxu0 }
 0x139   :  { %1160 = vst [vmem:[%s1896_s3] sm:$0xff] %v1159_v34 }

// kernel: pallas_forward.9
= control target key start
LH: loop header
LB: loop body
LE: loop exit
PB: predicated region body
PF: predicated region fallthrough
CT: control target
= control target key end

     0   :  { %s339_s1 = inlined_call_operand.vmem [shape: bf16[256,128], index: 1, kind: input, shape index: {}]   ;;  %s340_s0 = inlined_call_operand.vmem [shape: bf16[8,256], index: 0, kind: input, shape index: {}]   ;;  %s341_s2 = inlined_call_operand.vmem [shape: f32[1,128], index: 2, kind: input, shape index: {}]   ;;  %s342_s3 = inlined_call_operand.vmem [shape: f32[8,128], index: 3, kind: output, shape index: {}]  }
   0x1   :  { %v244_v0 = vld [vmem:[%s339_s1 + $0x78] sm:$0xff]   ;;  %v246_v2 = vld [vmem:[%s339_s1 + $0x70] sm:$0xff]   ;;  %v248_v4 = vld [vmem:[%s339_s1 + $0x68] sm:$0xff]  }
   0x2   :  { %v245_v1 = vld [vmem:[%s339_s1 + $0x38] sm:$0xff]   ;;  %222 = vmatprep.subr.bf16.mxu0 %v244_v0  ;;  %v247_v3 = vld [vmem:[%s339_s1 + $0x30] sm:$0xff]   ;;  %v249_v5 = vld [vmem:[%s339_s1 + $0x28] sm:$0xff]  }
   0x3   :  { %223 = vmatpush3.bf16.msra.mxu0 %v245_v1  ;;  %v250_v6 = vld [vmem:[%s339_s1 + $0x60] sm:$0xff]   ;;  %v252_v8 = vld [vmem:[%s339_s1 + $0x58] sm:$0xff]   ;;  %v254_v10 = vld [vmem:[%s339_s1 + $0x50] sm:$0xff]  }
   0x4   :  { %224 = vmatprep.subr.bf16.mxu0 %v246_v2  ;;  %v251_v7 = vld [vmem:[%s339_s1 + $0x20] sm:$0xff]   ;;  %v253_v9 = vld [vmem:[%s339_s1 + $0x18] sm:$0xff]   ;;  %v255_v13 = vld [vmem:[%s339_s1 + $0x10] sm:$0xff]  }
   0x5   :  { %v15_v11 = vld [vmem:[%s340_s0] sm:$0xff]  ;;  %v256_v14 = vld [vmem:[%s339_s1 + $0x48] sm:$0xff]  }
   0x6   :  { %v205_v12 = vcombine.high %v15_v11, %v15_v11  ;;  %v257_v15 = vld [vmem:[%s339_s1 + $0x8] sm:$0xff]   ;;  %v258_v16 = vld [vmem:[%s339_s1 + $0x40] sm:$0xff]   ;;  %v204_v18 = vcombine.low %v15_v11, %v15_v11 }
   0x7   :  { %225 = vmatpush3.bf16.msra.mxu0 %v247_v3  ;;  %v259_v17 = vld [vmem:[%s339_s1] sm:$0xff]  }
   0x8   :  { %226 = vmatprep.subr.bf16.mxu0 %v248_v4  ;;  %190 = vmatprep.mubr.bf16.mxu0 %v205_v12  ;;  %v203_v20 = vld [vmem:[%s341_s2] ss:$0 sm:$0xff] }
   0xb   :  { %227 = vmatpush3.bf16.msra.mxu0 %v249_v5 }
   0xc   :  { %228 = vmatprep.subr.bf16.mxu0 %v250_v6 }
   0xf   :  { %229 = vmatpush3.bf16.msra.mxu0 %v251_v7 }
  0x10   :  { %230 = vmatprep.subr.bf16.mxu0 %v252_v8 }
  0x13   :  { %231 = vmatpush3.bf16.msra.mxu0 %v253_v9 }
  0x14   :  { %232 = vmatprep.subr.bf16.mxu0 %v254_v10 }
  0x17   :  { %233 = vmatpush3.bf16.msra.mxu0 %v255_v13 }
  0x18   :  { %234 = vmatprep.subr.bf16.mxu0 %v256_v14 }
  0x1b   :  { %235 = vmatpush3.bf16.msra.mxu0 %v257_v15 }
  0x1c   :  { %236 = vmatprep.subr.bf16.mxu0 %v258_v16 }
  0x1f   :  { %237 = vmatpush3.bf16.msra.mxu0 %v259_v17 }
  0x22   :  { %191 = vmatmul.mubr.bf16.vlgmr.msra.gmra.mxu0 %v204_v18 }
  0xe2   :  { %v238_v19 = vpop.f32.mrf.mxu0 }
  0xe4   :  { %v239_v21 = vpop.f32.mrf.mxu0 }
  0xe5   :  { %v240_v22 = vadd.f32 %v239_v21, %v238_v19 }
  0xe6   :  { %v241_v23 = vpop.f32.mrf.mxu0 }
  0xe7   :  { %v193_v24 = vadd.f32 %v240_v22, %v203_v20 }
  0xe8   :  { %v242_v25 = vpop.f32.mrf.mxu0 }
  0xe9   :  { %198 = vst [vmem:[%s342_s3] sm:$0xff] %v193_v24 }

</bundles_post_ra>
